<compile_context>
chip_gen: v5e
topology: v5e:2x2
jax: 0.10.0
libtpu: 0.0.40
codegen_flags: <defaults>
</compile_context>

<pallas_src>
import functools

import jax
import jax.numpy as jnp
from jax.experimental import pallas as pl
from jax.experimental.pallas import tpu as pltpu


def _round_up(x, m):
    return (x + m - 1) // m * m


# -----------------------------------------------------------------------------
# Pallas kernel: tiled GEMM, bf16 operands on the MXU, f32 accumulator,
# fused bias + activation epilogue in f32.
# -----------------------------------------------------------------------------
def _matmul_kernel(a_ref, b_ref, bias_ref, o_ref, acc_ref, *, activation, k_steps):
    k = pl.program_id(2)

    @pl.when(k == 0)
    def _():
        acc_ref[...] = jnp.zeros_like(acc_ref)

    acc_ref[...] += jnp.dot(a_ref[...], b_ref[...],
                            preferred_element_type=jnp.float32)

    @pl.when(k == k_steps - 1)
    def _():
        r = acc_ref[...] + bias_ref[...]          # f32 epilogue (v5e-safe)
        if activation == "relu":
            r = jnp.maximum(r, 0.0)
        elif activation == "tanh":
            r = jnp.tanh(r)
        o_ref[...] = r.astype(o_ref.dtype)


def pallas_matmul(a, b, bias=None, activation="none"):
    """out = act(a @ b + bias);  a:(M,K)  b:(K,N)  bias:(N,)."""
    M, K = a.shape
    K2, N = b.shape
    assert K == K2
    if bias is None:
        bias = jnp.zeros((N,), jnp.float32)

    # bf16 MXU operands; accumulate + epilogue in f32.
    a = a.astype(jnp.bfloat16)
    b = b.astype(jnp.bfloat16)
    bias = bias.astype(jnp.float32)

    tm = min(256, _round_up(M, 16))            # 16: bf16 sublane packing
    tk = min(512, _round_up(K, 128))
    tn = 256 if N >= 512 else 128              # adaptive tn for skinny N
    tn = min(tn, _round_up(N, 128))
    Mp, Kp, Np = _round_up(M, tm), _round_up(K, tk), _round_up(N, tn)

    a_p = jnp.pad(a, ((0, Mp - M), (0, Kp - K)))
    b_p = jnp.pad(b, ((0, Kp - K), (0, Np - N)))
    bias_p = jnp.pad(bias, (0, Np - N)).reshape(1, Np)
    k_steps = Kp // tk

    out = pl.pallas_call(
        functools.partial(_matmul_kernel, activation=activation, k_steps=k_steps),
        out_shape=jax.ShapeDtypeStruct((Mp, Np), jnp.float32),
        grid_spec=pltpu.PrefetchScalarGridSpec(
            num_scalar_prefetch=0,
            grid=(Mp // tm, Np // tn, k_steps),
            in_specs=[
                pl.BlockSpec((tm, tk), lambda i, j, k: (i, k)),
                pl.BlockSpec((tk, tn), lambda i, j, k: (k, j)),
                pl.BlockSpec((1, tn), lambda i, j, k: (0, j)),
            ],
            out_specs=pl.BlockSpec((tm, tn), lambda i, j, k: (i, j)),
            scratch_shapes=[pltpu.VMEM((tm, tn), jnp.float32)],
        ),
        compiler_params=pltpu.CompilerParams(
            dimension_semantics=("parallel", "parallel", "arbitrary"),
            vmem_limit_bytes=32 * 1024 * 1024,
        ),
    )(a_p, b_p, bias_p)
    return out[:M, :N]


# -----------------------------------------------------------------------------
# Conv2d = fused patch extraction (single XLA op) + Pallas GEMM.  NHWC layout.
# -----------------------------------------------------------------------------
def conv2d_nhwc(x, w_gemm, bias, kh, kw, stride=1, pad=0, activation="none"):
    """x:(N,H,W,C);  w_gemm:(C*kh*kw, OC) pre-transposed GEMM-layout weight."""
    N, H, W, C = x.shape
    patches = jax.lax.conv_general_dilated_patches(
        x, filter_shape=(kh, kw), window_strides=(stride, stride),
        padding=((pad, pad), (pad, pad)),
        dimension_numbers=("NHWC", "HWIO", "NHWC"))
    OH, OW = patches.shape[1], patches.shape[2]
    out = pallas_matmul(patches.reshape(N * OH * OW, C * kh * kw),
                        w_gemm, bias, activation)
    return out.reshape(N, OH, OW, w_gemm.shape[1])


# -----------------------------------------------------------------------------
# Plain-JAX glue
# -----------------------------------------------------------------------------
def maxpool_nhwc(x, kh, kw):
    N, H, W, C = x.shape
    return x.reshape(N, H // kh, kh, W // kw, kw, C).max(axis=(2, 4))


def batchnorm_relu_nhwc(x, gamma, beta, eps=1e-5):
    # TODO(synk): training-mode BatchNorm (batch statistics, PyTorch forward
    # default); eval mode with running statistics would differ.
    mu = x.mean(axis=(0, 1, 2), keepdims=True)
    var = x.var(axis=(0, 1, 2), keepdims=True)
    y = (x - mu) * jax.lax.rsqrt(var + eps) * gamma + beta
    return jnp.maximum(y, 0.0)


# -----------------------------------------------------------------------------
# VGG_FeatureExtractor (deep-text-recognition-benchmark layout), NHWC
# -----------------------------------------------------------------------------
def vgg_feature_extractor(x, p):
    x = conv2d_nhwc(x, p["c0_w"], p["c0_b"], 3, 3, 1, 1, "relu")
    x = maxpool_nhwc(x, 2, 2)
    x = conv2d_nhwc(x, p["c1_w"], p["c1_b"], 3, 3, 1, 1, "relu")
    x = maxpool_nhwc(x, 2, 2)
    x = conv2d_nhwc(x, p["c2_w"], p["c2_b"], 3, 3, 1, 1, "relu")
    x = conv2d_nhwc(x, p["c3_w"], p["c3_b"], 3, 3, 1, 1, "relu")
    x = maxpool_nhwc(x, 2, 1)
    x = conv2d_nhwc(x, p["c4_w"], None, 3, 3, 1, 1)
    x = batchnorm_relu_nhwc(x, p["bn4_g"], p["bn4_b"])
    x = conv2d_nhwc(x, p["c5_w"], None, 3, 3, 1, 1)
    x = batchnorm_relu_nhwc(x, p["bn5_g"], p["bn5_b"])
    x = maxpool_nhwc(x, 2, 1)
    x = conv2d_nhwc(x, p["c6_w"], p["c6_b"], 2, 2, 1, 0, "relu")
    return x


# -----------------------------------------------------------------------------
# BidirectionalLSTM: nn.LSTM(bidirectional) + Linear(2H -> H)
# -----------------------------------------------------------------------------
def _lstm_scan(x_proj, w_hh, b_hh, reverse):
    """x_proj:(B,T,4H) precomputed x @ W_ih^T + b_ih.  PyTorch gate order i,f,g,o."""
    B, T, H4 = x_proj.shape
    H = H4 // 4

    def step(carry, xt):
        h, c = carry
        gates = xt + jnp.dot(h, w_hh) + b_hh
        i, f, g, o = jnp.split(gates, 4, axis=-1)
        i = jax.nn.sigmoid(i)
        f = jax.nn.sigmoid(f)
        g = jnp.tanh(g)
        o = jax.nn.sigmoid(o)
        c = f * c + i * g
        h = o * jnp.tanh(c)
        return (h, c), h

    xs = jnp.swapaxes(x_proj, 0, 1)                 # (T, B, 4H)
    if reverse:
        xs = xs[::-1]
    init = (jnp.zeros((B, H), jnp.float32), jnp.zeros((B, H), jnp.float32))
    # TODO(synk): the sequential recurrence stays in a lax.scan (tiny (B,H)
    # matmuls); only the large projections run on the Pallas GEMM.
    _, hs = jax.lax.scan(step, init, xs)
    if reverse:
        hs = hs[::-1]
    return jnp.swapaxes(hs, 0, 1)                   # (B, T, H)


def bidirectional_lstm(x, p, prefix, hidden):
    B, T, I = x.shape
    # Both directions' input projections fused into ONE Pallas GEMM.
    proj = pallas_matmul(x.reshape(B * T, I),
                         p[prefix + "_w_ih"], p[prefix + "_b_ih"])
    proj = proj.reshape(B, T, 8 * hidden)
    h_f = _lstm_scan(proj[..., : 4 * hidden],
                     p[prefix + "_w_hh_f"], p[prefix + "_b_hh_f"], reverse=False)
    h_b = _lstm_scan(proj[..., 4 * hidden:],
                     p[prefix + "_w_hh_b"], p[prefix + "_b_hh_b"], reverse=True)
    rec = jnp.concatenate([h_f, h_b], axis=-1)      # (B, T, 2H)
    out = pallas_matmul(rec.reshape(B * T, 2 * hidden),
                        p[prefix + "_lin_w"], p[prefix + "_lin_b"])
    return out.reshape(B, T, hidden)


# -----------------------------------------------------------------------------
# ModelV1 forward
# -----------------------------------------------------------------------------
def model_v1_forward(params, opt, inputs, text=None, is_train=True,
                     returnFeat="pred"):
    x = inputs                                      # (B, C_in, H, W) NCHW
    if opt["ocr_input_channel"] == 1 and opt["input_channel"] == 3:
        # Reproduces the reference expression exactly (channel 1 used twice).
        x = (x[:, 0] * 0.21 + x[:, 1] * 0.72 + x[:, 1] * 0.07)[:, None]
    if x.shape[2] != opt["ocr_imgH"] or x.shape[3] != opt["ocr_imgW"]:
        # TODO(synk): jax.image.resize 'bicubic' boundary handling differs
        # slightly from F.interpolate(mode='bicubic', align_corners=False).
        x = jax.image.resize(
            x, (x.shape[0], x.shape[1], opt["ocr_imgH"], opt["ocr_imgW"]),
            method="bicubic")
    # TODO(synk): TPS_SpatialTransformerNetwork (Transformation='TPS') not
    # implemented; this script uses Transformation='None'.

    x = jnp.transpose(x, (0, 2, 3, 1))              # NCHW -> NHWC internal layout
    visual = vgg_feature_extractor(x, params)       # (B, H', W', C)
    # AdaptiveAvgPool2d((None, 1)) on permute(0,3,1,2) + squeeze == mean over H'
    visual = visual.mean(axis=1)                    # (B, T=W', C)
    if returnFeat == "vis":
        return visual

    h = opt["hidden_size"]
    contextual = bidirectional_lstm(visual, params, "lstm0", h)
    contextual = bidirectional_lstm(contextual, params, "lstm1", h)
    if returnFeat == "seq":
        return contextual

    # CTC prediction head.  TODO(synk): Attention ('Attn') head not implemented.
    B, T, _ = contextual.shape
    pred = pallas_matmul(contextual.reshape(B * T, h),
                         params["pred_w"], params["pred_b"])
    return pred.reshape(B, T, opt["num_class"])


# -----------------------------------------------------------------------------
# Deterministic parameter init (weights stored in GEMM layout up-front)
# -----------------------------------------------------------------------------
def init_params(key, opt):
    ic = opt["ocr_input_channel"]
    oc = opt["output_channel"]
    ochs = [oc // 8, oc // 4, oc // 2, oc]
    h = opt["hidden_size"]
    keys = iter(jax.random.split(key, 64))

    def w(shape, scale=0.05):
        return jax.random.normal(next(keys), shape, jnp.float32) * scale

    def conv_w(o, i, kh, kw):
        # PyTorch OIHW init, pre-reshaped/transposed once to GEMM (I*kh*kw, O).
        return w((o, i, kh, kw)).reshape(o, i * kh * kw).T

    p = {}
    # VGG_FeatureExtractor
    p["c0_w"] = conv_w(ochs[0], ic, 3, 3);        p["c0_b"] = w((ochs[0],))
    p["c1_w"] = conv_w(ochs[1], ochs[0], 3, 3);   p["c1_b"] = w((ochs[1],))
    p["c2_w"] = conv_w(ochs[2], ochs[1], 3, 3);   p["c2_b"] = w((ochs[2],))
    p["c3_w"] = conv_w(ochs[2], ochs[2], 3, 3);   p["c3_b"] = w((ochs[2],))
    p["c4_w"] = conv_w(ochs[3], ochs[2], 3, 3)
    p["bn4_g"] = jnp.ones((ochs[3],));            p["bn4_b"] = jnp.zeros((ochs[3],))
    p["c5_w"] = conv_w(ochs[3], ochs[3], 3, 3)
    p["bn5_g"] = jnp.ones((ochs[3],));            p["bn5_b"] = jnp.zeros((ochs[3],))
    p["c6_w"] = conv_w(ochs[3], ochs[3], 2, 2);   p["c6_b"] = w((ochs[3],))

    # BiLSTM stack: layer0 (C -> h), layer1 (h -> h)
    for l, isz in enumerate([oc, h]):
        w_ih_f = w((4 * h, isz)); w_ih_b = w((4 * h, isz))
        p[f"lstm{l}_w_ih"] = jnp.concatenate([w_ih_f.T, w_ih_b.T], axis=1)  # (isz, 8h)
        b_ih_f = w((4 * h,)); b_ih_b = w((4 * h,))
        p[f"lstm{l}_b_ih"] = jnp.concatenate([b_ih_f, b_ih_b], axis=0)
        p[f"lstm{l}_w_hh_f"] = w((4 * h, h)).T     # (h, 4h)
        p[f"lstm{l}_w_hh_b"] = w((4 * h, h)).T
        p[f"lstm{l}_b_hh_f"] = w((4 * h,))
        p[f"lstm{l}_b_hh_b"] = w((4 * h,))
        p[f"lstm{l}_lin_w"] = w((h, 2 * h)).T      # (2h, h)
        p[f"lstm{l}_lin_b"] = jnp.zeros((h,))

    # CTC prediction Linear(h -> num_class)
    p["pred_w"] = w((opt["num_class"], h)).T
    p["pred_b"] = jnp.zeros((opt["num_class"],))
    return p


if __name__ == "__main__":
    opt = dict(
        Transformation="None", FeatureExtraction="VGG",
        SequenceModeling="BiLSTM", Prediction="CTC",
        input_channel=3, ocr_input_channel=1,
        output_channel=128, hidden_size=32, num_class=37,
        ocr_imgH=32, ocr_imgW=64, batch_max_length=25, num_fiducial=20,
    )

    key = jax.random.PRNGKey(0)
    pkey, xkey = jax.random.split(key)
    params = init_params(pkey, opt)

    B = 2
    images = jax.random.normal(
        xkey, (B, opt["input_channel"], opt["ocr_imgH"], opt["ocr_imgW"]),
        jnp.float32)

    @jax.jit
    def run(params, images):
        return model_v1_forward(params, opt, images, returnFeat="pred")

    pred = run(params, images)
    jax.block_until_ready(pred)

    # VGG on 32x64 -> feature map (B, 1, 15, 128) -> T = 15 timesteps.
    assert pred.shape == (B, 15, opt["num_class"]), pred.shape
    assert bool(jnp.all(jnp.isfinite(pred)))
    print("KERNEL_OK")
</pallas_src>

<mosaic_0001>
module attributes {stable_mosaic.version = 11 : i64} {
  func.func @_matmul_kernel(%arg0: i32, %arg1: i32, %arg2: i32, %arg3: memref<256x128xbf16, #tpu.memory_space<vmem>>, %arg4: memref<128x128xbf16, #tpu.memory_space<vmem>>, %arg5: memref<1x128xf32, #tpu.memory_space<vmem>>, %arg6: memref<256x128xf32, #tpu.memory_space<vmem>>, %arg7: memref<256x128xf32, #tpu.memory_space<vmem>>) attributes {dimension_semantics = [#tpu.dimension_semantics<parallel>, #tpu.dimension_semantics<parallel>, #tpu.dimension_semantics<arbitrary>], iteration_bounds = array<i64: 16, 1, 1>, scalar_prefetch = 0 : i64, scratch_operands = 1 : i64, tpu.core_type = #tpu.core_type<tc>, window_params = [{transform_indices = @transform_0, window_bounds = array<i64: 256, 128>}, {transform_indices = @transform_1, window_bounds = array<i64: 128, 128>}, {transform_indices = @transform_2, window_bounds = array<i64: 1, 128>}, {transform_indices = @transform_3, window_bounds = array<i64: 256, 128>}]} {
    %c0_i32 = arith.constant 0 : i32
    %0 = arith.cmpi eq, %arg2, %c0_i32 : i32
    %1 = arith.extui %0 : i1 to i32
    %c0_i32_0 = arith.constant 0 : i32
    %2 = arith.cmpi ne, %1, %c0_i32_0 : i32
    scf.if %2 {
      %cst_10 = arith.constant 0.000000e+00 : f32
      %12 = vector.broadcast %cst_10 : f32 to vector<256x128xf32>
      %c0_11 = arith.constant 0 : index
      %c0_12 = arith.constant 0 : index
      %13 = vector.load %arg7[%c0_11, %c0_12] : memref<256x128xf32, #tpu.memory_space<vmem>>, vector<256x128xf32>
      tpu.vector_store %arg7[%c0_11, %c0_12], %12 {strides = array<i32>} : memref<256x128xf32, #tpu.memory_space<vmem>>, vector<256x128xf32>,
    } else {
    }
    %c0 = arith.constant 0 : index
    %c0_1 = arith.constant 0 : index
    %3 = vector.load %arg7[%c0, %c0_1] : memref<256x128xf32, #tpu.memory_space<vmem>>, vector<256x128xf32>
    %c0_2 = arith.constant 0 : index
    %c0_3 = arith.constant 0 : index
    %4 = vector.load %arg3[%c0_2, %c0_3] : memref<256x128xbf16, #tpu.memory_space<vmem>>, vector<256x128xbf16>
    %c0_4 = arith.constant 0 : index
    %c0_5 = arith.constant 0 : index
    %5 = vector.load %arg4[%c0_4, %c0_5] : memref<128x128xbf16, #tpu.memory_space<vmem>>, vector<128x128xbf16>
    %cst = arith.constant dense<0.000000e+00> : vector<256x128xf32>
    %6 = tpu.matmul %4, %5, %cst {dimension_numbers = #tpu.dot_dimension_numbers<[1], [0], [0], [1], [0, 0, 1, 1], [], []>} : vector<256x128xbf16>, vector<128x128xbf16>, vector<256x128xf32> -> vector<256x128xf32>
    %7 = arith.addf %3, %6 : vector<256x128xf32>
    %c0_6 = arith.constant 0 : index
    %c0_7 = arith.constant 0 : index
    %8 = vector.load %arg7[%c0_6, %c0_7] : memref<256x128xf32, #tpu.memory_space<vmem>>, vector<256x128xf32>
    tpu.vector_store %arg7[%c0_6, %c0_7], %7 {strides = array<i32>} : memref<256x128xf32, #tpu.memory_space<vmem>>, vector<256x128xf32>,
    %c0_i32_8 = arith.constant 0 : i32
    %9 = arith.cmpi eq, %arg2, %c0_i32_8 : i32
    %10 = arith.extui %9 : i1 to i32
    %c0_i32_9 = arith.constant 0 : i32
    %11 = arith.cmpi ne, %10, %c0_i32_9 : i32
    scf.if %11 {
      %c0_10 = arith.constant 0 : index
      %c0_11 = arith.constant 0 : index
      %12 = vector.load %arg7[%c0_10, %c0_11] : memref<256x128xf32, #tpu.memory_space<vmem>>, vector<256x128xf32>
      %c0_12 = arith.constant 0 : index
      %c0_13 = arith.constant 0 : index
      %13 = vector.load %arg5[%c0_12, %c0_13] : memref<1x128xf32, #tpu.memory_space<vmem>>, vector<1x128xf32>
      %14 = vector.broadcast %13 : vector<1x128xf32> to vector<256x128xf32>
      %15 = arith.addf %12, %14 : vector<256x128xf32>
      %cst_14 = arith.constant 0.000000e+00 : f32
      %16 = vector.broadcast %cst_14 : f32 to vector<256x128xf32>
      %17 = arith.maximumf %15, %16 : vector<256x128xf32>
      %c0_15 = arith.constant 0 : index
      %c0_16 = arith.constant 0 : index
      %18 = vector.load %arg6[%c0_15, %c0_16] : memref<256x128xf32, #tpu.memory_space<vmem>>, vector<256x128xf32>
      tpu.vector_store %arg6[%c0_15, %c0_16], %17 {strides = array<i32>} : memref<256x128xf32, #tpu.memory_space<vmem>>, vector<256x128xf32>,
    } else {
    }
    return
  }
  func.func @transform_0(%arg0: i32, %arg1: i32, %arg2: i32) -> (i32, i32) {
    %c0_i32 = arith.constant 0 : i32
    return %arg0, %arg2 : i32, i32
  }
  func.func @transform_1(%arg0: i32, %arg1: i32, %arg2: i32) -> (i32, i32) {
    %c0_i32 = arith.constant 0 : i32
    return %arg2, %arg1 : i32, i32
  }
  func.func @transform_2(%arg0: i32, %arg1: i32, %arg2: i32) -> (i32, i32) {
    %c0_i32 = arith.constant 0 : i32
    %c0_i32_0 = arith.constant 0 : i32
    return %c0_i32, %arg1 : i32, i32
  }
  func.func @transform_3(%arg0: i32, %arg1: i32, %arg2: i32) -> (i32, i32) {
    %c0_i32 = arith.constant 0 : i32
    return %arg0, %arg1 : i32, i32
  }
}

module attributes {stable_mosaic.version = 11 : i64} {
  func.func @_matmul_kernel(%arg0: i32, %arg1: i32, %arg2: i32, %arg3: memref<256x256xbf16, #tpu.memory_space<vmem>>, %arg4: memref<256x128xbf16, #tpu.memory_space<vmem>>, %arg5: memref<1x128xf32, #tpu.memory_space<vmem>>, %arg6: memref<256x128xf32, #tpu.memory_space<vmem>>, %arg7: memref<256x128xf32, #tpu.memory_space<vmem>>) attributes {dimension_semantics = [#tpu.dimension_semantics<parallel>, #tpu.dimension_semantics<parallel>, #tpu.dimension_semantics<arbitrary>], iteration_bounds = array<i64: 4, 1, 1>, scalar_prefetch = 0 : i64, scratch_operands = 1 : i64, tpu.core_type = #tpu.core_type<tc>, window_params = [{transform_indices = @transform_0, window_bounds = array<i64: 256, 256>}, {transform_indices = @transform_1, window_bounds = array<i64: 256, 128>}, {transform_indices = @transform_2, window_bounds = array<i64: 1, 128>}, {transform_indices = @transform_3, window_bounds = array<i64: 256, 128>}]} {
    %c0_i32 = arith.constant 0 : i32
    %0 = arith.cmpi eq, %arg2, %c0_i32 : i32
    %1 = arith.extui %0 : i1 to i32
    %c0_i32_0 = arith.constant 0 : i32
    %2 = arith.cmpi ne, %1, %c0_i32_0 : i32
    scf.if %2 {
      %cst_10 = arith.constant 0.000000e+00 : f32
      %12 = vector.broadcast %cst_10 : f32 to vector<256x128xf32>
      %c0_11 = arith.constant 0 : index
      %c0_12 = arith.constant 0 : index
      %13 = vector.load %arg7[%c0_11, %c0_12] : memref<256x128xf32, #tpu.memory_space<vmem>>, vector<256x128xf32>
      tpu.vector_store %arg7[%c0_11, %c0_12], %12 {strides = array<i32>} : memref<256x128xf32, #tpu.memory_space<vmem>>, vector<256x128xf32>,
    } else {
    }
    %c0 = arith.constant 0 : index
    %c0_1 = arith.constant 0 : index
    %3 = vector.load %arg7[%c0, %c0_1] : memref<256x128xf32, #tpu.memory_space<vmem>>, vector<256x128xf32>
    %c0_2 = arith.constant 0 : index
    %c0_3 = arith.constant 0 : index
    %4 = vector.load %arg3[%c0_2, %c0_3] : memref<256x256xbf16, #tpu.memory_space<vmem>>, vector<256x256xbf16>
    %c0_4 = arith.constant 0 : index
    %c0_5 = arith.constant 0 : index
    %5 = vector.load %arg4[%c0_4, %c0_5] : memref<256x128xbf16, #tpu.memory_space<vmem>>, vector<256x128xbf16>
    %cst = arith.constant dense<0.000000e+00> : vector<256x128xf32>
    %6 = tpu.matmul %4, %5, %cst {dimension_numbers = #tpu.dot_dimension_numbers<[1], [0], [0], [1], [0, 0, 1, 1], [], []>} : vector<256x256xbf16>, vector<256x128xbf16>, vector<256x128xf32> -> vector<256x128xf32>
    %7 = arith.addf %3, %6 : vector<256x128xf32>
    %c0_6 = arith.constant 0 : index
    %c0_7 = arith.constant 0 : index
    %8 = vector.load %arg7[%c0_6, %c0_7] : memref<256x128xf32, #tpu.memory_space<vmem>>, vector<256x128xf32>
    tpu.vector_store %arg7[%c0_6, %c0_7], %7 {strides = array<i32>} : memref<256x128xf32, #tpu.memory_space<vmem>>, vector<256x128xf32>,
    %c0_i32_8 = arith.constant 0 : i32
    %9 = arith.cmpi eq, %arg2, %c0_i32_8 : i32
    %10 = arith.extui %9 : i1 to i32
    %c0_i32_9 = arith.constant 0 : i32
    %11 = arith.cmpi ne, %10, %c0_i32_9 : i32
    scf.if %11 {
      %c0_10 = arith.constant 0 : index
      %c0_11 = arith.constant 0 : index
      %12 = vector.load %arg7[%c0_10, %c0_11] : memref<256x128xf32, #tpu.memory_space<vmem>>, vector<256x128xf32>
      %c0_12 = arith.constant 0 : index
      %c0_13 = arith.constant 0 : index
      %13 = vector.load %arg5[%c0_12, %c0_13] : memref<1x128xf32, #tpu.memory_space<vmem>>, vector<1x128xf32>
      %14 = vector.broadcast %13 : vector<1x128xf32> to vector<256x128xf32>
      %15 = arith.addf %12, %14 : vector<256x128xf32>
      %cst_14 = arith.constant 0.000000e+00 : f32
      %16 = vector.broadcast %cst_14 : f32 to vector<256x128xf32>
      %17 = arith.maximumf %15, %16 : vector<256x128xf32>
      %c0_15 = arith.constant 0 : index
      %c0_16 = arith.constant 0 : index
      %18 = vector.load %arg6[%c0_15, %c0_16] : memref<256x128xf32, #tpu.memory_space<vmem>>, vector<256x128xf32>
      tpu.vector_store %arg6[%c0_15, %c0_16], %17 {strides = array<i32>} : memref<256x128xf32, #tpu.memory_space<vmem>>, vector<256x128xf32>,
    } else {
    }
    return
  }
  func.func @transform_0(%arg0: i32, %arg1: i32, %arg2: i32) -> (i32, i32) {
    %c0_i32 = arith.constant 0 : i32
    return %arg0, %arg2 : i32, i32
  }
  func.func @transform_1(%arg0: i32, %arg1: i32, %arg2: i32) -> (i32, i32) {
    %c0_i32 = arith.constant 0 : i32
    return %arg2, %arg1 : i32, i32
  }
  func.func @transform_2(%arg0: i32, %arg1: i32, %arg2: i32) -> (i32, i32) {
    %c0_i32 = arith.constant 0 : i32
    %c0_i32_0 = arith.constant 0 : i32
    return %c0_i32, %arg1 : i32, i32
  }
  func.func @transform_3(%arg0: i32, %arg1: i32, %arg2: i32) -> (i32, i32) {
    %c0_i32 = arith.constant 0 : i32
    return %arg0, %arg1 : i32, i32
  }
}

module attributes {stable_mosaic.version = 11 : i64} {
  func.func @_matmul_kernel(%arg0: i32, %arg1: i32, %arg2: i32, %arg3: memref<256x384xbf16, #tpu.memory_space<vmem>>, %arg4: memref<384x128xbf16, #tpu.memory_space<vmem>>, %arg5: memref<1x128xf32, #tpu.memory_space<vmem>>, %arg6: memref<256x128xf32, #tpu.memory_space<vmem>>, %arg7: memref<256x128xf32, #tpu.memory_space<vmem>>) attributes {dimension_semantics = [#tpu.dimension_semantics<parallel>, #tpu.dimension_semantics<parallel>, #tpu.dimension_semantics<arbitrary>], iteration_bounds = array<i64: 1, 1, 1>, scalar_prefetch = 0 : i64, scratch_operands = 1 : i64, tpu.core_type = #tpu.core_type<tc>, window_params = [{transform_indices = @transform_0, window_bounds = array<i64: 256, 384>}, {transform_indices = @transform_1, window_bounds = array<i64: 384, 128>}, {transform_indices = @transform_2, window_bounds = array<i64: 1, 128>}, {transform_indices = @transform_3, window_bounds = array<i64: 256, 128>}]} {
    %c0_i32 = arith.constant 0 : i32
    %0 = arith.cmpi eq, %arg2, %c0_i32 : i32
    %1 = arith.extui %0 : i1 to i32
    %c0_i32_0 = arith.constant 0 : i32
    %2 = arith.cmpi ne, %1, %c0_i32_0 : i32
    scf.if %2 {
      %cst_10 = arith.constant 0.000000e+00 : f32
      %12 = vector.broadcast %cst_10 : f32 to vector<256x128xf32>
      %c0_11 = arith.constant 0 : index
      %c0_12 = arith.constant 0 : index
      %13 = vector.load %arg7[%c0_11, %c0_12] : memref<256x128xf32, #tpu.memory_space<vmem>>, vector<256x128xf32>
      tpu.vector_store %arg7[%c0_11, %c0_12], %12 {strides = array<i32>} : memref<256x128xf32, #tpu.memory_space<vmem>>, vector<256x128xf32>,
    } else {
    }
    %c0 = arith.constant 0 : index
    %c0_1 = arith.constant 0 : index
    %3 = vector.load %arg7[%c0, %c0_1] : memref<256x128xf32, #tpu.memory_space<vmem>>, vector<256x128xf32>
    %c0_2 = arith.constant 0 : index
    %c0_3 = arith.constant 0 : index
    %4 = vector.load %arg3[%c0_2, %c0_3] : memref<256x384xbf16, #tpu.memory_space<vmem>>, vector<256x384xbf16>
    %c0_4 = arith.constant 0 : index
    %c0_5 = arith.constant 0 : index
    %5 = vector.load %arg4[%c0_4, %c0_5] : memref<384x128xbf16, #tpu.memory_space<vmem>>, vector<384x128xbf16>
    %cst = arith.constant dense<0.000000e+00> : vector<256x128xf32>
    %6 = tpu.matmul %4, %5, %cst {dimension_numbers = #tpu.dot_dimension_numbers<[1], [0], [0], [1], [0, 0, 1, 1], [], []>} : vector<256x384xbf16>, vector<384x128xbf16>, vector<256x128xf32> -> vector<256x128xf32>
    %7 = arith.addf %3, %6 : vector<256x128xf32>
    %c0_6 = arith.constant 0 : index
    %c0_7 = arith.constant 0 : index
    %8 = vector.load %arg7[%c0_6, %c0_7] : memref<256x128xf32, #tpu.memory_space<vmem>>, vector<256x128xf32>
    tpu.vector_store %arg7[%c0_6, %c0_7], %7 {strides = array<i32>} : memref<256x128xf32, #tpu.memory_space<vmem>>, vector<256x128xf32>,
    %c0_i32_8 = arith.constant 0 : i32
    %9 = arith.cmpi eq, %arg2, %c0_i32_8 : i32
    %10 = arith.extui %9 : i1 to i32
    %c0_i32_9 = arith.constant 0 : i32
    %11 = arith.cmpi ne, %10, %c0_i32_9 : i32
    scf.if %11 {
      %c0_10 = arith.constant 0 : index
      %c0_11 = arith.constant 0 : index
      %12 = vector.load %arg7[%c0_10, %c0_11] : memref<256x128xf32, #tpu.memory_space<vmem>>, vector<256x128xf32>
      %c0_12 = arith.constant 0 : index
      %c0_13 = arith.constant 0 : index
      %13 = vector.load %arg5[%c0_12, %c0_13] : memref<1x128xf32, #tpu.memory_space<vmem>>, vector<1x128xf32>
      %14 = vector.broadcast %13 : vector<1x128xf32> to vector<256x128xf32>
      %15 = arith.addf %12, %14 : vector<256x128xf32>
      %cst_14 = arith.constant 0.000000e+00 : f32
      %16 = vector.broadcast %cst_14 : f32 to vector<256x128xf32>
      %17 = arith.maximumf %15, %16 : vector<256x128xf32>
      %c0_15 = arith.constant 0 : index
      %c0_16 = arith.constant 0 : index
      %18 = vector.load %arg6[%c0_15, %c0_16] : memref<256x128xf32, #tpu.memory_space<vmem>>, vector<256x128xf32>
      tpu.vector_store %arg6[%c0_15, %c0_16], %17 {strides = array<i32>} : memref<256x128xf32, #tpu.memory_space<vmem>>, vector<256x128xf32>,
    } else {
    }
    return
  }
  func.func @transform_0(%arg0: i32, %arg1: i32, %arg2: i32) -> (i32, i32) {
    %c0_i32 = arith.constant 0 : i32
    return %arg0, %arg2 : i32, i32
  }
  func.func @transform_1(%arg0: i32, %arg1: i32, %arg2: i32) -> (i32, i32) {
    %c0_i32 = arith.constant 0 : i32
    return %arg2, %arg1 : i32, i32
  }
  func.func @transform_2(%arg0: i32, %arg1: i32, %arg2: i32) -> (i32, i32) {
    %c0_i32 = arith.constant 0 : i32
    %c0_i32_0 = arith.constant 0 : i32
    return %c0_i32, %arg1 : i32, i32
  }
  func.func @transform_3(%arg0: i32, %arg1: i32, %arg2: i32) -> (i32, i32) {
    %c0_i32 = arith.constant 0 : i32
    return %arg0, %arg1 : i32, i32
  }
}

module attributes {stable_mosaic.version = 11 : i64} {
  func.func @_matmul_kernel(%arg0: i32, %arg1: i32, %arg2: i32, %arg3: memref<256x512xbf16, #tpu.memory_space<vmem>>, %arg4: memref<512x128xbf16, #tpu.memory_space<vmem>>, %arg5: memref<1x128xf32, #tpu.memory_space<vmem>>, %arg6: memref<256x128xf32, #tpu.memory_space<vmem>>, %arg7: memref<256x128xf32, #tpu.memory_space<vmem>>) attributes {dimension_semantics = [#tpu.dimension_semantics<parallel>, #tpu.dimension_semantics<parallel>, #tpu.dimension_semantics<arbitrary>], iteration_bounds = array<i64: 1, 1, 2>, scalar_prefetch = 0 : i64, scratch_operands = 1 : i64, tpu.core_type = #tpu.core_type<tc>, window_params = [{transform_indices = @transform_0, window_bounds = array<i64: 256, 512>}, {transform_indices = @transform_1, window_bounds = array<i64: 512, 128>}, {transform_indices = @transform_2, window_bounds = array<i64: 1, 128>}, {transform_indices = @transform_3, window_bounds = array<i64: 256, 128>}]} {
    %c0_i32 = arith.constant 0 : i32
    %0 = arith.cmpi eq, %arg2, %c0_i32 : i32
    %1 = arith.extui %0 : i1 to i32
    %c0_i32_0 = arith.constant 0 : i32
    %2 = arith.cmpi ne, %1, %c0_i32_0 : i32
    scf.if %2 {
      %cst_9 = arith.constant 0.000000e+00 : f32
      %12 = vector.broadcast %cst_9 : f32 to vector<256x128xf32>
      %c0_10 = arith.constant 0 : index
      %c0_11 = arith.constant 0 : index
      %13 = vector.load %arg7[%c0_10, %c0_11] : memref<256x128xf32, #tpu.memory_space<vmem>>, vector<256x128xf32>
      tpu.vector_store %arg7[%c0_10, %c0_11], %12 {strides = array<i32>} : memref<256x128xf32, #tpu.memory_space<vmem>>, vector<256x128xf32>,
    } else {
    }
    %c0 = arith.constant 0 : index
    %c0_1 = arith.constant 0 : index
    %3 = vector.load %arg7[%c0, %c0_1] : memref<256x128xf32, #tpu.memory_space<vmem>>, vector<256x128xf32>
    %c0_2 = arith.constant 0 : index
    %c0_3 = arith.constant 0 : index
    %4 = vector.load %arg3[%c0_2, %c0_3] : memref<256x512xbf16, #tpu.memory_space<vmem>>, vector<256x512xbf16>
    %c0_4 = arith.constant 0 : index
    %c0_5 = arith.constant 0 : index
    %5 = vector.load %arg4[%c0_4, %c0_5] : memref<512x128xbf16, #tpu.memory_space<vmem>>, vector<512x128xbf16>
    %cst = arith.constant dense<0.000000e+00> : vector<256x128xf32>
    %6 = tpu.matmul %4, %5, %cst {dimension_numbers = #tpu.dot_dimension_numbers<[1], [0], [0], [1], [0, 0, 1, 1], [], []>} : vector<256x512xbf16>, vector<512x128xbf16>, vector<256x128xf32> -> vector<256x128xf32>
    %7 = arith.addf %3, %6 : vector<256x128xf32>
    %c0_6 = arith.constant 0 : index
    %c0_7 = arith.constant 0 : index
    %8 = vector.load %arg7[%c0_6, %c0_7] : memref<256x128xf32, #tpu.memory_space<vmem>>, vector<256x128xf32>
    tpu.vector_store %arg7[%c0_6, %c0_7], %7 {strides = array<i32>} : memref<256x128xf32, #tpu.memory_space<vmem>>, vector<256x128xf32>,
    %c1_i32 = arith.constant 1 : i32
    %9 = arith.cmpi eq, %arg2, %c1_i32 : i32
    %10 = arith.extui %9 : i1 to i32
    %c0_i32_8 = arith.constant 0 : i32
    %11 = arith.cmpi ne, %10, %c0_i32_8 : i32
    scf.if %11 {
      %c0_9 = arith.constant 0 : index
      %c0_10 = arith.constant 0 : index
      %12 = vector.load %arg7[%c0_9, %c0_10] : memref<256x128xf32, #tpu.memory_space<vmem>>, vector<256x128xf32>
      %c0_11 = arith.constant 0 : index
      %c0_12 = arith.constant 0 : index
      %13 = vector.load %arg5[%c0_11, %c0_12] : memref<1x128xf32, #tpu.memory_space<vmem>>, vector<1x128xf32>
      %14 = vector.broadcast %13 : vector<1x128xf32> to vector<256x128xf32>
      %15 = arith.addf %12, %14 : vector<256x128xf32>
      %cst_13 = arith.constant 0.000000e+00 : f32
      %16 = vector.broadcast %cst_13 : f32 to vector<256x128xf32>
      %17 = arith.maximumf %15, %16 : vector<256x128xf32>
      %c0_14 = arith.constant 0 : index
      %c0_15 = arith.constant 0 : index
      %18 = vector.load %arg6[%c0_14, %c0_15] : memref<256x128xf32, #tpu.memory_space<vmem>>, vector<256x128xf32>
      tpu.vector_store %arg6[%c0_14, %c0_15], %17 {strides = array<i32>} : memref<256x128xf32, #tpu.memory_space<vmem>>, vector<256x128xf32>,
    } else {
    }
    return
  }
  func.func @transform_0(%arg0: i32, %arg1: i32, %arg2: i32) -> (i32, i32) {
    %c0_i32 = arith.constant 0 : i32
    return %arg0, %arg2 : i32, i32
  }
  func.func @transform_1(%arg0: i32, %arg1: i32, %arg2: i32) -> (i32, i32) {
    %c0_i32 = arith.constant 0 : i32
    return %arg2, %arg1 : i32, i32
  }
  func.func @transform_2(%arg0: i32, %arg1: i32, %arg2: i32) -> (i32, i32) {
    %c0_i32 = arith.constant 0 : i32
    %c0_i32_0 = arith.constant 0 : i32
    return %c0_i32, %arg1 : i32, i32
  }
  func.func @transform_3(%arg0: i32, %arg1: i32, %arg2: i32) -> (i32, i32) {
    %c0_i32 = arith.constant 0 : i32
    return %arg0, %arg1 : i32, i32
  }
}

module attributes {stable_mosaic.version = 11 : i64} {
  func.func @_matmul_kernel(%arg0: i32, %arg1: i32, %arg2: i32, %arg3: memref<128x512xbf16, #tpu.memory_space<vmem>>, %arg4: memref<512x128xbf16, #tpu.memory_space<vmem>>, %arg5: memref<1x128xf32, #tpu.memory_space<vmem>>, %arg6: memref<128x128xf32, #tpu.memory_space<vmem>>, %arg7: memref<128x128xf32, #tpu.memory_space<vmem>>) attributes {dimension_semantics = [#tpu.dimension_semantics<parallel>, #tpu.dimension_semantics<parallel>, #tpu.dimension_semantics<arbitrary>], iteration_bounds = array<i64: 1, 1, 2>, scalar_prefetch = 0 : i64, scratch_operands = 1 : i64, tpu.core_type = #tpu.core_type<tc>, window_params = [{transform_indices = @transform_0, window_bounds = array<i64: 128, 512>}, {transform_indices = @transform_1, window_bounds = array<i64: 512, 128>}, {transform_indices = @transform_2, window_bounds = array<i64: 1, 128>}, {transform_indices = @transform_3, window_bounds = array<i64: 128, 128>}]} {
    %c0_i32 = arith.constant 0 : i32
    %0 = arith.cmpi eq, %arg2, %c0_i32 : i32
    %1 = arith.extui %0 : i1 to i32
    %c0_i32_0 = arith.constant 0 : i32
    %2 = arith.cmpi ne, %1, %c0_i32_0 : i32
    scf.if %2 {
      %cst_9 = arith.constant 0.000000e+00 : f32
      %12 = vector.broadcast %cst_9 : f32 to vector<128x128xf32>
      %c0_10 = arith.constant 0 : index
      %c0_11 = arith.constant 0 : index
      %13 = vector.load %arg7[%c0_10, %c0_11] : memref<128x128xf32, #tpu.memory_space<vmem>>, vector<128x128xf32>
      tpu.vector_store %arg7[%c0_10, %c0_11], %12 {strides = array<i32>} : memref<128x128xf32, #tpu.memory_space<vmem>>, vector<128x128xf32>,
    } else {
    }
    %c0 = arith.constant 0 : index
    %c0_1 = arith.constant 0 : index
    %3 = vector.load %arg7[%c0, %c0_1] : memref<128x128xf32, #tpu.memory_space<vmem>>, vector<128x128xf32>
    %c0_2 = arith.constant 0 : index
    %c0_3 = arith.constant 0 : index
    %4 = vector.load %arg3[%c0_2, %c0_3] : memref<128x512xbf16, #tpu.memory_space<vmem>>, vector<128x512xbf16>
    %c0_4 = arith.constant 0 : index
    %c0_5 = arith.constant 0 : index
    %5 = vector.load %arg4[%c0_4, %c0_5] : memref<512x128xbf16, #tpu.memory_space<vmem>>, vector<512x128xbf16>
    %cst = arith.constant dense<0.000000e+00> : vector<128x128xf32>
    %6 = tpu.matmul %4, %5, %cst {dimension_numbers = #tpu.dot_dimension_numbers<[1], [0], [0], [1], [0, 0, 1, 1], [], []>} : vector<128x512xbf16>, vector<512x128xbf16>, vector<128x128xf32> -> vector<128x128xf32>
    %7 = arith.addf %3, %6 : vector<128x128xf32>
    %c0_6 = arith.constant 0 : index
    %c0_7 = arith.constant 0 : index
    %8 = vector.load %arg7[%c0_6, %c0_7] : memref<128x128xf32, #tpu.memory_space<vmem>>, vector<128x128xf32>
    tpu.vector_store %arg7[%c0_6, %c0_7], %7 {strides = array<i32>} : memref<128x128xf32, #tpu.memory_space<vmem>>, vector<128x128xf32>,
    %c1_i32 = arith.constant 1 : i32
    %9 = arith.cmpi eq, %arg2, %c1_i32 : i32
    %10 = arith.extui %9 : i1 to i32
    %c0_i32_8 = arith.constant 0 : i32
    %11 = arith.cmpi ne, %10, %c0_i32_8 : i32
    scf.if %11 {
      %c0_9 = arith.constant 0 : index
      %c0_10 = arith.constant 0 : index
      %12 = vector.load %arg7[%c0_9, %c0_10] : memref<128x128xf32, #tpu.memory_space<vmem>>, vector<128x128xf32>
      %c0_11 = arith.constant 0 : index
      %c0_12 = arith.constant 0 : index
      %13 = vector.load %arg5[%c0_11, %c0_12] : memref<1x128xf32, #tpu.memory_space<vmem>>, vector<1x128xf32>
      %14 = vector.broadcast %13 : vector<1x128xf32> to vector<128x128xf32>
      %15 = arith.addf %12, %14 : vector<128x128xf32>
      %c0_13 = arith.constant 0 : index
      %c0_14 = arith.constant 0 : index
      %16 = vector.load %arg6[%c0_13, %c0_14] : memref<128x128xf32, #tpu.memory_space<vmem>>, vector<128x128xf32>
      tpu.vector_store %arg6[%c0_13, %c0_14], %15 {strides = array<i32>} : memref<128x128xf32, #tpu.memory_space<vmem>>, vector<128x128xf32>,
    } else {
    }
    return
  }
  func.func @transform_0(%arg0: i32, %arg1: i32, %arg2: i32) -> (i32, i32) {
    %c0_i32 = arith.constant 0 : i32
    return %arg0, %arg2 : i32, i32
  }
  func.func @transform_1(%arg0: i32, %arg1: i32, %arg2: i32) -> (i32, i32) {
    %c0_i32 = arith.constant 0 : i32
    return %arg2, %arg1 : i32, i32
  }
  func.func @transform_2(%arg0: i32, %arg1: i32, %arg2: i32) -> (i32, i32) {
    %c0_i32 = arith.constant 0 : i32
    %c0_i32_0 = arith.constant 0 : i32
    return %c0_i32, %arg1 : i32, i32
  }
  func.func @transform_3(%arg0: i32, %arg1: i32, %arg2: i32) -> (i32, i32) {
    %c0_i32 = arith.constant 0 : i32
    return %arg0, %arg1 : i32, i32
  }
}

module attributes {stable_mosaic.version = 11 : i64} {
  func.func @_matmul_kernel(%arg0: i32, %arg1: i32, %arg2: i32, %arg3: memref<128x512xbf16, #tpu.memory_space<vmem>>, %arg4: memref<512x128xbf16, #tpu.memory_space<vmem>>, %arg5: memref<1x128xf32, #tpu.memory_space<vmem>>, %arg6: memref<128x128xf32, #tpu.memory_space<vmem>>, %arg7: memref<128x128xf32, #tpu.memory_space<vmem>>) attributes {dimension_semantics = [#tpu.dimension_semantics<parallel>, #tpu.dimension_semantics<parallel>, #tpu.dimension_semantics<arbitrary>], iteration_bounds = array<i64: 1, 1, 3>, scalar_prefetch = 0 : i64, scratch_operands = 1 : i64, tpu.core_type = #tpu.core_type<tc>, window_params = [{transform_indices = @transform_0, window_bounds = array<i64: 128, 512>}, {transform_indices = @transform_1, window_bounds = array<i64: 512, 128>}, {transform_indices = @transform_2, window_bounds = array<i64: 1, 128>}, {transform_indices = @transform_3, window_bounds = array<i64: 128, 128>}]} {
    %c0_i32 = arith.constant 0 : i32
    %0 = arith.cmpi eq, %arg2, %c0_i32 : i32
    %1 = arith.extui %0 : i1 to i32
    %c0_i32_0 = arith.constant 0 : i32
    %2 = arith.cmpi ne, %1, %c0_i32_0 : i32
    scf.if %2 {
      %cst_9 = arith.constant 0.000000e+00 : f32
      %12 = vector.broadcast %cst_9 : f32 to vector<128x128xf32>
      %c0_10 = arith.constant 0 : index
      %c0_11 = arith.constant 0 : index
      %13 = vector.load %arg7[%c0_10, %c0_11] : memref<128x128xf32, #tpu.memory_space<vmem>>, vector<128x128xf32>
      tpu.vector_store %arg7[%c0_10, %c0_11], %12 {strides = array<i32>} : memref<128x128xf32, #tpu.memory_space<vmem>>, vector<128x128xf32>,
    } else {
    }
    %c0 = arith.constant 0 : index
    %c0_1 = arith.constant 0 : index
    %3 = vector.load %arg7[%c0, %c0_1] : memref<128x128xf32, #tpu.memory_space<vmem>>, vector<128x128xf32>
    %c0_2 = arith.constant 0 : index
    %c0_3 = arith.constant 0 : index
    %4 = vector.load %arg3[%c0_2, %c0_3] : memref<128x512xbf16, #tpu.memory_space<vmem>>, vector<128x512xbf16>
    %c0_4 = arith.constant 0 : index
    %c0_5 = arith.constant 0 : index
    %5 = vector.load %arg4[%c0_4, %c0_5] : memref<512x128xbf16, #tpu.memory_space<vmem>>, vector<512x128xbf16>
    %cst = arith.constant dense<0.000000e+00> : vector<128x128xf32>
    %6 = tpu.matmul %4, %5, %cst {dimension_numbers = #tpu.dot_dimension_numbers<[1], [0], [0], [1], [0, 0, 1, 1], [], []>} : vector<128x512xbf16>, vector<512x128xbf16>, vector<128x128xf32> -> vector<128x128xf32>
    %7 = arith.addf %3, %6 : vector<128x128xf32>
    %c0_6 = arith.constant 0 : index
    %c0_7 = arith.constant 0 : index
    %8 = vector.load %arg7[%c0_6, %c0_7] : memref<128x128xf32, #tpu.memory_space<vmem>>, vector<128x128xf32>
    tpu.vector_store %arg7[%c0_6, %c0_7], %7 {strides = array<i32>} : memref<128x128xf32, #tpu.memory_space<vmem>>, vector<128x128xf32>,
    %c2_i32 = arith.constant 2 : i32
    %9 = arith.cmpi eq, %arg2, %c2_i32 : i32
    %10 = arith.extui %9 : i1 to i32
    %c0_i32_8 = arith.constant 0 : i32
    %11 = arith.cmpi ne, %10, %c0_i32_8 : i32
    scf.if %11 {
      %c0_9 = arith.constant 0 : index
      %c0_10 = arith.constant 0 : index
      %12 = vector.load %arg7[%c0_9, %c0_10] : memref<128x128xf32, #tpu.memory_space<vmem>>, vector<128x128xf32>
      %c0_11 = arith.constant 0 : index
      %c0_12 = arith.constant 0 : index
      %13 = vector.load %arg5[%c0_11, %c0_12] : memref<1x128xf32, #tpu.memory_space<vmem>>, vector<1x128xf32>
      %14 = vector.broadcast %13 : vector<1x128xf32> to vector<128x128xf32>
      %15 = arith.addf %12, %14 : vector<128x128xf32>
      %c0_13 = arith.constant 0 : index
      %c0_14 = arith.constant 0 : index
      %16 = vector.load %arg6[%c0_13, %c0_14] : memref<128x128xf32, #tpu.memory_space<vmem>>, vector<128x128xf32>
      tpu.vector_store %arg6[%c0_13, %c0_14], %15 {strides = array<i32>} : memref<128x128xf32, #tpu.memory_space<vmem>>, vector<128x128xf32>,
    } else {
    }
    return
  }
  func.func @transform_0(%arg0: i32, %arg1: i32, %arg2: i32) -> (i32, i32) {
    %c0_i32 = arith.constant 0 : i32
    return %arg0, %arg2 : i32, i32
  }
  func.func @transform_1(%arg0: i32, %arg1: i32, %arg2: i32) -> (i32, i32) {
    %c0_i32 = arith.constant 0 : i32
    return %arg2, %arg1 : i32, i32
  }
  func.func @transform_2(%arg0: i32, %arg1: i32, %arg2: i32) -> (i32, i32) {
    %c0_i32 = arith.constant 0 : i32
    %c0_i32_0 = arith.constant 0 : i32
    return %c0_i32, %arg1 : i32, i32
  }
  func.func @transform_3(%arg0: i32, %arg1: i32, %arg2: i32) -> (i32, i32) {
    %c0_i32 = arith.constant 0 : i32
    return %arg0, %arg1 : i32, i32
  }
}

module attributes {stable_mosaic.version = 11 : i64} {
  func.func @_matmul_kernel(%arg0: i32, %arg1: i32, %arg2: i32, %arg3: memref<32x512xbf16, #tpu.memory_space<vmem>>, %arg4: memref<512x128xbf16, #tpu.memory_space<vmem>>, %arg5: memref<1x128xf32, #tpu.memory_space<vmem>>, %arg6: memref<32x128xf32, #tpu.memory_space<vmem>>, %arg7: memref<32x128xf32, #tpu.memory_space<vmem>>) attributes {dimension_semantics = [#tpu.dimension_semantics<parallel>, #tpu.dimension_semantics<parallel>, #tpu.dimension_semantics<arbitrary>], iteration_bounds = array<i64: 1, 1, 1>, scalar_prefetch = 0 : i64, scratch_operands = 1 : i64, tpu.core_type = #tpu.core_type<tc>, window_params = [{transform_indices = @transform_0, window_bounds = array<i64: 32, 512>}, {transform_indices = @transform_1, window_bounds = array<i64: 512, 128>}, {transform_indices = @transform_2, window_bounds = array<i64: 1, 128>}, {transform_indices = @transform_3, window_bounds = array<i64: 32, 128>}]} {
    %c0_i32 = arith.constant 0 : i32
    %0 = arith.cmpi eq, %arg2, %c0_i32 : i32
    %1 = arith.extui %0 : i1 to i32
    %c0_i32_0 = arith.constant 0 : i32
    %2 = arith.cmpi ne, %1, %c0_i32_0 : i32
    scf.if %2 {
      %cst_10 = arith.constant 0.000000e+00 : f32
      %12 = vector.broadcast %cst_10 : f32 to vector<32x128xf32>
      %c0_11 = arith.constant 0 : index
      %c0_12 = arith.constant 0 : index
      %13 = vector.load %arg7[%c0_11, %c0_12] : memref<32x128xf32, #tpu.memory_space<vmem>>, vector<32x128xf32>
      tpu.vector_store %arg7[%c0_11, %c0_12], %12 {strides = array<i32>} : memref<32x128xf32, #tpu.memory_space<vmem>>, vector<32x128xf32>,
    } else {
    }
    %c0 = arith.constant 0 : index
    %c0_1 = arith.constant 0 : index
    %3 = vector.load %arg7[%c0, %c0_1] : memref<32x128xf32, #tpu.memory_space<vmem>>, vector<32x128xf32>
    %c0_2 = arith.constant 0 : index
    %c0_3 = arith.constant 0 : index
    %4 = vector.load %arg3[%c0_2, %c0_3] : memref<32x512xbf16, #tpu.memory_space<vmem>>, vector<32x512xbf16>
    %c0_4 = arith.constant 0 : index
    %c0_5 = arith.constant 0 : index
    %5 = vector.load %arg4[%c0_4, %c0_5] : memref<512x128xbf16, #tpu.memory_space<vmem>>, vector<512x128xbf16>
    %cst = arith.constant dense<0.000000e+00> : vector<32x128xf32>
    %6 = tpu.matmul %4, %5, %cst {dimension_numbers = #tpu.dot_dimension_numbers<[1], [0], [0], [1], [0, 0, 1, 1], [], []>} : vector<32x512xbf16>, vector<512x128xbf16>, vector<32x128xf32> -> vector<32x128xf32>
    %7 = arith.addf %3, %6 : vector<32x128xf32>
    %c0_6 = arith.constant 0 : index
    %c0_7 = arith.constant 0 : index
    %8 = vector.load %arg7[%c0_6, %c0_7] : memref<32x128xf32, #tpu.memory_space<vmem>>, vector<32x128xf32>
    tpu.vector_store %arg7[%c0_6, %c0_7], %7 {strides = array<i32>} : memref<32x128xf32, #tpu.memory_space<vmem>>, vector<32x128xf32>,
    %c0_i32_8 = arith.constant 0 : i32
    %9 = arith.cmpi eq, %arg2, %c0_i32_8 : i32
    %10 = arith.extui %9 : i1 to i32
    %c0_i32_9 = arith.constant 0 : i32
    %11 = arith.cmpi ne, %10, %c0_i32_9 : i32
    scf.if %11 {
      %c0_10 = arith.constant 0 : index
      %c0_11 = arith.constant 0 : index
      %12 = vector.load %arg7[%c0_10, %c0_11] : memref<32x128xf32, #tpu.memory_space<vmem>>, vector<32x128xf32>
      %c0_12 = arith.constant 0 : index
      %c0_13 = arith.constant 0 : index
      %13 = vector.load %arg5[%c0_12, %c0_13] : memref<1x128xf32, #tpu.memory_space<vmem>>, vector<1x128xf32>
      %14 = vector.broadcast %13 : vector<1x128xf32> to vector<32x128xf32>
      %15 = arith.addf %12, %14 : vector<32x128xf32>
      %cst_14 = arith.constant 0.000000e+00 : f32
      %16 = vector.broadcast %cst_14 : f32 to vector<32x128xf32>
      %17 = arith.maximumf %15, %16 : vector<32x128xf32>
      %c0_15 = arith.constant 0 : index
      %c0_16 = arith.constant 0 : index
      %18 = vector.load %arg6[%c0_15, %c0_16] : memref<32x128xf32, #tpu.memory_space<vmem>>, vector<32x128xf32>
      tpu.vector_store %arg6[%c0_15, %c0_16], %17 {strides = array<i32>} : memref<32x128xf32, #tpu.memory_space<vmem>>, vector<32x128xf32>,
    } else {
    }
    return
  }
  func.func @transform_0(%arg0: i32, %arg1: i32, %arg2: i32) -> (i32, i32) {
    %c0_i32 = arith.constant 0 : i32
    return %arg0, %arg2 : i32, i32
  }
  func.func @transform_1(%arg0: i32, %arg1: i32, %arg2: i32) -> (i32, i32) {
    %c0_i32 = arith.constant 0 : i32
    return %arg2, %arg1 : i32, i32
  }
  func.func @transform_2(%arg0: i32, %arg1: i32, %arg2: i32) -> (i32, i32) {
    %c0_i32 = arith.constant 0 : i32
    %c0_i32_0 = arith.constant 0 : i32
    return %c0_i32, %arg1 : i32, i32
  }
  func.func @transform_3(%arg0: i32, %arg1: i32, %arg2: i32) -> (i32, i32) {
    %c0_i32 = arith.constant 0 : i32
    return %arg0, %arg1 : i32, i32
  }
}

module attributes {stable_mosaic.version = 11 : i64} {
  func.func @_matmul_kernel(%arg0: i32, %arg1: i32, %arg2: i32, %arg3: memref<32x128xbf16, #tpu.memory_space<vmem>>, %arg4: memref<128x128xbf16, #tpu.memory_space<vmem>>, %arg5: memref<1x128xf32, #tpu.memory_space<vmem>>, %arg6: memref<32x128xf32, #tpu.memory_space<vmem>>, %arg7: memref<32x128xf32, #tpu.memory_space<vmem>>) attributes {dimension_semantics = [#tpu.dimension_semantics<parallel>, #tpu.dimension_semantics<parallel>, #tpu.dimension_semantics<arbitrary>], iteration_bounds = array<i64: 1, 2, 1>, scalar_prefetch = 0 : i64, scratch_operands = 1 : i64, tpu.core_type = #tpu.core_type<tc>, window_params = [{transform_indices = @transform_0, window_bounds = array<i64: 32, 128>}, {transform_indices = @transform_1, window_bounds = array<i64: 128, 128>}, {transform_indices = @transform_2, window_bounds = array<i64: 1, 128>}, {transform_indices = @transform_3, window_bounds = array<i64: 32, 128>}]} {
    %c0_i32 = arith.constant 0 : i32
    %0 = arith.cmpi eq, %arg2, %c0_i32 : i32
    %1 = arith.extui %0 : i1 to i32
    %c0_i32_0 = arith.constant 0 : i32
    %2 = arith.cmpi ne, %1, %c0_i32_0 : i32
    scf.if %2 {
      %cst_10 = arith.constant 0.000000e+00 : f32
      %12 = vector.broadcast %cst_10 : f32 to vector<32x128xf32>
      %c0_11 = arith.constant 0 : index
      %c0_12 = arith.constant 0 : index
      %13 = vector.load %arg7[%c0_11, %c0_12] : memref<32x128xf32, #tpu.memory_space<vmem>>, vector<32x128xf32>
      tpu.vector_store %arg7[%c0_11, %c0_12], %12 {strides = array<i32>} : memref<32x128xf32, #tpu.memory_space<vmem>>, vector<32x128xf32>,
    } else {
    }
    %c0 = arith.constant 0 : index
    %c0_1 = arith.constant 0 : index
    %3 = vector.load %arg7[%c0, %c0_1] : memref<32x128xf32, #tpu.memory_space<vmem>>, vector<32x128xf32>
    %c0_2 = arith.constant 0 : index
    %c0_3 = arith.constant 0 : index
    %4 = vector.load %arg3[%c0_2, %c0_3] : memref<32x128xbf16, #tpu.memory_space<vmem>>, vector<32x128xbf16>
    %c0_4 = arith.constant 0 : index
    %c0_5 = arith.constant 0 : index
    %5 = vector.load %arg4[%c0_4, %c0_5] : memref<128x128xbf16, #tpu.memory_space<vmem>>, vector<128x128xbf16>
    %cst = arith.constant dense<0.000000e+00> : vector<32x128xf32>
    %6 = tpu.matmul %4, %5, %cst {dimension_numbers = #tpu.dot_dimension_numbers<[1], [0], [0], [1], [0, 0, 1, 1], [], []>} : vector<32x128xbf16>, vector<128x128xbf16>, vector<32x128xf32> -> vector<32x128xf32>
    %7 = arith.addf %3, %6 : vector<32x128xf32>
    %c0_6 = arith.constant 0 : index
    %c0_7 = arith.constant 0 : index
    %8 = vector.load %arg7[%c0_6, %c0_7] : memref<32x128xf32, #tpu.memory_space<vmem>>, vector<32x128xf32>
    tpu.vector_store %arg7[%c0_6, %c0_7], %7 {strides = array<i32>} : memref<32x128xf32, #tpu.memory_space<vmem>>, vector<32x128xf32>,
    %c0_i32_8 = arith.constant 0 : i32
    %9 = arith.cmpi eq, %arg2, %c0_i32_8 : i32
    %10 = arith.extui %9 : i1 to i32
    %c0_i32_9 = arith.constant 0 : i32
    %11 = arith.cmpi ne, %10, %c0_i32_9 : i32
    scf.if %11 {
      %c0_10 = arith.constant 0 : index
      %c0_11 = arith.constant 0 : index
      %12 = vector.load %arg7[%c0_10, %c0_11] : memref<32x128xf32, #tpu.memory_space<vmem>>, vector<32x128xf32>
      %c0_12 = arith.constant 0 : index
      %c0_13 = arith.constant 0 : index
      %13 = vector.load %arg5[%c0_12, %c0_13] : memref<1x128xf32, #tpu.memory_space<vmem>>, vector<1x128xf32>
      %14 = vector.broadcast %13 : vector<1x128xf32> to vector<32x128xf32>
      %15 = arith.addf %12, %14 : vector<32x128xf32>
      %c0_14 = arith.constant 0 : index
      %c0_15 = arith.constant 0 : index
      %16 = vector.load %arg6[%c0_14, %c0_15] : memref<32x128xf32, #tpu.memory_space<vmem>>, vector<32x128xf32>
      tpu.vector_store %arg6[%c0_14, %c0_15], %15 {strides = array<i32>} : memref<32x128xf32, #tpu.memory_space<vmem>>, vector<32x128xf32>,
    } else {
    }
    return
  }
  func.func @transform_0(%arg0: i32, %arg1: i32, %arg2: i32) -> (i32, i32) {
    %c0_i32 = arith.constant 0 : i32
    return %arg0, %arg2 : i32, i32
  }
  func.func @transform_1(%arg0: i32, %arg1: i32, %arg2: i32) -> (i32, i32) {
    %c0_i32 = arith.constant 0 : i32
    return %arg2, %arg1 : i32, i32
  }
  func.func @transform_2(%arg0: i32, %arg1: i32, %arg2: i32) -> (i32, i32) {
    %c0_i32 = arith.constant 0 : i32
    %c0_i32_0 = arith.constant 0 : i32
    return %c0_i32, %arg1 : i32, i32
  }
  func.func @transform_3(%arg0: i32, %arg1: i32, %arg2: i32) -> (i32, i32) {
    %c0_i32 = arith.constant 0 : i32
    return %arg0, %arg1 : i32, i32
  }
}

module attributes {stable_mosaic.version = 11 : i64} {
  func.func @_matmul_kernel(%arg0: i32, %arg1: i32, %arg2: i32, %arg3: memref<32x128xbf16, #tpu.memory_space<vmem>>, %arg4: memref<128x128xbf16, #tpu.memory_space<vmem>>, %arg5: memref<1x128xf32, #tpu.memory_space<vmem>>, %arg6: memref<32x128xf32, #tpu.memory_space<vmem>>, %arg7: memref<32x128xf32, #tpu.memory_space<vmem>>) attributes {dimension_semantics = [#tpu.dimension_semantics<parallel>, #tpu.dimension_semantics<parallel>, #tpu.dimension_semantics<arbitrary>], iteration_bounds = array<i64: 1, 1, 1>, scalar_prefetch = 0 : i64, scratch_operands = 1 : i64, tpu.core_type = #tpu.core_type<tc>, window_params = [{transform_indices = @transform_0, window_bounds = array<i64: 32, 128>}, {transform_indices = @transform_1, window_bounds = array<i64: 128, 128>}, {transform_indices = @transform_2, window_bounds = array<i64: 1, 128>}, {transform_indices = @transform_3, window_bounds = array<i64: 32, 128>}]} {
    %c0_i32 = arith.constant 0 : i32
    %0 = arith.cmpi eq, %arg2, %c0_i32 : i32
    %1 = arith.extui %0 : i1 to i32
    %c0_i32_0 = arith.constant 0 : i32
    %2 = arith.cmpi ne, %1, %c0_i32_0 : i32
    scf.if %2 {
      %cst_10 = arith.constant 0.000000e+00 : f32
      %12 = vector.broadcast %cst_10 : f32 to vector<32x128xf32>
      %c0_11 = arith.constant 0 : index
      %c0_12 = arith.constant 0 : index
      %13 = vector.load %arg7[%c0_11, %c0_12] : memref<32x128xf32, #tpu.memory_space<vmem>>, vector<32x128xf32>
      tpu.vector_store %arg7[%c0_11, %c0_12], %12 {strides = array<i32>} : memref<32x128xf32, #tpu.memory_space<vmem>>, vector<32x128xf32>,
    } else {
    }
    %c0 = arith.constant 0 : index
    %c0_1 = arith.constant 0 : index
    %3 = vector.load %arg7[%c0, %c0_1] : memref<32x128xf32, #tpu.memory_space<vmem>>, vector<32x128xf32>
    %c0_2 = arith.constant 0 : index
    %c0_3 = arith.constant 0 : index
    %4 = vector.load %arg3[%c0_2, %c0_3] : memref<32x128xbf16, #tpu.memory_space<vmem>>, vector<32x128xbf16>
    %c0_4 = arith.constant 0 : index
    %c0_5 = arith.constant 0 : index
    %5 = vector.load %arg4[%c0_4, %c0_5] : memref<128x128xbf16, #tpu.memory_space<vmem>>, vector<128x128xbf16>
    %cst = arith.constant dense<0.000000e+00> : vector<32x128xf32>
    %6 = tpu.matmul %4, %5, %cst {dimension_numbers = #tpu.dot_dimension_numbers<[1], [0], [0], [1], [0, 0, 1, 1], [], []>} : vector<32x128xbf16>, vector<128x128xbf16>, vector<32x128xf32> -> vector<32x128xf32>
    %7 = arith.addf %3, %6 : vector<32x128xf32>
    %c0_6 = arith.constant 0 : index
    %c0_7 = arith.constant 0 : index
    %8 = vector.load %arg7[%c0_6, %c0_7] : memref<32x128xf32, #tpu.memory_space<vmem>>, vector<32x128xf32>
    tpu.vector_store %arg7[%c0_6, %c0_7], %7 {strides = array<i32>} : memref<32x128xf32, #tpu.memory_space<vmem>>, vector<32x128xf32>,
    %c0_i32_8 = arith.constant 0 : i32
    %9 = arith.cmpi eq, %arg2, %c0_i32_8 : i32
    %10 = arith.extui %9 : i1 to i32
    %c0_i32_9 = arith.constant 0 : i32
    %11 = arith.cmpi ne, %10, %c0_i32_9 : i32
    scf.if %11 {
      %c0_10 = arith.constant 0 : index
      %c0_11 = arith.constant 0 : index
      %12 = vector.load %arg7[%c0_10, %c0_11] : memref<32x128xf32, #tpu.memory_space<vmem>>, vector<32x128xf32>
      %c0_12 = arith.constant 0 : index
      %c0_13 = arith.constant 0 : index
      %13 = vector.load %arg5[%c0_12, %c0_13] : memref<1x128xf32, #tpu.memory_space<vmem>>, vector<1x128xf32>
      %14 = vector.broadcast %13 : vector<1x128xf32> to vector<32x128xf32>
      %15 = arith.addf %12, %14 : vector<32x128xf32>
      %c0_14 = arith.constant 0 : index
      %c0_15 = arith.constant 0 : index
      %16 = vector.load %arg6[%c0_14, %c0_15] : memref<32x128xf32, #tpu.memory_space<vmem>>, vector<32x128xf32>
      tpu.vector_store %arg6[%c0_14, %c0_15], %15 {strides = array<i32>} : memref<32x128xf32, #tpu.memory_space<vmem>>, vector<32x128xf32>,
    } else {
    }
    return
  }
  func.func @transform_0(%arg0: i32, %arg1: i32, %arg2: i32) -> (i32, i32) {
    %c0_i32 = arith.constant 0 : i32
    return %arg0, %arg2 : i32, i32
  }
  func.func @transform_1(%arg0: i32, %arg1: i32, %arg2: i32) -> (i32, i32) {
    %c0_i32 = arith.constant 0 : i32
    return %arg2, %arg1 : i32, i32
  }
  func.func @transform_2(%arg0: i32, %arg1: i32, %arg2: i32) -> (i32, i32) {
    %c0_i32 = arith.constant 0 : i32
    %c0_i32_0 = arith.constant 0 : i32
    return %c0_i32, %arg1 : i32, i32
  }
  func.func @transform_3(%arg0: i32, %arg1: i32, %arg2: i32) -> (i32, i32) {
    %c0_i32 = arith.constant 0 : i32
    return %arg0, %arg1 : i32, i32
  }
}

</mosaic_0001>

<bundles_post_ra>
// kernel: run.12
= control target key start
LH: loop header
LB: loop body
LE: loop exit
PB: predicated region body
PF: predicated region fallthrough
CT: control target
= control target key end

     0   :  { %s1144_s12 = smov 0   ;;  %s1146_s13 = smov 0   ;;  %s1297_s0 = inlined_call_operand.vmem [shape: bf16[4096,128], index: 0, kind: input, shape index: {}]   ;;  %s1298_s1 = inlined_call_operand.vmem [shape: bf16[128,128], index: 1, kind: input, shape index: {}]   ;;  %s1299_s2 = inlined_call_operand.vmem [shape: f32[1,128], index: 2, kind: input, shape index: {}]   ;;  %s1300_s3 = inlined_call_operand.vmem [shape: f32[4096,128], index: 3, kind: output, shape index: {}]  }
   0x1   :  { %s1148_s14 = smov 0  }
   0x2 LB: > { %s32_s15 = sadd.s32 1, %s1118_s13  ;;  %p924_p0 = scmp.ge.s32.totalorder %s1122_s14, 1  ;;  %s1122_s14 = sphi %s1148_s14, %s13_s14   ;;  %s1118_s13 = sphi %s1146_s13, %s1302_s13   ;;  %s1114_s12 = sphi %s1144_s12, %s1301_s12  }
   0x3   : > { %p34_p1 = scmp.ge.s32.totalorder %s32_s15, 16  ;;  %p188_p2 = scmp.lt.s32.totalorder %s1122_s14, 17 }
   0x5   : > { %s1304_s15 = smov (%p34_p1, %s32_s15), 0  ;;  %p189_p3 = pnand %p924_p0, %p188_p2 }
   0x6   : > { %s925_s24 = sshll.u32 (!%p189_p3), %s1114_s12, 5 }
   0x7   : > { %192 = sbr.rel (%p189_p3) target bundleno = 239 (0xef), region = 32  ;;  %p230_p4 = scmp.lt.s32.totalorder (!%p189_p3), %s925_s24, 511 }
   0xc   : > { %v1050_v0 = vld [vmem:[%s1298_s1 + $0x38] sm:$0xff]  ;;  %v1049_v1 = vld [vmem:[%s1298_s1 + $0x30] sm:$0xff]  ;;  %v1048_v2 = vld [vmem:[%s1298_s1 + $0x28] sm:$0xff]  ;;  %s1306_s24 = smov (!%p230_p4, %s925_s24), 511 }
   0xd   : > { %519 = vmatpush.bf16.msra.mxu0 %v1050_v0  ;;  %1051 = vmatpush.bf16.msra.mxu1 %v1050_v0  ;;  %v1047_v3 = vld [vmem:[%s1298_s1 + $0x20] sm:$0xff]  ;;  %v1046_v4 = vld [vmem:[%s1298_s1 + $0x18] sm:$0xff]  ;;  %v1045_v5 = vld [vmem:[%s1298_s1 + $0x10] sm:$0xff]  ;;  %s926_s4 = sshll.u32 %s1306_s24, 2  ;;  %s928_s12 = sshll.u32 %s1306_s24, 3 }
   0xe   : > { %1052 = vmatpush.bf16.msra.mxu2 %v1050_v0  ;;  %1053 = vmatpush.bf16.msra.mxu3 %v1050_v0  ;;  %v1044_v6 = vld [vmem:[%s1298_s1 + $0x8] sm:$0xff]  ;;  %v1043_v7 = vld [vmem:[%s1298_s1] sm:$0xff]  ;;  %s1195_s9 = scalar_lea.vmem %s1297_s0, %s926_s4  ;;  %s1224_s18 = scalar_lea.vmem %s1300_s3, %s928_s12 }
   0xf   : > { %v1027_v8 = vld [vmem:[%s1195_s9] sm:$0xff]  ;;  %v1028_v12 = vld [vmem:[%s1195_s9 + $0x8] sm:$0xff]  ;;  %v1029_v16 = vld [vmem:[%s1195_s9 + $0x10] sm:$0xff] }
  0x10   : > { %v1031_v9 = vld [vmem:[%s1195_s9 + $0x20] sm:$0xff]  ;;  %v1032_v13 = vld [vmem:[%s1195_s9 + $0x28] sm:$0xff]  ;;  %v1033_v17 = vld [vmem:[%s1195_s9 + $0x30] sm:$0xff] }
  0x11   : > { %520 = vmatpush.bf16.msra.mxu0 %v1049_v1  ;;  %1054 = vmatpush.bf16.msra.mxu1 %v1049_v1  ;;  %v1035_v10 = vld [vmem:[%s1195_s9 + $0x40] sm:$0xff]  ;;  %v1036_v14 = vld [vmem:[%s1195_s9 + $0x48] sm:$0xff]  ;;  %v1037_v18 = vld [vmem:[%s1195_s9 + $0x50] sm:$0xff] }
  0x12   : > { %1055 = vmatpush.bf16.msra.mxu2 %v1049_v1  ;;  %1056 = vmatpush.bf16.msra.mxu3 %v1049_v1  ;;  %v1039_v11 = vld [vmem:[%s1195_s9 + $0x60] sm:$0xff]  ;;  %v1040_v15 = vld [vmem:[%s1195_s9 + $0x68] sm:$0xff]  ;;  %v1041_v19 = vld [vmem:[%s1195_s9 + $0x70] sm:$0xff] }
  0x13   : > { %v1030_v20 = vld [vmem:[%s1195_s9 + $0x18] sm:$0xff]  ;;  %v1216_v24 = vld [vmem:[%s1299_s2] ss:$0 sm:$0xff] }
  0x14   : > { %v1034_v21 = vld [vmem:[%s1195_s9 + $0x38] sm:$0xff] }
  0x15   : > { %521 = vmatpush.bf16.msra.mxu0 %v1048_v2  ;;  %1057 = vmatpush.bf16.msra.mxu1 %v1048_v2  ;;  %v1038_v22 = vld [vmem:[%s1195_s9 + $0x58] sm:$0xff] }
  0x16   : > { %1058 = vmatpush.bf16.msra.mxu2 %v1048_v2  ;;  %1059 = vmatpush.bf16.msra.mxu3 %v1048_v2  ;;  %v1042_v23 = vld [vmem:[%s1195_s9 + $0x78] sm:$0xff] }
  0x19   : > { %522 = vmatpush.bf16.msra.mxu0 %v1047_v3  ;;  %1060 = vmatpush.bf16.msra.mxu1 %v1047_v3 }
  0x1a   : > { %1061 = vmatpush.bf16.msra.mxu2 %v1047_v3  ;;  %1062 = vmatpush.bf16.msra.mxu3 %v1047_v3 }
  0x1d   : > { %523 = vmatpush.bf16.msra.mxu0 %v1046_v4  ;;  %1063 = vmatpush.bf16.msra.mxu1 %v1046_v4 }
  0x1e   : > { %1064 = vmatpush.bf16.msra.mxu2 %v1046_v4  ;;  %1065 = vmatpush.bf16.msra.mxu3 %v1046_v4 }
  0x21   : > { %524 = vmatpush.bf16.msra.mxu0 %v1045_v5  ;;  %1066 = vmatpush.bf16.msra.mxu1 %v1045_v5 }
  0x22   : > { %1067 = vmatpush.bf16.msra.mxu2 %v1045_v5  ;;  %1068 = vmatpush.bf16.msra.mxu3 %v1045_v5 }
  0x25   : > { %525 = vmatpush.bf16.msra.mxu0 %v1044_v6  ;;  %1069 = vmatpush.bf16.msra.mxu1 %v1044_v6 }
  0x26   : > { %1070 = vmatpush.bf16.msra.mxu2 %v1044_v6  ;;  %1071 = vmatpush.bf16.msra.mxu3 %v1044_v6 }
  0x29   : > { %526 = vmatpush.bf16.msra.mxu0 %v1043_v7  ;;  %1072 = vmatpush.bf16.msra.mxu1 %v1043_v7 }
  0x2a   : > { %1073 = vmatpush.bf16.msra.mxu2 %v1043_v7  ;;  %1074 = vmatpush.bf16.msra.mxu3 %v1043_v7 }
  0x2c   : > { %527 = vmatmul.bf16.vlgmr.msra.gmra.mxu0 %v1027_v8  ;;  %547 = vmatmul.bf16.vlgmr.msra.gmra.mxu1 %v1031_v9 }
  0x2d   : > { %567 = vmatmul.bf16.vlgmr.msra.gmra.mxu2 %v1035_v10  ;;  %587 = vmatmul.bf16.vlgmr.msra.gmra.mxu3 %v1039_v11 }
  0x3c   : > { %532 = vmatmul.bf16.gmra.mxu0 %v1028_v12  ;;  %552 = vmatmul.bf16.gmra.mxu1 %v1032_v13 }
  0x3d   : > { %572 = vmatmul.bf16.gmra.mxu2 %v1036_v14  ;;  %592 = vmatmul.bf16.gmra.mxu3 %v1040_v15 }
  0x4c   : > { %537 = vmatmul.bf16.gmra.mxu0 %v1029_v16  ;;  %557 = vmatmul.bf16.gmra.mxu1 %v1033_v17 }
  0x4d   : > { %577 = vmatmul.bf16.gmra.mxu2 %v1037_v18  ;;  %597 = vmatmul.bf16.gmra.mxu3 %v1041_v19 }
  0x5c   : > { %542 = vmatmul.bf16.gmra.mxu0 %v1030_v20  ;;  %562 = vmatmul.bf16.gmra.mxu1 %v1034_v21 }
  0x5d   : > { %582 = vmatmul.bf16.gmra.mxu2 %v1038_v22  ;;  %602 = vmatmul.bf16.gmra.mxu3 %v1042_v23 }
  0xa9   : > { %v528_v25 = vpop.f32.mrf.mxu0  ;;  %v548_v26 = vpop.f32.mrf.mxu1 }
  0xaa   : > { %v711_v27 = vadd.f32 %v1216_v24, %v528_v25  ;;  %v719_v28 = vadd.f32 %v1216_v24, %v548_v26 }
  0xac   : > { %v743_v29 = vmax.f32 %v711_v27, 0.0  ;;  %v751_v30 = vmax.f32 %v719_v28, 0.0 }
  0xae   : > { %775 = vst [vmem:[%s1224_s18] sm:$0xff] %v743_v29 }
  0xaf   : > { %783 = vst [vmem:[%s1224_s18 + $0x40] sm:$0xff] %v751_v30 }
  0xb0   : > { %v568_v31 = vpop.f32.mrf.mxu2  ;;  %v588_v32 = vpop.f32.mrf.mxu3 }
  0xb1   : > { %v727_v33 = vadd.f32 %v1216_v24, %v568_v31  ;;  %v735_v34 = vadd.f32 %v1216_v24, %v588_v32  ;;  %v530_v35 = vpop.f32.mrf.mxu0  ;;  %v550_v36 = vpop.f32.mrf.mxu1 }
  0xb2   : > { %v712_v37 = vadd.f32 %v1216_v24, %v530_v35  ;;  %v720_v38 = vadd.f32 %v1216_v24, %v550_v36 }
  0xb3   : > { %v759_v39 = vmax.f32 %v727_v33, 0.0  ;;  %v767_v40 = vmax.f32 %v735_v34, 0.0 }
  0xb4   : > { %v744_v41 = vmax.f32 %v712_v37, 0.0  ;;  %v752_v42 = vmax.f32 %v720_v38, 0.0 }
  0xb5   : > { %791 = vst [vmem:[%s1224_s18 + $0x80] sm:$0xff] %v759_v39 }
  0xb6   : > { %799 = vst [vmem:[%s1224_s18 + $0xc0] sm:$0xff] %v767_v40 }
  0xb7   : > { %776 = vst [vmem:[%s1224_s18 + $0x8] sm:$0xff] %v744_v41 }
  0xb8   : > { %784 = vst [vmem:[%s1224_s18 + $0x48] sm:$0xff] %v752_v42  ;;  %v570_v43 = vpop.f32.mrf.mxu2  ;;  %v590_v44 = vpop.f32.mrf.mxu3 }
  0xb9   : > { %v728_v45 = vadd.f32 %v1216_v24, %v570_v43  ;;  %v736_v46 = vadd.f32 %v1216_v24, %v590_v44  ;;  %v533_v47 = vpop.f32.mrf.mxu0  ;;  %v553_v48 = vpop.f32.mrf.mxu1 }
  0xba   : > { %v713_v49 = vadd.f32 %v1216_v24, %v533_v47  ;;  %v721_v50 = vadd.f32 %v1216_v24, %v553_v48 }
  0xbb   : > { %v760_v51 = vmax.f32 %v728_v45, 0.0  ;;  %v768_v52 = vmax.f32 %v736_v46, 0.0 }
  0xbc   : > { %v745_v53 = vmax.f32 %v713_v49, 0.0  ;;  %v753_v54 = vmax.f32 %v721_v50, 0.0 }
  0xbd   : > { %792 = vst [vmem:[%s1224_s18 + $0x88] sm:$0xff] %v760_v51 }
  0xbe   : > { %800 = vst [vmem:[%s1224_s18 + $0xc8] sm:$0xff] %v768_v52 }
  0xbf   : > { %777 = vst [vmem:[%s1224_s18 + $0x10] sm:$0xff] %v745_v53 }
  0xc0   : > { %785 = vst [vmem:[%s1224_s18 + $0x50] sm:$0xff] %v753_v54  ;;  %v573_v55 = vpop.f32.mrf.mxu2  ;;  %v593_v56 = vpop.f32.mrf.mxu3 }
  0xc1   : > { %v729_v57 = vadd.f32 %v1216_v24, %v573_v55  ;;  %v737_v58 = vadd.f32 %v1216_v24, %v593_v56  ;;  %v535_v59 = vpop.f32.mrf.mxu0  ;;  %v555_v60 = vpop.f32.mrf.mxu1 }
  0xc2   : > { %v714_v61 = vadd.f32 %v1216_v24, %v535_v59  ;;  %v722_v62 = vadd.f32 %v1216_v24, %v555_v60 }
  0xc3   : > { %v761_v63 = vmax.f32 %v729_v57, 0.0  ;;  %v769_v0 = vmax.f32 %v737_v58, 0.0 }
  0xc4   : > { %v746_v1 = vmax.f32 %v714_v61, 0.0  ;;  %v754_v2 = vmax.f32 %v722_v62, 0.0 }
  0xc5   : > { %793 = vst [vmem:[%s1224_s18 + $0x90] sm:$0xff] %v761_v63 }
  0xc6   : > { %801 = vst [vmem:[%s1224_s18 + $0xd0] sm:$0xff] %v769_v0 }
  0xc7   : > { %778 = vst [vmem:[%s1224_s18 + $0x18] sm:$0xff] %v746_v1 }
  0xc8   : > { %786 = vst [vmem:[%s1224_s18 + $0x58] sm:$0xff] %v754_v2  ;;  %v575_v3 = vpop.f32.mrf.mxu2  ;;  %v595_v4 = vpop.f32.mrf.mxu3 }
  0xc9   : > { %v730_v5 = vadd.f32 %v1216_v24, %v575_v3  ;;  %v738_v6 = vadd.f32 %v1216_v24, %v595_v4  ;;  %v538_v7 = vpop.f32.mrf.mxu0  ;;  %v558_v8 = vpop.f32.mrf.mxu1 }
  0xca   : > { %v715_v9 = vadd.f32 %v1216_v24, %v538_v7  ;;  %v723_v10 = vadd.f32 %v1216_v24, %v558_v8 }
  0xcb   : > { %v762_v11 = vmax.f32 %v730_v5, 0.0  ;;  %v770_v12 = vmax.f32 %v738_v6, 0.0 }
  0xcc   : > { %v747_v13 = vmax.f32 %v715_v9, 0.0  ;;  %v755_v14 = vmax.f32 %v723_v10, 0.0 }
  0xcd   : > { %794 = vst [vmem:[%s1224_s18 + $0x98] sm:$0xff] %v762_v11 }
  0xce   : > { %802 = vst [vmem:[%s1224_s18 + $0xd8] sm:$0xff] %v770_v12 }
  0xcf   : > { %779 = vst [vmem:[%s1224_s18 + $0x20] sm:$0xff] %v747_v13 }
  0xd0   : > { %787 = vst [vmem:[%s1224_s18 + $0x60] sm:$0xff] %v755_v14  ;;  %v578_v15 = vpop.f32.mrf.mxu2  ;;  %v598_v16 = vpop.f32.mrf.mxu3 }
  0xd1   : > { %v731_v17 = vadd.f32 %v1216_v24, %v578_v15  ;;  %v739_v18 = vadd.f32 %v1216_v24, %v598_v16  ;;  %v540_v19 = vpop.f32.mrf.mxu0  ;;  %v560_v20 = vpop.f32.mrf.mxu1 }
  0xd2   : > { %v716_v21 = vadd.f32 %v1216_v24, %v540_v19  ;;  %v724_v22 = vadd.f32 %v1216_v24, %v560_v20 }
  0xd3   : > { %v763_v23 = vmax.f32 %v731_v17, 0.0  ;;  %v771_v25 = vmax.f32 %v739_v18, 0.0 }
  0xd4   : > { %v748_v26 = vmax.f32 %v716_v21, 0.0  ;;  %v756_v27 = vmax.f32 %v724_v22, 0.0 }
  0xd5   : > { %795 = vst [vmem:[%s1224_s18 + $0xa0] sm:$0xff] %v763_v23 }
  0xd6   : > { %803 = vst [vmem:[%s1224_s18 + $0xe0] sm:$0xff] %v771_v25 }
  0xd7   : > { %780 = vst [vmem:[%s1224_s18 + $0x28] sm:$0xff] %v748_v26 }
  0xd8   : > { %788 = vst [vmem:[%s1224_s18 + $0x68] sm:$0xff] %v756_v27  ;;  %v580_v28 = vpop.f32.mrf.mxu2  ;;  %v600_v29 = vpop.f32.mrf.mxu3 }
  0xd9   : > { %v732_v30 = vadd.f32 %v1216_v24, %v580_v28  ;;  %v740_v31 = vadd.f32 %v1216_v24, %v600_v29  ;;  %v543_v32 = vpop.f32.mrf.mxu0  ;;  %v563_v33 = vpop.f32.mrf.mxu1 }
  0xda   : > { %v717_v34 = vadd.f32 %v1216_v24, %v543_v32  ;;  %v725_v35 = vadd.f32 %v1216_v24, %v563_v33 }
  0xdb   : > { %v764_v36 = vmax.f32 %v732_v30, 0.0  ;;  %v772_v37 = vmax.f32 %v740_v31, 0.0 }
  0xdc   : > { %v749_v38 = vmax.f32 %v717_v34, 0.0  ;;  %v757_v39 = vmax.f32 %v725_v35, 0.0 }
  0xdd   : > { %796 = vst [vmem:[%s1224_s18 + $0xa8] sm:$0xff] %v764_v36 }
  0xde   : > { %804 = vst [vmem:[%s1224_s18 + $0xe8] sm:$0xff] %v772_v37 }
  0xdf   : > { %781 = vst [vmem:[%s1224_s18 + $0x30] sm:$0xff] %v749_v38 }
  0xe0   : > { %789 = vst [vmem:[%s1224_s18 + $0x70] sm:$0xff] %v757_v39  ;;  %v583_v40 = vpop.f32.mrf.mxu2  ;;  %v603_v41 = vpop.f32.mrf.mxu3 }
  0xe1   : > { %v733_v42 = vadd.f32 %v1216_v24, %v583_v40  ;;  %v741_v43 = vadd.f32 %v1216_v24, %v603_v41  ;;  %v545_v44 = vpop.f32.mrf.mxu0  ;;  %v565_v45 = vpop.f32.mrf.mxu1 }
  0xe2   : > { %v718_v46 = vadd.f32 %v1216_v24, %v545_v44  ;;  %v726_v47 = vadd.f32 %v1216_v24, %v565_v45 }
  0xe3   : > { %v765_v48 = vmax.f32 %v733_v42, 0.0  ;;  %v773_v49 = vmax.f32 %v741_v43, 0.0 }
  0xe4   : > { %v750_v50 = vmax.f32 %v718_v46, 0.0  ;;  %v758_v51 = vmax.f32 %v726_v47, 0.0 }
  0xe5   : > { %797 = vst [vmem:[%s1224_s18 + $0xb0] sm:$0xff] %v765_v48 }
  0xe6   : > { %805 = vst [vmem:[%s1224_s18 + $0xf0] sm:$0xff] %v773_v49 }
  0xe7   : > { %782 = vst [vmem:[%s1224_s18 + $0x38] sm:$0xff] %v750_v50 }
  0xe8   : > { %790 = vst [vmem:[%s1224_s18 + $0x78] sm:$0xff] %v758_v51  ;;  %v585_v52 = vpop.f32.mrf.mxu2  ;;  %v605_v53 = vpop.f32.mrf.mxu3 }
  0xe9   : > { %v734_v54 = vadd.f32 %v1216_v24, %v585_v52  ;;  %v742_v55 = vadd.f32 %v1216_v24, %v605_v53 }
  0xeb   : > { %v766_v56 = vmax.f32 %v734_v54, 0.0  ;;  %v774_v57 = vmax.f32 %v742_v55, 0.0 }
  0xed   : > { %798 = vst [vmem:[%s1224_s18 + $0xb8] sm:$0xff] %v766_v56 }
  0xee   : > { %806 = vst [vmem:[%s1224_s18 + $0xf8] sm:$0xff] %v774_v57 }
  0xef PF: > { %s13_s14 = sadd.s32 1, %s1122_s14   ;;  %s1301_s12 = smov %s1118_s13 }
  0xf0   : > { %p10_p5 = scmp.ge.s32.totalorder %s13_s14, 18   ;;  %s1302_s13 = smov %s1304_s15 }
  0xf2   :  { %12 = sbr.rel (!%p10_p5) target bundleno = 2 (0x2), region = 76 }

// kernel: run.13
= control target key start
LH: loop header
LB: loop body
LE: loop exit
PB: predicated region body
PF: predicated region fallthrough
CT: control target
= control target key end

     0   :  { %s1486_s12 = smov 0   ;;  %s1488_s13 = smov 0   ;;  %s1714_s0 = inlined_call_operand.vmem [shape: bf16[1024,256], index: 0, kind: input, shape index: {}]   ;;  %s1715_s1 = inlined_call_operand.vmem [shape: bf16[256,128], index: 1, kind: input, shape index: {}]   ;;  %s1716_s2 = inlined_call_operand.vmem [shape: f32[1,128], index: 2, kind: input, shape index: {}]   ;;  %s1717_s3 = inlined_call_operand.vmem [shape: f32[1024,128], index: 3, kind: output, shape index: {}]  }
   0x1   :  { %s1490_s14 = smov 0  }
   0x2 LB: > { %s32_s15 = sadd.s32 1, %s1460_s13  ;;  %p1152_p0 = scmp.ge.s32.totalorder %s1464_s14, 1  ;;  %s1464_s14 = sphi %s1490_s14, %s13_s14   ;;  %s1460_s13 = sphi %s1488_s13, %s1719_s13   ;;  %s1456_s12 = sphi %s1486_s12, %s1718_s12  }
   0x3   : > { %p34_p1 = scmp.ge.s32.totalorder %s32_s15, 4  ;;  %p191_p2 = scmp.lt.s32.totalorder %s1464_s14, 5 }
   0x5   : > { %s1721_s15 = smov (%p34_p1, %s32_s15), 0  ;;  %p192_p3 = pnand %p1152_p0, %p191_p2 }
   0x6   : > { %s1153_s28 = sshll.u32 (!%p192_p3), %s1456_s12, 5 }
   0x7   : > { %195 = sbr.rel (%p192_p3) target bundleno = 304 (0x130), region = 32  ;;  %p236_p4 = scmp.lt.s32.totalorder (!%p192_p3), %s1153_s28, 127 }
   0xc   : > { %v1392_v0 = vld [vmem:[%s1715_s1 + $0x38] sm:$0xff]  ;;  %v1391_v2 = vld [vmem:[%s1715_s1 + $0x30] sm:$0xff]  ;;  %v1390_v4 = vld [vmem:[%s1715_s1 + $0x28] sm:$0xff]  ;;  %s1723_s28 = smov (!%p236_p4, %s1153_s28), 127 }
   0xd   : > { %v1400_v1 = vld [vmem:[%s1715_s1 + $0x78] sm:$0xff]  ;;  %655 = vmatpush.bf16.msra.mxu0 %v1392_v0  ;;  %1401 = vmatpush.bf16.msra.mxu2 %v1392_v0  ;;  %v1399_v3 = vld [vmem:[%s1715_s1 + $0x70] sm:$0xff]  ;;  %v1398_v5 = vld [vmem:[%s1715_s1 + $0x68] sm:$0xff]  ;;  %s1352_s17 = sshll.u32 %s1723_s28, 3 }
   0xe   : > { %744 = vmatpush.bf16.msra.mxu1 %v1400_v1  ;;  %1409 = vmatpush.bf16.msra.mxu3 %v1400_v1  ;;  %v1389_v6 = vld [vmem:[%s1715_s1 + $0x20] sm:$0xff]  ;;  %v1388_v8 = vld [vmem:[%s1715_s1 + $0x18] sm:$0xff]  ;;  %v1387_v10 = vld [vmem:[%s1715_s1 + $0x10] sm:$0xff]  ;;  %s1554_s22 = scalar_lea.vmem %s1714_s0, %s1352_s17  ;;  %s1640_s7 = scalar_lea.vmem %s1717_s3, %s1352_s17 }
   0xf   : > { %v1397_v7 = vld [vmem:[%s1715_s1 + $0x60] sm:$0xff]  ;;  %v1396_v9 = vld [vmem:[%s1715_s1 + $0x58] sm:$0xff]  ;;  %v1395_v11 = vld [vmem:[%s1715_s1 + $0x50] sm:$0xff] }
  0x10   : > { %v1386_v12 = vld [vmem:[%s1715_s1 + $0x8] sm:$0xff]  ;;  %v1385_v14 = vld [vmem:[%s1715_s1] sm:$0xff]  ;;  %v1168_v28 = vld [vmem:[%s1554_s22 + $0x10] sm:$0xf] }
  0x11   : > { %656 = vmatpush.bf16.msra.mxu0 %v1391_v2  ;;  %1402 = vmatpush.bf16.msra.mxu2 %v1391_v2  ;;  %v1394_v13 = vld [vmem:[%s1715_s1 + $0x48] sm:$0xff]  ;;  %v1393_v15 = vld [vmem:[%s1715_s1 + $0x40] sm:$0xff]  ;;  %v1356_v29 = vld [vmem:[%s1554_s22 + $0x14] sm:$0xf0] }
  0x12   : > { %745 = vmatpush.bf16.msra.mxu1 %v1399_v3  ;;  %1410 = vmatpush.bf16.msra.mxu3 %v1399_v3  ;;  %v1160_v16 = vld [vmem:[%s1554_s22] sm:$0xf]  ;;  %v1354_v17 = vld [vmem:[%s1554_s22 + $0x4] sm:$0xf0]  ;;  %v1353_v20 = vld [vmem:[%s1554_s22 + $0x4] sm:$0xf]  ;;  %v1169_v36 = vor.u32 %v1356_v29, %v1168_v28 }
  0x13   : > { %v1224_v18 = vld [vmem:[%s1554_s22 + $0x80] sm:$0xf]  ;;  %v1370_v19 = vld [vmem:[%s1554_s22 + $0x84] sm:$0xf0]  ;;  %v1162_v21 = vld [vmem:[%s1554_s22 + $0x8] sm:$0xf0]  ;;  %v1161_v24 = vor.u32 %v1354_v17, %v1160_v16 }
  0x14   : > { %v1369_v22 = vld [vmem:[%s1554_s22 + $0x84] sm:$0xf]  ;;  %v1226_v23 = vld [vmem:[%s1554_s22 + $0x88] sm:$0xf0]  ;;  %v1225_v25 = vor.u32 %v1370_v19, %v1224_v18  ;;  %v1165_v26 = vor.u32 %v1353_v20, %v1162_v21  ;;  %v1232_v30 = vld [vmem:[%s1554_s22 + $0x90] sm:$0xf] }
  0x15   : > { %657 = vmatpush.bf16.msra.mxu0 %v1390_v4  ;;  %1403 = vmatpush.bf16.msra.mxu2 %v1390_v4  ;;  %v1229_v27 = vor.u32 %v1369_v22, %v1226_v23  ;;  %v1372_v31 = vld [vmem:[%s1554_s22 + $0x94] sm:$0xf0]  ;;  %v1355_v32 = vld [vmem:[%s1554_s22 + $0x14] sm:$0xf]  ;;  %v1170_v33 = vld [vmem:[%s1554_s22 + $0x18] sm:$0xf0] }
  0x16   : > { %746 = vmatpush.bf16.msra.mxu1 %v1398_v5  ;;  %1411 = vmatpush.bf16.msra.mxu3 %v1398_v5  ;;  %v1371_v34 = vld [vmem:[%s1554_s22 + $0x94] sm:$0xf]  ;;  %v1234_v35 = vld [vmem:[%s1554_s22 + $0x98] sm:$0xf0]  ;;  %v1233_v37 = vor.u32 %v1372_v31, %v1232_v30  ;;  %v1173_v38 = vor.u32 %v1355_v32, %v1170_v33  ;;  %v1176_v40 = vld [vmem:[%s1554_s22 + $0x20] sm:$0xf] }
  0x17   : > { %v1237_v39 = vor.u32 %v1371_v34, %v1234_v35  ;;  %v1358_v41 = vld [vmem:[%s1554_s22 + $0x24] sm:$0xf0]  ;;  %v1240_v42 = vld [vmem:[%s1554_s22 + $0xa0] sm:$0xf]  ;;  %v1357_v44 = vld [vmem:[%s1554_s22 + $0x24] sm:$0xf] }
  0x18   : > { %v1374_v43 = vld [vmem:[%s1554_s22 + $0xa4] sm:$0xf0]  ;;  %v1178_v45 = vld [vmem:[%s1554_s22 + $0x28] sm:$0xf0]  ;;  %v1373_v46 = vld [vmem:[%s1554_s22 + $0xa4] sm:$0xf]  ;;  %v1177_v48 = vor.u32 %v1358_v41, %v1176_v40 }
  0x19   : > { %658 = vmatpush.bf16.msra.mxu0 %v1389_v6  ;;  %1404 = vmatpush.bf16.msra.mxu2 %v1389_v6  ;;  %v1242_v47 = vld [vmem:[%s1554_s22 + $0xa8] sm:$0xf0]  ;;  %v1241_v49 = vor.u32 %v1374_v43, %v1240_v42  ;;  %v1181_v50 = vor.u32 %v1357_v44, %v1178_v45  ;;  %v1184_v52 = vld [vmem:[%s1554_s22 + $0x30] sm:$0xf]  ;;  %v1360_v53 = vld [vmem:[%s1554_s22 + $0x34] sm:$0xf0] }
  0x1a   : > { %747 = vmatpush.bf16.msra.mxu1 %v1397_v7  ;;  %1412 = vmatpush.bf16.msra.mxu3 %v1397_v7  ;;  %v1245_v51 = vor.u32 %v1373_v46, %v1242_v47  ;;  %v1248_v54 = vld [vmem:[%s1554_s22 + $0xb0] sm:$0xf]  ;;  %v1376_v55 = vld [vmem:[%s1554_s22 + $0xb4] sm:$0xf0]  ;;  %v1359_v56 = vld [vmem:[%s1554_s22 + $0x34] sm:$0xf]  ;;  %v1185_v60 = vor.u32 %v1360_v53, %v1184_v52 }
  0x1b   : > { %v1186_v57 = vld [vmem:[%s1554_s22 + $0x38] sm:$0xf0]  ;;  %v1375_v58 = vld [vmem:[%s1554_s22 + $0xb4] sm:$0xf]  ;;  %v1249_v61 = vor.u32 %v1376_v55, %v1248_v54  ;;  %v1192_v0 = vld [vmem:[%s1554_s22 + $0x40] sm:$0xf] }
  0x1c   : > { %v1250_v59 = vld [vmem:[%s1554_s22 + $0xb8] sm:$0xf0]  ;;  %v1189_v62 = vor.u32 %v1359_v56, %v1186_v57  ;;  %v1362_v1 = vld [vmem:[%s1554_s22 + $0x44] sm:$0xf0]  ;;  %v1256_v2 = vld [vmem:[%s1554_s22 + $0xc0] sm:$0xf] }
  0x1d   : > { %659 = vmatpush.bf16.msra.mxu0 %v1388_v8  ;;  %1405 = vmatpush.bf16.msra.mxu2 %v1388_v8  ;;  %v1253_v63 = vor.u32 %v1375_v58, %v1250_v59  ;;  %v1378_v3 = vld [vmem:[%s1554_s22 + $0xc4] sm:$0xf0]  ;;  %v1361_v4 = vld [vmem:[%s1554_s22 + $0x44] sm:$0xf]  ;;  %v1194_v5 = vld [vmem:[%s1554_s22 + $0x48] sm:$0xf0]  ;;  %v1193_v8 = vor.u32 %v1362_v1, %v1192_v0 }
  0x1e   : > { %748 = vmatpush.bf16.msra.mxu1 %v1396_v9  ;;  %1413 = vmatpush.bf16.msra.mxu3 %v1396_v9  ;;  %v1377_v6 = vld [vmem:[%s1554_s22 + $0xc4] sm:$0xf]  ;;  %v1258_v7 = vld [vmem:[%s1554_s22 + $0xc8] sm:$0xf0]  ;;  %v1257_v9 = vor.u32 %v1378_v3, %v1256_v2  ;;  %v1363_v16 = vld [vmem:[%s1554_s22 + $0x54] sm:$0xf] }
  0x1f   : > { %v1202_v17 = vld [vmem:[%s1554_s22 + $0x58] sm:$0xf0]  ;;  %v1379_v18 = vld [vmem:[%s1554_s22 + $0xd4] sm:$0xf]  ;;  %v1365_v28 = vld [vmem:[%s1554_s22 + $0x64] sm:$0xf] }
  0x20   : > { %v1266_v19 = vld [vmem:[%s1554_s22 + $0xd8] sm:$0xf0]  ;;  %v1205_v22 = vor.u32 %v1363_v16, %v1202_v17  ;;  %v1210_v29 = vld [vmem:[%s1554_s22 + $0x68] sm:$0xf0]  ;;  %v1381_v30 = vld [vmem:[%s1554_s22 + $0xe4] sm:$0xf] }
  0x21   : > { %660 = vmatpush.bf16.msra.mxu0 %v1387_v10  ;;  %1406 = vmatpush.bf16.msra.mxu2 %v1387_v10  ;;  %v1197_v10 = vor.u32 %v1361_v4, %v1194_v5  ;;  %v1269_v23 = vor.u32 %v1379_v18, %v1266_v19  ;;  %v1274_v31 = vld [vmem:[%s1554_s22 + $0xe8] sm:$0xf0]  ;;  %v1213_v34 = vor.u32 %v1365_v28, %v1210_v29  ;;  %v1367_v40 = vld [vmem:[%s1554_s22 + $0x74] sm:$0xf]  ;;  %v1218_v41 = vld [vmem:[%s1554_s22 + $0x78] sm:$0xf0] }
  0x22   : > { %749 = vmatpush.bf16.msra.mxu1 %v1395_v11  ;;  %1414 = vmatpush.bf16.msra.mxu3 %v1395_v11  ;;  %v1261_v11 = vor.u32 %v1377_v6, %v1258_v7  ;;  %v1277_v35 = vor.u32 %v1381_v30, %v1274_v31  ;;  %v1383_v42 = vld [vmem:[%s1554_s22 + $0xf4] sm:$0xf]  ;;  %v1282_v43 = vld [vmem:[%s1554_s22 + $0xf8] sm:$0xf0]  ;;  %v1221_v46 = vor.u32 %v1367_v40, %v1218_v41 }
  0x23   : > { %v1285_v47 = vor.u32 %v1383_v42, %v1282_v43 }
  0x25   : > { %661 = vmatpush.bf16.msra.mxu0 %v1386_v12  ;;  %1407 = vmatpush.bf16.msra.mxu2 %v1386_v12  ;;  %v1200_v12 = vld [vmem:[%s1554_s22 + $0x50] sm:$0xf] }
  0x26   : > { %750 = vmatpush.bf16.msra.mxu1 %v1394_v13  ;;  %1415 = vmatpush.bf16.msra.mxu3 %v1394_v13  ;;  %v1364_v13 = vld [vmem:[%s1554_s22 + $0x54] sm:$0xf0] }
  0x27   : > { %v1201_v20 = vor.u32 %v1364_v13, %v1200_v12 }
  0x29   : > { %662 = vmatpush.bf16.msra.mxu0 %v1385_v14  ;;  %1408 = vmatpush.bf16.msra.mxu2 %v1385_v14  ;;  %v1264_v14 = vld [vmem:[%s1554_s22 + $0xd0] sm:$0xf] }
  0x2a   : > { %751 = vmatpush.bf16.msra.mxu1 %v1393_v15  ;;  %1416 = vmatpush.bf16.msra.mxu3 %v1393_v15  ;;  %v1380_v15 = vld [vmem:[%s1554_s22 + $0xd4] sm:$0xf0] }
  0x2b   : > { %v1265_v21 = vor.u32 %v1380_v15, %v1264_v14 }
  0x2c   : > { %663 = vmatmul.bf16.vlgmr.msra.gmra.mxu0 %v1161_v24  ;;  %703 = vmatmul.bf16.vlgmr.msra.gmra.mxu2 %v1225_v25  ;;  %v1208_v24 = vld [vmem:[%s1554_s22 + $0x60] sm:$0xf]  ;;  %v1366_v25 = vld [vmem:[%s1554_s22 + $0x64] sm:$0xf0] }
  0x2d   : > { %752 = vmatmul.bf16.vlgmr.msra.gmra.mxu1 %v1165_v26  ;;  %792 = vmatmul.bf16.vlgmr.msra.gmra.mxu3 %v1229_v27  ;;  %v1272_v26 = vld [vmem:[%s1554_s22 + $0xe0] sm:$0xf]  ;;  %v1382_v27 = vld [vmem:[%s1554_s22 + $0xe4] sm:$0xf0]  ;;  %v1209_v32 = vor.u32 %v1366_v25, %v1208_v24 }
  0x2e   : > { %v1273_v33 = vor.u32 %v1382_v27, %v1272_v26 }
  0x3c   : > { %668 = vmatmul.bf16.gmra.mxu0 %v1169_v36  ;;  %708 = vmatmul.bf16.gmra.mxu2 %v1233_v37  ;;  %v1216_v36 = vld [vmem:[%s1554_s22 + $0x70] sm:$0xf]  ;;  %v1368_v37 = vld [vmem:[%s1554_s22 + $0x74] sm:$0xf0] }
  0x3d   : > { %757 = vmatmul.bf16.gmra.mxu1 %v1173_v38  ;;  %797 = vmatmul.bf16.gmra.mxu3 %v1237_v39  ;;  %v1280_v38 = vld [vmem:[%s1554_s22 + $0xf0] sm:$0xf]  ;;  %v1384_v39 = vld [vmem:[%s1554_s22 + $0xf4] sm:$0xf0]  ;;  %v1217_v44 = vor.u32 %v1368_v37, %v1216_v36 }
  0x3e   : > { %v1281_v45 = vor.u32 %v1384_v39, %v1280_v38 }
  0x4c   : > { %673 = vmatmul.bf16.gmra.mxu0 %v1177_v48  ;;  %713 = vmatmul.bf16.gmra.mxu2 %v1241_v49  ;;  %v1632_v49 = vld [vmem:[%s1716_s2] ss:$0 sm:$0xff] }
  0x4d   : > { %762 = vmatmul.bf16.gmra.mxu1 %v1181_v50  ;;  %802 = vmatmul.bf16.gmra.mxu3 %v1245_v51 }
  0x5c   : > { %678 = vmatmul.bf16.gmra.mxu0 %v1185_v60  ;;  %718 = vmatmul.bf16.gmra.mxu2 %v1249_v61 }
  0x5d   : > { %767 = vmatmul.bf16.gmra.mxu1 %v1189_v62  ;;  %807 = vmatmul.bf16.gmra.mxu3 %v1253_v63 }
  0x6c   : > { %683 = vmatmul.bf16.gmra.mxu0 %v1193_v8  ;;  %723 = vmatmul.bf16.gmra.mxu2 %v1257_v9 }
  0x6d   : > { %772 = vmatmul.bf16.gmra.mxu1 %v1197_v10  ;;  %812 = vmatmul.bf16.gmra.mxu3 %v1261_v11 }
  0x7c   : > { %688 = vmatmul.bf16.gmra.mxu0 %v1201_v20  ;;  %728 = vmatmul.bf16.gmra.mxu2 %v1265_v21 }
  0x7d   : > { %777 = vmatmul.bf16.gmra.mxu1 %v1205_v22  ;;  %817 = vmatmul.bf16.gmra.mxu3 %v1269_v23 }
  0x8c   : > { %693 = vmatmul.bf16.gmra.mxu0 %v1209_v32  ;;  %733 = vmatmul.bf16.gmra.mxu2 %v1273_v33 }
  0x8d   : > { %782 = vmatmul.bf16.gmra.mxu1 %v1213_v34  ;;  %822 = vmatmul.bf16.gmra.mxu3 %v1277_v35 }
  0x9c   : > { %698 = vmatmul.bf16.gmra.mxu0 %v1217_v44  ;;  %738 = vmatmul.bf16.gmra.mxu2 %v1281_v45 }
  0x9d   : > { %787 = vmatmul.bf16.gmra.mxu1 %v1221_v46  ;;  %827 = vmatmul.bf16.gmra.mxu3 %v1285_v47 }
  0xa9   : > { %v664_v48 = vpop.f32.mrf.mxu0 }
  0xaa   : > { %v753_v50 = vpop.f32.mrf.mxu1 }
  0xab   : > { %v754_v51 = vadd.f32 %v753_v50, %v664_v48 }
  0xad   : > { %v936_v52 = vadd.f32 %v1632_v49, %v754_v51 }
  0xaf   : > { %v968_v53 = vmax.f32 %v936_v52, 0.0  ;;  %v704_v54 = vpop.f32.mrf.mxu2 }
  0xb0   : > { %v793_v55 = vpop.f32.mrf.mxu3 }
  0xb1   : > { %1000 = vst [vmem:[%s1640_s7] sm:$0xff] %v968_v53  ;;  %v794_v56 = vadd.f32 %v793_v55, %v704_v54  ;;  %v666_v57 = vpop.f32.mrf.mxu0 }
  0xb2   : > { %v755_v58 = vpop.f32.mrf.mxu1 }
  0xb3   : > { %v952_v59 = vadd.f32 %v1632_v49, %v794_v56  ;;  %v756_v60 = vadd.f32 %v755_v58, %v666_v57 }
  0xb5   : > { %v984_v61 = vmax.f32 %v952_v59, 0.0  ;;  %v937_v62 = vadd.f32 %v1632_v49, %v756_v60 }
  0xb7   : > { %1016 = vst [vmem:[%s1640_s7 + $0x80] sm:$0xff] %v984_v61  ;;  %v969_v63 = vmax.f32 %v937_v62, 0.0  ;;  %v706_v0 = vpop.f32.mrf.mxu2 }
  0xb8   : > { %v795_v1 = vpop.f32.mrf.mxu3 }
  0xb9   : > { %1001 = vst [vmem:[%s1640_s7 + $0x8] sm:$0xff] %v969_v63  ;;  %v796_v2 = vadd.f32 %v795_v1, %v706_v0  ;;  %v669_v3 = vpop.f32.mrf.mxu0 }
  0xba   : > { %v758_v4 = vpop.f32.mrf.mxu1 }
  0xbb   : > { %v953_v5 = vadd.f32 %v1632_v49, %v796_v2  ;;  %v759_v6 = vadd.f32 %v758_v4, %v669_v3 }
  0xbd   : > { %v985_v7 = vmax.f32 %v953_v5, 0.0  ;;  %v938_v8 = vadd.f32 %v1632_v49, %v759_v6 }
  0xbf   : > { %1017 = vst [vmem:[%s1640_s7 + $0x88] sm:$0xff] %v985_v7  ;;  %v970_v9 = vmax.f32 %v938_v8, 0.0  ;;  %v709_v10 = vpop.f32.mrf.mxu2 }
  0xc0   : > { %v798_v11 = vpop.f32.mrf.mxu3 }
  0xc1   : > { %1002 = vst [vmem:[%s1640_s7 + $0x10] sm:$0xff] %v970_v9  ;;  %v799_v12 = vadd.f32 %v798_v11, %v709_v10  ;;  %v671_v13 = vpop.f32.mrf.mxu0 }
  0xc2   : > { %v760_v14 = vpop.f32.mrf.mxu1 }
  0xc3   : > { %v954_v15 = vadd.f32 %v1632_v49, %v799_v12  ;;  %v761_v16 = vadd.f32 %v760_v14, %v671_v13 }
  0xc5   : > { %v986_v17 = vmax.f32 %v954_v15, 0.0  ;;  %v939_v18 = vadd.f32 %v1632_v49, %v761_v16 }
  0xc7   : > { %1018 = vst [vmem:[%s1640_s7 + $0x90] sm:$0xff] %v986_v17  ;;  %v971_v19 = vmax.f32 %v939_v18, 0.0  ;;  %v711_v20 = vpop.f32.mrf.mxu2 }
  0xc8   : > { %v800_v21 = vpop.f32.mrf.mxu3 }
  0xc9   : > { %1003 = vst [vmem:[%s1640_s7 + $0x18] sm:$0xff] %v971_v19  ;;  %v801_v22 = vadd.f32 %v800_v21, %v711_v20  ;;  %v674_v23 = vpop.f32.mrf.mxu0 }
  0xca   : > { %v763_v24 = vpop.f32.mrf.mxu1 }
  0xcb   : > { %v955_v25 = vadd.f32 %v1632_v49, %v801_v22  ;;  %v764_v26 = vadd.f32 %v763_v24, %v674_v23 }
  0xcd   : > { %v987_v27 = vmax.f32 %v955_v25, 0.0  ;;  %v940_v28 = vadd.f32 %v1632_v49, %v764_v26 }
  0xcf   : > { %1019 = vst [vmem:[%s1640_s7 + $0x98] sm:$0xff] %v987_v27  ;;  %v972_v29 = vmax.f32 %v940_v28, 0.0  ;;  %v714_v30 = vpop.f32.mrf.mxu2 }
  0xd0   : > { %v803_v31 = vpop.f32.mrf.mxu3 }
  0xd1   : > { %1004 = vst [vmem:[%s1640_s7 + $0x20] sm:$0xff] %v972_v29  ;;  %v804_v32 = vadd.f32 %v803_v31, %v714_v30  ;;  %v676_v33 = vpop.f32.mrf.mxu0 }
  0xd2   : > { %v765_v34 = vpop.f32.mrf.mxu1 }
  0xd3   : > { %v956_v35 = vadd.f32 %v1632_v49, %v804_v32  ;;  %v766_v36 = vadd.f32 %v765_v34, %v676_v33 }
  0xd5   : > { %v988_v37 = vmax.f32 %v956_v35, 0.0  ;;  %v941_v38 = vadd.f32 %v1632_v49, %v766_v36 }
  0xd7   : > { %1020 = vst [vmem:[%s1640_s7 + $0xa0] sm:$0xff] %v988_v37  ;;  %v973_v39 = vmax.f32 %v941_v38, 0.0  ;;  %v716_v40 = vpop.f32.mrf.mxu2 }
  0xd8   : > { %v805_v41 = vpop.f32.mrf.mxu3 }
  0xd9   : > { %1005 = vst [vmem:[%s1640_s7 + $0x28] sm:$0xff] %v973_v39  ;;  %v806_v42 = vadd.f32 %v805_v41, %v716_v40  ;;  %v679_v43 = vpop.f32.mrf.mxu0 }
  0xda   : > { %v768_v44 = vpop.f32.mrf.mxu1 }
  0xdb   : > { %v957_v45 = vadd.f32 %v1632_v49, %v806_v42  ;;  %v769_v46 = vadd.f32 %v768_v44, %v679_v43 }
  0xdd   : > { %v989_v47 = vmax.f32 %v957_v45, 0.0  ;;  %v942_v48 = vadd.f32 %v1632_v49, %v769_v46 }
  0xdf   : > { %1021 = vst [vmem:[%s1640_s7 + $0xa8] sm:$0xff] %v989_v47  ;;  %v974_v50 = vmax.f32 %v942_v48, 0.0  ;;  %v719_v51 = vpop.f32.mrf.mxu2 }
  0xe0   : > { %v808_v52 = vpop.f32.mrf.mxu3 }
  0xe1   : > { %1006 = vst [vmem:[%s1640_s7 + $0x30] sm:$0xff] %v974_v50  ;;  %v809_v53 = vadd.f32 %v808_v52, %v719_v51  ;;  %v681_v54 = vpop.f32.mrf.mxu0 }
  0xe2   : > { %v770_v55 = vpop.f32.mrf.mxu1 }
  0xe3   : > { %v958_v56 = vadd.f32 %v1632_v49, %v809_v53  ;;  %v771_v57 = vadd.f32 %v770_v55, %v681_v54 }
  0xe5   : > { %v990_v58 = vmax.f32 %v958_v56, 0.0  ;;  %v943_v59 = vadd.f32 %v1632_v49, %v771_v57 }
  0xe7   : > { %1022 = vst [vmem:[%s1640_s7 + $0xb0] sm:$0xff] %v990_v58  ;;  %v975_v60 = vmax.f32 %v943_v59, 0.0  ;;  %v721_v61 = vpop.f32.mrf.mxu2 }
  0xe8   : > { %v810_v62 = vpop.f32.mrf.mxu3 }
  0xe9   : > { %1007 = vst [vmem:[%s1640_s7 + $0x38] sm:$0xff] %v975_v60  ;;  %v811_v63 = vadd.f32 %v810_v62, %v721_v61  ;;  %v684_v0 = vpop.f32.mrf.mxu0 }
  0xea   : > { %v773_v1 = vpop.f32.mrf.mxu1 }
  0xeb   : > { %v959_v2 = vadd.f32 %v1632_v49, %v811_v63  ;;  %v774_v3 = vadd.f32 %v773_v1, %v684_v0 }
  0xed   : > { %v991_v4 = vmax.f32 %v959_v2, 0.0  ;;  %v944_v5 = vadd.f32 %v1632_v49, %v774_v3 }
  0xef   : > { %1023 = vst [vmem:[%s1640_s7 + $0xb8] sm:$0xff] %v991_v4  ;;  %v976_v6 = vmax.f32 %v944_v5, 0.0  ;;  %v724_v7 = vpop.f32.mrf.mxu2 }
  0xf0   : > { %v813_v8 = vpop.f32.mrf.mxu3 }
  0xf1   : > { %1008 = vst [vmem:[%s1640_s7 + $0x40] sm:$0xff] %v976_v6  ;;  %v814_v9 = vadd.f32 %v813_v8, %v724_v7  ;;  %v686_v10 = vpop.f32.mrf.mxu0 }
  0xf2   : > { %v775_v11 = vpop.f32.mrf.mxu1 }
  0xf3   : > { %v960_v12 = vadd.f32 %v1632_v49, %v814_v9  ;;  %v776_v13 = vadd.f32 %v775_v11, %v686_v10 }
  0xf5   : > { %v992_v14 = vmax.f32 %v960_v12, 0.0  ;;  %v945_v15 = vadd.f32 %v1632_v49, %v776_v13 }
  0xf7   : > { %1024 = vst [vmem:[%s1640_s7 + $0xc0] sm:$0xff] %v992_v14  ;;  %v977_v16 = vmax.f32 %v945_v15, 0.0  ;;  %v726_v17 = vpop.f32.mrf.mxu2 }
  0xf8   : > { %v815_v18 = vpop.f32.mrf.mxu3 }
  0xf9   : > { %1009 = vst [vmem:[%s1640_s7 + $0x48] sm:$0xff] %v977_v16  ;;  %v816_v19 = vadd.f32 %v815_v18, %v726_v17  ;;  %v689_v20 = vpop.f32.mrf.mxu0 }
  0xfa   : > { %v778_v21 = vpop.f32.mrf.mxu1 }
  0xfb   : > { %v961_v22 = vadd.f32 %v1632_v49, %v816_v19  ;;  %v779_v23 = vadd.f32 %v778_v21, %v689_v20 }
  0xfd   : > { %v993_v24 = vmax.f32 %v961_v22, 0.0  ;;  %v946_v25 = vadd.f32 %v1632_v49, %v779_v23 }
  0xff   : > { %1025 = vst [vmem:[%s1640_s7 + $0xc8] sm:$0xff] %v993_v24  ;;  %v978_v26 = vmax.f32 %v946_v25, 0.0  ;;  %v729_v27 = vpop.f32.mrf.mxu2 }
 0x100   : > { %v818_v28 = vpop.f32.mrf.mxu3 }
 0x101   : > { %1010 = vst [vmem:[%s1640_s7 + $0x50] sm:$0xff] %v978_v26  ;;  %v819_v29 = vadd.f32 %v818_v28, %v729_v27  ;;  %v691_v30 = vpop.f32.mrf.mxu0 }
 0x102   : > { %v780_v31 = vpop.f32.mrf.mxu1 }
 0x103   : > { %v962_v32 = vadd.f32 %v1632_v49, %v819_v29  ;;  %v781_v33 = vadd.f32 %v780_v31, %v691_v30 }
 0x105   : > { %v994_v34 = vmax.f32 %v962_v32, 0.0  ;;  %v947_v35 = vadd.f32 %v1632_v49, %v781_v33 }
 0x107   : > { %1026 = vst [vmem:[%s1640_s7 + $0xd0] sm:$0xff] %v994_v34  ;;  %v979_v36 = vmax.f32 %v947_v35, 0.0  ;;  %v731_v37 = vpop.f32.mrf.mxu2 }
 0x108   : > { %v820_v38 = vpop.f32.mrf.mxu3 }
 0x109   : > { %1011 = vst [vmem:[%s1640_s7 + $0x58] sm:$0xff] %v979_v36  ;;  %v821_v39 = vadd.f32 %v820_v38, %v731_v37  ;;  %v694_v40 = vpop.f32.mrf.mxu0 }
 0x10a   : > { %v783_v41 = vpop.f32.mrf.mxu1 }
 0x10b   : > { %v963_v42 = vadd.f32 %v1632_v49, %v821_v39  ;;  %v784_v43 = vadd.f32 %v783_v41, %v694_v40 }
 0x10d   : > { %v995_v44 = vmax.f32 %v963_v42, 0.0  ;;  %v948_v45 = vadd.f32 %v1632_v49, %v784_v43 }
 0x10f   : > { %1027 = vst [vmem:[%s1640_s7 + $0xd8] sm:$0xff] %v995_v44  ;;  %v980_v46 = vmax.f32 %v948_v45, 0.0  ;;  %v734_v47 = vpop.f32.mrf.mxu2 }
 0x110   : > { %v823_v48 = vpop.f32.mrf.mxu3 }
 0x111   : > { %1012 = vst [vmem:[%s1640_s7 + $0x60] sm:$0xff] %v980_v46  ;;  %v824_v50 = vadd.f32 %v823_v48, %v734_v47  ;;  %v696_v51 = vpop.f32.mrf.mxu0 }
 0x112   : > { %v785_v52 = vpop.f32.mrf.mxu1 }
 0x113   : > { %v964_v53 = vadd.f32 %v1632_v49, %v824_v50  ;;  %v786_v54 = vadd.f32 %v785_v52, %v696_v51 }
 0x115   : > { %v996_v55 = vmax.f32 %v964_v53, 0.0  ;;  %v949_v56 = vadd.f32 %v1632_v49, %v786_v54 }
 0x117   : > { %1028 = vst [vmem:[%s1640_s7 + $0xe0] sm:$0xff] %v996_v55  ;;  %v981_v57 = vmax.f32 %v949_v56, 0.0  ;;  %v736_v58 = vpop.f32.mrf.mxu2 }
 0x118   : > { %v825_v59 = vpop.f32.mrf.mxu3 }
 0x119   : > { %1013 = vst [vmem:[%s1640_s7 + $0x68] sm:$0xff] %v981_v57  ;;  %v826_v60 = vadd.f32 %v825_v59, %v736_v58  ;;  %v699_v61 = vpop.f32.mrf.mxu0 }
 0x11a   : > { %v788_v62 = vpop.f32.mrf.mxu1 }
 0x11b   : > { %v965_v63 = vadd.f32 %v1632_v49, %v826_v60  ;;  %v789_v0 = vadd.f32 %v788_v62, %v699_v61 }
 0x11d   : > { %v997_v1 = vmax.f32 %v965_v63, 0.0  ;;  %v950_v2 = vadd.f32 %v1632_v49, %v789_v0 }
 0x11f   : > { %1029 = vst [vmem:[%s1640_s7 + $0xe8] sm:$0xff] %v997_v1  ;;  %v982_v3 = vmax.f32 %v950_v2, 0.0  ;;  %v739_v4 = vpop.f32.mrf.mxu2 }
 0x120   : > { %v828_v5 = vpop.f32.mrf.mxu3 }
 0x121   : > { %1014 = vst [vmem:[%s1640_s7 + $0x70] sm:$0xff] %v982_v3  ;;  %v829_v6 = vadd.f32 %v828_v5, %v739_v4  ;;  %v701_v7 = vpop.f32.mrf.mxu0 }
 0x122   : > { %v790_v8 = vpop.f32.mrf.mxu1 }
 0x123   : > { %v966_v9 = vadd.f32 %v1632_v49, %v829_v6  ;;  %v791_v10 = vadd.f32 %v790_v8, %v701_v7 }
 0x125   : > { %v998_v11 = vmax.f32 %v966_v9, 0.0  ;;  %v951_v12 = vadd.f32 %v1632_v49, %v791_v10 }
 0x127   : > { %1030 = vst [vmem:[%s1640_s7 + $0xf0] sm:$0xff] %v998_v11  ;;  %v983_v13 = vmax.f32 %v951_v12, 0.0  ;;  %v741_v14 = vpop.f32.mrf.mxu2 }
 0x128   : > { %v830_v15 = vpop.f32.mrf.mxu3 }
 0x129   : > { %1015 = vst [vmem:[%s1640_s7 + $0x78] sm:$0xff] %v983_v13  ;;  %v831_v16 = vadd.f32 %v830_v15, %v741_v14 }
 0x12b   : > { %v967_v17 = vadd.f32 %v1632_v49, %v831_v16 }
 0x12d   : > { %v999_v18 = vmax.f32 %v967_v17, 0.0 }
 0x12f   : > { %1031 = vst [vmem:[%s1640_s7 + $0xf8] sm:$0xff] %v999_v18 }
 0x130 PF: > { %s13_s14 = sadd.s32 1, %s1464_s14   ;;  %s1718_s12 = smov %s1460_s13 }
 0x131   : > { %p10_p5 = scmp.ge.s32.totalorder %s13_s14, 6   ;;  %s1719_s13 = smov %s1721_s15 }
 0x133   :  { %12 = sbr.rel (!%p10_p5) target bundleno = 2 (0x2), region = 76 }

// kernel: run.14
= control target key start
LH: loop header
LB: loop body
LE: loop exit
PB: predicated region body
PF: predicated region fallthrough
CT: control target
= control target key end

     0   :  { %s2050_s1 = inlined_call_operand.vmem [shape: bf16[384,128], index: 1, kind: input, shape index: {}]   ;;  %s2051_s0 = inlined_call_operand.vmem [shape: bf16[256,384], index: 0, kind: input, shape index: {}]   ;;  %s2052_s2 = inlined_call_operand.vmem [shape: f32[1,128], index: 2, kind: input, shape index: {}]   ;;  %s2053_s3 = inlined_call_operand.vmem [shape: f32[256,128], index: 3, kind: output, shape index: {}]  }
   0x1   :  { %v1407_v0 = vld [vmem:[%s2050_s1 + $0x38] sm:$0xff]  ;;  %v1406_v3 = vld [vmem:[%s2050_s1 + $0x30] sm:$0xff]  ;;  %v1405_v6 = vld [vmem:[%s2050_s1 + $0x28] sm:$0xff] }
   0x2   :  { %v1475_v1 = vld [vmem:[%s2050_s1 + $0x78] sm:$0xff]  ;;  %594 = vmatpush.bf16.msra.mxu0 %v1407_v0  ;;  %1424 = vmatpush.bf16.msra.mxu3 %v1407_v0  ;;  %v1490_v4 = vld [vmem:[%s2050_s1 + $0x70] sm:$0xff]  ;;  %v1413_v7 = vld [vmem:[%s2050_s1 + $0x68] sm:$0xff] }
   0x3   :  { %v1480_v2 = vld [vmem:[%s2050_s1 + $0xb8] sm:$0xff]  ;;  %683 = vmatpush.bf16.msra.mxu1 %v1475_v1  ;;  %v1495_v5 = vld [vmem:[%s2050_s1 + $0xb0] sm:$0xff]  ;;  %v1508_v8 = vld [vmem:[%s2050_s1 + $0xa8] sm:$0xff] }
   0x4   :  { %772 = vmatpush.bf16.msra.mxu2 %v1480_v2  ;;  %v1404_v9 = vld [vmem:[%s2050_s1 + $0x20] sm:$0xff]  ;;  %v1403_v12 = vld [vmem:[%s2050_s1 + $0x18] sm:$0xff]  ;;  %v1402_v15 = vld [vmem:[%s2050_s1 + $0x10] sm:$0xff] }
   0x5   :  { %v1412_v10 = vld [vmem:[%s2050_s1 + $0x60] sm:$0xff]  ;;  %v1411_v13 = vld [vmem:[%s2050_s1 + $0x58] sm:$0xff]  ;;  %v1410_v16 = vld [vmem:[%s2050_s1 + $0x50] sm:$0xff] }
   0x6   :  { %595 = vmatpush.bf16.msra.mxu0 %v1406_v3  ;;  %1425 = vmatpush.bf16.msra.mxu3 %v1406_v3  ;;  %v1520_v11 = vld [vmem:[%s2050_s1 + $0xa0] sm:$0xff]  ;;  %v1532_v14 = vld [vmem:[%s2050_s1 + $0x98] sm:$0xff]  ;;  %v1544_v17 = vld [vmem:[%s2050_s1 + $0x90] sm:$0xff] }
   0x7   :  { %684 = vmatpush.bf16.msra.mxu1 %v1490_v4  ;;  %v1401_v18 = vld [vmem:[%s2050_s1 + $0x8] sm:$0xff]  ;;  %v1400_v21 = vld [vmem:[%s2050_s1] sm:$0xff]  ;;  %v1068_v29 = vld [vmem:[%s2051_s0 + $0xc] sm:$0xf0] }
   0x8   :  { %773 = vmatpush.bf16.msra.mxu2 %v1495_v5  ;;  %v1409_v19 = vld [vmem:[%s2050_s1 + $0x48] sm:$0xff]  ;;  %v1408_v22 = vld [vmem:[%s2050_s1 + $0x40] sm:$0xff]  ;;  %v1354_v31 = vld [vmem:[%s2051_s0 + $0x10] sm:$0xf0] }
   0x9   :  { %v1556_v20 = vld [vmem:[%s2050_s1 + $0x88] sm:$0xff]  ;;  %v1567_v23 = vld [vmem:[%s2050_s1 + $0x80] sm:$0xff]  ;;  %v1078_v36 = vld [vmem:[%s2051_s0 + $0x18] sm:$0xf] }
   0xa   :  { %596 = vmatpush.bf16.msra.mxu0 %v1405_v6  ;;  %1426 = vmatpush.bf16.msra.mxu3 %v1405_v6  ;;  %v1066_v24 = vld [vmem:[%s2051_s0] sm:$0xf]  ;;  %v1353_v25 = vld [vmem:[%s2051_s0 + $0x8] sm:$0xf0]  ;;  %v1352_v28 = vld [vmem:[%s2051_s0 + $0x4] sm:$0xf] }
   0xb   :  { %685 = vmatpush.bf16.msra.mxu1 %v1413_v7  ;;  %v1210_v26 = vld [vmem:[%s2051_s0 + $0x120] sm:$0xf]  ;;  %v1389_v27 = vld [vmem:[%s2051_s0 + $0x128] sm:$0xf0]  ;;  %v1074_v30 = vld [vmem:[%s2051_s0 + $0x8] sm:$0xf]  ;;  %v1067_v32 = vor.u32 %v1353_v25, %v1066_v24  ;;  %v1071_v34 = vor.u32 %v1352_v28, %v1068_v29 }
   0xc   :  { %774 = vmatpush.bf16.msra.mxu2 %v1508_v8  ;;  %v1211_v33 = vor.u32 %v1389_v27, %v1210_v26  ;;  %v1075_v35 = vor.u32 %v1354_v31, %v1074_v30  ;;  %v1356_v37 = vld [vmem:[%s2051_s0 + $0x20] sm:$0xf0]  ;;  %v1222_v38 = vld [vmem:[%s2051_s0 + $0x138] sm:$0xf]  ;;  %v1355_v40 = vld [vmem:[%s2051_s0 + $0x1c] sm:$0xf] }
   0xd   :  { %v1392_v39 = vld [vmem:[%s2051_s0 + $0x140] sm:$0xf0]  ;;  %v1080_v41 = vld [vmem:[%s2051_s0 + $0x24] sm:$0xf0]  ;;  %v1086_v42 = vld [vmem:[%s2051_s0 + $0x20] sm:$0xf]  ;;  %v1079_v44 = vor.u32 %v1356_v37, %v1078_v36 }
   0xe   :  { %597 = vmatpush.bf16.msra.mxu0 %v1404_v9  ;;  %1427 = vmatpush.bf16.msra.mxu3 %v1404_v9  ;;  %v1357_v43 = vld [vmem:[%s2051_s0 + $0x28] sm:$0xf0]  ;;  %v1223_v45 = vor.u32 %v1392_v39, %v1222_v38  ;;  %v1083_v46 = vor.u32 %v1355_v40, %v1080_v41  ;;  %v1090_v48 = vld [vmem:[%s2051_s0 + $0x30] sm:$0xf]  ;;  %v1359_v49 = vld [vmem:[%s2051_s0 + $0x38] sm:$0xf0] }
   0xf   :  { %686 = vmatpush.bf16.msra.mxu1 %v1412_v10  ;;  %v1087_v47 = vor.u32 %v1357_v43, %v1086_v42  ;;  %v1234_v50 = vld [vmem:[%s2051_s0 + $0x150] sm:$0xf]  ;;  %v1395_v51 = vld [vmem:[%s2051_s0 + $0x158] sm:$0xf0]  ;;  %v1358_v52 = vld [vmem:[%s2051_s0 + $0x34] sm:$0xf]  ;;  %v1091_v56 = vor.u32 %v1359_v49, %v1090_v48 }
  0x10   :  { %775 = vmatpush.bf16.msra.mxu2 %v1520_v11  ;;  %v1092_v53 = vld [vmem:[%s2051_s0 + $0x3c] sm:$0xf0]  ;;  %v1098_v54 = vld [vmem:[%s2051_s0 + $0x38] sm:$0xf]  ;;  %v1360_v55 = vld [vmem:[%s2051_s0 + $0x40] sm:$0xf0]  ;;  %v1235_v57 = vor.u32 %v1395_v51, %v1234_v50 }
  0x11   :  { %v1095_v58 = vor.u32 %v1358_v52, %v1092_v53  ;;  %v1099_v59 = vor.u32 %v1360_v55, %v1098_v54  ;;  %v1102_v60 = vld [vmem:[%s2051_s0 + $0x48] sm:$0xf]  ;;  %v1362_v61 = vld [vmem:[%s2051_s0 + $0x50] sm:$0xf0]  ;;  %v1361_v0 = vld [vmem:[%s2051_s0 + $0x4c] sm:$0xf] }
  0x12   :  { %598 = vmatpush.bf16.msra.mxu0 %v1403_v12  ;;  %1428 = vmatpush.bf16.msra.mxu3 %v1403_v12  ;;  %v1246_v62 = vld [vmem:[%s2051_s0 + $0x168] sm:$0xf]  ;;  %v1398_v63 = vld [vmem:[%s2051_s0 + $0x170] sm:$0xf0]  ;;  %v1363_v3 = vld [vmem:[%s2051_s0 + $0x58] sm:$0xf0] }
  0x13   :  { %687 = vmatpush.bf16.msra.mxu1 %v1411_v13  ;;  %v1365_v9 = vld [vmem:[%s2051_s0 + $0x68] sm:$0xf0]  ;;  %v1212_v12 = vld [vmem:[%s2051_s0 + $0x12c] sm:$0xf0]  ;;  %v1224_v24 = vld [vmem:[%s2051_s0 + $0x144] sm:$0xf0] }
  0x14   :  { %776 = vmatpush.bf16.msra.mxu2 %v1532_v14  ;;  %v1128_v25 = vld [vmem:[%s2051_s0 + $0x84] sm:$0xf0]  ;;  %v1134_v26 = vld [vmem:[%s2051_s0 + $0x80] sm:$0xf]  ;;  %v1369_v27 = vld [vmem:[%s2051_s0 + $0x88] sm:$0xf0] }
  0x15   :  { %v1135_v31 = vor.u32 %v1369_v27, %v1134_v26  ;;  %v1236_v36 = vld [vmem:[%s2051_s0 + $0x15c] sm:$0xf0]  ;;  %v1146_v38 = vld [vmem:[%s2051_s0 + $0x98] sm:$0xf]  ;;  %v1372_v39 = vld [vmem:[%s2051_s0 + $0xa0] sm:$0xf0] }
  0x16   :  { %599 = vmatpush.bf16.msra.mxu0 %v1402_v15  ;;  %1429 = vmatpush.bf16.msra.mxu3 %v1402_v15  ;;  %v1366_v15 = vld [vmem:[%s2051_s0 + $0x70] sm:$0xf0]  ;;  %v1140_v37 = vld [vmem:[%s2051_s0 + $0x9c] sm:$0xf0]  ;;  %v1147_v43 = vor.u32 %v1372_v39, %v1146_v38  ;;  %v1248_v48 = vld [vmem:[%s2051_s0 + $0x174] sm:$0xf0] }
  0x17   :  { %688 = vmatpush.bf16.msra.mxu1 %v1410_v16  ;;  %v1152_v49 = vld [vmem:[%s2051_s0 + $0xb4] sm:$0xf0]  ;;  %v1158_v50 = vld [vmem:[%s2051_s0 + $0xb0] sm:$0xf]  ;;  %v1375_v51 = vld [vmem:[%s2051_s0 + $0xb8] sm:$0xf0] }
  0x18   :  { %777 = vmatpush.bf16.msra.mxu2 %v1544_v17  ;;  %v1159_v55 = vor.u32 %v1375_v51, %v1158_v50  ;;  %v1384_v50 = vld [vmem:[%s2051_s0 + $0x100] sm:$0xf0] }
  0x1a   :  { %600 = vmatpush.bf16.msra.mxu0 %v1401_v18  ;;  %1430 = vmatpush.bf16.msra.mxu3 %v1401_v18 }
  0x1b   :  { %689 = vmatpush.bf16.msra.mxu1 %v1409_v19 }
  0x1c   :  { %778 = vmatpush.bf16.msra.mxu2 %v1556_v20 }
  0x1e   :  { %601 = vmatpush.bf16.msra.mxu0 %v1400_v21  ;;  %1431 = vmatpush.bf16.msra.mxu3 %v1400_v21  ;;  %v1368_v21 = vld [vmem:[%s2051_s0 + $0x80] sm:$0xf0] }
  0x1f   :  { %690 = vmatpush.bf16.msra.mxu1 %v1408_v22 }
  0x20   :  { %779 = vmatpush.bf16.msra.mxu2 %v1567_v23 }
  0x21   :  { %602 = vmatmul.bf16.vlgmr.msra.gmra.mxu0 %v1067_v32  ;;  %662 = vmatmul.bf16.vlgmr.msra.gmra.mxu3 %v1211_v33  ;;  %v1138_v32 = vld [vmem:[%s2051_s0 + $0x90] sm:$0xf]  ;;  %v1371_v33 = vld [vmem:[%s2051_s0 + $0x98] sm:$0xf0] }
  0x22   :  { %1432 = vmatpush.bf16.msrb.mxu3 %v1475_v1  ;;  %691 = vmatmul.bf16.vlgmr.msra.gmra.mxu1 %v1071_v34  ;;  %v1104_v1 = vld [vmem:[%s2051_s0 + $0x54] sm:$0xf0]  ;;  %v1370_v34 = vld [vmem:[%s2051_s0 + $0x94] sm:$0xf]  ;;  %v1139_v40 = vor.u32 %v1371_v33, %v1138_v32 }
  0x23   :  { %780 = vmatmul.bf16.vlgmr.msra.gmra.mxu2 %v1075_v35  ;;  %v1107_v6 = vor.u32 %v1361_v0, %v1104_v1  ;;  %v1394_v35 = vld [vmem:[%s2051_s0 + $0x154] sm:$0xf]  ;;  %v1143_v42 = vor.u32 %v1370_v34, %v1140_v37 }
  0x24   :  { %v1239_v41 = vor.u32 %v1394_v35, %v1236_v36 }
  0x26   :  { %1433 = vmatpush.bf16.msrb.mxu3 %v1490_v4  ;;  %v1103_v4 = vor.u32 %v1362_v61, %v1102_v60  ;;  %v1390_v60 = vld [vmem:[%s2051_s0 + $0x130] sm:$0xf0]  ;;  %v1164_v61 = vld [vmem:[%s2051_s0 + $0xcc] sm:$0xf0] }
  0x2a   :  { %1434 = vmatpush.bf16.msrb.mxu3 %v1413_v7 }
  0x2e   :  { %1435 = vmatpush.bf16.msrb.mxu3 %v1412_v10  ;;  %v1364_v10 = vld [vmem:[%s2051_s0 + $0x64] sm:$0xf] }
  0x31   :  { %607 = vmatmul.bf16.gmra.mxu0 %v1079_v44  ;;  %667 = vmatmul.bf16.gmra.mxu3 %v1223_v45  ;;  %v1150_v44 = vld [vmem:[%s2051_s0 + $0xa8] sm:$0xf]  ;;  %v1374_v45 = vld [vmem:[%s2051_s0 + $0xb0] sm:$0xf0] }
  0x32   :  { %1436 = vmatpush.bf16.msrb.mxu3 %v1411_v13  ;;  %696 = vmatmul.bf16.gmra.mxu1 %v1083_v46  ;;  %v1116_v13 = vld [vmem:[%s2051_s0 + $0x6c] sm:$0xf0]  ;;  %v1373_v46 = vld [vmem:[%s2051_s0 + $0xac] sm:$0xf]  ;;  %v1151_v52 = vor.u32 %v1374_v45, %v1150_v44  ;;  %v1382_v44 = vld [vmem:[%s2051_s0 + $0xf4] sm:$0xf] }
  0x33   :  { %785 = vmatmul.bf16.gmra.mxu2 %v1087_v47  ;;  %v1119_v18 = vor.u32 %v1364_v10, %v1116_v13  ;;  %v1397_v47 = vld [vmem:[%s2051_s0 + $0x16c] sm:$0xf]  ;;  %v1155_v54 = vor.u32 %v1373_v46, %v1152_v49  ;;  %v1242_v46 = vld [vmem:[%s2051_s0 + $0x158] sm:$0xf] }
  0x34   :  { %v1251_v53 = vor.u32 %v1397_v47, %v1248_v48  ;;  %v1396_v47 = vld [vmem:[%s2051_s0 + $0x160] sm:$0xf0]  ;;  %v1188_v48 = vld [vmem:[%s2051_s0 + $0xfc] sm:$0xf0]  ;;  %v1194_v49 = vld [vmem:[%s2051_s0 + $0xf8] sm:$0xf] }
  0x36   :  { %1437 = vmatpush.bf16.msrb.mxu3 %v1410_v16 }
  0x3a   :  { %1438 = vmatpush.bf16.msrb.mxu3 %v1409_v19 }
  0x3e   :  { %1439 = vmatpush.bf16.msrb.mxu3 %v1408_v22  ;;  %v1367_v22 = vld [vmem:[%s2051_s0 + $0x7c] sm:$0xf] }
  0x3f   :  { %v1131_v30 = vor.u32 %v1367_v22, %v1128_v25  ;;  %v1381_v22 = vld [vmem:[%s2051_s0 + $0xe8] sm:$0xf0] }
  0x41   :  { %612 = vmatmul.bf16.gmra.mxu0 %v1091_v56  ;;  %672 = vmatmul.bf16.gmra.mxu3 %v1235_v57  ;;  %v1162_v56 = vld [vmem:[%s2051_s0 + $0xc0] sm:$0xf]  ;;  %v1377_v57 = vld [vmem:[%s2051_s0 + $0xc8] sm:$0xf0] }
  0x42   :  { %1440 = vmatpush.bf16.msra.mxu3 %v1480_v2  ;;  %701 = vmatmul.bf16.gmra.mxu1 %v1095_v58  ;;  %v1110_v2 = vld [vmem:[%s2051_s0 + $0x50] sm:$0xf]  ;;  %v1376_v58 = vld [vmem:[%s2051_s0 + $0xc4] sm:$0xf]  ;;  %v1163_v0 = vor.u32 %v1377_v57, %v1162_v56 }
  0x43   :  { %790 = vmatmul.bf16.gmra.mxu2 %v1099_v59  ;;  %v1111_v7 = vor.u32 %v1363_v3, %v1110_v2  ;;  %v1218_v59 = vld [vmem:[%s2051_s0 + $0x128] sm:$0xf]  ;;  %v1167_v3 = vor.u32 %v1376_v58, %v1164_v61  ;;  %v1191_v58 = vor.u32 %v1382_v44, %v1188_v48 }
  0x44   :  { %v1219_v1 = vor.u32 %v1390_v60, %v1218_v59  ;;  %v1195_v59 = vor.u32 %v1384_v50, %v1194_v49 }
  0x46   :  { %1441 = vmatpush.bf16.msra.mxu3 %v1495_v5  ;;  %v1247_v5 = vor.u32 %v1398_v63, %v1246_v62  ;;  %v1170_v62 = vld [vmem:[%s2051_s0 + $0xc8] sm:$0xf]  ;;  %v1378_v63 = vld [vmem:[%s2051_s0 + $0xd0] sm:$0xf0] }
  0x4a   :  { %1442 = vmatpush.bf16.msra.mxu3 %v1508_v8  ;;  %v1114_v8 = vld [vmem:[%s2051_s0 + $0x60] sm:$0xf] }
  0x4b   :  { %v1115_v16 = vor.u32 %v1365_v9, %v1114_v8  ;;  %v1802_v8 = vld [vmem:[%s2052_s2] ss:$0 sm:$0xff] }
  0x4e   :  { %1443 = vmatpush.bf16.msra.mxu3 %v1520_v11  ;;  %v1388_v11 = vld [vmem:[%s2051_s0 + $0x124] sm:$0xf] }
  0x51   :  { %617 = vmatmul.bf16.gmra.mxu0 %v1103_v4  ;;  %677 = vmatmul.bf16.gmra.mxu3 %v1247_v5  ;;  %v1171_v4 = vor.u32 %v1378_v63, %v1170_v62 }
  0x52   :  { %1444 = vmatpush.bf16.msra.mxu3 %v1532_v14  ;;  %706 = vmatmul.bf16.gmra.mxu1 %v1107_v6  ;;  %v1122_v14 = vld [vmem:[%s2051_s0 + $0x68] sm:$0xf] }
  0x53   :  { %795 = vmatmul.bf16.gmra.mxu2 %v1111_v7  ;;  %v1123_v19 = vor.u32 %v1366_v15, %v1122_v14  ;;  %v1174_v14 = vld [vmem:[%s2051_s0 + $0xd8] sm:$0xf]  ;;  %v1380_v15 = vld [vmem:[%s2051_s0 + $0xe0] sm:$0xf0] }
  0x54   :  { %v1175_v26 = vor.u32 %v1380_v15, %v1174_v14  ;;  %v1200_v14 = vld [vmem:[%s2051_s0 + $0x114] sm:$0xf0]  ;;  %v1206_v15 = vld [vmem:[%s2051_s0 + $0x110] sm:$0xf] }
  0x56   :  { %1445 = vmatpush.bf16.msra.mxu3 %v1544_v17  ;;  %v1215_v17 = vor.u32 %v1388_v11, %v1212_v12 }
  0x5a   :  { %1446 = vmatpush.bf16.msra.mxu3 %v1556_v20  ;;  %v1126_v20 = vld [vmem:[%s2051_s0 + $0x78] sm:$0xf] }
  0x5b   :  { %v1127_v28 = vor.u32 %v1368_v21, %v1126_v20  ;;  %v1176_v20 = vld [vmem:[%s2051_s0 + $0xe4] sm:$0xf0]  ;;  %v1182_v21 = vld [vmem:[%s2051_s0 + $0xe0] sm:$0xf] }
  0x5e   :  { %1447 = vmatpush.bf16.msra.mxu3 %v1567_v23  ;;  %v1391_v23 = vld [vmem:[%s2051_s0 + $0x13c] sm:$0xf] }
  0x5f   :  { %v1227_v29 = vor.u32 %v1391_v23, %v1224_v24 }
  0x61   :  { %622 = vmatmul.bf16.gmra.mxu0 %v1115_v16  ;;  %751 = vmatmul.bf16.vlgmr.msrb.gmra.mxu3 %v1215_v17  ;;  %v1379_v16 = vld [vmem:[%s2051_s0 + $0xdc] sm:$0xf] }
  0x62   :  { %711 = vmatmul.bf16.gmra.mxu1 %v1119_v18  ;;  %v1230_v18 = vld [vmem:[%s2051_s0 + $0x140] sm:$0xf] }
  0x63   :  { %800 = vmatmul.bf16.gmra.mxu2 %v1123_v19  ;;  %v1393_v19 = vld [vmem:[%s2051_s0 + $0x148] sm:$0xf0] }
  0x64   :  { %v1231_v27 = vor.u32 %v1393_v19, %v1230_v18 }
  0x71   :  { %627 = vmatmul.bf16.gmra.mxu0 %v1127_v28  ;;  %756 = vmatmul.bf16.gmra.mxu3 %v1227_v29 }
  0x72   :  { %716 = vmatmul.bf16.gmra.mxu1 %v1131_v30  ;;  %v1179_v30 = vor.u32 %v1379_v16, %v1176_v20  ;;  %v1387_v16 = vld [vmem:[%s2051_s0 + $0x118] sm:$0xf0] }
  0x73   :  { %805 = vmatmul.bf16.gmra.mxu2 %v1135_v31  ;;  %v1183_v31 = vor.u32 %v1381_v22, %v1182_v21 }
  0x81   :  { %632 = vmatmul.bf16.gmra.mxu0 %v1139_v40  ;;  %761 = vmatmul.bf16.gmra.mxu3 %v1239_v41 }
  0x82   :  { %721 = vmatmul.bf16.gmra.mxu1 %v1143_v42  ;;  %v1186_v42 = vld [vmem:[%s2051_s0 + $0xf0] sm:$0xf] }
  0x83   :  { %810 = vmatmul.bf16.gmra.mxu2 %v1147_v43  ;;  %v1383_v43 = vld [vmem:[%s2051_s0 + $0xf8] sm:$0xf0] }
  0x91   :  { %637 = vmatmul.bf16.gmra.mxu0 %v1151_v52  ;;  %766 = vmatmul.bf16.gmra.mxu3 %v1251_v53 }
  0x92   :  { %726 = vmatmul.bf16.gmra.mxu1 %v1155_v54  ;;  %v1187_v54 = vor.u32 %v1383_v43, %v1186_v42 }
  0x93   :  { %815 = vmatmul.bf16.gmra.mxu2 %v1159_v55  ;;  %v1243_v55 = vor.u32 %v1396_v47, %v1242_v46 }
  0x9e   :  { %v603_v2 = vpop.f32.mrf.mxu0 }
  0x9f   :  { %v692_v5 = vpop.f32.mrf.mxu1 }
  0xa0   :  { %v693_v6 = vadd.f32 %v692_v5, %v603_v2 }
  0xa1   :  { %642 = vmatmul.bf16.gmra.mxu0 %v1163_v0  ;;  %840 = vmatmul.bf16.vlgmr.msra.gmra.mxu3 %v1219_v1 }
  0xa2   :  { %731 = vmatmul.bf16.gmra.mxu1 %v1167_v3 }
  0xa3   :  { %820 = vmatmul.bf16.gmra.mxu2 %v1171_v4 }
  0xa4   :  { %v1797_v7 = vpop.f32.mrf.mxu3 }
  0xa6   :  { %v781_v9 = vpop.f32.mrf.mxu2  ;;  %v605_v11 = vpop.f32.mrf.mxu0 }
  0xa7   :  { %v782_v10 = vadd.f32 %v781_v9, %v693_v6  ;;  %v694_v12 = vpop.f32.mrf.mxu1  ;;  %v1198_v6 = vld [vmem:[%s2051_s0 + $0x108] sm:$0xf]  ;;  %v1386_v9 = vld [vmem:[%s2051_s0 + $0x110] sm:$0xf0] }
  0xa8   :  { %v695_v23 = vadd.f32 %v694_v12, %v605_v11  ;;  %v1254_v12 = vld [vmem:[%s2051_s0 + $0x170] sm:$0xf]  ;;  %v1199_v20 = vor.u32 %v1386_v9, %v1198_v6 }
  0xa9   :  { %v964_v13 = vadd.f32 %v1802_v8, %v782_v10  ;;  %v1385_v10 = vld [vmem:[%s2051_s0 + $0x10c] sm:$0xf] }
  0xab   :  { %v996_v17 = vmax.f32 %v964_v13, 0.0  ;;  %v1399_v13 = vld [vmem:[%s2051_s0 + $0x178] sm:$0xf0] }
  0xac   :  { %v1832_v24 = vpop.f32.mrf.mxu3  ;;  %v1255_v21 = vor.u32 %v1399_v13, %v1254_v12 }
  0xad   :  { %1028 = vst [vmem:[%s2053_s3] sm:$0xff] %v996_v17 }
  0xae   :  { %v783_v25 = vpop.f32.mrf.mxu2  ;;  %v608_v29 = vpop.f32.mrf.mxu0 }
  0xaf   :  { %v784_v28 = vadd.f32 %v783_v25, %v695_v23  ;;  %v697_v32 = vpop.f32.mrf.mxu1  ;;  %v1203_v25 = vor.u32 %v1385_v10, %v1200_v14 }
  0xb0   :  { %v698_v35 = vadd.f32 %v697_v32, %v608_v29 }
  0xb1   :  { %v965_v33 = vadd.f32 %v1802_v8, %v784_v28  ;;  %647 = vmatmul.bf16.gmra.mxu0 %v1175_v26  ;;  %845 = vmatmul.bf16.gmra.mxu3 %v1231_v27  ;;  %v1207_v26 = vor.u32 %v1387_v16, %v1206_v15 }
  0xb2   :  { %736 = vmatmul.bf16.gmra.mxu1 %v1179_v30 }
  0xb3   :  { %v997_v34 = vmax.f32 %v965_v33, 0.0  ;;  %825 = vmatmul.bf16.gmra.mxu2 %v1183_v31 }
  0xb4   :  { %v1838_v36 = vpop.f32.mrf.mxu3 }
  0xb5   :  { %1029 = vst [vmem:[%s2053_s3 + $0x8] sm:$0xff] %v997_v34 }
  0xb6   :  { %v786_v37 = vpop.f32.mrf.mxu2  ;;  %v610_v39 = vpop.f32.mrf.mxu0 }
  0xb7   :  { %v787_v38 = vadd.f32 %v786_v37, %v698_v35  ;;  %v699_v40 = vpop.f32.mrf.mxu1 }
  0xb8   :  { %v700_v51 = vadd.f32 %v699_v40, %v610_v39 }
  0xb9   :  { %v966_v41 = vadd.f32 %v1802_v8, %v787_v38 }
  0xbb   :  { %v998_v45 = vmax.f32 %v966_v41, 0.0 }
  0xbc   :  { %v1868_v52 = vpop.f32.mrf.mxu3 }
  0xbd   :  { %1030 = vst [vmem:[%s2053_s3 + $0x10] sm:$0xff] %v998_v45 }
  0xbe   :  { %v788_v53 = vpop.f32.mrf.mxu2  ;;  %v613_v57 = vpop.f32.mrf.mxu0 }
  0xbf   :  { %v789_v56 = vadd.f32 %v788_v53, %v700_v51  ;;  %v702_v60 = vpop.f32.mrf.mxu1 }
  0xc0   :  { %v703_v63 = vadd.f32 %v702_v60, %v613_v57 }
  0xc1   :  { %v967_v61 = vadd.f32 %v1802_v8, %v789_v56  ;;  %652 = vmatmul.bf16.gmra.mxu0 %v1187_v54  ;;  %850 = vmatmul.bf16.gmra.mxu3 %v1243_v55 }
  0xc2   :  { %741 = vmatmul.bf16.gmra.mxu1 %v1191_v58 }
  0xc3   :  { %v999_v62 = vmax.f32 %v967_v61, 0.0  ;;  %830 = vmatmul.bf16.gmra.mxu2 %v1195_v59 }
  0xc4   :  { %v1874_v0 = vpop.f32.mrf.mxu3 }
  0xc5   :  { %1031 = vst [vmem:[%s2053_s3 + $0x18] sm:$0xff] %v999_v62 }
  0xc6   :  { %v791_v1 = vpop.f32.mrf.mxu2  ;;  %v615_v3 = vpop.f32.mrf.mxu0 }
  0xc7   :  { %v792_v2 = vadd.f32 %v791_v1, %v703_v63  ;;  %v704_v4 = vpop.f32.mrf.mxu1 }
  0xc8   :  { %v705_v17 = vadd.f32 %v704_v4, %v615_v3 }
  0xc9   :  { %v968_v5 = vadd.f32 %v1802_v8, %v792_v2 }
  0xcb   :  { %v1000_v11 = vmax.f32 %v968_v5, 0.0 }
  0xcc   :  { %v1904_v18 = vpop.f32.mrf.mxu3 }
  0xcd   :  { %1032 = vst [vmem:[%s2053_s3 + $0x20] sm:$0xff] %v1000_v11 }
  0xce   :  { %v793_v19 = vpop.f32.mrf.mxu2  ;;  %v618_v23 = vpop.f32.mrf.mxu0 }
  0xcf   :  { %v794_v22 = vadd.f32 %v793_v19, %v705_v17  ;;  %v707_v27 = vpop.f32.mrf.mxu1 }
  0xd0   :  { %v708_v30 = vadd.f32 %v707_v27, %v618_v23 }
  0xd1   :  { %v969_v28 = vadd.f32 %v1802_v8, %v794_v22  ;;  %657 = vmatmul.bf16.gmra.mxu0 %v1199_v20  ;;  %855 = vmatmul.bf16.gmra.mxu3 %v1255_v21 }
  0xd2   :  { %746 = vmatmul.bf16.gmra.mxu1 %v1203_v25 }
  0xd3   :  { %v1001_v29 = vmax.f32 %v969_v28, 0.0  ;;  %835 = vmatmul.bf16.gmra.mxu2 %v1207_v26 }
  0xd4   :  { %v1910_v31 = vpop.f32.mrf.mxu3 }
  0xd5   :  { %1033 = vst [vmem:[%s2053_s3 + $0x28] sm:$0xff] %v1001_v29 }
  0xd6   :  { %v796_v32 = vpop.f32.mrf.mxu2  ;;  %v620_v34 = vpop.f32.mrf.mxu0 }
  0xd7   :  { %v797_v33 = vadd.f32 %v796_v32, %v708_v30  ;;  %v709_v35 = vpop.f32.mrf.mxu1 }
  0xd8   :  { %v710_v39 = vadd.f32 %v709_v35, %v620_v34 }
  0xd9   :  { %v970_v37 = vadd.f32 %v1802_v8, %v797_v33 }
  0xdb   :  { %v1002_v38 = vmax.f32 %v970_v37, 0.0 }
  0xdc   :  { %v1916_v40 = vpop.f32.mrf.mxu3 }
  0xdd   :  { %1034 = vst [vmem:[%s2053_s3 + $0x30] sm:$0xff] %v1002_v38 }
  0xde   :  { %v798_v41 = vpop.f32.mrf.mxu2  ;;  %v623_v43 = vpop.f32.mrf.mxu0 }
  0xdf   :  { %v799_v42 = vadd.f32 %v798_v41, %v710_v39  ;;  %v712_v44 = vpop.f32.mrf.mxu1 }
  0xe0   :  { %v713_v47 = vadd.f32 %v712_v44, %v623_v43 }
  0xe1   :  { %v971_v45 = vadd.f32 %v1802_v8, %v799_v42 }
  0xe3   :  { %v1003_v46 = vmax.f32 %v971_v45, 0.0 }
  0xe4   :  { %v1922_v48 = vpop.f32.mrf.mxu3 }
  0xe5   :  { %1035 = vst [vmem:[%s2053_s3 + $0x38] sm:$0xff] %v1003_v46 }
  0xe6   :  { %v801_v49 = vpop.f32.mrf.mxu2  ;;  %v625_v51 = vpop.f32.mrf.mxu0 }
  0xe7   :  { %v802_v50 = vadd.f32 %v801_v49, %v713_v47  ;;  %v714_v53 = vpop.f32.mrf.mxu1 }
  0xe8   :  { %v715_v56 = vadd.f32 %v714_v53, %v625_v51 }
  0xe9   :  { %v972_v54 = vadd.f32 %v1802_v8, %v802_v50 }
  0xeb   :  { %v1004_v55 = vmax.f32 %v972_v54, 0.0 }
  0xec   :  { %v1928_v57 = vpop.f32.mrf.mxu3 }
  0xed   :  { %1036 = vst [vmem:[%s2053_s3 + $0x40] sm:$0xff] %v1004_v55 }
  0xee   :  { %v803_v58 = vpop.f32.mrf.mxu2  ;;  %v628_v60 = vpop.f32.mrf.mxu0 }
  0xef   :  { %v804_v59 = vadd.f32 %v803_v58, %v715_v56  ;;  %v717_v61 = vpop.f32.mrf.mxu1 }
  0xf0   :  { %v718_v1 = vadd.f32 %v717_v61, %v628_v60  ;;  %v753_v60 = vadd.f32 %v1922_v48, %v1797_v7 }
  0xf1   :  { %v973_v62 = vadd.f32 %v1802_v8, %v804_v59 }
  0xf3   :  { %v1005_v63 = vmax.f32 %v973_v62, 0.0 }
  0xf4   :  { %v1934_v2 = vpop.f32.mrf.mxu3 }
  0xf5   :  { %1037 = vst [vmem:[%s2053_s3 + $0x48] sm:$0xff] %v1005_v63 }
  0xf6   :  { %v806_v3 = vpop.f32.mrf.mxu2  ;;  %v630_v5 = vpop.f32.mrf.mxu0 }
  0xf7   :  { %v807_v4 = vadd.f32 %v806_v3, %v718_v1  ;;  %v719_v6 = vpop.f32.mrf.mxu1 }
  0xf8   :  { %v720_v11 = vadd.f32 %v719_v6, %v630_v5 }
  0xf9   :  { %v974_v9 = vadd.f32 %v1802_v8, %v807_v4 }
  0xfb   :  { %v1006_v10 = vmax.f32 %v974_v9, 0.0 }
  0xfc   :  { %v1940_v12 = vpop.f32.mrf.mxu3 }
  0xfd   :  { %1038 = vst [vmem:[%s2053_s3 + $0x50] sm:$0xff] %v1006_v10 }
  0xfe   :  { %v808_v13 = vpop.f32.mrf.mxu2  ;;  %v633_v15 = vpop.f32.mrf.mxu0 }
  0xff   :  { %v809_v14 = vadd.f32 %v808_v13, %v720_v11  ;;  %v722_v16 = vpop.f32.mrf.mxu1  ;;  %v755_v11 = vadd.f32 %v1928_v57, %v1832_v24 }
 0x100   :  { %v723_v20 = vadd.f32 %v722_v16, %v633_v15 }
 0x101   :  { %v975_v17 = vadd.f32 %v1802_v8, %v809_v14 }
 0x103   :  { %v1007_v19 = vmax.f32 %v975_v17, 0.0 }
 0x104   :  { %v1946_v21 = vpop.f32.mrf.mxu3 }
 0x105   :  { %1039 = vst [vmem:[%s2053_s3 + $0x58] sm:$0xff] %v1007_v19 }
 0x106   :  { %v811_v22 = vpop.f32.mrf.mxu2  ;;  %v635_v25 = vpop.f32.mrf.mxu0 }
 0x107   :  { %v812_v23 = vadd.f32 %v811_v22, %v723_v20  ;;  %v724_v26 = vpop.f32.mrf.mxu1 }
 0x108   :  { %v725_v29 = vadd.f32 %v724_v26, %v635_v25 }
 0x109   :  { %v976_v27 = vadd.f32 %v1802_v8, %v812_v23  ;;  %v758_v23 = vadd.f32 %v1934_v2, %v1838_v36  ;;  %v760_v2 = vadd.f32 %v1940_v12, %v1868_v52 }
 0x10b   :  { %v1008_v28 = vmax.f32 %v976_v27, 0.0 }
 0x10c   :  { %v1952_v30 = vpop.f32.mrf.mxu3 }
 0x10d   :  { %1040 = vst [vmem:[%s2053_s3 + $0x60] sm:$0xff] %v1008_v28 }
 0x10e   :  { %v813_v32 = vpop.f32.mrf.mxu2  ;;  %v638_v34 = vpop.f32.mrf.mxu0 }
 0x10f   :  { %v814_v33 = vadd.f32 %v813_v32, %v725_v29  ;;  %v727_v35 = vpop.f32.mrf.mxu1 }
 0x110   :  { %v728_v39 = vadd.f32 %v727_v35, %v638_v34 }
 0x111   :  { %v977_v37 = vadd.f32 %v1802_v8, %v814_v33 }
 0x113   :  { %v1009_v38 = vmax.f32 %v977_v37, 0.0 }
 0x114   :  { %v1958_v41 = vpop.f32.mrf.mxu3 }
 0x115   :  { %1041 = vst [vmem:[%s2053_s3 + $0x68] sm:$0xff] %v1009_v38 }
 0x116   :  { %v816_v42 = vpop.f32.mrf.mxu2  ;;  %v640_v44 = vpop.f32.mrf.mxu0 }
 0x117   :  { %v817_v43 = vadd.f32 %v816_v42, %v728_v39  ;;  %v729_v45 = vpop.f32.mrf.mxu1 }
 0x118   :  { %v730_v49 = vadd.f32 %v729_v45, %v640_v44 }
 0x119   :  { %v978_v46 = vadd.f32 %v1802_v8, %v817_v43 }
 0x11b   :  { %v1010_v47 = vmax.f32 %v978_v46, 0.0 }
 0x11c   :  { %v1964_v50 = vpop.f32.mrf.mxu3 }
 0x11d   :  { %1042 = vst [vmem:[%s2053_s3 + $0x70] sm:$0xff] %v1010_v47 }
 0x11e   :  { %v818_v51 = vpop.f32.mrf.mxu2  ;;  %v643_v54 = vpop.f32.mrf.mxu0 }
 0x11f   :  { %v819_v53 = vadd.f32 %v818_v51, %v730_v49  ;;  %v732_v55 = vpop.f32.mrf.mxu1  ;;  %v763_v51 = vadd.f32 %v1946_v21, %v1874_v0  ;;  %v765_v21 = vadd.f32 %v1952_v30, %v1904_v18 }
 0x120   :  { %v733_v59 = vadd.f32 %v732_v55, %v643_v54 }
 0x121   :  { %v979_v56 = vadd.f32 %v1802_v8, %v819_v53 }
 0x123   :  { %v1011_v58 = vmax.f32 %v979_v56, 0.0 }
 0x124   :  { %v841_v61 = vpop.f32.mrf.mxu3 }
 0x125   :  { %1043 = vst [vmem:[%s2053_s3 + $0x78] sm:$0xff] %v1011_v58  ;;  %v842_v63 = vadd.f32 %v841_v61, %v753_v60 }
 0x126   :  { %v821_v62 = vpop.f32.mrf.mxu2  ;;  %v645_v3 = vpop.f32.mrf.mxu0 }
 0x127   :  { %v822_v1 = vadd.f32 %v821_v62, %v733_v59  ;;  %v988_v4 = vadd.f32 %v1802_v8, %v842_v63  ;;  %v734_v5 = vpop.f32.mrf.mxu1 }
 0x128   :  { %v735_v7 = vadd.f32 %v734_v5, %v645_v3 }
 0x129   :  { %v980_v6 = vadd.f32 %v1802_v8, %v822_v1  ;;  %v1020_v9 = vmax.f32 %v988_v4, 0.0 }
 0x12b   :  { %v1012_v10 = vmax.f32 %v980_v6, 0.0  ;;  %1052 = vst [vmem:[%s2053_s3 + $0xc0] sm:$0xff] %v1020_v9 }
 0x12c   :  { %v843_v48 = vpop.f32.mrf.mxu3 }
 0x12d   :  { %1044 = vst [vmem:[%s2053_s3 + $0x80] sm:$0xff] %v1012_v10  ;;  %v844_v14 = vadd.f32 %v843_v48, %v755_v11  ;;  %v768_v48 = vadd.f32 %v1958_v41, %v1910_v31  ;;  %v770_v41 = vadd.f32 %v1964_v50, %v1916_v40 }
 0x12e   :  { %v823_v13 = vpop.f32.mrf.mxu2  ;;  %v648_v16 = vpop.f32.mrf.mxu0 }
 0x12f   :  { %v824_v15 = vadd.f32 %v823_v13, %v735_v7  ;;  %v989_v17 = vadd.f32 %v1802_v8, %v844_v14  ;;  %v737_v19 = vpop.f32.mrf.mxu1 }
 0x130   :  { %v738_v22 = vadd.f32 %v737_v19, %v648_v16 }
 0x131   :  { %v981_v20 = vadd.f32 %v1802_v8, %v824_v15  ;;  %v1021_v24 = vmax.f32 %v989_v17, 0.0 }
 0x133   :  { %v1013_v57 = vmax.f32 %v981_v20, 0.0  ;;  %1053 = vst [vmem:[%s2053_s3 + $0xc8] sm:$0xff] %v1021_v24 }
 0x134   :  { %v846_v25 = vpop.f32.mrf.mxu3 }
 0x135   :  { %1045 = vst [vmem:[%s2053_s3 + $0x88] sm:$0xff] %v1013_v57  ;;  %v847_v27 = vadd.f32 %v846_v25, %v758_v23 }
 0x136   :  { %v826_v26 = vpop.f32.mrf.mxu2  ;;  %v650_v29 = vpop.f32.mrf.mxu0 }
 0x137   :  { %v827_v28 = vadd.f32 %v826_v26, %v738_v22  ;;  %v990_v32 = vadd.f32 %v1802_v8, %v847_v27  ;;  %v739_v33 = vpop.f32.mrf.mxu1 }
 0x138   :  { %v740_v37 = vadd.f32 %v739_v33, %v650_v29 }
 0x139   :  { %v982_v34 = vadd.f32 %v1802_v8, %v827_v28  ;;  %v1022_v35 = vmax.f32 %v990_v32, 0.0 }
 0x13b   :  { %v1014_v36 = vmax.f32 %v982_v34, 0.0  ;;  %1054 = vst [vmem:[%s2053_s3 + $0xd0] sm:$0xff] %v1022_v35 }
 0x13c   :  { %v848_v38 = vpop.f32.mrf.mxu3 }
 0x13d   :  { %1046 = vst [vmem:[%s2053_s3 + $0x90] sm:$0xff] %v1014_v36  ;;  %v849_v42 = vadd.f32 %v848_v38, %v760_v2 }
 0x13e   :  { %v828_v39 = vpop.f32.mrf.mxu2  ;;  %v653_v44 = vpop.f32.mrf.mxu0 }
 0x13f   :  { %v829_v43 = vadd.f32 %v828_v39, %v740_v37  ;;  %v991_v45 = vadd.f32 %v1802_v8, %v849_v42  ;;  %v742_v46 = vpop.f32.mrf.mxu1 }
 0x140   :  { %v743_v49 = vadd.f32 %v742_v46, %v653_v44 }
 0x141   :  { %v983_v47 = vadd.f32 %v1802_v8, %v829_v43  ;;  %v1023_v52 = vmax.f32 %v991_v45, 0.0 }
 0x143   :  { %v1015_v12 = vmax.f32 %v983_v47, 0.0  ;;  %1055 = vst [vmem:[%s2053_s3 + $0xd8] sm:$0xff] %v1023_v52 }
 0x144   :  { %v851_v53 = vpop.f32.mrf.mxu3 }
 0x145   :  { %1047 = vst [vmem:[%s2053_s3 + $0x98] sm:$0xff] %v1015_v12  ;;  %v852_v55 = vadd.f32 %v851_v53, %v763_v51 }
 0x146   :  { %v831_v54 = vpop.f32.mrf.mxu2  ;;  %v655_v58 = vpop.f32.mrf.mxu0 }
 0x147   :  { %v832_v56 = vadd.f32 %v831_v54, %v743_v49  ;;  %v992_v59 = vadd.f32 %v1802_v8, %v852_v55  ;;  %v744_v60 = vpop.f32.mrf.mxu1 }
 0x148   :  { %v745_v63 = vadd.f32 %v744_v60, %v655_v58 }
 0x149   :  { %v984_v61 = vadd.f32 %v1802_v8, %v832_v56  ;;  %v1024_v62 = vmax.f32 %v992_v59, 0.0 }
 0x14b   :  { %v1016_v0 = vmax.f32 %v984_v61, 0.0  ;;  %1056 = vst [vmem:[%s2053_s3 + $0xe0] sm:$0xff] %v1024_v62 }
 0x14c   :  { %v853_v1 = vpop.f32.mrf.mxu3 }
 0x14d   :  { %1048 = vst [vmem:[%s2053_s3 + $0xa0] sm:$0xff] %v1016_v0  ;;  %v854_v4 = vadd.f32 %v853_v1, %v765_v21 }
 0x14e   :  { %v833_v3 = vpop.f32.mrf.mxu2  ;;  %v658_v9 = vpop.f32.mrf.mxu0 }
 0x14f   :  { %v834_v5 = vadd.f32 %v833_v3, %v745_v63  ;;  %v993_v6 = vadd.f32 %v1802_v8, %v854_v4  ;;  %v747_v10 = vpop.f32.mrf.mxu1 }
 0x150   :  { %v748_v7 = vadd.f32 %v747_v10, %v658_v9 }
 0x151   :  { %v985_v11 = vadd.f32 %v1802_v8, %v834_v5  ;;  %v1025_v18 = vmax.f32 %v993_v6, 0.0 }
 0x153   :  { %v1017_v30 = vmax.f32 %v985_v11, 0.0  ;;  %1057 = vst [vmem:[%s2053_s3 + $0xe8] sm:$0xff] %v1025_v18 }
 0x154   :  { %v856_v13 = vpop.f32.mrf.mxu3 }
 0x155   :  { %1049 = vst [vmem:[%s2053_s3 + $0xa8] sm:$0xff] %v1017_v30  ;;  %v857_v15 = vadd.f32 %v856_v13, %v768_v48 }
 0x156   :  { %v836_v14 = vpop.f32.mrf.mxu2  ;;  %v660_v24 = vpop.f32.mrf.mxu0 }
 0x157   :  { %v837_v16 = vadd.f32 %v836_v14, %v748_v7  ;;  %v994_v17 = vadd.f32 %v1802_v8, %v857_v15  ;;  %v749_v57 = vpop.f32.mrf.mxu1 }
 0x158   :  { %v750_v22 = vadd.f32 %v749_v57, %v660_v24 }
 0x159   :  { %v986_v19 = vadd.f32 %v1802_v8, %v837_v16  ;;  %v1026_v20 = vmax.f32 %v994_v17, 0.0 }
 0x15b   :  { %v1018_v31 = vmax.f32 %v986_v19, 0.0  ;;  %1058 = vst [vmem:[%s2053_s3 + $0xf0] sm:$0xff] %v1026_v20 }
 0x15c   :  { %v858_v23 = vpop.f32.mrf.mxu3 }
 0x15d   :  { %1050 = vst [vmem:[%s2053_s3 + $0xb0] sm:$0xff] %v1018_v31  ;;  %v859_v26 = vadd.f32 %v858_v23, %v770_v41 }
 0x15e   :  { %v838_v25 = vpop.f32.mrf.mxu2 }
 0x15f   :  { %v839_v27 = vadd.f32 %v838_v25, %v750_v22  ;;  %v995_v28 = vadd.f32 %v1802_v8, %v859_v26 }
 0x161   :  { %v987_v29 = vadd.f32 %v1802_v8, %v839_v27  ;;  %v1027_v32 = vmax.f32 %v995_v28, 0.0 }
 0x163   :  { %v1019_v33 = vmax.f32 %v987_v29, 0.0  ;;  %1059 = vst [vmem:[%s2053_s3 + $0xf8] sm:$0xff] %v1027_v32 }
 0x165   :  { %1051 = vst [vmem:[%s2053_s3 + $0xb8] sm:$0xff] %v1019_v33 }

// kernel: run.15
= control target key start
LH: loop header
LB: loop body
LE: loop exit
PB: predicated region body
PF: predicated region fallthrough
CT: control target
= control target key end

     0   :  { %s2375_s12 = smov 0   ;;  %s2377_s13 = smov 0   ;;  %s2871_s0 = inlined_call_operand.vmem [shape: bf16[256,1024], index: 0, kind: input, shape index: {}]   ;;  %s2872_s1 = inlined_call_operand.vmem [shape: bf16[1024,128], index: 1, kind: input, shape index: {}]   ;;  %s2873_s2 = inlined_call_operand.vmem [shape: f32[1,128], index: 2, kind: input, shape index: {}]   ;;  %s2874_s3 = inlined_call_operand.vmem [shape: f32[256,128], index: 3, kind: output, shape index: {}]  }
   0x1   :  { %s2379_s14 = smov 0   ;;  %s2381_s15 = smov 0  }
   0x2   :  { %s2383_s16 = smov 0  }
   0x3 LB: > { %s25_s17 = sadd.s32 1, %s2348_s15  ;;  %p48_p1 = scmp.ne.s32.totalorder %s2340_s13, %s2336_s12  ;;  %s2352_s16 = sphi %s2383_s16, %s13_s16   ;;  %s2348_s15 = sphi %s2381_s15, %s2878_s15   ;;  %s2344_s14 = sphi %s2379_s14, %s2877_s14   ;;  %s2340_s13 = sphi %s2377_s13, %s2876_s13   ;;  %s2336_s12 = sphi %s2375_s12, %s2875_s12  }
   0x4   : > { %p26_p0 = scmp.ge.s32.totalorder %s25_s17, 2  ;;  %p49_p2 = scmp.eq.s32.totalorder %s2352_s16, 0 }
   0x5   : > { %s41_s19 = sadd.s32 1, %s2340_s13  ;;  %p1777_p5 = scmp.ge.s32.totalorder %s2352_s16, 2 }
   0x6   : > { %s2880_s17 = smov (%p26_p0, %s25_s17), 0  ;;  %p50_p3 = por %p49_p2, %p48_p1 }
   0x7   : > { %s37_s18 = ssub.s32 %s2348_s15, %s2880_s17  ;;  %162 = sbr.rel (%p1777_p5) target bundleno = 80 (0x50), region = 20 }
   0x8   : > { %p39_p4 = scmp.eq.s32.totalorder %s37_s18, 0 }
   0xa   : > { %s2410_s20 = scalar_select %p39_p4, %s2340_s13, %s41_s19  }
   0xc   : > { %165 = sbr.rel (!%p50_p3) target bundleno = 80 (0x50), region = 24  ;;  %s167_s21 = sand.u32 (%p50_p3), 1, %s2340_s13  }
   0xd   : > { %s2175_s22 = sshll.u32 (%p50_p3), %s2348_s15, 4  ;;  %s1778_s23 = sshll.u32 (%p50_p3), %s167_s21, 9 }
   0xe   : > { %s2418_s26 = scalar_lea.vmem (%p50_p3), %s2871_s0, %s2175_s22  ;;  %s2423_s27 = scalar_lea.vmem (%p50_p3), [#allocation3], %s1778_s23 }
   0xf   : > { %v188_v0 = vld [vmem:[%s2418_s26] sm:$0xff] (%p50_p3)  ;;  %v190_v1 = vld [vmem:[%s2418_s26 + $0x8] sm:$0xff] (%p50_p3) }
  0x10   : > { %v192_v2 = vld [vmem:[%s2418_s26 + $0x20] sm:$0xff] (%p50_p3)  ;;  %189 = vst [vmem:[%s2423_s27] sm:$0xff] (%p50_p3), %v188_v0  ;;  %v194_v3 = vld [vmem:[%s2418_s26 + $0x28] sm:$0xff] (%p50_p3) }
  0x11   : > { %191 = vst [vmem:[%s2423_s27 + $0x8] sm:$0xff] %v190_v1  ;;  %v196_v4 = vld [vmem:[%s2418_s26 + $0x40] sm:$0xff]  ;;  %v198_v5 = vld [vmem:[%s2418_s26 + $0x48] sm:$0xff] }
  0x12   : > { %193 = vst [vmem:[%s2423_s27 + $0x10] sm:$0xff] %v192_v2  ;;  %v200_v6 = vld [vmem:[%s2418_s26 + $0x60] sm:$0xff]  ;;  %v202_v7 = vld [vmem:[%s2418_s26 + $0x68] sm:$0xff] }
  0x13   : > { %195 = vst [vmem:[%s2423_s27 + $0x18] sm:$0xff] %v194_v3  ;;  %v204_v8 = vld [vmem:[%s2418_s26 + $0x80] sm:$0xff]  ;;  %v206_v9 = vld [vmem:[%s2418_s26 + $0x88] sm:$0xff] }
  0x14   : > { %197 = vst [vmem:[%s2423_s27 + $0x20] sm:$0xff] %v196_v4  ;;  %v208_v10 = vld [vmem:[%s2418_s26 + $0xa0] sm:$0xff]  ;;  %v210_v11 = vld [vmem:[%s2418_s26 + $0xa8] sm:$0xff] }
  0x15   : > { %199 = vst [vmem:[%s2423_s27 + $0x28] sm:$0xff] %v198_v5  ;;  %v212_v12 = vld [vmem:[%s2418_s26 + $0xc0] sm:$0xff]  ;;  %v214_v13 = vld [vmem:[%s2418_s26 + $0xc8] sm:$0xff] }
  0x16   : > { %201 = vst [vmem:[%s2423_s27 + $0x30] sm:$0xff] %v200_v6  ;;  %v216_v14 = vld [vmem:[%s2418_s26 + $0xe0] sm:$0xff]  ;;  %v218_v15 = vld [vmem:[%s2418_s26 + $0xe8] sm:$0xff] }
  0x17   : > { %203 = vst [vmem:[%s2423_s27 + $0x38] sm:$0xff] %v202_v7  ;;  %v220_v16 = vld [vmem:[%s2418_s26 + $0x100] sm:$0xff]  ;;  %v222_v17 = vld [vmem:[%s2418_s26 + $0x108] sm:$0xff] }
  0x18   : > { %205 = vst [vmem:[%s2423_s27 + $0x40] sm:$0xff] %v204_v8  ;;  %v224_v18 = vld [vmem:[%s2418_s26 + $0x120] sm:$0xff]  ;;  %v226_v19 = vld [vmem:[%s2418_s26 + $0x128] sm:$0xff] }
  0x19   : > { %207 = vst [vmem:[%s2423_s27 + $0x48] sm:$0xff] %v206_v9  ;;  %v228_v20 = vld [vmem:[%s2418_s26 + $0x140] sm:$0xff]  ;;  %v230_v21 = vld [vmem:[%s2418_s26 + $0x148] sm:$0xff] }
  0x1a   : > { %209 = vst [vmem:[%s2423_s27 + $0x50] sm:$0xff] %v208_v10  ;;  %v232_v22 = vld [vmem:[%s2418_s26 + $0x160] sm:$0xff]  ;;  %v234_v23 = vld [vmem:[%s2418_s26 + $0x168] sm:$0xff] }
  0x1b   : > { %211 = vst [vmem:[%s2423_s27 + $0x58] sm:$0xff] %v210_v11  ;;  %v236_v24 = vld [vmem:[%s2418_s26 + $0x180] sm:$0xff]  ;;  %v238_v25 = vld [vmem:[%s2418_s26 + $0x188] sm:$0xff] }
  0x1c   : > { %213 = vst [vmem:[%s2423_s27 + $0x60] sm:$0xff] %v212_v12  ;;  %v240_v26 = vld [vmem:[%s2418_s26 + $0x1a0] sm:$0xff]  ;;  %v242_v27 = vld [vmem:[%s2418_s26 + $0x1a8] sm:$0xff] }
  0x1d   : > { %215 = vst [vmem:[%s2423_s27 + $0x68] sm:$0xff] %v214_v13  ;;  %v244_v28 = vld [vmem:[%s2418_s26 + $0x1c0] sm:$0xff]  ;;  %v246_v29 = vld [vmem:[%s2418_s26 + $0x1c8] sm:$0xff] }
  0x1e   : > { %217 = vst [vmem:[%s2423_s27 + $0x70] sm:$0xff] %v216_v14  ;;  %v248_v30 = vld [vmem:[%s2418_s26 + $0x1e0] sm:$0xff]  ;;  %v250_v31 = vld [vmem:[%s2418_s26 + $0x1e8] sm:$0xff] }
  0x1f   : > { %219 = vst [vmem:[%s2423_s27 + $0x78] sm:$0xff] %v218_v15  ;;  %v252_v32 = vld [vmem:[%s2418_s26 + $0x200] sm:$0xff]  ;;  %v254_v33 = vld [vmem:[%s2418_s26 + $0x208] sm:$0xff] }
  0x20   : > { %221 = vst [vmem:[%s2423_s27 + $0x80] sm:$0xff] %v220_v16  ;;  %v256_v34 = vld [vmem:[%s2418_s26 + $0x220] sm:$0xff]  ;;  %v258_v35 = vld [vmem:[%s2418_s26 + $0x228] sm:$0xff] }
  0x21   : > { %223 = vst [vmem:[%s2423_s27 + $0x88] sm:$0xff] %v222_v17  ;;  %v260_v36 = vld [vmem:[%s2418_s26 + $0x240] sm:$0xff]  ;;  %v262_v37 = vld [vmem:[%s2418_s26 + $0x248] sm:$0xff] }
  0x22   : > { %225 = vst [vmem:[%s2423_s27 + $0x90] sm:$0xff] %v224_v18  ;;  %v264_v38 = vld [vmem:[%s2418_s26 + $0x260] sm:$0xff]  ;;  %v266_v39 = vld [vmem:[%s2418_s26 + $0x268] sm:$0xff] }
  0x23   : > { %227 = vst [vmem:[%s2423_s27 + $0x98] sm:$0xff] %v226_v19  ;;  %v268_v40 = vld [vmem:[%s2418_s26 + $0x280] sm:$0xff]  ;;  %v270_v41 = vld [vmem:[%s2418_s26 + $0x288] sm:$0xff] }
  0x24   : > { %229 = vst [vmem:[%s2423_s27 + $0xa0] sm:$0xff] %v228_v20  ;;  %v272_v42 = vld [vmem:[%s2418_s26 + $0x2a0] sm:$0xff]  ;;  %v274_v43 = vld [vmem:[%s2418_s26 + $0x2a8] sm:$0xff] }
  0x25   : > { %231 = vst [vmem:[%s2423_s27 + $0xa8] sm:$0xff] %v230_v21  ;;  %v276_v44 = vld [vmem:[%s2418_s26 + $0x2c0] sm:$0xff]  ;;  %v278_v45 = vld [vmem:[%s2418_s26 + $0x2c8] sm:$0xff] }
  0x26   : > { %233 = vst [vmem:[%s2423_s27 + $0xb0] sm:$0xff] %v232_v22  ;;  %v280_v46 = vld [vmem:[%s2418_s26 + $0x2e0] sm:$0xff]  ;;  %v282_v47 = vld [vmem:[%s2418_s26 + $0x2e8] sm:$0xff] }
  0x27   : > { %235 = vst [vmem:[%s2423_s27 + $0xb8] sm:$0xff] %v234_v23  ;;  %v284_v48 = vld [vmem:[%s2418_s26 + $0x300] sm:$0xff]  ;;  %v286_v49 = vld [vmem:[%s2418_s26 + $0x308] sm:$0xff] }
  0x28   : > { %237 = vst [vmem:[%s2423_s27 + $0xc0] sm:$0xff] %v236_v24  ;;  %v288_v50 = vld [vmem:[%s2418_s26 + $0x320] sm:$0xff]  ;;  %v290_v51 = vld [vmem:[%s2418_s26 + $0x328] sm:$0xff] }
  0x29   : > { %239 = vst [vmem:[%s2423_s27 + $0xc8] sm:$0xff] %v238_v25  ;;  %v292_v52 = vld [vmem:[%s2418_s26 + $0x340] sm:$0xff]  ;;  %v294_v53 = vld [vmem:[%s2418_s26 + $0x348] sm:$0xff] }
  0x2a   : > { %241 = vst [vmem:[%s2423_s27 + $0xd0] sm:$0xff] %v240_v26  ;;  %v296_v54 = vld [vmem:[%s2418_s26 + $0x360] sm:$0xff]  ;;  %v298_v55 = vld [vmem:[%s2418_s26 + $0x368] sm:$0xff] }
  0x2b   : > { %243 = vst [vmem:[%s2423_s27 + $0xd8] sm:$0xff] %v242_v27  ;;  %v300_v56 = vld [vmem:[%s2418_s26 + $0x380] sm:$0xff]  ;;  %v302_v57 = vld [vmem:[%s2418_s26 + $0x388] sm:$0xff] }
  0x2c   : > { %245 = vst [vmem:[%s2423_s27 + $0xe0] sm:$0xff] %v244_v28  ;;  %v304_v58 = vld [vmem:[%s2418_s26 + $0x3a0] sm:$0xff]  ;;  %v306_v59 = vld [vmem:[%s2418_s26 + $0x3a8] sm:$0xff] }
  0x2d   : > { %247 = vst [vmem:[%s2423_s27 + $0xe8] sm:$0xff] %v246_v29  ;;  %v308_v60 = vld [vmem:[%s2418_s26 + $0x3c0] sm:$0xff]  ;;  %v310_v61 = vld [vmem:[%s2418_s26 + $0x3c8] sm:$0xff] }
  0x2e   : > { %249 = vst [vmem:[%s2423_s27 + $0xf0] sm:$0xff] %v248_v30  ;;  %v312_v62 = vld [vmem:[%s2418_s26 + $0x3e0] sm:$0xff]  ;;  %v314_v63 = vld [vmem:[%s2418_s26 + $0x3e8] sm:$0xff] }
  0x2f   : > { %251 = vst [vmem:[%s2423_s27 + $0xf8] sm:$0xff] %v250_v31 }
  0x30   : > { %253 = vst [vmem:[%s2423_s27 + $0x100] sm:$0xff] %v252_v32 }
  0x31   : > { %255 = vst [vmem:[%s2423_s27 + $0x108] sm:$0xff] %v254_v33 }
  0x32   : > { %257 = vst [vmem:[%s2423_s27 + $0x110] sm:$0xff] %v256_v34 }
  0x33   : > { %259 = vst [vmem:[%s2423_s27 + $0x118] sm:$0xff] %v258_v35 }
  0x34   : > { %261 = vst [vmem:[%s2423_s27 + $0x120] sm:$0xff] %v260_v36 }
  0x35   : > { %263 = vst [vmem:[%s2423_s27 + $0x128] sm:$0xff] %v262_v37 }
  0x36   : > { %265 = vst [vmem:[%s2423_s27 + $0x130] sm:$0xff] %v264_v38 }
  0x37   : > { %267 = vst [vmem:[%s2423_s27 + $0x138] sm:$0xff] %v266_v39 }
  0x38   : > { %269 = vst [vmem:[%s2423_s27 + $0x140] sm:$0xff] %v268_v40 }
  0x39   : > { %271 = vst [vmem:[%s2423_s27 + $0x148] sm:$0xff] %v270_v41 }
  0x3a   : > { %273 = vst [vmem:[%s2423_s27 + $0x150] sm:$0xff] %v272_v42 }
  0x3b   : > { %275 = vst [vmem:[%s2423_s27 + $0x158] sm:$0xff] %v274_v43 }
  0x3c   : > { %277 = vst [vmem:[%s2423_s27 + $0x160] sm:$0xff] %v276_v44 }
  0x3d   : > { %279 = vst [vmem:[%s2423_s27 + $0x168] sm:$0xff] %v278_v45 }
  0x3e   : > { %281 = vst [vmem:[%s2423_s27 + $0x170] sm:$0xff] %v280_v46 }
  0x3f   : > { %283 = vst [vmem:[%s2423_s27 + $0x178] sm:$0xff] %v282_v47 }
  0x40   : > { %285 = vst [vmem:[%s2423_s27 + $0x180] sm:$0xff] %v284_v48 }
  0x41   : > { %287 = vst [vmem:[%s2423_s27 + $0x188] sm:$0xff] %v286_v49 }
  0x42   : > { %289 = vst [vmem:[%s2423_s27 + $0x190] sm:$0xff] %v288_v50 }
  0x43   : > { %291 = vst [vmem:[%s2423_s27 + $0x198] sm:$0xff] %v290_v51 }
  0x44   : > { %293 = vst [vmem:[%s2423_s27 + $0x1a0] sm:$0xff] %v292_v52 }
  0x45   : > { %295 = vst [vmem:[%s2423_s27 + $0x1a8] sm:$0xff] %v294_v53 }
  0x46   : > { %297 = vst [vmem:[%s2423_s27 + $0x1b0] sm:$0xff] %v296_v54 }
  0x47   : > { %299 = vst [vmem:[%s2423_s27 + $0x1b8] sm:$0xff] %v298_v55 }
  0x48   : > { %301 = vst [vmem:[%s2423_s27 + $0x1c0] sm:$0xff] %v300_v56 }
  0x49   : > { %303 = vst [vmem:[%s2423_s27 + $0x1c8] sm:$0xff] %v302_v57 }
  0x4a   : > { %305 = vst [vmem:[%s2423_s27 + $0x1d0] sm:$0xff] %v304_v58 }
  0x4b   : > { %307 = vst [vmem:[%s2423_s27 + $0x1d8] sm:$0xff] %v306_v59 }
  0x4c   : > { %309 = vst [vmem:[%s2423_s27 + $0x1e0] sm:$0xff] %v308_v60 }
  0x4d   : > { %311 = vst [vmem:[%s2423_s27 + $0x1e8] sm:$0xff] %v310_v61 }
  0x4e   : > { %313 = vst [vmem:[%s2423_s27 + $0x1f0] sm:$0xff] %v312_v62 }
  0x4f   : > { %315 = vst [vmem:[%s2423_s27 + $0x1f8] sm:$0xff] %v314_v63 }
  0x50 PF: > { %p1781_p6 = scmp.ge.s32.totalorder %s2352_s16, 1  ;;  %p332_p7 = scmp.lt.s32.totalorder %s2352_s16, 3 }
  0x52   : > { %p333_p8 = pnand %p1781_p6, %p332_p7 }
  0x53   : > { %s339_s28 = sand.u32 (!%p333_p8), 1, %s2336_s12   ;;  %s1783_s29 = sshll.u32 (!%p333_p8), %s2344_s14, 6 }
  0x54   : > { %336 = sbr.rel (%p333_p8) target bundleno = 585 (0x249), region = 51  ;;  %s1782_s30 = sshll.u32 (!%p333_p8), %s339_s28, 9 }
  0x55   : > { %p379_p9 = scmp.lt.s32.totalorder (!%p333_p8), %s1783_s29, 127  ;;  %s2559_s8 = scalar_lea.vmem (!%p333_p8), [#allocation3], %s1782_s30 }
  0x56   : > { %p1785_p10 = scmp.ne.s32.totalorder (!%p333_p8), %s2344_s14, 0 }
  0x59   : > { %s2882_s29 = smov (!%p379_p9, %s1783_s29), 127  ;;  %402 = sbr.rel (%p1785_p10) target bundleno = 127 (0x7f), region = 59 }
  0x5a   : > { %s1784_s4 = sshll.u32 %s2882_s29, 2 }
  0x5b   : > { %s2557_s7 = scalar_lea.vmem %s2872_s1, %s1784_s4 }
  0x5e   : > { %v2354_v0 = vmov 0.0  }
  0x5f   : > { %403 = vst [vmem:[#allocation2 + $0xb0] sm:$0xff] %v2354_v0 }
  0x60   : > { %404 = vst [vmem:[#allocation2] sm:$0xff] %v2354_v0 }
  0x61   : > { %405 = vst [vmem:[#allocation2 + $0xd8] sm:$0xff] %v2354_v0 }
  0x62   : > { %406 = vst [vmem:[#allocation2 + $0x18] sm:$0xff] %v2354_v0 }
  0x63   : > { %407 = vst [vmem:[#allocation2 + $0x50] sm:$0xff] %v2354_v0 }
  0x64   : > { %408 = vst [vmem:[#allocation2 + $0x68] sm:$0xff] %v2354_v0 }
  0x65   : > { %409 = vst [vmem:[#allocation2 + $0x30] sm:$0xff] %v2354_v0 }
  0x66   : > { %410 = vst [vmem:[#allocation2 + $0x48] sm:$0xff] %v2354_v0 }
  0x67   : > { %411 = vst [vmem:[#allocation2 + $0x80] sm:$0xff] %v2354_v0 }
  0x68   : > { %412 = vst [vmem:[#allocation2 + $0x88] sm:$0xff] %v2354_v0 }
  0x69   : > { %413 = vst [vmem:[#allocation2 + $0xe8] sm:$0xff] %v2354_v0 }
  0x6a   : > { %414 = vst [vmem:[#allocation2 + $0xb8] sm:$0xff] %v2354_v0 }
  0x6b   : > { %415 = vst [vmem:[#allocation2 + $0x60] sm:$0xff] %v2354_v0 }
  0x6c   : > { %416 = vst [vmem:[#allocation2 + $0xf0] sm:$0xff] %v2354_v0 }
  0x6d   : > { %417 = vst [vmem:[#allocation2 + $0x8] sm:$0xff] %v2354_v0 }
  0x6e   : > { %418 = vst [vmem:[#allocation2 + $0x78] sm:$0xff] %v2354_v0 }
  0x6f   : > { %419 = vst [vmem:[#allocation2 + $0x38] sm:$0xff] %v2354_v0 }
  0x70   : > { %420 = vst [vmem:[#allocation2 + $0x58] sm:$0xff] %v2354_v0 }
  0x71   : > { %421 = vst [vmem:[#allocation2 + $0x40] sm:$0xff] %v2354_v0 }
  0x72   : > { %422 = vst [vmem:[#allocation2 + $0xc8] sm:$0xff] %v2354_v0 }
  0x73   : > { %423 = vst [vmem:[#allocation2 + $0xe0] sm:$0xff] %v2354_v0 }
  0x74   : > { %424 = vst [vmem:[#allocation2 + $0x90] sm:$0xff] %v2354_v0 }
  0x75   : > { %425 = vst [vmem:[#allocation2 + $0x70] sm:$0xff] %v2354_v0 }
  0x76   : > { %426 = vst [vmem:[#allocation2 + $0xc0] sm:$0xff] %v2354_v0 }
  0x77   : > { %427 = vst [vmem:[#allocation2 + $0xa8] sm:$0xff] %v2354_v0 }
  0x78   : > { %428 = vst [vmem:[#allocation2 + $0xd0] sm:$0xff] %v2354_v0 }
  0x79   : > { %429 = vst [vmem:[#allocation2 + $0x10] sm:$0xff] %v2354_v0 }
  0x7a   : > { %430 = vst [vmem:[#allocation2 + $0x28] sm:$0xff] %v2354_v0 }
  0x7b   : > { %431 = vst [vmem:[#allocation2 + $0xa0] sm:$0xff] %v2354_v0 }
  0x7c   : > { %432 = vst [vmem:[#allocation2 + $0xf8] sm:$0xff] %v2354_v0 }
  0x7d   : > { %433 = vst [vmem:[#allocation2 + $0x20] sm:$0xff] %v2354_v0 }
  0x7e   : > { %434 = vst [vmem:[#allocation2 + $0x98] sm:$0xff] %v2354_v0 }
  0x7f PF: > { %v2247_v1 = vld [vmem:[%s2557_s7 + $0x38] sm:$0xff]  ;;  %v2246_v5 = vld [vmem:[%s2557_s7 + $0x30] sm:$0xff]  ;;  %v2245_v9 = vld [vmem:[%s2557_s7 + $0x28] sm:$0xff]  ;;  %p2170_p11 = scmp.ne.s32.totalorder %s2344_s14, 1 }
  0x80   : > { %v2255_v2 = vld [vmem:[%s2557_s7 + $0x78] sm:$0xff]  ;;  %1107 = vmatpush.bf16.msra.mxu0 %v2247_v1  ;;  %v2254_v6 = vld [vmem:[%s2557_s7 + $0x70] sm:$0xff]  ;;  %v2253_v10 = vld [vmem:[%s2557_s7 + $0x68] sm:$0xff] }
  0x81   : > { %v2263_v3 = vld [vmem:[%s2557_s7 + $0xb8] sm:$0xff]  ;;  %1196 = vmatpush.bf16.msra.mxu1 %v2255_v2  ;;  %v2262_v7 = vld [vmem:[%s2557_s7 + $0xb0] sm:$0xff]  ;;  %v2261_v11 = vld [vmem:[%s2557_s7 + $0xa8] sm:$0xff] }
  0x82   : > { %v2271_v4 = vld [vmem:[%s2557_s7 + $0xf8] sm:$0xff]  ;;  %1285 = vmatpush.bf16.msra.mxu2 %v2263_v3  ;;  %v2270_v8 = vld [vmem:[%s2557_s7 + $0xf0] sm:$0xff]  ;;  %v2269_v12 = vld [vmem:[%s2557_s7 + $0xe8] sm:$0xff] }
  0x83   : > { %1374 = vmatpush.bf16.msra.mxu3 %v2271_v4  ;;  %v2244_v13 = vld [vmem:[%s2557_s7 + $0x20] sm:$0xff]  ;;  %v2243_v17 = vld [vmem:[%s2557_s7 + $0x18] sm:$0xff]  ;;  %v2242_v21 = vld [vmem:[%s2557_s7 + $0x10] sm:$0xff] }
  0x84   : > { %1108 = vmatpush.bf16.msra.mxu0 %v2246_v5  ;;  %v2252_v14 = vld [vmem:[%s2557_s7 + $0x60] sm:$0xff]  ;;  %v2251_v18 = vld [vmem:[%s2557_s7 + $0x58] sm:$0xff]  ;;  %v2250_v22 = vld [vmem:[%s2557_s7 + $0x50] sm:$0xff] }
  0x85   : > { %1197 = vmatpush.bf16.msra.mxu1 %v2254_v6  ;;  %v2260_v15 = vld [vmem:[%s2557_s7 + $0xa0] sm:$0xff]  ;;  %v2259_v19 = vld [vmem:[%s2557_s7 + $0x98] sm:$0xff]  ;;  %v2258_v23 = vld [vmem:[%s2557_s7 + $0x90] sm:$0xff] }
  0x86   : > { %1286 = vmatpush.bf16.msra.mxu2 %v2262_v7  ;;  %v2268_v16 = vld [vmem:[%s2557_s7 + $0xe0] sm:$0xff]  ;;  %v2267_v20 = vld [vmem:[%s2557_s7 + $0xd8] sm:$0xff]  ;;  %v2266_v24 = vld [vmem:[%s2557_s7 + $0xd0] sm:$0xff] }
  0x87   : > { %1375 = vmatpush.bf16.msra.mxu3 %v2270_v8  ;;  %v2241_v25 = vld [vmem:[%s2557_s7 + $0x8] sm:$0xff]  ;;  %v2240_v29 = vld [vmem:[%s2557_s7] sm:$0xff]  ;;  %v2178_v34 = vld [vmem:[%s2559_s8 + $0xc] sm:$0xf0] }
  0x88   : > { %1109 = vmatpush.bf16.msra.mxu0 %v2245_v9  ;;  %v2249_v26 = vld [vmem:[%s2557_s7 + $0x48] sm:$0xff]  ;;  %v2248_v30 = vld [vmem:[%s2557_s7 + $0x40] sm:$0xff]  ;;  %v1790_v36 = vld [vmem:[%s2559_s8 + $0x10] sm:$0xf0] }
  0x89   : > { %1198 = vmatpush.bf16.msra.mxu1 %v2253_v10  ;;  %v2257_v27 = vld [vmem:[%s2557_s7 + $0x88] sm:$0xff]  ;;  %v2256_v31 = vld [vmem:[%s2557_s7 + $0x80] sm:$0xff]  ;;  %v2179_v38 = vld [vmem:[%s2559_s8 + $0x14] sm:$0xf0] }
  0x8a   : > { %1287 = vmatpush.bf16.msra.mxu2 %v2261_v11  ;;  %v2265_v28 = vld [vmem:[%s2557_s7 + $0xc8] sm:$0xff]  ;;  %v2264_v32 = vld [vmem:[%s2557_s7 + $0xc0] sm:$0xff]  ;;  %v1798_v40 = vld [vmem:[%s2559_s8 + $0x18] sm:$0xf0] }
  0x8b   : > { %1376 = vmatpush.bf16.msra.mxu3 %v2269_v12  ;;  %v1788_v33 = vld [vmem:[%s2559_s8] sm:$0xf]  ;;  %v2176_v35 = vld [vmem:[%s2559_s8 + $0x4] sm:$0xf]  ;;  %v1796_v37 = vld [vmem:[%s2559_s8 + $0x8] sm:$0xf] }
  0x8c   : > { %1110 = vmatpush.bf16.msra.mxu0 %v2244_v13  ;;  %v2177_v39 = vld [vmem:[%s2559_s8 + $0xc] sm:$0xf]  ;;  %v1789_v41 = vor.u32 %v2178_v34, %v1788_v33  ;;  %v1793_v42 = vor.u32 %v2176_v35, %v1790_v36  ;;  %v1797_v43 = vor.u32 %v2179_v38, %v1796_v37  ;;  %v1804_v45 = vld [vmem:[%s2559_s8 + $0x20] sm:$0xf]  ;;  %v2182_v46 = vld [vmem:[%s2559_s8 + $0x2c] sm:$0xf0] }
  0x8d   : > { %1199 = vmatpush.bf16.msra.mxu1 %v2252_v14  ;;  %v1801_v44 = vor.u32 %v2177_v39, %v1798_v40  ;;  %v2180_v47 = vld [vmem:[%s2559_s8 + $0x24] sm:$0xf]  ;;  %v1806_v48 = vld [vmem:[%s2559_s8 + $0x30] sm:$0xf0]  ;;  %v1812_v49 = vld [vmem:[%s2559_s8 + $0x28] sm:$0xf]  ;;  %v1805_v53 = vor.u32 %v2182_v46, %v1804_v45 }
  0x8e   : > { %1288 = vmatpush.bf16.msra.mxu2 %v2260_v15  ;;  %v2183_v50 = vld [vmem:[%s2559_s8 + $0x34] sm:$0xf0]  ;;  %v2181_v51 = vld [vmem:[%s2559_s8 + $0x2c] sm:$0xf]  ;;  %v1814_v52 = vld [vmem:[%s2559_s8 + $0x38] sm:$0xf0]  ;;  %v1809_v54 = vor.u32 %v2180_v47, %v1806_v48 }
  0x8f   : > { %1377 = vmatpush.bf16.msra.mxu3 %v2268_v16  ;;  %v1813_v55 = vor.u32 %v2183_v50, %v1812_v49  ;;  %v1817_v56 = vor.u32 %v2181_v51, %v1814_v52  ;;  %v1820_v57 = vld [vmem:[%s2559_s8 + $0x40] sm:$0xf]  ;;  %v2186_v58 = vld [vmem:[%s2559_s8 + $0x4c] sm:$0xf0]  ;;  %v2184_v59 = vld [vmem:[%s2559_s8 + $0x44] sm:$0xf] }
  0x90   : > { %1111 = vmatpush.bf16.msra.mxu0 %v2243_v17  ;;  %v1822_v60 = vld [vmem:[%s2559_s8 + $0x50] sm:$0xf0]  ;;  %v1828_v61 = vld [vmem:[%s2559_s8 + $0x48] sm:$0xf]  ;;  %v2187_v62 = vld [vmem:[%s2559_s8 + $0x54] sm:$0xf0]  ;;  %v1821_v1 = vor.u32 %v2186_v58, %v1820_v57 }
  0x91   : > { %1200 = vmatpush.bf16.msra.mxu1 %v2251_v18  ;;  %v2185_v63 = vld [vmem:[%s2559_s8 + $0x4c] sm:$0xf]  ;;  %v1830_v0 = vld [vmem:[%s2559_s8 + $0x58] sm:$0xf0]  ;;  %v1825_v2 = vor.u32 %v2184_v59, %v1822_v60  ;;  %v1829_v3 = vor.u32 %v2187_v62, %v1828_v61  ;;  %v1836_v5 = vld [vmem:[%s2559_s8 + $0x60] sm:$0xf] }
  0x92   : > { %1289 = vmatpush.bf16.msra.mxu2 %v2259_v19  ;;  %v1833_v4 = vor.u32 %v2185_v63, %v1830_v0  ;;  %v2190_v6 = vld [vmem:[%s2559_s8 + $0x6c] sm:$0xf0]  ;;  %v2188_v7 = vld [vmem:[%s2559_s8 + $0x64] sm:$0xf]  ;;  %v1838_v8 = vld [vmem:[%s2559_s8 + $0x70] sm:$0xf0] }
  0x93   : > { %1378 = vmatpush.bf16.msra.mxu3 %v2267_v20  ;;  %v1844_v9 = vld [vmem:[%s2559_s8 + $0x68] sm:$0xf]  ;;  %v2191_v10 = vld [vmem:[%s2559_s8 + $0x74] sm:$0xf0]  ;;  %v2189_v11 = vld [vmem:[%s2559_s8 + $0x6c] sm:$0xf]  ;;  %v1837_v13 = vor.u32 %v2190_v6, %v1836_v5  ;;  %v1841_v14 = vor.u32 %v2188_v7, %v1838_v8 }
  0x94   : > { %1112 = vmatpush.bf16.msra.mxu0 %v2242_v21  ;;  %v1846_v12 = vld [vmem:[%s2559_s8 + $0x78] sm:$0xf0]  ;;  %v1845_v15 = vor.u32 %v2191_v10, %v1844_v9  ;;  %v1852_v17 = vld [vmem:[%s2559_s8 + $0x80] sm:$0xf]  ;;  %v2194_v18 = vld [vmem:[%s2559_s8 + $0x8c] sm:$0xf0] }
  0x95   : > { %1201 = vmatpush.bf16.msra.mxu1 %v2250_v22  ;;  %v1849_v16 = vor.u32 %v2189_v11, %v1846_v12  ;;  %v2192_v19 = vld [vmem:[%s2559_s8 + $0x84] sm:$0xf]  ;;  %v1854_v20 = vld [vmem:[%s2559_s8 + $0x90] sm:$0xf0]  ;;  %v1860_v21 = vld [vmem:[%s2559_s8 + $0x88] sm:$0xf] }
  0x96   : > { %1290 = vmatpush.bf16.msra.mxu2 %v2258_v23  ;;  %v2195_v22 = vld [vmem:[%s2559_s8 + $0x94] sm:$0xf0]  ;;  %v2193_v23 = vld [vmem:[%s2559_s8 + $0x8c] sm:$0xf]  ;;  %v1876_v33 = vld [vmem:[%s2559_s8 + $0xa8] sm:$0xf] }
  0x97   : > { %1379 = vmatpush.bf16.msra.mxu3 %v2266_v24  ;;  %v1862_v24 = vld [vmem:[%s2559_s8 + $0x98] sm:$0xf0]  ;;  %v2199_v34 = vld [vmem:[%s2559_s8 + $0xb4] sm:$0xf0]  ;;  %v2197_v35 = vld [vmem:[%s2559_s8 + $0xac] sm:$0xf] }
  0x98   : > { %1113 = vmatpush.bf16.msra.mxu0 %v2241_v25  ;;  %v1853_v25 = vor.u32 %v2194_v18, %v1852_v17  ;;  %v1878_v36 = vld [vmem:[%s2559_s8 + $0xb8] sm:$0xf0]  ;;  %v1877_v39 = vor.u32 %v2199_v34, %v1876_v33  ;;  %v1892_v45 = vld [vmem:[%s2559_s8 + $0xc8] sm:$0xf]  ;;  %v2203_v46 = vld [vmem:[%s2559_s8 + $0xd4] sm:$0xf0] }
  0x99   : > { %1202 = vmatpush.bf16.msra.mxu1 %v2249_v26  ;;  %v1857_v26 = vor.u32 %v2192_v19, %v1854_v20  ;;  %v1881_v40 = vor.u32 %v2197_v35, %v1878_v36  ;;  %v2201_v47 = vld [vmem:[%s2559_s8 + $0xcc] sm:$0xf]  ;;  %v1894_v48 = vld [vmem:[%s2559_s8 + $0xd8] sm:$0xf0]  ;;  %v1893_v51 = vor.u32 %v2203_v46, %v1892_v45  ;;  %v1908_v57 = vld [vmem:[%s2559_s8 + $0xe8] sm:$0xf] }
  0x9a   : > { %1291 = vmatpush.bf16.msra.mxu2 %v2257_v27  ;;  %v1861_v27 = vor.u32 %v2195_v22, %v1860_v21  ;;  %v1897_v52 = vor.u32 %v2201_v47, %v1894_v48  ;;  %v2207_v58 = vld [vmem:[%s2559_s8 + $0xf4] sm:$0xf0]  ;;  %v2205_v59 = vld [vmem:[%s2559_s8 + $0xec] sm:$0xf]  ;;  %v1910_v60 = vld [vmem:[%s2559_s8 + $0xf8] sm:$0xf0] }
  0x9b   : > { %1380 = vmatpush.bf16.msra.mxu3 %v2265_v28  ;;  %v1865_v28 = vor.u32 %v2193_v23, %v1862_v24  ;;  %v1909_v63 = vor.u32 %v2207_v58, %v1908_v57  ;;  %v1913_v0 = vor.u32 %v2205_v59, %v1910_v60  ;;  %v1924_v5 = vld [vmem:[%s2559_s8 + $0x108] sm:$0xf]  ;;  %v2211_v6 = vld [vmem:[%s2559_s8 + $0x114] sm:$0xf0]  ;;  %v2209_v7 = vld [vmem:[%s2559_s8 + $0x10c] sm:$0xf] }
  0x9c   : > { %1114 = vmatpush.bf16.msra.mxu0 %v2240_v29  ;;  %v1868_v29 = vld [vmem:[%s2559_s8 + $0xa0] sm:$0xf]  ;;  %v1926_v8 = vld [vmem:[%s2559_s8 + $0x118] sm:$0xf0]  ;;  %v435_v21 = vld [vmem:[#allocation2 + $0xb0] sm:$0xff] }
  0x9d   : > { %1203 = vmatpush.bf16.msra.mxu1 %v2248_v30  ;;  %v2198_v30 = vld [vmem:[%s2559_s8 + $0xac] sm:$0xf0]  ;;  %v1932_v23 = vld [vmem:[%s2559_s8 + $0x120] sm:$0xf]  ;;  %v1950_v57 = vld [vmem:[%s2559_s8 + $0x150] sm:$0xf0] }
  0x9e   : > { %1292 = vmatpush.bf16.msra.mxu2 %v2256_v31  ;;  %v2196_v31 = vld [vmem:[%s2559_s8 + $0xa4] sm:$0xf]  ;;  %v1869_v37 = vor.u32 %v2198_v30, %v1868_v29  ;;  %v2214_v24 = vld [vmem:[%s2559_s8 + $0x12c] sm:$0xf0]  ;;  %v2215_v29 = vld [vmem:[%s2559_s8 + $0x134] sm:$0xf0] }
  0x9f   : > { %1381 = vmatpush.bf16.msra.mxu3 %v2264_v32  ;;  %1115 = vmatmul.bf16.vlgmr.msra.gmra.mxu0 %v1789_v41  ;;  %v1870_v32 = vld [vmem:[%s2559_s8 + $0xb0] sm:$0xf0]  ;;  %v1884_v41 = vld [vmem:[%s2559_s8 + $0xc0] sm:$0xf]  ;;  %v2213_v30 = vld [vmem:[%s2559_s8 + $0x12c] sm:$0xf]  ;;  %v1933_v35 = vor.u32 %v2214_v24, %v1932_v23 }
  0xa0   : > { %1204 = vmatmul.bf16.vlgmr.msra.gmra.mxu1 %v1793_v42  ;;  %v1873_v38 = vor.u32 %v2196_v31, %v1870_v32  ;;  %v2202_v42 = vld [vmem:[%s2559_s8 + $0xcc] sm:$0xf0]  ;;  %v1942_v31 = vld [vmem:[%s2559_s8 + $0x138] sm:$0xf0]  ;;  %v1956_v58 = vld [vmem:[%s2559_s8 + $0x148] sm:$0xf] }
  0xa1   : > { %1293 = vmatmul.bf16.vlgmr.msra.gmra.mxu2 %v1797_v43  ;;  %v2200_v43 = vld [vmem:[%s2559_s8 + $0xc4] sm:$0xf]  ;;  %v1885_v49 = vor.u32 %v2202_v42, %v1884_v41  ;;  %v1945_v41 = vor.u32 %v2213_v30, %v1942_v31  ;;  %v2219_v59 = vld [vmem:[%s2559_s8 + $0x154] sm:$0xf0]  ;;  %v2217_v60 = vld [vmem:[%s2559_s8 + $0x14c] sm:$0xf] }
  0xa2   : > { %1382 = vmatmul.bf16.vlgmr.msra.gmra.mxu3 %v1801_v44  ;;  %v1886_v44 = vld [vmem:[%s2559_s8 + $0xd0] sm:$0xf0]  ;;  %v436_v42 = vld [vmem:[#allocation2] sm:$0xff]  ;;  %v1972_v24 = vld [vmem:[%s2559_s8 + $0x168] sm:$0xf] }
  0xa3   : > { %v1889_v50 = vor.u32 %v2200_v43, %v1886_v44  ;;  %v1966_v23 = vld [vmem:[%s2559_s8 + $0x170] sm:$0xf0] }
  0xaf   : > { %1120 = vmatmul.bf16.gmra.mxu0 %v1805_v53  ;;  %v1900_v53 = vld [vmem:[%s2559_s8 + $0xe0] sm:$0xf] }
  0xb0   : > { %1209 = vmatmul.bf16.gmra.mxu1 %v1809_v54  ;;  %v2206_v54 = vld [vmem:[%s2559_s8 + $0xec] sm:$0xf0] }
  0xb1   : > { %1298 = vmatmul.bf16.gmra.mxu2 %v1813_v55  ;;  %v2204_v55 = vld [vmem:[%s2559_s8 + $0xe4] sm:$0xf]  ;;  %v1901_v61 = vor.u32 %v2206_v54, %v1900_v53  ;;  %v1948_v53 = vld [vmem:[%s2559_s8 + $0x140] sm:$0xf]  ;;  %v2218_v54 = vld [vmem:[%s2559_s8 + $0x14c] sm:$0xf0] }
  0xb2   : > { %1387 = vmatmul.bf16.gmra.mxu3 %v1817_v56  ;;  %v1902_v56 = vld [vmem:[%s2559_s8 + $0xf0] sm:$0xf0] }
  0xb3   : > { %v1905_v62 = vor.u32 %v2204_v55, %v1902_v56  ;;  %v2216_v56 = vld [vmem:[%s2559_s8 + $0x144] sm:$0xf] }
  0xbf   : > { %1125 = vmatmul.bf16.gmra.mxu0 %v1821_v1  ;;  %v1916_v1 = vld [vmem:[%s2559_s8 + $0x100] sm:$0xf] }
  0xc0   : > { %1214 = vmatmul.bf16.gmra.mxu1 %v1825_v2  ;;  %v2210_v2 = vld [vmem:[%s2559_s8 + $0x10c] sm:$0xf0] }
  0xc1   : > { %1303 = vmatmul.bf16.gmra.mxu2 %v1829_v3  ;;  %v2208_v3 = vld [vmem:[%s2559_s8 + $0x104] sm:$0xf]  ;;  %v1917_v9 = vor.u32 %v2210_v2, %v1916_v1  ;;  %v1949_v1 = vor.u32 %v2218_v54, %v1948_v53  ;;  %v1953_v2 = vor.u32 %v2216_v56, %v1950_v57  ;;  %v1982_v53 = vld [vmem:[%s2559_s8 + $0x190] sm:$0xf0]  ;;  %v1988_v54 = vld [vmem:[%s2559_s8 + $0x188] sm:$0xf] }
  0xc2   : > { %1392 = vmatmul.bf16.gmra.mxu3 %v1833_v4  ;;  %v1918_v4 = vld [vmem:[%s2559_s8 + $0x110] sm:$0xf0]  ;;  %v2225_v56 = vld [vmem:[%s2559_s8 + $0x18c] sm:$0xf]  ;;  %v1990_v57 = vld [vmem:[%s2559_s8 + $0x198] sm:$0xf0] }
  0xc3   : > { %v1921_v10 = vor.u32 %v2208_v3, %v1918_v4 }
  0xcf   : > { %1130 = vmatmul.bf16.gmra.mxu0 %v1837_v13  ;;  %v1925_v13 = vor.u32 %v2211_v6, %v1924_v5  ;;  %v1957_v6 = vor.u32 %v2219_v59, %v1956_v58 }
  0xd0   : > { %1219 = vmatmul.bf16.gmra.mxu1 %v1841_v14  ;;  %v1929_v14 = vor.u32 %v2209_v7, %v1926_v8  ;;  %v438_v8 = vld [vmem:[#allocation2 + $0x18] sm:$0xff] }
  0xd1   : > { %1308 = vmatmul.bf16.gmra.mxu2 %v1845_v15 }
  0xd2   : > { %1397 = vmatmul.bf16.gmra.mxu3 %v1849_v16 }
  0xdf   : > { %1135 = vmatmul.bf16.gmra.mxu0 %v1853_v25 }
  0xe0   : > { %1224 = vmatmul.bf16.gmra.mxu1 %v1857_v26  ;;  %v2212_v26 = vld [vmem:[%s2559_s8 + $0x124] sm:$0xf] }
  0xe1   : > { %1313 = vmatmul.bf16.gmra.mxu2 %v1861_v27  ;;  %v1934_v27 = vld [vmem:[%s2559_s8 + $0x130] sm:$0xf0] }
  0xe2   : > { %1402 = vmatmul.bf16.gmra.mxu3 %v1865_v28  ;;  %v1940_v28 = vld [vmem:[%s2559_s8 + $0x128] sm:$0xf]  ;;  %v1937_v36 = vor.u32 %v2212_v26, %v1934_v27  ;;  %v2221_v26 = vld [vmem:[%s2559_s8 + $0x16c] sm:$0xf]  ;;  %v1974_v27 = vld [vmem:[%s2559_s8 + $0x178] sm:$0xf0] }
  0xef   : > { %1140 = vmatmul.bf16.gmra.mxu0 %v1869_v37 }
  0xf0   : > { %1229 = vmatmul.bf16.gmra.mxu1 %v1873_v38 }
  0xf1   : > { %1318 = vmatmul.bf16.gmra.mxu2 %v1877_v39 }
  0xf2   : > { %1407 = vmatmul.bf16.gmra.mxu3 %v1881_v40  ;;  %v1941_v40 = vor.u32 %v2215_v29, %v1940_v28 }
  0xff   : > { %1145 = vmatmul.bf16.gmra.mxu0 %v1885_v49 }
 0x100   : > { %1234 = vmatmul.bf16.gmra.mxu1 %v1889_v50 }
 0x101   : > { %1323 = vmatmul.bf16.gmra.mxu2 %v1893_v51  ;;  %v437_v51 = vld [vmem:[#allocation2 + $0xd8] sm:$0xff] }
 0x102   : > { %1412 = vmatmul.bf16.gmra.mxu3 %v1897_v52 }
 0x10f   : > { %1150 = vmatmul.bf16.gmra.mxu0 %v1901_v61  ;;  %v1958_v61 = vld [vmem:[%s2559_s8 + $0x158] sm:$0xf0] }
 0x110   : > { %1239 = vmatmul.bf16.gmra.mxu1 %v1905_v62  ;;  %v1961_v7 = vor.u32 %v2217_v60, %v1958_v61 }
 0x111   : > { %1328 = vmatmul.bf16.gmra.mxu2 %v1909_v63 }
 0x112   : > { %1417 = vmatmul.bf16.gmra.mxu3 %v1913_v0 }
 0x11c   : > { %v1116_v11 = vpop.f32.mrf.mxu0 }
 0x11d   : > { %v1205_v12 = vpop.f32.mrf.mxu1 }
 0x11e   : > { %v1206_v15 = vadd.f32 %v1205_v12, %v1116_v11 }
 0x11f   : > { %1155 = vmatmul.bf16.gmra.mxu0 %v1917_v9 }
 0x120   : > { %1244 = vmatmul.bf16.gmra.mxu1 %v1921_v10 }
 0x121   : > { %1333 = vmatmul.bf16.gmra.mxu2 %v1925_v13 }
 0x122   : > { %1422 = vmatmul.bf16.gmra.mxu3 %v1929_v14 }
 0x124   : > { %v1294_v16 = vpop.f32.mrf.mxu2  ;;  %v1118_v19 = vpop.f32.mrf.mxu0 }
 0x125   : > { %v1383_v17 = vpop.f32.mrf.mxu3  ;;  %v1295_v18 = vadd.f32 %v1294_v16, %v1206_v15  ;;  %v1207_v20 = vpop.f32.mrf.mxu1 }
 0x126   : > { %v1208_v32 = vadd.f32 %v1207_v20, %v1118_v19  ;;  %v1964_v19 = vld [vmem:[%s2559_s8 + $0x160] sm:$0xf]  ;;  %v2222_v20 = vld [vmem:[%s2559_s8 + $0x16c] sm:$0xf0] }
 0x127   : > { %v1384_v22 = vadd.f32 %v1383_v17, %v1295_v18  ;;  %v439_v17 = vld [vmem:[#allocation2 + $0x50] sm:$0xff]  ;;  %v1965_v31 = vor.u32 %v2222_v20, %v1964_v19  ;;  %v2004_v20 = vld [vmem:[%s2559_s8 + $0x1a8] sm:$0xf] }
 0x128   : > { %v1998_v19 = vld [vmem:[%s2559_s8 + $0x1b0] sm:$0xf0] }
 0x129   : > { %v1463_v25 = vadd.f32 %v1384_v22, %v435_v21  ;;  %v2220_v22 = vld [vmem:[%s2559_s8 + $0x164] sm:$0xf] }
 0x12b   : > { %1495 = vst [vmem:[#allocation2 + $0xb0] sm:$0xff] %v1463_v25  ;;  %v2223_v25 = vld [vmem:[%s2559_s8 + $0x174] sm:$0xf0] }
 0x12c   : > { %v1296_v33 = vpop.f32.mrf.mxu2  ;;  %v1121_v38 = vpop.f32.mrf.mxu0 }
 0x12d   : > { %v1385_v34 = vpop.f32.mrf.mxu3  ;;  %v1297_v37 = vadd.f32 %v1296_v33, %v1208_v32  ;;  %v1210_v39 = vpop.f32.mrf.mxu1  ;;  %v1969_v32 = vor.u32 %v2220_v22, %v1966_v23  ;;  %v2229_v22 = vld [vmem:[%s2559_s8 + $0x1ac] sm:$0xf]  ;;  %v2006_v23 = vld [vmem:[%s2559_s8 + $0x1b8] sm:$0xf0] }
 0x12e   : > { %v1211_v45 = vadd.f32 %v1210_v39, %v1121_v38  ;;  %v440_v38 = vld [vmem:[#allocation2 + $0x68] sm:$0xff] }
 0x12f   : > { %v1386_v43 = vadd.f32 %v1385_v34, %v1297_v37  ;;  %1160 = vmatmul.bf16.gmra.mxu0 %v1933_v35  ;;  %v1977_v37 = vor.u32 %v2221_v26, %v1974_v27 }
 0x130   : > { %1249 = vmatmul.bf16.gmra.mxu1 %v1937_v36  ;;  %v1973_v36 = vor.u32 %v2223_v25, %v1972_v24 }
 0x131   : > { %v1464_v44 = vadd.f32 %v1386_v43, %v436_v42  ;;  %1338 = vmatmul.bf16.gmra.mxu2 %v1941_v40 }
 0x132   : > { %1427 = vmatmul.bf16.gmra.mxu3 %v1945_v41 }
 0x133   : > { %1496 = vst [vmem:[#allocation2] sm:$0xff] %v1464_v44 }
 0x134   : > { %v1299_v46 = vpop.f32.mrf.mxu2  ;;  %v1123_v49 = vpop.f32.mrf.mxu0 }
 0x135   : > { %v1388_v47 = vpop.f32.mrf.mxu3  ;;  %v1300_v48 = vadd.f32 %v1299_v46, %v1211_v45  ;;  %v1212_v50 = vpop.f32.mrf.mxu1 }
 0x136   : > { %v1213_v62 = vadd.f32 %v1212_v50, %v1123_v49  ;;  %v1980_v49 = vld [vmem:[%s2559_s8 + $0x180] sm:$0xf]  ;;  %v2226_v50 = vld [vmem:[%s2559_s8 + $0x18c] sm:$0xf0] }
 0x137   : > { %v1389_v52 = vadd.f32 %v1388_v47, %v1300_v48  ;;  %v441_v47 = vld [vmem:[#allocation2 + $0x30] sm:$0xff]  ;;  %v1981_v61 = vor.u32 %v2226_v50, %v1980_v49  ;;  %v2020_v50 = vld [vmem:[%s2559_s8 + $0x1c8] sm:$0xf] }
 0x138   : > { %v2014_v49 = vld [vmem:[%s2559_s8 + $0x1d0] sm:$0xf0] }
 0x139   : > { %v1465_v55 = vadd.f32 %v1389_v52, %v437_v51  ;;  %v2224_v52 = vld [vmem:[%s2559_s8 + $0x184] sm:$0xf] }
 0x13b   : > { %1497 = vst [vmem:[#allocation2 + $0xd8] sm:$0xff] %v1465_v55  ;;  %v2227_v55 = vld [vmem:[%s2559_s8 + $0x194] sm:$0xf0] }
 0x13c   : > { %v1301_v63 = vpop.f32.mrf.mxu2  ;;  %v1126_v4 = vpop.f32.mrf.mxu0 }
 0x13d   : > { %v1390_v0 = vpop.f32.mrf.mxu3  ;;  %v1302_v3 = vadd.f32 %v1301_v63, %v1213_v62  ;;  %v1215_v5 = vpop.f32.mrf.mxu1  ;;  %v1985_v62 = vor.u32 %v2224_v52, %v1982_v53  ;;  %v2233_v52 = vld [vmem:[%s2559_s8 + $0x1cc] sm:$0xf]  ;;  %v2022_v53 = vld [vmem:[%s2559_s8 + $0x1d8] sm:$0xf0] }
 0x13e   : > { %v1216_v11 = vadd.f32 %v1215_v5, %v1126_v4  ;;  %v442_v4 = vld [vmem:[#allocation2 + $0x48] sm:$0xff] }
 0x13f   : > { %v1391_v9 = vadd.f32 %v1390_v0, %v1302_v3  ;;  %1165 = vmatmul.bf16.gmra.mxu0 %v1949_v1  ;;  %v1993_v3 = vor.u32 %v2225_v56, %v1990_v57 }
 0x140   : > { %1254 = vmatmul.bf16.gmra.mxu1 %v1953_v2  ;;  %v1989_v2 = vor.u32 %v2227_v55, %v1988_v54 }
 0x141   : > { %v1466_v10 = vadd.f32 %v1391_v9, %v438_v8  ;;  %1343 = vmatmul.bf16.gmra.mxu2 %v1957_v6 }
 0x142   : > { %1432 = vmatmul.bf16.gmra.mxu3 %v1961_v7 }
 0x143   : > { %1498 = vst [vmem:[#allocation2 + $0x18] sm:$0xff] %v1466_v10 }
 0x144   : > { %v1304_v12 = vpop.f32.mrf.mxu2  ;;  %v1128_v15 = vpop.f32.mrf.mxu0 }
 0x145   : > { %v1393_v13 = vpop.f32.mrf.mxu3  ;;  %v1305_v14 = vadd.f32 %v1304_v12, %v1216_v11  ;;  %v1217_v16 = vpop.f32.mrf.mxu1 }
 0x146   : > { %v1218_v28 = vadd.f32 %v1217_v16, %v1128_v15  ;;  %v1996_v15 = vld [vmem:[%s2559_s8 + $0x1a0] sm:$0xf]  ;;  %v2230_v16 = vld [vmem:[%s2559_s8 + $0x1ac] sm:$0xf0] }
 0x147   : > { %v1394_v18 = vadd.f32 %v1393_v13, %v1305_v14  ;;  %v443_v13 = vld [vmem:[#allocation2 + $0x80] sm:$0xff]  ;;  %v1997_v27 = vor.u32 %v2230_v16, %v1996_v15  ;;  %v2030_v15 = vld [vmem:[%s2559_s8 + $0x1f0] sm:$0xf0]  ;;  %v2036_v16 = vld [vmem:[%s2559_s8 + $0x1e8] sm:$0xf] }
 0x149   : > { %v1467_v21 = vadd.f32 %v1394_v18, %v439_v17  ;;  %v2228_v18 = vld [vmem:[%s2559_s8 + $0x1a4] sm:$0xf] }
 0x14b   : > { %1499 = vst [vmem:[#allocation2 + $0x50] sm:$0xff] %v1467_v21  ;;  %v2231_v21 = vld [vmem:[%s2559_s8 + $0x1b4] sm:$0xf0] }
 0x14c   : > { %v1306_v29 = vpop.f32.mrf.mxu2  ;;  %v1131_v34 = vpop.f32.mrf.mxu0 }
 0x14d   : > { %v1395_v30 = vpop.f32.mrf.mxu3  ;;  %v1307_v33 = vadd.f32 %v1306_v29, %v1218_v28  ;;  %v1220_v35 = vpop.f32.mrf.mxu1  ;;  %v2001_v28 = vor.u32 %v2228_v18, %v1998_v19  ;;  %v2237_v18 = vld [vmem:[%s2559_s8 + $0x1ec] sm:$0xf]  ;;  %v2038_v19 = vld [vmem:[%s2559_s8 + $0x1f8] sm:$0xf0] }
 0x14e   : > { %v1221_v41 = vadd.f32 %v1220_v35, %v1131_v34  ;;  %v444_v34 = vld [vmem:[#allocation2 + $0x88] sm:$0xff] }
 0x14f   : > { %v1396_v39 = vadd.f32 %v1395_v30, %v1307_v33  ;;  %1170 = vmatmul.bf16.gmra.mxu0 %v1965_v31  ;;  %v2009_v33 = vor.u32 %v2229_v22, %v2006_v23 }
 0x150   : > { %1259 = vmatmul.bf16.gmra.mxu1 %v1969_v32  ;;  %v2005_v32 = vor.u32 %v2231_v21, %v2004_v20 }
 0x151   : > { %v1468_v40 = vadd.f32 %v1396_v39, %v440_v38  ;;  %1348 = vmatmul.bf16.gmra.mxu2 %v1973_v36 }
 0x152   : > { %1437 = vmatmul.bf16.gmra.mxu3 %v1977_v37 }
 0x153   : > { %1500 = vst [vmem:[#allocation2 + $0x68] sm:$0xff] %v1468_v40 }
 0x154   : > { %v1309_v42 = vpop.f32.mrf.mxu2  ;;  %v1133_v45 = vpop.f32.mrf.mxu0 }
 0x155   : > { %v1398_v43 = vpop.f32.mrf.mxu3  ;;  %v1310_v44 = vadd.f32 %v1309_v42, %v1221_v41  ;;  %v1222_v46 = vpop.f32.mrf.mxu1 }
 0x156   : > { %v1223_v58 = vadd.f32 %v1222_v46, %v1133_v45  ;;  %v2012_v45 = vld [vmem:[%s2559_s8 + $0x1c0] sm:$0xf]  ;;  %v2234_v46 = vld [vmem:[%s2559_s8 + $0x1cc] sm:$0xf0] }
 0x157   : > { %v1399_v48 = vadd.f32 %v1398_v43, %v1310_v44  ;;  %v445_v43 = vld [vmem:[#allocation2 + $0xe8] sm:$0xff]  ;;  %v2013_v57 = vor.u32 %v2234_v46, %v2012_v45 }
 0x159   : > { %v1469_v51 = vadd.f32 %v1399_v48, %v441_v47  ;;  %v2232_v48 = vld [vmem:[%s2559_s8 + $0x1c4] sm:$0xf] }
 0x15b   : > { %1501 = vst [vmem:[#allocation2 + $0x30] sm:$0xff] %v1469_v51  ;;  %v2235_v51 = vld [vmem:[%s2559_s8 + $0x1d4] sm:$0xf0] }
 0x15c   : > { %v1311_v59 = vpop.f32.mrf.mxu2  ;;  %v1136_v0 = vpop.f32.mrf.mxu0 }
 0x15d   : > { %v1400_v60 = vpop.f32.mrf.mxu3  ;;  %v1312_v63 = vadd.f32 %v1311_v59, %v1223_v58  ;;  %v1225_v1 = vpop.f32.mrf.mxu1  ;;  %v2017_v58 = vor.u32 %v2232_v48, %v2014_v49  ;;  %v450_v48 = vld [vmem:[#allocation2 + $0x78] sm:$0xff] }
 0x15e   : > { %v1226_v7 = vadd.f32 %v1225_v1, %v1136_v0  ;;  %v446_v0 = vld [vmem:[#allocation2 + $0xb8] sm:$0xff] }
 0x15f   : > { %v1401_v5 = vadd.f32 %v1400_v60, %v1312_v63  ;;  %1175 = vmatmul.bf16.gmra.mxu0 %v1981_v61  ;;  %v2025_v63 = vor.u32 %v2233_v52, %v2022_v53 }
 0x160   : > { %1264 = vmatmul.bf16.gmra.mxu1 %v1985_v62  ;;  %v2021_v62 = vor.u32 %v2235_v51, %v2020_v50 }
 0x161   : > { %v1470_v6 = vadd.f32 %v1401_v5, %v442_v4  ;;  %1353 = vmatmul.bf16.gmra.mxu2 %v1989_v2 }
 0x162   : > { %1442 = vmatmul.bf16.gmra.mxu3 %v1993_v3 }
 0x163   : > { %1502 = vst [vmem:[#allocation2 + $0x48] sm:$0xff] %v1470_v6 }
 0x164   : > { %v1314_v8 = vpop.f32.mrf.mxu2  ;;  %v1138_v11 = vpop.f32.mrf.mxu0 }
 0x165   : > { %v1403_v9 = vpop.f32.mrf.mxu3  ;;  %v1315_v10 = vadd.f32 %v1314_v8, %v1226_v7  ;;  %v1227_v12 = vpop.f32.mrf.mxu1 }
 0x166   : > { %v1228_v24 = vadd.f32 %v1227_v12, %v1138_v11  ;;  %v2028_v11 = vld [vmem:[%s2559_s8 + $0x1e0] sm:$0xf]  ;;  %v2238_v12 = vld [vmem:[%s2559_s8 + $0x1ec] sm:$0xf0] }
 0x167   : > { %v1404_v14 = vadd.f32 %v1403_v9, %v1315_v10  ;;  %v447_v9 = vld [vmem:[#allocation2 + $0x60] sm:$0xff]  ;;  %v2029_v23 = vor.u32 %v2238_v12, %v2028_v11 }
 0x168   : > { %v453_v11 = vld [vmem:[#allocation2 + $0x40] sm:$0xff] }
 0x169   : > { %v1471_v17 = vadd.f32 %v1404_v14, %v443_v13  ;;  %v2236_v14 = vld [vmem:[%s2559_s8 + $0x1e4] sm:$0xf] }
 0x16b   : > { %1503 = vst [vmem:[#allocation2 + $0x80] sm:$0xff] %v1471_v17  ;;  %v2239_v17 = vld [vmem:[%s2559_s8 + $0x1f4] sm:$0xf0] }
 0x16c   : > { %v1316_v25 = vpop.f32.mrf.mxu2  ;;  %v1141_v30 = vpop.f32.mrf.mxu0 }
 0x16d   : > { %v1405_v26 = vpop.f32.mrf.mxu3  ;;  %v1317_v29 = vadd.f32 %v1316_v25, %v1228_v24  ;;  %v1230_v31 = vpop.f32.mrf.mxu1  ;;  %v2033_v24 = vor.u32 %v2236_v14, %v2030_v15 }
 0x16e   : > { %v1231_v37 = vadd.f32 %v1230_v31, %v1141_v30  ;;  %v448_v30 = vld [vmem:[#allocation2 + $0xf0] sm:$0xff] }
 0x16f   : > { %v1406_v35 = vadd.f32 %v1405_v26, %v1317_v29  ;;  %1180 = vmatmul.bf16.gmra.mxu0 %v1997_v27  ;;  %v2041_v29 = vor.u32 %v2237_v18, %v2038_v19 }
 0x170   : > { %1269 = vmatmul.bf16.gmra.mxu1 %v2001_v28  ;;  %v2037_v28 = vor.u32 %v2239_v17, %v2036_v16 }
 0x171   : > { %v1472_v36 = vadd.f32 %v1406_v35, %v444_v34  ;;  %1358 = vmatmul.bf16.gmra.mxu2 %v2005_v32 }
 0x172   : > { %1447 = vmatmul.bf16.gmra.mxu3 %v2009_v33 }
 0x173   : > { %1504 = vst [vmem:[#allocation2 + $0x88] sm:$0xff] %v1472_v36 }
 0x174   : > { %v1319_v38 = vpop.f32.mrf.mxu2  ;;  %v1143_v41 = vpop.f32.mrf.mxu0 }
 0x175   : > { %v1408_v39 = vpop.f32.mrf.mxu3  ;;  %v1320_v40 = vadd.f32 %v1319_v38, %v1231_v37  ;;  %v1232_v42 = vpop.f32.mrf.mxu1 }
 0x176   : > { %v1233_v54 = vadd.f32 %v1232_v42, %v1143_v41 }
 0x177   : > { %v1409_v44 = vadd.f32 %v1408_v39, %v1320_v40  ;;  %v449_v39 = vld [vmem:[#allocation2 + $0x8] sm:$0xff] }
 0x179   : > { %v1473_v47 = vadd.f32 %v1409_v44, %v445_v43 }
 0x17b   : > { %1505 = vst [vmem:[#allocation2 + $0xe8] sm:$0xff] %v1473_v47 }
 0x17c   : > { %v1321_v55 = vpop.f32.mrf.mxu2  ;;  %v1146_v60 = vpop.f32.mrf.mxu0 }
 0x17d   : > { %v1410_v56 = vpop.f32.mrf.mxu3  ;;  %v1322_v59 = vadd.f32 %v1321_v55, %v1233_v54  ;;  %v1235_v61 = vpop.f32.mrf.mxu1 }
 0x17e   : > { %v1236_v3 = vadd.f32 %v1235_v61, %v1146_v60 }
 0x17f   : > { %v1411_v1 = vadd.f32 %v1410_v56, %v1322_v59  ;;  %1185 = vmatmul.bf16.gmra.mxu0 %v2013_v57  ;;  %v451_v57 = vld [vmem:[#allocation2 + $0x38] sm:$0xff] }
 0x180   : > { %1274 = vmatmul.bf16.gmra.mxu1 %v2017_v58 }
 0x181   : > { %v1474_v2 = vadd.f32 %v1411_v1, %v446_v0  ;;  %1363 = vmatmul.bf16.gmra.mxu2 %v2021_v62 }
 0x182   : > { %1452 = vmatmul.bf16.gmra.mxu3 %v2025_v63 }
 0x183   : > { %1506 = vst [vmem:[#allocation2 + $0xb8] sm:$0xff] %v1474_v2  ;;  %v452_v2 = vld [vmem:[#allocation2 + $0x58] sm:$0xff] }
 0x184   : > { %v1324_v4 = vpop.f32.mrf.mxu2  ;;  %v1148_v7 = vpop.f32.mrf.mxu0 }
 0x185   : > { %v1413_v5 = vpop.f32.mrf.mxu3  ;;  %v1325_v6 = vadd.f32 %v1324_v4, %v1236_v3  ;;  %v1237_v8 = vpop.f32.mrf.mxu1 }
 0x186   : > { %v1238_v20 = vadd.f32 %v1237_v8, %v1148_v7 }
 0x187   : > { %v1414_v10 = vadd.f32 %v1413_v5, %v1325_v6 }
 0x189   : > { %v1475_v13 = vadd.f32 %v1414_v10, %v447_v9 }
 0x18b   : > { %1507 = vst [vmem:[#allocation2 + $0x60] sm:$0xff] %v1475_v13 }
 0x18c   : > { %v1326_v21 = vpop.f32.mrf.mxu2  ;;  %v1151_v26 = vpop.f32.mrf.mxu0 }
 0x18d   : > { %v1415_v22 = vpop.f32.mrf.mxu3  ;;  %v1327_v25 = vadd.f32 %v1326_v21, %v1238_v20  ;;  %v1240_v27 = vpop.f32.mrf.mxu1  ;;  %v454_v20 = vld [vmem:[#allocation2 + $0xc8] sm:$0xff] }
 0x18e   : > { %v1241_v33 = vadd.f32 %v1240_v27, %v1151_v26 }
 0x18f   : > { %v1416_v31 = vadd.f32 %v1415_v22, %v1327_v25  ;;  %1190 = vmatmul.bf16.gmra.mxu0 %v2029_v23 }
 0x190   : > { %1279 = vmatmul.bf16.gmra.mxu1 %v2033_v24 }
 0x191   : > { %v1476_v32 = vadd.f32 %v1416_v31, %v448_v30  ;;  %1368 = vmatmul.bf16.gmra.mxu2 %v2037_v28 }
 0x192   : > { %1457 = vmatmul.bf16.gmra.mxu3 %v2041_v29  ;;  %v455_v29 = vld [vmem:[#allocation2 + $0xe0] sm:$0xff] }
 0x193   : > { %1508 = vst [vmem:[#allocation2 + $0xf0] sm:$0xff] %v1476_v32 }
 0x194   : > { %v1329_v34 = vpop.f32.mrf.mxu2  ;;  %v1153_v37 = vpop.f32.mrf.mxu0 }
 0x195   : > { %v1418_v35 = vpop.f32.mrf.mxu3  ;;  %v1330_v36 = vadd.f32 %v1329_v34, %v1241_v33  ;;  %v1242_v38 = vpop.f32.mrf.mxu1 }
 0x196   : > { %v1243_v42 = vadd.f32 %v1242_v38, %v1153_v37  ;;  %v456_v38 = vld [vmem:[#allocation2 + $0x90] sm:$0xff] }
 0x197   : > { %v1419_v40 = vadd.f32 %v1418_v35, %v1330_v36 }
 0x199   : > { %v1477_v41 = vadd.f32 %v1419_v40, %v449_v39 }
 0x19b   : > { %1509 = vst [vmem:[#allocation2 + $0x8] sm:$0xff] %v1477_v41 }
 0x19c   : > { %v1331_v43 = vpop.f32.mrf.mxu2  ;;  %v1156_v46 = vpop.f32.mrf.mxu0 }
 0x19d   : > { %v1420_v44 = vpop.f32.mrf.mxu3  ;;  %v1332_v45 = vadd.f32 %v1331_v43, %v1243_v42  ;;  %v1245_v47 = vpop.f32.mrf.mxu1 }
 0x19e   : > { %v1246_v51 = vadd.f32 %v1245_v47, %v1156_v46  ;;  %v457_v47 = vld [vmem:[#allocation2 + $0x70] sm:$0xff] }
 0x19f   : > { %v1421_v49 = vadd.f32 %v1420_v44, %v1332_v45 }
 0x1a1   : > { %v1478_v50 = vadd.f32 %v1421_v49, %v450_v48 }
 0x1a3   : > { %1510 = vst [vmem:[#allocation2 + $0x78] sm:$0xff] %v1478_v50 }
 0x1a4   : > { %v1334_v52 = vpop.f32.mrf.mxu2  ;;  %v1158_v55 = vpop.f32.mrf.mxu0 }
 0x1a5   : > { %v1423_v53 = vpop.f32.mrf.mxu3  ;;  %v1335_v54 = vadd.f32 %v1334_v52, %v1246_v51  ;;  %v1247_v56 = vpop.f32.mrf.mxu1 }
 0x1a6   : > { %v1248_v60 = vadd.f32 %v1247_v56, %v1158_v55  ;;  %v458_v56 = vld [vmem:[#allocation2 + $0xc0] sm:$0xff] }
 0x1a7   : > { %v1424_v58 = vadd.f32 %v1423_v53, %v1335_v54 }
 0x1a9   : > { %v1479_v59 = vadd.f32 %v1424_v58, %v451_v57 }
 0x1ab   : > { %1511 = vst [vmem:[#allocation2 + $0x38] sm:$0xff] %v1479_v59 }
 0x1ac   : > { %v1336_v61 = vpop.f32.mrf.mxu2  ;;  %v1161_v0 = vpop.f32.mrf.mxu0 }
 0x1ad   : > { %v1425_v62 = vpop.f32.mrf.mxu3  ;;  %v1337_v63 = vadd.f32 %v1336_v61, %v1248_v60  ;;  %v1250_v1 = vpop.f32.mrf.mxu1 }
 0x1ae   : > { %v1251_v5 = vadd.f32 %v1250_v1, %v1161_v0  ;;  %v459_v1 = vld [vmem:[#allocation2 + $0xa8] sm:$0xff] }
 0x1af   : > { %v1426_v3 = vadd.f32 %v1425_v62, %v1337_v63 }
 0x1b1   : > { %v1480_v4 = vadd.f32 %v1426_v3, %v452_v2 }
 0x1b3   : > { %1512 = vst [vmem:[#allocation2 + $0x58] sm:$0xff] %v1480_v4 }
 0x1b4   : > { %v1339_v6 = vpop.f32.mrf.mxu2  ;;  %v1163_v9 = vpop.f32.mrf.mxu0 }
 0x1b5   : > { %v1428_v7 = vpop.f32.mrf.mxu3  ;;  %v1340_v8 = vadd.f32 %v1339_v6, %v1251_v5  ;;  %v1252_v10 = vpop.f32.mrf.mxu1 }
 0x1b6   : > { %v1253_v14 = vadd.f32 %v1252_v10, %v1163_v9  ;;  %v460_v10 = vld [vmem:[#allocation2 + $0xd0] sm:$0xff] }
 0x1b7   : > { %v1429_v12 = vadd.f32 %v1428_v7, %v1340_v8 }
 0x1b9   : > { %v1481_v13 = vadd.f32 %v1429_v12, %v453_v11 }
 0x1bb   : > { %1513 = vst [vmem:[#allocation2 + $0x40] sm:$0xff] %v1481_v13 }
 0x1bc   : > { %v1341_v15 = vpop.f32.mrf.mxu2  ;;  %v1166_v18 = vpop.f32.mrf.mxu0 }
 0x1bd   : > { %v1430_v16 = vpop.f32.mrf.mxu3  ;;  %v1342_v17 = vadd.f32 %v1341_v15, %v1253_v14  ;;  %v1255_v19 = vpop.f32.mrf.mxu1 }
 0x1be   : > { %v1256_v23 = vadd.f32 %v1255_v19, %v1166_v18  ;;  %v461_v19 = vld [vmem:[#allocation2 + $0x10] sm:$0xff] }
 0x1bf   : > { %v1431_v21 = vadd.f32 %v1430_v16, %v1342_v17 }
 0x1c1   : > { %v1482_v22 = vadd.f32 %v1431_v21, %v454_v20 }
 0x1c3   : > { %1514 = vst [vmem:[#allocation2 + $0xc8] sm:$0xff] %v1482_v22 }
 0x1c4   : > { %v1344_v24 = vpop.f32.mrf.mxu2  ;;  %v1168_v27 = vpop.f32.mrf.mxu0 }
 0x1c5   : > { %v1433_v25 = vpop.f32.mrf.mxu3  ;;  %v1345_v26 = vadd.f32 %v1344_v24, %v1256_v23  ;;  %v1257_v28 = vpop.f32.mrf.mxu1 }
 0x1c6   : > { %v1258_v32 = vadd.f32 %v1257_v28, %v1168_v27  ;;  %v462_v28 = vld [vmem:[#allocation2 + $0x28] sm:$0xff] }
 0x1c7   : > { %v1434_v30 = vadd.f32 %v1433_v25, %v1345_v26 }
 0x1c9   : > { %v1483_v31 = vadd.f32 %v1434_v30, %v455_v29 }
 0x1cb   : > { %1515 = vst [vmem:[#allocation2 + $0xe0] sm:$0xff] %v1483_v31 }
 0x1cc   : > { %v1346_v33 = vpop.f32.mrf.mxu2  ;;  %v1171_v36 = vpop.f32.mrf.mxu0 }
 0x1cd   : > { %v1435_v34 = vpop.f32.mrf.mxu3  ;;  %v1347_v35 = vadd.f32 %v1346_v33, %v1258_v32  ;;  %v1260_v37 = vpop.f32.mrf.mxu1 }
 0x1ce   : > { %v1261_v41 = vadd.f32 %v1260_v37, %v1171_v36  ;;  %v463_v37 = vld [vmem:[#allocation2 + $0xa0] sm:$0xff] }
 0x1cf   : > { %v1436_v39 = vadd.f32 %v1435_v34, %v1347_v35 }
 0x1d1   : > { %v1484_v40 = vadd.f32 %v1436_v39, %v456_v38 }
 0x1d3   : > { %1516 = vst [vmem:[#allocation2 + $0x90] sm:$0xff] %v1484_v40 }
 0x1d4   : > { %v1349_v42 = vpop.f32.mrf.mxu2  ;;  %v1173_v45 = vpop.f32.mrf.mxu0 }
 0x1d5   : > { %v1438_v43 = vpop.f32.mrf.mxu3  ;;  %v1350_v44 = vadd.f32 %v1349_v42, %v1261_v41  ;;  %v1262_v46 = vpop.f32.mrf.mxu1 }
 0x1d6   : > { %v1263_v50 = vadd.f32 %v1262_v46, %v1173_v45 }
 0x1d7   : > { %v1439_v48 = vadd.f32 %v1438_v43, %v1350_v44  ;;  %v464_v44 = vld [vmem:[#allocation2 + $0xf8] sm:$0xff] }
 0x1d9   : > { %v1485_v49 = vadd.f32 %v1439_v48, %v457_v47 }
 0x1db   : > { %1517 = vst [vmem:[#allocation2 + $0x70] sm:$0xff] %v1485_v49 }
 0x1dc   : > { %v1351_v51 = vpop.f32.mrf.mxu2  ;;  %v1176_v54 = vpop.f32.mrf.mxu0 }
 0x1dd   : > { %v1440_v52 = vpop.f32.mrf.mxu3  ;;  %v1352_v53 = vadd.f32 %v1351_v51, %v1263_v50  ;;  %v1265_v55 = vpop.f32.mrf.mxu1 }
 0x1de   : > { %v1266_v59 = vadd.f32 %v1265_v55, %v1176_v54 }
 0x1df   : > { %v1441_v57 = vadd.f32 %v1440_v52, %v1352_v53  ;;  %v465_v53 = vld [vmem:[#allocation2 + $0x20] sm:$0xff] }
 0x1e1   : > { %v1486_v58 = vadd.f32 %v1441_v57, %v458_v56 }
 0x1e3   : > { %1518 = vst [vmem:[#allocation2 + $0xc0] sm:$0xff] %v1486_v58 }
 0x1e4   : > { %v1354_v60 = vpop.f32.mrf.mxu2  ;;  %v1178_v63 = vpop.f32.mrf.mxu0 }
 0x1e5   : > { %v1443_v61 = vpop.f32.mrf.mxu3  ;;  %v1355_v62 = vadd.f32 %v1354_v60, %v1266_v59  ;;  %v1267_v0 = vpop.f32.mrf.mxu1 }
 0x1e6   : > { %v1268_v4 = vadd.f32 %v1267_v0, %v1178_v63 }
 0x1e7   : > { %v1444_v2 = vadd.f32 %v1443_v61, %v1355_v62  ;;  %v466_v61 = vld [vmem:[#allocation2 + $0x98] sm:$0xff] }
 0x1e9   : > { %v1487_v3 = vadd.f32 %v1444_v2, %v459_v1 }
 0x1eb   : > { %1519 = vst [vmem:[#allocation2 + $0xa8] sm:$0xff] %v1487_v3 }
 0x1ec   : > { %v1356_v5 = vpop.f32.mrf.mxu2  ;;  %v1181_v8 = vpop.f32.mrf.mxu0 }
 0x1ed   : > { %v1445_v6 = vpop.f32.mrf.mxu3  ;;  %v1357_v7 = vadd.f32 %v1356_v5, %v1268_v4  ;;  %v1270_v9 = vpop.f32.mrf.mxu1 }
 0x1ee   : > { %v1271_v13 = vadd.f32 %v1270_v9, %v1181_v8 }
 0x1ef   : > { %v1446_v11 = vadd.f32 %v1445_v6, %v1357_v7 }
 0x1f1   : > { %v1488_v12 = vadd.f32 %v1446_v11, %v460_v10 }
 0x1f3   : > { %1520 = vst [vmem:[#allocation2 + $0xd0] sm:$0xff] %v1488_v12 }
 0x1f4   : > { %v1359_v14 = vpop.f32.mrf.mxu2  ;;  %v1183_v17 = vpop.f32.mrf.mxu0 }
 0x1f5   : > { %v1448_v15 = vpop.f32.mrf.mxu3  ;;  %v1360_v16 = vadd.f32 %v1359_v14, %v1271_v13  ;;  %v1272_v18 = vpop.f32.mrf.mxu1 }
 0x1f6   : > { %v1273_v22 = vadd.f32 %v1272_v18, %v1183_v17 }
 0x1f7   : > { %v1449_v20 = vadd.f32 %v1448_v15, %v1360_v16 }
 0x1f9   : > { %v1489_v21 = vadd.f32 %v1449_v20, %v461_v19 }
 0x1fb   : > { %1521 = vst [vmem:[#allocation2 + $0x10] sm:$0xff] %v1489_v21 }
 0x1fc   : > { %v1361_v23 = vpop.f32.mrf.mxu2  ;;  %v1186_v26 = vpop.f32.mrf.mxu0 }
 0x1fd   : > { %v1450_v24 = vpop.f32.mrf.mxu3  ;;  %v1362_v25 = vadd.f32 %v1361_v23, %v1273_v22  ;;  %v1275_v27 = vpop.f32.mrf.mxu1 }
 0x1fe   : > { %v1276_v31 = vadd.f32 %v1275_v27, %v1186_v26 }
 0x1ff   : > { %v1451_v29 = vadd.f32 %v1450_v24, %v1362_v25 }
 0x201   : > { %v1490_v30 = vadd.f32 %v1451_v29, %v462_v28 }
 0x203   : > { %1522 = vst [vmem:[#allocation2 + $0x28] sm:$0xff] %v1490_v30 }
 0x204   : > { %v1364_v32 = vpop.f32.mrf.mxu2  ;;  %v1188_v35 = vpop.f32.mrf.mxu0 }
 0x205   : > { %v1453_v33 = vpop.f32.mrf.mxu3  ;;  %v1365_v34 = vadd.f32 %v1364_v32, %v1276_v31  ;;  %v1277_v36 = vpop.f32.mrf.mxu1 }
 0x206   : > { %v1278_v40 = vadd.f32 %v1277_v36, %v1188_v35 }
 0x207   : > { %v1454_v38 = vadd.f32 %v1453_v33, %v1365_v34 }
 0x209   : > { %v1491_v39 = vadd.f32 %v1454_v38, %v463_v37 }
 0x20b   : > { %1523 = vst [vmem:[#allocation2 + $0xa0] sm:$0xff] %v1491_v39 }
 0x20c   : > { %v1366_v41 = vpop.f32.mrf.mxu2  ;;  %v1191_v45 = vpop.f32.mrf.mxu0 }
 0x20d   : > { %v1455_v42 = vpop.f32.mrf.mxu3  ;;  %v1367_v43 = vadd.f32 %v1366_v41, %v1278_v40  ;;  %v1280_v46 = vpop.f32.mrf.mxu1 }
 0x20e   : > { %v1281_v49 = vadd.f32 %v1280_v46, %v1191_v45 }
 0x20f   : > { %v1456_v47 = vadd.f32 %v1455_v42, %v1367_v43 }
 0x211   : > { %v1492_v48 = vadd.f32 %v1456_v47, %v464_v44 }
 0x213   : > { %1524 = vst [vmem:[#allocation2 + $0xf8] sm:$0xff] %v1492_v48 }
 0x214   : > { %v1369_v50 = vpop.f32.mrf.mxu2  ;;  %v1193_v55 = vpop.f32.mrf.mxu0 }
 0x215   : > { %v1458_v51 = vpop.f32.mrf.mxu3  ;;  %v1370_v52 = vadd.f32 %v1369_v50, %v1281_v49  ;;  %v1282_v56 = vpop.f32.mrf.mxu1 }
 0x216   : > { %v1283_v58 = vadd.f32 %v1282_v56, %v1193_v55 }
 0x217   : > { %v1459_v54 = vadd.f32 %v1458_v51, %v1370_v52 }
 0x219   : > { %v1493_v57 = vadd.f32 %v1459_v54, %v465_v53 }
 0x21b   : > { %1525 = vst [vmem:[#allocation2 + $0x20] sm:$0xff] %v1493_v57 }
 0x21c   : > { %v1371_v59 = vpop.f32.mrf.mxu2 }
 0x21d   : > { %v1372_v60 = vadd.f32 %v1371_v59, %v1283_v58  ;;  %v1460_v62 = vpop.f32.mrf.mxu3 }
 0x21f   : > { %v1461_v63 = vadd.f32 %v1460_v62, %v1372_v60  ;;  %1530 = sbr.rel (%p2170_p11) target bundleno = 585 (0x249), region = 63 }
 0x221   : > { %v1494_v0 = vadd.f32 %v1461_v63, %v466_v61 }
 0x223   : > { %1526 = vst [vmem:[#allocation2 + $0x98] sm:$0xff] %v1494_v0 }
 0x224   : > { %v1531_v1 = vld [vmem:[#allocation2 + $0xb0] sm:$0xff]  ;;  %v2726_v2 = vld [vmem:[%s2873_s2] ss:$0 sm:$0xff]  ;;  %v1533_v4 = vld [vmem:[#allocation2 + $0xd8] sm:$0xff] }
 0x225   : > { %v1532_v3 = vld [vmem:[#allocation2] sm:$0xff]  ;;  %v1534_v5 = vld [vmem:[#allocation2 + $0x18] sm:$0xff]  ;;  %v1567_v6 = vadd.f32 %v2726_v2, %v1531_v1  ;;  %v1569_v8 = vadd.f32 %v2726_v2, %v1533_v4  ;;  %v1535_v10 = vld [vmem:[#allocation2 + $0x50] sm:$0xff] }
 0x226   : > { %v1568_v7 = vadd.f32 %v2726_v2, %v1532_v3  ;;  %v1570_v9 = vadd.f32 %v2726_v2, %v1534_v5  ;;  %v1536_v11 = vld [vmem:[#allocation2 + $0x68] sm:$0xff]  ;;  %v1537_v12 = vld [vmem:[#allocation2 + $0x30] sm:$0xff]  ;;  %v1571_v13 = vadd.f32 %v2726_v2, %v1535_v10  ;;  %v1539_v16 = vld [vmem:[#allocation2 + $0x80] sm:$0xff] }
 0x227   : > { %v1572_v14 = vadd.f32 %v2726_v2, %v1536_v11  ;;  %v1538_v15 = vld [vmem:[#allocation2 + $0x48] sm:$0xff]  ;;  %v1599_v17 = vmax.f32 %v1567_v6, 0.0  ;;  %v1601_v19 = vmax.f32 %v1569_v8, 0.0  ;;  %v1573_v20 = vadd.f32 %v2726_v2, %v1537_v12  ;;  %v1542_v27 = vld [vmem:[#allocation2 + $0xb8] sm:$0xff]  ;;  %v1543_v30 = vld [vmem:[#allocation2 + $0x60] sm:$0xff] }
 0x228   : > { %v1600_v18 = vmax.f32 %v1568_v7, 0.0  ;;  %v1540_v21 = vld [vmem:[#allocation2 + $0x88] sm:$0xff]  ;;  %v1602_v22 = vmax.f32 %v1570_v9, 0.0  ;;  %v1574_v23 = vadd.f32 %v2726_v2, %v1538_v15  ;;  %v1603_v25 = vmax.f32 %v1571_v13, 0.0  ;;  %v1544_v33 = vld [vmem:[#allocation2 + $0xf0] sm:$0xff]  ;;  %v1546_v39 = vld [vmem:[#allocation2 + $0x78] sm:$0xff] }
 0x229   : > { %v1541_v24 = vld [vmem:[#allocation2 + $0xe8] sm:$0xff]  ;;  %1631 = vst [vmem:[%s2874_s3] sm:$0xff] %v1599_v17  ;;  %v1575_v26 = vadd.f32 %v2726_v2, %v1539_v16  ;;  %v1604_v28 = vmax.f32 %v1572_v14, 0.0  ;;  %v1576_v29 = vadd.f32 %v2726_v2, %v1540_v21  ;;  %v1605_v31 = vmax.f32 %v1573_v20, 0.0  ;;  %v1547_v42 = vld [vmem:[#allocation2 + $0x38] sm:$0xff]  ;;  %v1549_v48 = vld [vmem:[#allocation2 + $0x40] sm:$0xff] }
 0x22a   : > { %1632 = vst [vmem:[%s2874_s3 + $0x8] sm:$0xff] %v1600_v18  ;;  %v1577_v32 = vadd.f32 %v2726_v2, %v1541_v24  ;;  %v1606_v34 = vmax.f32 %v1574_v23, 0.0  ;;  %v1578_v35 = vadd.f32 %v2726_v2, %v1542_v27  ;;  %v1545_v36 = vld [vmem:[#allocation2 + $0x8] sm:$0xff]  ;;  %v1579_v38 = vadd.f32 %v2726_v2, %v1543_v30  ;;  %v1548_v45 = vld [vmem:[#allocation2 + $0x58] sm:$0xff]  ;;  %v1551_v54 = vld [vmem:[#allocation2 + $0xe0] sm:$0xff] }
 0x22b   : > { %1633 = vst [vmem:[%s2874_s3 + $0x10] sm:$0xff] %v1601_v19  ;;  %v1607_v37 = vmax.f32 %v1575_v26, 0.0  ;;  %v1608_v40 = vmax.f32 %v1576_v29, 0.0  ;;  %v1580_v41 = vadd.f32 %v2726_v2, %v1544_v33  ;;  %v1581_v44 = vadd.f32 %v2726_v2, %v1545_v36  ;;  %v1550_v51 = vld [vmem:[#allocation2 + $0xc8] sm:$0xff]  ;;  %v1552_v57 = vld [vmem:[#allocation2 + $0x90] sm:$0xff]  ;;  %v1554_v63 = vld [vmem:[#allocation2 + $0xc0] sm:$0xff] }
 0x22c   : > { %1634 = vst [vmem:[%s2874_s3 + $0x18] sm:$0xff] %v1602_v22  ;;  %v1609_v43 = vmax.f32 %v1577_v32, 0.0  ;;  %v1610_v46 = vmax.f32 %v1578_v35, 0.0  ;;  %v1582_v47 = vadd.f32 %v2726_v2, %v1546_v39  ;;  %v1611_v49 = vmax.f32 %v1579_v38, 0.0  ;;  %v1553_v60 = vld [vmem:[#allocation2 + $0x70] sm:$0xff]  ;;  %v1555_v3 = vld [vmem:[#allocation2 + $0xa8] sm:$0xff] }
 0x22d   : > { %1635 = vst [vmem:[%s2874_s3 + $0x20] sm:$0xff] %v1603_v25  ;;  %v1583_v50 = vadd.f32 %v2726_v2, %v1547_v42  ;;  %v1612_v52 = vmax.f32 %v1580_v41, 0.0  ;;  %v1584_v53 = vadd.f32 %v2726_v2, %v1548_v45  ;;  %v1613_v55 = vmax.f32 %v1581_v44, 0.0  ;;  %v1556_v6 = vld [vmem:[#allocation2 + $0xd0] sm:$0xff]  ;;  %v1558_v12 = vld [vmem:[#allocation2 + $0x28] sm:$0xff]  ;;  %v1559_v15 = vld [vmem:[#allocation2 + $0xa0] sm:$0xff] }
 0x22e   : > { %1636 = vst [vmem:[%s2874_s3 + $0x28] sm:$0xff] %v1604_v28  ;;  %v1585_v56 = vadd.f32 %v2726_v2, %v1549_v48  ;;  %v1614_v58 = vmax.f32 %v1582_v47, 0.0  ;;  %v1586_v59 = vadd.f32 %v2726_v2, %v1550_v51  ;;  %v1587_v62 = vadd.f32 %v2726_v2, %v1551_v54  ;;  %v1557_v9 = vld [vmem:[#allocation2 + $0x10] sm:$0xff]  ;;  %v1560_v18 = vld [vmem:[#allocation2 + $0xf8] sm:$0xff]  ;;  %v1561_v21 = vld [vmem:[#allocation2 + $0x20] sm:$0xff] }
 0x22f   : > { %1637 = vst [vmem:[%s2874_s3 + $0x30] sm:$0xff] %v1605_v31  ;;  %v1615_v61 = vmax.f32 %v1583_v50, 0.0  ;;  %v1616_v0 = vmax.f32 %v1584_v53, 0.0  ;;  %v1588_v1 = vadd.f32 %v2726_v2, %v1552_v57  ;;  %v1589_v5 = vadd.f32 %v2726_v2, %v1553_v60  ;;  %v1562_v24 = vld [vmem:[#allocation2 + $0x98] sm:$0xff] }
 0x230   : > { %1638 = vst [vmem:[%s2874_s3 + $0x38] sm:$0xff] %v1606_v34  ;;  %v1617_v4 = vmax.f32 %v1585_v56, 0.0  ;;  %v1618_v7 = vmax.f32 %v1586_v59, 0.0  ;;  %v1590_v8 = vadd.f32 %v2726_v2, %v1554_v63  ;;  %v1619_v10 = vmax.f32 %v1587_v62, 0.0 }
 0x231   : > { %1639 = vst [vmem:[%s2874_s3 + $0x40] sm:$0xff] %v1607_v37  ;;  %v1591_v11 = vadd.f32 %v2726_v2, %v1555_v3  ;;  %v1620_v13 = vmax.f32 %v1588_v1, 0.0  ;;  %v1592_v14 = vadd.f32 %v2726_v2, %v1556_v6  ;;  %v1621_v16 = vmax.f32 %v1589_v5, 0.0 }
 0x232   : > { %1640 = vst [vmem:[%s2874_s3 + $0x48] sm:$0xff] %v1608_v40  ;;  %v1593_v17 = vadd.f32 %v2726_v2, %v1557_v9  ;;  %v1622_v19 = vmax.f32 %v1590_v8, 0.0  ;;  %v1594_v20 = vadd.f32 %v2726_v2, %v1558_v12  ;;  %v1595_v23 = vadd.f32 %v2726_v2, %v1559_v15 }
 0x233   : > { %1641 = vst [vmem:[%s2874_s3 + $0x50] sm:$0xff] %v1609_v43  ;;  %v1623_v22 = vmax.f32 %v1591_v11, 0.0  ;;  %v1624_v25 = vmax.f32 %v1592_v14, 0.0  ;;  %v1596_v26 = vadd.f32 %v2726_v2, %v1560_v18  ;;  %v1597_v28 = vadd.f32 %v2726_v2, %v1561_v21 }
 0x234   : > { %1642 = vst [vmem:[%s2874_s3 + $0x58] sm:$0xff] %v1610_v46  ;;  %v1625_v27 = vmax.f32 %v1593_v17, 0.0  ;;  %v1626_v29 = vmax.f32 %v1594_v20, 0.0  ;;  %v1598_v30 = vadd.f32 %v2726_v2, %v1562_v24  ;;  %v1627_v31 = vmax.f32 %v1595_v23, 0.0 }
 0x235   : > { %1643 = vst [vmem:[%s2874_s3 + $0x60] sm:$0xff] %v1611_v49  ;;  %v1628_v32 = vmax.f32 %v1596_v26, 0.0  ;;  %v1629_v33 = vmax.f32 %v1597_v28, 0.0 }
 0x236   : > { %1644 = vst [vmem:[%s2874_s3 + $0x68] sm:$0xff] %v1612_v52  ;;  %v1630_v2 = vmax.f32 %v1598_v30, 0.0 }
 0x237   : > { %1645 = vst [vmem:[%s2874_s3 + $0x70] sm:$0xff] %v1613_v55 }
 0x238   : > { %1646 = vst [vmem:[%s2874_s3 + $0x78] sm:$0xff] %v1614_v58 }
 0x239   : > { %1647 = vst [vmem:[%s2874_s3 + $0x80] sm:$0xff] %v1615_v61 }
 0x23a   : > { %1648 = vst [vmem:[%s2874_s3 + $0x88] sm:$0xff] %v1616_v0 }
 0x23b   : > { %1649 = vst [vmem:[%s2874_s3 + $0x90] sm:$0xff] %v1617_v4 }
 0x23c   : > { %1650 = vst [vmem:[%s2874_s3 + $0x98] sm:$0xff] %v1618_v7 }
 0x23d   : > { %1651 = vst [vmem:[%s2874_s3 + $0xa0] sm:$0xff] %v1619_v10 }
 0x23e   : > { %1652 = vst [vmem:[%s2874_s3 + $0xa8] sm:$0xff] %v1620_v13 }
 0x23f   : > { %1653 = vst [vmem:[%s2874_s3 + $0xb0] sm:$0xff] %v1621_v16 }
 0x240   : > { %1654 = vst [vmem:[%s2874_s3 + $0xb8] sm:$0xff] %v1622_v19 }
 0x241   : > { %1655 = vst [vmem:[%s2874_s3 + $0xc0] sm:$0xff] %v1623_v22 }
 0x242   : > { %1656 = vst [vmem:[%s2874_s3 + $0xc8] sm:$0xff] %v1624_v25 }
 0x243   : > { %1657 = vst [vmem:[%s2874_s3 + $0xd0] sm:$0xff] %v1625_v27 }
 0x244   : > { %1658 = vst [vmem:[%s2874_s3 + $0xd8] sm:$0xff] %v1626_v29 }
 0x245   : > { %1659 = vst [vmem:[%s2874_s3 + $0xe0] sm:$0xff] %v1627_v31 }
 0x246   : > { %1660 = vst [vmem:[%s2874_s3 + $0xe8] sm:$0xff] %v1628_v32 }
 0x247   : > { %1661 = vst [vmem:[%s2874_s3 + $0xf0] sm:$0xff] %v1629_v33 }
 0x248   : > { %1662 = vst [vmem:[%s2874_s3 + $0xf8] sm:$0xff] %v1630_v2 }
 0x249 PF: > { %s13_s16 = sadd.s32 1, %s2352_s16   ;;  %s2875_s12 = smov %s2340_s13 }
 0x24a   : > { %p10_p12 = scmp.ge.s32.totalorder %s13_s16, 4   ;;  %s2876_s13 = smov %s2410_s20 }
 0x24b   : > { %s2877_s14 = smov %s2348_s15  ;;  %s2878_s15 = smov %s2880_s17 }
 0x24c   :  { %12 = sbr.rel (!%p10_p12) target bundleno = 3 (0x3), region = 104 }

// kernel: run.16
= control target key start
LH: loop header
LB: loop body
LE: loop exit
PB: predicated region body
PF: predicated region fallthrough
CT: control target
= control target key end

     0   :  { %s1655_s12 = smov 0   ;;  %s1657_s13 = smov 0   ;;  %s1941_s0 = inlined_call_operand.vmem [shape: bf16[128,1024], index: 0, kind: input, shape index: {}]   ;;  %s1942_s1 = inlined_call_operand.vmem [shape: bf16[1024,128], index: 1, kind: input, shape index: {}]   ;;  %s1943_s2 = inlined_call_operand.vmem [shape: f32[1,128], index: 2, kind: input, shape index: {}]   ;;  %s1944_s3 = inlined_call_operand.vmem [shape: f32[128,128], index: 3, kind: output, shape index: {}]  }
   0x1   :  { %s1659_s14 = smov 0   ;;  %s1661_s15 = smov 0  }
   0x2   :  { %s1663_s16 = smov 0  }
   0x3 LB: > { %s25_s17 = sadd.s32 1, %s1628_s15  ;;  %p48_p1 = scmp.ne.s32.totalorder %s1620_s13, %s1616_s12  ;;  %s1632_s16 = sphi %s1663_s16, %s13_s16   ;;  %s1628_s15 = sphi %s1661_s15, %s1948_s15   ;;  %s1624_s14 = sphi %s1659_s14, %s1947_s14   ;;  %s1620_s13 = sphi %s1657_s13, %s1946_s13   ;;  %s1616_s12 = sphi %s1655_s12, %s1945_s12  }
   0x4   : > { %p26_p0 = scmp.ge.s32.totalorder %s25_s17, 2  ;;  %p49_p2 = scmp.eq.s32.totalorder %s1632_s16, 0 }
   0x5   : > { %s41_s19 = sadd.s32 1, %s1620_s13  ;;  %p1217_p5 = scmp.ge.s32.totalorder %s1632_s16, 2 }
   0x6   : > { %s1950_s17 = smov (%p26_p0, %s25_s17), 0  ;;  %p50_p3 = por %p49_p2, %p48_p1 }
   0x7   : > { %s37_s18 = ssub.s32 %s1628_s15, %s1950_s17  ;;  %162 = sbr.rel (%p1217_p5) target bundleno = 48 (0x30), region = 20 }
   0x8   : > { %p39_p4 = scmp.eq.s32.totalorder %s37_s18, 0 }
   0xa   : > { %s1690_s20 = scalar_select %p39_p4, %s1620_s13, %s41_s19  }
   0xc   : > { %165 = sbr.rel (!%p50_p3) target bundleno = 48 (0x30), region = 24  ;;  %s167_s21 = sand.u32 (%p50_p3), 1, %s1620_s13  }
   0xd   : > { %s1487_s22 = sshll.u32 (%p50_p3), %s1628_s15, 4  ;;  %s1218_s23 = sshll.u32 (%p50_p3), %s167_s21, 8 }
   0xe   : > { %s1698_s26 = scalar_lea.vmem (%p50_p3), %s1941_s0, %s1487_s22  ;;  %s1703_s27 = scalar_lea.vmem (%p50_p3), [#allocation3], %s1218_s23 }
   0xf   : > { %v188_v0 = vld [vmem:[%s1698_s26] sm:$0xff] (%p50_p3)  ;;  %v190_v1 = vld [vmem:[%s1698_s26 + $0x8] sm:$0xff] (%p50_p3) }
  0x10   : > { %v192_v2 = vld [vmem:[%s1698_s26 + $0x20] sm:$0xff] (%p50_p3)  ;;  %189 = vst [vmem:[%s1703_s27] sm:$0xff] (%p50_p3), %v188_v0  ;;  %v194_v3 = vld [vmem:[%s1698_s26 + $0x28] sm:$0xff] (%p50_p3) }
  0x11   : > { %191 = vst [vmem:[%s1703_s27 + $0x8] sm:$0xff] %v190_v1  ;;  %v196_v4 = vld [vmem:[%s1698_s26 + $0x40] sm:$0xff]  ;;  %v198_v5 = vld [vmem:[%s1698_s26 + $0x48] sm:$0xff] }
  0x12   : > { %193 = vst [vmem:[%s1703_s27 + $0x10] sm:$0xff] %v192_v2  ;;  %v200_v6 = vld [vmem:[%s1698_s26 + $0x60] sm:$0xff]  ;;  %v202_v7 = vld [vmem:[%s1698_s26 + $0x68] sm:$0xff] }
  0x13   : > { %195 = vst [vmem:[%s1703_s27 + $0x18] sm:$0xff] %v194_v3  ;;  %v204_v8 = vld [vmem:[%s1698_s26 + $0x80] sm:$0xff]  ;;  %v206_v9 = vld [vmem:[%s1698_s26 + $0x88] sm:$0xff] }
  0x14   : > { %197 = vst [vmem:[%s1703_s27 + $0x20] sm:$0xff] %v196_v4  ;;  %v208_v10 = vld [vmem:[%s1698_s26 + $0xa0] sm:$0xff]  ;;  %v210_v11 = vld [vmem:[%s1698_s26 + $0xa8] sm:$0xff] }
  0x15   : > { %199 = vst [vmem:[%s1703_s27 + $0x28] sm:$0xff] %v198_v5  ;;  %v212_v12 = vld [vmem:[%s1698_s26 + $0xc0] sm:$0xff]  ;;  %v214_v13 = vld [vmem:[%s1698_s26 + $0xc8] sm:$0xff] }
  0x16   : > { %201 = vst [vmem:[%s1703_s27 + $0x30] sm:$0xff] %v200_v6  ;;  %v216_v14 = vld [vmem:[%s1698_s26 + $0xe0] sm:$0xff]  ;;  %v218_v15 = vld [vmem:[%s1698_s26 + $0xe8] sm:$0xff] }
  0x17   : > { %203 = vst [vmem:[%s1703_s27 + $0x38] sm:$0xff] %v202_v7  ;;  %v220_v16 = vld [vmem:[%s1698_s26 + $0x100] sm:$0xff]  ;;  %v222_v17 = vld [vmem:[%s1698_s26 + $0x108] sm:$0xff] }
  0x18   : > { %205 = vst [vmem:[%s1703_s27 + $0x40] sm:$0xff] %v204_v8  ;;  %v224_v18 = vld [vmem:[%s1698_s26 + $0x120] sm:$0xff]  ;;  %v226_v19 = vld [vmem:[%s1698_s26 + $0x128] sm:$0xff] }
  0x19   : > { %207 = vst [vmem:[%s1703_s27 + $0x48] sm:$0xff] %v206_v9  ;;  %v228_v20 = vld [vmem:[%s1698_s26 + $0x140] sm:$0xff]  ;;  %v230_v21 = vld [vmem:[%s1698_s26 + $0x148] sm:$0xff] }
  0x1a   : > { %209 = vst [vmem:[%s1703_s27 + $0x50] sm:$0xff] %v208_v10  ;;  %v232_v22 = vld [vmem:[%s1698_s26 + $0x160] sm:$0xff]  ;;  %v234_v23 = vld [vmem:[%s1698_s26 + $0x168] sm:$0xff] }
  0x1b   : > { %211 = vst [vmem:[%s1703_s27 + $0x58] sm:$0xff] %v210_v11  ;;  %v236_v24 = vld [vmem:[%s1698_s26 + $0x180] sm:$0xff]  ;;  %v238_v25 = vld [vmem:[%s1698_s26 + $0x188] sm:$0xff] }
  0x1c   : > { %213 = vst [vmem:[%s1703_s27 + $0x60] sm:$0xff] %v212_v12  ;;  %v240_v26 = vld [vmem:[%s1698_s26 + $0x1a0] sm:$0xff]  ;;  %v242_v27 = vld [vmem:[%s1698_s26 + $0x1a8] sm:$0xff] }
  0x1d   : > { %215 = vst [vmem:[%s1703_s27 + $0x68] sm:$0xff] %v214_v13  ;;  %v244_v28 = vld [vmem:[%s1698_s26 + $0x1c0] sm:$0xff]  ;;  %v246_v29 = vld [vmem:[%s1698_s26 + $0x1c8] sm:$0xff] }
  0x1e   : > { %217 = vst [vmem:[%s1703_s27 + $0x70] sm:$0xff] %v216_v14  ;;  %v248_v30 = vld [vmem:[%s1698_s26 + $0x1e0] sm:$0xff]  ;;  %v250_v31 = vld [vmem:[%s1698_s26 + $0x1e8] sm:$0xff] }
  0x1f   : > { %219 = vst [vmem:[%s1703_s27 + $0x78] sm:$0xff] %v218_v15 }
  0x20   : > { %221 = vst [vmem:[%s1703_s27 + $0x80] sm:$0xff] %v220_v16 }
  0x21   : > { %223 = vst [vmem:[%s1703_s27 + $0x88] sm:$0xff] %v222_v17 }
  0x22   : > { %225 = vst [vmem:[%s1703_s27 + $0x90] sm:$0xff] %v224_v18 }
  0x23   : > { %227 = vst [vmem:[%s1703_s27 + $0x98] sm:$0xff] %v226_v19 }
  0x24   : > { %229 = vst [vmem:[%s1703_s27 + $0xa0] sm:$0xff] %v228_v20 }
  0x25   : > { %231 = vst [vmem:[%s1703_s27 + $0xa8] sm:$0xff] %v230_v21 }
  0x26   : > { %233 = vst [vmem:[%s1703_s27 + $0xb0] sm:$0xff] %v232_v22 }
  0x27   : > { %235 = vst [vmem:[%s1703_s27 + $0xb8] sm:$0xff] %v234_v23 }
  0x28   : > { %237 = vst [vmem:[%s1703_s27 + $0xc0] sm:$0xff] %v236_v24 }
  0x29   : > { %239 = vst [vmem:[%s1703_s27 + $0xc8] sm:$0xff] %v238_v25 }
  0x2a   : > { %241 = vst [vmem:[%s1703_s27 + $0xd0] sm:$0xff] %v240_v26 }
  0x2b   : > { %243 = vst [vmem:[%s1703_s27 + $0xd8] sm:$0xff] %v242_v27 }
  0x2c   : > { %245 = vst [vmem:[%s1703_s27 + $0xe0] sm:$0xff] %v244_v28 }
  0x2d   : > { %247 = vst [vmem:[%s1703_s27 + $0xe8] sm:$0xff] %v246_v29 }
  0x2e   : > { %249 = vst [vmem:[%s1703_s27 + $0xf0] sm:$0xff] %v248_v30 }
  0x2f   : > { %251 = vst [vmem:[%s1703_s27 + $0xf8] sm:$0xff] %v250_v31 }
  0x30 PF: > { %p1221_p6 = scmp.ge.s32.totalorder %s1632_s16, 1  ;;  %p268_p7 = scmp.lt.s32.totalorder %s1632_s16, 3 }
  0x32   : > { %p269_p8 = pnand %p1221_p6, %p268_p7 }
  0x33   : > { %s275_s28 = sand.u32 (!%p269_p8), 1, %s1616_s12   ;;  %s1223_s29 = sshll.u32 (!%p269_p8), %s1624_s14, 6 }
  0x34   : > { %272 = sbr.rel (%p269_p8) target bundleno = 391 (0x187), region = 51  ;;  %s1222_s30 = sshll.u32 (!%p269_p8), %s275_s28, 8 }
  0x35   : > { %p315_p9 = scmp.lt.s32.totalorder (!%p269_p8), %s1223_s29, 127  ;;  %s1775_s8 = scalar_lea.vmem (!%p269_p8), [#allocation3], %s1222_s30 }
  0x36   : > { %p1225_p10 = scmp.ne.s32.totalorder (!%p269_p8), %s1624_s14, 0 }
  0x39   : > { %s1952_s29 = smov (!%p315_p9, %s1223_s29), 127  ;;  %338 = sbr.rel (%p1225_p10) target bundleno = 79 (0x4f), region = 59 }
  0x3a   : > { %s1224_s4 = sshll.u32 %s1952_s29, 2 }
  0x3b   : > { %s1773_s7 = scalar_lea.vmem %s1942_s1, %s1224_s4 }
  0x3e   : > { %v1634_v32 = vmov 0.0  }
  0x3f   : > { %339 = vst [vmem:[#allocation2 + $0x30] sm:$0xff] %v1634_v32 }
  0x40   : > { %340 = vst [vmem:[#allocation2] sm:$0xff] %v1634_v32 }
  0x41   : > { %341 = vst [vmem:[#allocation2 + $0x58] sm:$0xff] %v1634_v32 }
  0x42   : > { %342 = vst [vmem:[#allocation2 + $0x18] sm:$0xff] %v1634_v32 }
  0x43   : > { %343 = vst [vmem:[#allocation2 + $0x50] sm:$0xff] %v1634_v32 }
  0x44   : > { %344 = vst [vmem:[#allocation2 + $0x68] sm:$0xff] %v1634_v32 }
  0x45   : > { %345 = vst [vmem:[#allocation2 + $0x8] sm:$0xff] %v1634_v32 }
  0x46   : > { %346 = vst [vmem:[#allocation2 + $0x48] sm:$0xff] %v1634_v32 }
  0x47   : > { %347 = vst [vmem:[#allocation2 + $0x40] sm:$0xff] %v1634_v32 }
  0x48   : > { %348 = vst [vmem:[#allocation2 + $0x20] sm:$0xff] %v1634_v32 }
  0x49   : > { %349 = vst [vmem:[#allocation2 + $0x10] sm:$0xff] %v1634_v32 }
  0x4a   : > { %350 = vst [vmem:[#allocation2 + $0x38] sm:$0xff] %v1634_v32 }
  0x4b   : > { %351 = vst [vmem:[#allocation2 + $0x60] sm:$0xff] %v1634_v32 }
  0x4c   : > { %352 = vst [vmem:[#allocation2 + $0x70] sm:$0xff] %v1634_v32 }
  0x4d   : > { %353 = vst [vmem:[#allocation2 + $0x78] sm:$0xff] %v1634_v32 }
  0x4e   : > { %354 = vst [vmem:[#allocation2 + $0x28] sm:$0xff] %v1634_v32 }
  0x4f PF: > { %v1527_v33 = vld [vmem:[%s1773_s7 + $0x38] sm:$0xff]  ;;  %v1526_v37 = vld [vmem:[%s1773_s7 + $0x30] sm:$0xff]  ;;  %v1525_v41 = vld [vmem:[%s1773_s7 + $0x28] sm:$0xff]  ;;  %p1482_p11 = scmp.ne.s32.totalorder %s1624_s14, 1 }
  0x50   : > { %v1535_v34 = vld [vmem:[%s1773_s7 + $0x78] sm:$0xff]  ;;  %819 = vmatpush.bf16.msra.mxu0 %v1527_v33  ;;  %v1534_v38 = vld [vmem:[%s1773_s7 + $0x70] sm:$0xff]  ;;  %v1533_v42 = vld [vmem:[%s1773_s7 + $0x68] sm:$0xff] }
  0x51   : > { %v1543_v35 = vld [vmem:[%s1773_s7 + $0xb8] sm:$0xff]  ;;  %868 = vmatpush.bf16.msra.mxu1 %v1535_v34  ;;  %v1542_v39 = vld [vmem:[%s1773_s7 + $0xb0] sm:$0xff]  ;;  %v1541_v43 = vld [vmem:[%s1773_s7 + $0xa8] sm:$0xff] }
  0x52   : > { %v1551_v36 = vld [vmem:[%s1773_s7 + $0xf8] sm:$0xff]  ;;  %917 = vmatpush.bf16.msra.mxu2 %v1543_v35  ;;  %v1550_v40 = vld [vmem:[%s1773_s7 + $0xf0] sm:$0xff]  ;;  %v1549_v44 = vld [vmem:[%s1773_s7 + $0xe8] sm:$0xff] }
  0x53   : > { %966 = vmatpush.bf16.msra.mxu3 %v1551_v36  ;;  %v1524_v45 = vld [vmem:[%s1773_s7 + $0x20] sm:$0xff]  ;;  %v1523_v49 = vld [vmem:[%s1773_s7 + $0x18] sm:$0xff]  ;;  %v1522_v53 = vld [vmem:[%s1773_s7 + $0x10] sm:$0xff] }
  0x54   : > { %820 = vmatpush.bf16.msra.mxu0 %v1526_v37  ;;  %v1532_v46 = vld [vmem:[%s1773_s7 + $0x60] sm:$0xff]  ;;  %v1531_v50 = vld [vmem:[%s1773_s7 + $0x58] sm:$0xff]  ;;  %v1530_v54 = vld [vmem:[%s1773_s7 + $0x50] sm:$0xff] }
  0x55   : > { %869 = vmatpush.bf16.msra.mxu1 %v1534_v38  ;;  %v1540_v47 = vld [vmem:[%s1773_s7 + $0xa0] sm:$0xff]  ;;  %v1539_v51 = vld [vmem:[%s1773_s7 + $0x98] sm:$0xff]  ;;  %v1538_v55 = vld [vmem:[%s1773_s7 + $0x90] sm:$0xff] }
  0x56   : > { %918 = vmatpush.bf16.msra.mxu2 %v1542_v39  ;;  %v1548_v48 = vld [vmem:[%s1773_s7 + $0xe0] sm:$0xff]  ;;  %v1547_v52 = vld [vmem:[%s1773_s7 + $0xd8] sm:$0xff]  ;;  %v1546_v56 = vld [vmem:[%s1773_s7 + $0xd0] sm:$0xff] }
  0x57   : > { %967 = vmatpush.bf16.msra.mxu3 %v1550_v40  ;;  %v1521_v57 = vld [vmem:[%s1773_s7 + $0x8] sm:$0xff]  ;;  %v1520_v61 = vld [vmem:[%s1773_s7] sm:$0xff]  ;;  %v1490_v2 = vld [vmem:[%s1775_s8 + $0xc] sm:$0xf0] }
  0x58   : > { %821 = vmatpush.bf16.msra.mxu0 %v1525_v41  ;;  %v1529_v58 = vld [vmem:[%s1773_s7 + $0x48] sm:$0xff]  ;;  %v1528_v62 = vld [vmem:[%s1773_s7 + $0x40] sm:$0xff]  ;;  %v1230_v4 = vld [vmem:[%s1775_s8 + $0x10] sm:$0xf0] }
  0x59   : > { %870 = vmatpush.bf16.msra.mxu1 %v1533_v42  ;;  %v1537_v59 = vld [vmem:[%s1773_s7 + $0x88] sm:$0xff]  ;;  %v1536_v63 = vld [vmem:[%s1773_s7 + $0x80] sm:$0xff]  ;;  %v1491_v6 = vld [vmem:[%s1775_s8 + $0x14] sm:$0xf0] }
  0x5a   : > { %919 = vmatpush.bf16.msra.mxu2 %v1541_v43  ;;  %v1545_v60 = vld [vmem:[%s1773_s7 + $0xc8] sm:$0xff]  ;;  %v1544_v0 = vld [vmem:[%s1773_s7 + $0xc0] sm:$0xff]  ;;  %v1238_v8 = vld [vmem:[%s1775_s8 + $0x18] sm:$0xf0] }
  0x5b   : > { %968 = vmatpush.bf16.msra.mxu3 %v1549_v44  ;;  %v1228_v1 = vld [vmem:[%s1775_s8] sm:$0xf]  ;;  %v1488_v3 = vld [vmem:[%s1775_s8 + $0x4] sm:$0xf]  ;;  %v1236_v5 = vld [vmem:[%s1775_s8 + $0x8] sm:$0xf] }
  0x5c   : > { %822 = vmatpush.bf16.msra.mxu0 %v1524_v45  ;;  %v1489_v7 = vld [vmem:[%s1775_s8 + $0xc] sm:$0xf]  ;;  %v1229_v9 = vor.u32 %v1490_v2, %v1228_v1  ;;  %v1233_v10 = vor.u32 %v1488_v3, %v1230_v4  ;;  %v1237_v11 = vor.u32 %v1491_v6, %v1236_v5  ;;  %v1244_v13 = vld [vmem:[%s1775_s8 + $0x20] sm:$0xf]  ;;  %v1494_v14 = vld [vmem:[%s1775_s8 + $0x2c] sm:$0xf0] }
  0x5d   : > { %871 = vmatpush.bf16.msra.mxu1 %v1532_v46  ;;  %v1241_v12 = vor.u32 %v1489_v7, %v1238_v8  ;;  %v1492_v15 = vld [vmem:[%s1775_s8 + $0x24] sm:$0xf]  ;;  %v1246_v16 = vld [vmem:[%s1775_s8 + $0x30] sm:$0xf0]  ;;  %v1252_v17 = vld [vmem:[%s1775_s8 + $0x28] sm:$0xf]  ;;  %v1245_v21 = vor.u32 %v1494_v14, %v1244_v13 }
  0x5e   : > { %920 = vmatpush.bf16.msra.mxu2 %v1540_v47  ;;  %v1495_v18 = vld [vmem:[%s1775_s8 + $0x34] sm:$0xf0]  ;;  %v1493_v19 = vld [vmem:[%s1775_s8 + $0x2c] sm:$0xf]  ;;  %v1254_v20 = vld [vmem:[%s1775_s8 + $0x38] sm:$0xf0]  ;;  %v1249_v22 = vor.u32 %v1492_v15, %v1246_v16 }
  0x5f   : > { %969 = vmatpush.bf16.msra.mxu3 %v1548_v48  ;;  %v1253_v23 = vor.u32 %v1495_v18, %v1252_v17  ;;  %v1257_v24 = vor.u32 %v1493_v19, %v1254_v20  ;;  %v1260_v25 = vld [vmem:[%s1775_s8 + $0x40] sm:$0xf]  ;;  %v1498_v26 = vld [vmem:[%s1775_s8 + $0x4c] sm:$0xf0]  ;;  %v1496_v27 = vld [vmem:[%s1775_s8 + $0x44] sm:$0xf] }
  0x60   : > { %823 = vmatpush.bf16.msra.mxu0 %v1523_v49  ;;  %v1262_v28 = vld [vmem:[%s1775_s8 + $0x50] sm:$0xf0]  ;;  %v1268_v29 = vld [vmem:[%s1775_s8 + $0x48] sm:$0xf]  ;;  %v1499_v30 = vld [vmem:[%s1775_s8 + $0x54] sm:$0xf0]  ;;  %v1261_v33 = vor.u32 %v1498_v26, %v1260_v25 }
  0x61   : > { %872 = vmatpush.bf16.msra.mxu1 %v1531_v50  ;;  %v1497_v31 = vld [vmem:[%s1775_s8 + $0x4c] sm:$0xf]  ;;  %v1270_v32 = vld [vmem:[%s1775_s8 + $0x58] sm:$0xf0]  ;;  %v1265_v34 = vor.u32 %v1496_v27, %v1262_v28  ;;  %v1269_v35 = vor.u32 %v1499_v30, %v1268_v29  ;;  %v1276_v37 = vld [vmem:[%s1775_s8 + $0x60] sm:$0xf] }
  0x62   : > { %921 = vmatpush.bf16.msra.mxu2 %v1539_v51  ;;  %v1273_v36 = vor.u32 %v1497_v31, %v1270_v32  ;;  %v1502_v38 = vld [vmem:[%s1775_s8 + $0x6c] sm:$0xf0]  ;;  %v1500_v39 = vld [vmem:[%s1775_s8 + $0x64] sm:$0xf]  ;;  %v1278_v40 = vld [vmem:[%s1775_s8 + $0x70] sm:$0xf0] }
  0x63   : > { %970 = vmatpush.bf16.msra.mxu3 %v1547_v52  ;;  %v1284_v41 = vld [vmem:[%s1775_s8 + $0x68] sm:$0xf]  ;;  %v1503_v42 = vld [vmem:[%s1775_s8 + $0x74] sm:$0xf0]  ;;  %v1501_v43 = vld [vmem:[%s1775_s8 + $0x6c] sm:$0xf]  ;;  %v1277_v45 = vor.u32 %v1502_v38, %v1276_v37  ;;  %v1281_v46 = vor.u32 %v1500_v39, %v1278_v40 }
  0x64   : > { %824 = vmatpush.bf16.msra.mxu0 %v1522_v53  ;;  %v1286_v44 = vld [vmem:[%s1775_s8 + $0x78] sm:$0xf0]  ;;  %v1285_v47 = vor.u32 %v1503_v42, %v1284_v41  ;;  %v1292_v49 = vld [vmem:[%s1775_s8 + $0x80] sm:$0xf]  ;;  %v1506_v50 = vld [vmem:[%s1775_s8 + $0x8c] sm:$0xf0] }
  0x65   : > { %873 = vmatpush.bf16.msra.mxu1 %v1530_v54  ;;  %v1289_v48 = vor.u32 %v1501_v43, %v1286_v44  ;;  %v1504_v51 = vld [vmem:[%s1775_s8 + $0x84] sm:$0xf]  ;;  %v1294_v52 = vld [vmem:[%s1775_s8 + $0x90] sm:$0xf0]  ;;  %v1300_v53 = vld [vmem:[%s1775_s8 + $0x88] sm:$0xf] }
  0x66   : > { %922 = vmatpush.bf16.msra.mxu2 %v1538_v55  ;;  %v1507_v54 = vld [vmem:[%s1775_s8 + $0x94] sm:$0xf0]  ;;  %v1505_v55 = vld [vmem:[%s1775_s8 + $0x8c] sm:$0xf]  ;;  %v1316_v1 = vld [vmem:[%s1775_s8 + $0xa8] sm:$0xf] }
  0x67   : > { %971 = vmatpush.bf16.msra.mxu3 %v1546_v56  ;;  %v1302_v56 = vld [vmem:[%s1775_s8 + $0x98] sm:$0xf0]  ;;  %v1511_v2 = vld [vmem:[%s1775_s8 + $0xb4] sm:$0xf0]  ;;  %v1509_v3 = vld [vmem:[%s1775_s8 + $0xac] sm:$0xf] }
  0x68   : > { %825 = vmatpush.bf16.msra.mxu0 %v1521_v57  ;;  %v1293_v57 = vor.u32 %v1506_v50, %v1292_v49  ;;  %v1318_v4 = vld [vmem:[%s1775_s8 + $0xb8] sm:$0xf0]  ;;  %v1317_v7 = vor.u32 %v1511_v2, %v1316_v1  ;;  %v1332_v13 = vld [vmem:[%s1775_s8 + $0xc8] sm:$0xf]  ;;  %v1515_v14 = vld [vmem:[%s1775_s8 + $0xd4] sm:$0xf0] }
  0x69   : > { %874 = vmatpush.bf16.msra.mxu1 %v1529_v58  ;;  %v1297_v58 = vor.u32 %v1504_v51, %v1294_v52  ;;  %v1321_v8 = vor.u32 %v1509_v3, %v1318_v4  ;;  %v1513_v15 = vld [vmem:[%s1775_s8 + $0xcc] sm:$0xf]  ;;  %v1334_v16 = vld [vmem:[%s1775_s8 + $0xd8] sm:$0xf0]  ;;  %v1333_v19 = vor.u32 %v1515_v14, %v1332_v13  ;;  %v1348_v25 = vld [vmem:[%s1775_s8 + $0xe8] sm:$0xf] }
  0x6a   : > { %923 = vmatpush.bf16.msra.mxu2 %v1537_v59  ;;  %v1301_v59 = vor.u32 %v1507_v54, %v1300_v53  ;;  %v1337_v20 = vor.u32 %v1513_v15, %v1334_v16  ;;  %v1519_v26 = vld [vmem:[%s1775_s8 + $0xf4] sm:$0xf0]  ;;  %v1517_v27 = vld [vmem:[%s1775_s8 + $0xec] sm:$0xf]  ;;  %v1350_v28 = vld [vmem:[%s1775_s8 + $0xf8] sm:$0xf0] }
  0x6b   : > { %972 = vmatpush.bf16.msra.mxu3 %v1545_v60  ;;  %v1305_v60 = vor.u32 %v1505_v55, %v1302_v56  ;;  %v1349_v31 = vor.u32 %v1519_v26, %v1348_v25  ;;  %v1353_v32 = vor.u32 %v1517_v27, %v1350_v28  ;;  %v355_v41 = vld [vmem:[#allocation2 + $0x30] sm:$0xff]  ;;  %v356_v50 = vld [vmem:[#allocation2] sm:$0xff]  ;;  %v358_v4 = vld [vmem:[#allocation2 + $0x18] sm:$0xff] }
  0x6c   : > { %826 = vmatpush.bf16.msra.mxu0 %v1520_v61  ;;  %v1308_v61 = vld [vmem:[%s1775_s8 + $0xa0] sm:$0xf]  ;;  %v359_v13 = vld [vmem:[#allocation2 + $0x50] sm:$0xff] }
  0x6d   : > { %875 = vmatpush.bf16.msra.mxu1 %v1528_v62  ;;  %v1510_v62 = vld [vmem:[%s1775_s8 + $0xac] sm:$0xf0] }
  0x6e   : > { %924 = vmatpush.bf16.msra.mxu2 %v1536_v63  ;;  %v1508_v63 = vld [vmem:[%s1775_s8 + $0xa4] sm:$0xf]  ;;  %v1309_v5 = vor.u32 %v1510_v62, %v1308_v61 }
  0x6f   : > { %973 = vmatpush.bf16.msra.mxu3 %v1544_v0  ;;  %827 = vmatmul.bf16.vlgmr.msra.gmra.mxu0 %v1229_v9  ;;  %v1310_v0 = vld [vmem:[%s1775_s8 + $0xb0] sm:$0xf0]  ;;  %v1324_v9 = vld [vmem:[%s1775_s8 + $0xc0] sm:$0xf] }
  0x70   : > { %876 = vmatmul.bf16.vlgmr.msra.gmra.mxu1 %v1233_v10  ;;  %v1313_v6 = vor.u32 %v1508_v63, %v1310_v0  ;;  %v1514_v10 = vld [vmem:[%s1775_s8 + $0xcc] sm:$0xf0] }
  0x71   : > { %925 = vmatmul.bf16.vlgmr.msra.gmra.mxu2 %v1237_v11  ;;  %v1512_v11 = vld [vmem:[%s1775_s8 + $0xc4] sm:$0xf]  ;;  %v1325_v17 = vor.u32 %v1514_v10, %v1324_v9 }
  0x72   : > { %974 = vmatmul.bf16.vlgmr.msra.gmra.mxu3 %v1241_v12  ;;  %v1326_v12 = vld [vmem:[%s1775_s8 + $0xd0] sm:$0xf0] }
  0x73   : > { %v1329_v18 = vor.u32 %v1512_v11, %v1326_v12 }
  0x7f   : > { %832 = vmatmul.bf16.gmra.mxu0 %v1245_v21  ;;  %v1340_v21 = vld [vmem:[%s1775_s8 + $0xe0] sm:$0xf] }
  0x80   : > { %881 = vmatmul.bf16.gmra.mxu1 %v1249_v22  ;;  %v1518_v22 = vld [vmem:[%s1775_s8 + $0xec] sm:$0xf0] }
  0x81   : > { %930 = vmatmul.bf16.gmra.mxu2 %v1253_v23  ;;  %v1516_v23 = vld [vmem:[%s1775_s8 + $0xe4] sm:$0xf]  ;;  %v1341_v29 = vor.u32 %v1518_v22, %v1340_v21  ;;  %v360_v22 = vld [vmem:[#allocation2 + $0x68] sm:$0xff] }
  0x82   : > { %979 = vmatmul.bf16.gmra.mxu3 %v1257_v24  ;;  %v1342_v24 = vld [vmem:[%s1775_s8 + $0xf0] sm:$0xf0] }
  0x83   : > { %v1345_v30 = vor.u32 %v1516_v23, %v1342_v24 }
  0x8f   : > { %837 = vmatmul.bf16.gmra.mxu0 %v1261_v33 }
  0x90   : > { %886 = vmatmul.bf16.gmra.mxu1 %v1265_v34 }
  0x91   : > { %935 = vmatmul.bf16.gmra.mxu2 %v1269_v35 }
  0x92   : > { %984 = vmatmul.bf16.gmra.mxu3 %v1273_v36 }
  0x9f   : > { %842 = vmatmul.bf16.gmra.mxu0 %v1277_v45 }
  0xa0   : > { %891 = vmatmul.bf16.gmra.mxu1 %v1281_v46 }
  0xa1   : > { %940 = vmatmul.bf16.gmra.mxu2 %v1285_v47 }
  0xa2   : > { %989 = vmatmul.bf16.gmra.mxu3 %v1289_v48 }
  0xaf   : > { %847 = vmatmul.bf16.gmra.mxu0 %v1293_v57 }
  0xb0   : > { %896 = vmatmul.bf16.gmra.mxu1 %v1297_v58 }
  0xb1   : > { %945 = vmatmul.bf16.gmra.mxu2 %v1301_v59  ;;  %v357_v59 = vld [vmem:[#allocation2 + $0x58] sm:$0xff] }
  0xb2   : > { %994 = vmatmul.bf16.gmra.mxu3 %v1305_v60 }
  0xbf   : > { %852 = vmatmul.bf16.gmra.mxu0 %v1309_v5 }
  0xc0   : > { %901 = vmatmul.bf16.gmra.mxu1 %v1313_v6 }
  0xc1   : > { %950 = vmatmul.bf16.gmra.mxu2 %v1317_v7 }
  0xc2   : > { %999 = vmatmul.bf16.gmra.mxu3 %v1321_v8 }
  0xcf   : > { %857 = vmatmul.bf16.gmra.mxu0 %v1325_v17 }
  0xd0   : > { %906 = vmatmul.bf16.gmra.mxu1 %v1329_v18 }
  0xd1   : > { %955 = vmatmul.bf16.gmra.mxu2 %v1333_v19 }
  0xd2   : > { %1004 = vmatmul.bf16.gmra.mxu3 %v1337_v20 }
  0xdf   : > { %862 = vmatmul.bf16.gmra.mxu0 %v1341_v29 }
  0xe0   : > { %911 = vmatmul.bf16.gmra.mxu1 %v1345_v30 }
  0xe1   : > { %960 = vmatmul.bf16.gmra.mxu2 %v1349_v31  ;;  %v361_v31 = vld [vmem:[#allocation2 + $0x8] sm:$0xff] }
  0xe2   : > { %1009 = vmatmul.bf16.gmra.mxu3 %v1353_v32 }
  0xec   : > { %v828_v33 = vpop.f32.mrf.mxu0 }
  0xed   : > { %v877_v34 = vpop.f32.mrf.mxu1 }
  0xee   : > { %v878_v35 = vadd.f32 %v877_v34, %v828_v33 }
  0xf4   : > { %v926_v36 = vpop.f32.mrf.mxu2  ;;  %v830_v39 = vpop.f32.mrf.mxu0 }
  0xf5   : > { %v975_v37 = vpop.f32.mrf.mxu3  ;;  %v927_v38 = vadd.f32 %v926_v36, %v878_v35  ;;  %v879_v40 = vpop.f32.mrf.mxu1 }
  0xf6   : > { %v880_v44 = vadd.f32 %v879_v40, %v830_v39  ;;  %v362_v40 = vld [vmem:[#allocation2 + $0x48] sm:$0xff] }
  0xf7   : > { %v976_v42 = vadd.f32 %v975_v37, %v927_v38 }
  0xf9   : > { %v1015_v43 = vadd.f32 %v976_v42, %v355_v41 }
  0xfb   : > { %1031 = vst [vmem:[#allocation2 + $0x30] sm:$0xff] %v1015_v43 }
  0xfc   : > { %v928_v45 = vpop.f32.mrf.mxu2  ;;  %v833_v48 = vpop.f32.mrf.mxu0 }
  0xfd   : > { %v977_v46 = vpop.f32.mrf.mxu3  ;;  %v929_v47 = vadd.f32 %v928_v45, %v880_v44  ;;  %v882_v49 = vpop.f32.mrf.mxu1 }
  0xfe   : > { %v883_v53 = vadd.f32 %v882_v49, %v833_v48  ;;  %v363_v49 = vld [vmem:[#allocation2 + $0x40] sm:$0xff] }
  0xff   : > { %v978_v51 = vadd.f32 %v977_v46, %v929_v47 }
 0x101   : > { %v1016_v52 = vadd.f32 %v978_v51, %v356_v50 }
 0x103   : > { %1032 = vst [vmem:[#allocation2] sm:$0xff] %v1016_v52 }
 0x104   : > { %v931_v54 = vpop.f32.mrf.mxu2  ;;  %v835_v57 = vpop.f32.mrf.mxu0 }
 0x105   : > { %v980_v55 = vpop.f32.mrf.mxu3  ;;  %v932_v56 = vadd.f32 %v931_v54, %v883_v53  ;;  %v884_v58 = vpop.f32.mrf.mxu1 }
 0x106   : > { %v885_v62 = vadd.f32 %v884_v58, %v835_v57  ;;  %v364_v58 = vld [vmem:[#allocation2 + $0x20] sm:$0xff] }
 0x107   : > { %v981_v60 = vadd.f32 %v980_v55, %v932_v56 }
 0x109   : > { %v1017_v61 = vadd.f32 %v981_v60, %v357_v59 }
 0x10b   : > { %1033 = vst [vmem:[#allocation2 + $0x58] sm:$0xff] %v1017_v61 }
 0x10c   : > { %v933_v63 = vpop.f32.mrf.mxu2  ;;  %v838_v2 = vpop.f32.mrf.mxu0 }
 0x10d   : > { %v982_v0 = vpop.f32.mrf.mxu3  ;;  %v934_v1 = vadd.f32 %v933_v63, %v885_v62  ;;  %v887_v3 = vpop.f32.mrf.mxu1 }
 0x10e   : > { %v888_v7 = vadd.f32 %v887_v3, %v838_v2  ;;  %v365_v3 = vld [vmem:[#allocation2 + $0x10] sm:$0xff] }
 0x10f   : > { %v983_v5 = vadd.f32 %v982_v0, %v934_v1 }
 0x111   : > { %v1018_v6 = vadd.f32 %v983_v5, %v358_v4 }
 0x113   : > { %1034 = vst [vmem:[#allocation2 + $0x18] sm:$0xff] %v1018_v6 }
 0x114   : > { %v936_v8 = vpop.f32.mrf.mxu2  ;;  %v840_v11 = vpop.f32.mrf.mxu0 }
 0x115   : > { %v985_v9 = vpop.f32.mrf.mxu3  ;;  %v937_v10 = vadd.f32 %v936_v8, %v888_v7  ;;  %v889_v12 = vpop.f32.mrf.mxu1 }
 0x116   : > { %v890_v16 = vadd.f32 %v889_v12, %v840_v11  ;;  %v366_v12 = vld [vmem:[#allocation2 + $0x38] sm:$0xff] }
 0x117   : > { %v986_v14 = vadd.f32 %v985_v9, %v937_v10 }
 0x119   : > { %v1019_v15 = vadd.f32 %v986_v14, %v359_v13 }
 0x11b   : > { %1035 = vst [vmem:[#allocation2 + $0x50] sm:$0xff] %v1019_v15 }
 0x11c   : > { %v938_v17 = vpop.f32.mrf.mxu2  ;;  %v843_v20 = vpop.f32.mrf.mxu0 }
 0x11d   : > { %v987_v18 = vpop.f32.mrf.mxu3  ;;  %v939_v19 = vadd.f32 %v938_v17, %v890_v16  ;;  %v892_v21 = vpop.f32.mrf.mxu1 }
 0x11e   : > { %v893_v25 = vadd.f32 %v892_v21, %v843_v20  ;;  %v367_v21 = vld [vmem:[#allocation2 + $0x60] sm:$0xff] }
 0x11f   : > { %v988_v23 = vadd.f32 %v987_v18, %v939_v19 }
 0x121   : > { %v1020_v24 = vadd.f32 %v988_v23, %v360_v22 }
 0x123   : > { %1036 = vst [vmem:[#allocation2 + $0x68] sm:$0xff] %v1020_v24 }
 0x124   : > { %v941_v26 = vpop.f32.mrf.mxu2  ;;  %v845_v29 = vpop.f32.mrf.mxu0 }
 0x125   : > { %v990_v27 = vpop.f32.mrf.mxu3  ;;  %v942_v28 = vadd.f32 %v941_v26, %v893_v25  ;;  %v894_v30 = vpop.f32.mrf.mxu1 }
 0x126   : > { %v895_v34 = vadd.f32 %v894_v30, %v845_v29 }
 0x127   : > { %v991_v32 = vadd.f32 %v990_v27, %v942_v28  ;;  %v368_v28 = vld [vmem:[#allocation2 + $0x70] sm:$0xff] }
 0x129   : > { %v1021_v33 = vadd.f32 %v991_v32, %v361_v31 }
 0x12b   : > { %1037 = vst [vmem:[#allocation2 + $0x8] sm:$0xff] %v1021_v33 }
 0x12c   : > { %v943_v35 = vpop.f32.mrf.mxu2  ;;  %v848_v38 = vpop.f32.mrf.mxu0 }
 0x12d   : > { %v992_v36 = vpop.f32.mrf.mxu3  ;;  %v944_v37 = vadd.f32 %v943_v35, %v895_v34  ;;  %v897_v39 = vpop.f32.mrf.mxu1 }
 0x12e   : > { %v898_v43 = vadd.f32 %v897_v39, %v848_v38 }
 0x12f   : > { %v993_v41 = vadd.f32 %v992_v36, %v944_v37  ;;  %v369_v37 = vld [vmem:[#allocation2 + $0x78] sm:$0xff] }
 0x131   : > { %v1022_v42 = vadd.f32 %v993_v41, %v362_v40 }
 0x133   : > { %1038 = vst [vmem:[#allocation2 + $0x48] sm:$0xff] %v1022_v42 }
 0x134   : > { %v946_v44 = vpop.f32.mrf.mxu2  ;;  %v850_v47 = vpop.f32.mrf.mxu0 }
 0x135   : > { %v995_v45 = vpop.f32.mrf.mxu3  ;;  %v947_v46 = vadd.f32 %v946_v44, %v898_v43  ;;  %v899_v48 = vpop.f32.mrf.mxu1 }
 0x136   : > { %v900_v52 = vadd.f32 %v899_v48, %v850_v47 }
 0x137   : > { %v996_v50 = vadd.f32 %v995_v45, %v947_v46  ;;  %v370_v45 = vld [vmem:[#allocation2 + $0x28] sm:$0xff] }
 0x139   : > { %v1023_v51 = vadd.f32 %v996_v50, %v363_v49 }
 0x13b   : > { %1039 = vst [vmem:[#allocation2 + $0x40] sm:$0xff] %v1023_v51 }
 0x13c   : > { %v948_v53 = vpop.f32.mrf.mxu2  ;;  %v853_v56 = vpop.f32.mrf.mxu0 }
 0x13d   : > { %v997_v54 = vpop.f32.mrf.mxu3  ;;  %v949_v55 = vadd.f32 %v948_v53, %v900_v52  ;;  %v902_v57 = vpop.f32.mrf.mxu1 }
 0x13e   : > { %v903_v61 = vadd.f32 %v902_v57, %v853_v56 }
 0x13f   : > { %v998_v59 = vadd.f32 %v997_v54, %v949_v55 }
 0x141   : > { %v1024_v60 = vadd.f32 %v998_v59, %v364_v58 }
 0x143   : > { %1040 = vst [vmem:[#allocation2 + $0x20] sm:$0xff] %v1024_v60 }
 0x144   : > { %v951_v62 = vpop.f32.mrf.mxu2  ;;  %v855_v1 = vpop.f32.mrf.mxu0 }
 0x145   : > { %v1000_v63 = vpop.f32.mrf.mxu3  ;;  %v952_v0 = vadd.f32 %v951_v62, %v903_v61  ;;  %v904_v2 = vpop.f32.mrf.mxu1 }
 0x146   : > { %v905_v6 = vadd.f32 %v904_v2, %v855_v1 }
 0x147   : > { %v1001_v4 = vadd.f32 %v1000_v63, %v952_v0 }
 0x149   : > { %v1025_v5 = vadd.f32 %v1001_v4, %v365_v3 }
 0x14b   : > { %1041 = vst [vmem:[#allocation2 + $0x10] sm:$0xff] %v1025_v5 }
 0x14c   : > { %v953_v7 = vpop.f32.mrf.mxu2  ;;  %v858_v10 = vpop.f32.mrf.mxu0 }
 0x14d   : > { %v1002_v8 = vpop.f32.mrf.mxu3  ;;  %v954_v9 = vadd.f32 %v953_v7, %v905_v6  ;;  %v907_v11 = vpop.f32.mrf.mxu1 }
 0x14e   : > { %v908_v15 = vadd.f32 %v907_v11, %v858_v10 }
 0x14f   : > { %v1003_v13 = vadd.f32 %v1002_v8, %v954_v9 }
 0x151   : > { %v1026_v14 = vadd.f32 %v1003_v13, %v366_v12 }
 0x153   : > { %1042 = vst [vmem:[#allocation2 + $0x38] sm:$0xff] %v1026_v14 }
 0x154   : > { %v956_v16 = vpop.f32.mrf.mxu2  ;;  %v860_v19 = vpop.f32.mrf.mxu0 }
 0x155   : > { %v1005_v17 = vpop.f32.mrf.mxu3  ;;  %v957_v18 = vadd.f32 %v956_v16, %v908_v15  ;;  %v909_v20 = vpop.f32.mrf.mxu1 }
 0x156   : > { %v910_v24 = vadd.f32 %v909_v20, %v860_v19 }
 0x157   : > { %v1006_v22 = vadd.f32 %v1005_v17, %v957_v18 }
 0x159   : > { %v1027_v23 = vadd.f32 %v1006_v22, %v367_v21 }
 0x15b   : > { %1043 = vst [vmem:[#allocation2 + $0x60] sm:$0xff] %v1027_v23 }
 0x15c   : > { %v958_v25 = vpop.f32.mrf.mxu2  ;;  %v863_v29 = vpop.f32.mrf.mxu0 }
 0x15d   : > { %v1007_v26 = vpop.f32.mrf.mxu3  ;;  %v959_v27 = vadd.f32 %v958_v25, %v910_v24  ;;  %v912_v30 = vpop.f32.mrf.mxu1 }
 0x15e   : > { %v913_v33 = vadd.f32 %v912_v30, %v863_v29 }
 0x15f   : > { %v1008_v31 = vadd.f32 %v1007_v26, %v959_v27 }
 0x161   : > { %v1028_v32 = vadd.f32 %v1008_v31, %v368_v28 }
 0x163   : > { %1044 = vst [vmem:[#allocation2 + $0x70] sm:$0xff] %v1028_v32 }
 0x164   : > { %v961_v34 = vpop.f32.mrf.mxu2  ;;  %v865_v39 = vpop.f32.mrf.mxu0 }
 0x165   : > { %v1010_v35 = vpop.f32.mrf.mxu3  ;;  %v962_v36 = vadd.f32 %v961_v34, %v913_v33  ;;  %v914_v40 = vpop.f32.mrf.mxu1 }
 0x166   : > { %v915_v42 = vadd.f32 %v914_v40, %v865_v39 }
 0x167   : > { %v1011_v38 = vadd.f32 %v1010_v35, %v962_v36 }
 0x169   : > { %v1029_v41 = vadd.f32 %v1011_v38, %v369_v37 }
 0x16b   : > { %1045 = vst [vmem:[#allocation2 + $0x78] sm:$0xff] %v1029_v41 }
 0x16c   : > { %v963_v43 = vpop.f32.mrf.mxu2 }
 0x16d   : > { %v964_v44 = vadd.f32 %v963_v43, %v915_v42  ;;  %v1012_v46 = vpop.f32.mrf.mxu3 }
 0x16f   : > { %v1013_v47 = vadd.f32 %v1012_v46, %v964_v44  ;;  %1050 = sbr.rel (%p1482_p11) target bundleno = 391 (0x187), region = 63 }
 0x171   : > { %v1030_v48 = vadd.f32 %v1013_v47, %v370_v45 }
 0x173   : > { %1046 = vst [vmem:[#allocation2 + $0x28] sm:$0xff] %v1030_v48 }
 0x174   : > { %v1051_v49 = vld [vmem:[#allocation2 + $0x30] sm:$0xff]  ;;  %v1593_v50 = vld [vmem:[%s1943_s2] ss:$0 sm:$0xff]  ;;  %v1053_v52 = vld [vmem:[#allocation2 + $0x58] sm:$0xff] }
 0x175   : > { %v1052_v51 = vld [vmem:[#allocation2] sm:$0xff]  ;;  %v1054_v53 = vld [vmem:[#allocation2 + $0x18] sm:$0xff]  ;;  %v1071_v54 = vadd.f32 %v1593_v50, %v1051_v49  ;;  %v1073_v56 = vadd.f32 %v1593_v50, %v1053_v52  ;;  %v1055_v57 = vld [vmem:[#allocation2 + $0x50] sm:$0xff] }
 0x176   : > { %v1072_v55 = vadd.f32 %v1593_v50, %v1052_v51  ;;  %v1056_v58 = vld [vmem:[#allocation2 + $0x68] sm:$0xff]  ;;  %v1074_v59 = vadd.f32 %v1593_v50, %v1054_v53  ;;  %v1075_v61 = vadd.f32 %v1593_v50, %v1055_v57  ;;  %v1059_v0 = vld [vmem:[#allocation2 + $0x40] sm:$0xff]  ;;  %v1061_v4 = vld [vmem:[#allocation2 + $0x10] sm:$0xff] }
 0x177   : > { %v1057_v60 = vld [vmem:[#allocation2 + $0x8] sm:$0xff]  ;;  %1087 = vst [vmem:[%s1944_s3] sm:$0xff] %v1071_v54  ;;  %v1076_v63 = vadd.f32 %v1593_v50, %v1056_v58  ;;  %v1060_v2 = vld [vmem:[#allocation2 + $0x20] sm:$0xff]  ;;  %v1079_v5 = vadd.f32 %v1593_v50, %v1059_v0  ;;  %v1062_v6 = vld [vmem:[#allocation2 + $0x38] sm:$0xff]  ;;  %v1081_v9 = vadd.f32 %v1593_v50, %v1061_v4 }
 0x178   : > { %v1058_v62 = vld [vmem:[#allocation2 + $0x48] sm:$0xff]  ;;  %1088 = vst [vmem:[%s1944_s3 + $0x8] sm:$0xff] %v1072_v55  ;;  %v1077_v1 = vadd.f32 %v1593_v50, %v1057_v60  ;;  %v1080_v7 = vadd.f32 %v1593_v50, %v1060_v2  ;;  %v1063_v8 = vld [vmem:[#allocation2 + $0x60] sm:$0xff]  ;;  %v1064_v10 = vld [vmem:[#allocation2 + $0x70] sm:$0xff]  ;;  %v1082_v11 = vadd.f32 %v1593_v50, %v1062_v6 }
 0x179   : > { %1089 = vst [vmem:[%s1944_s3 + $0x10] sm:$0xff] %v1073_v56  ;;  %v1078_v3 = vadd.f32 %v1593_v50, %v1058_v62  ;;  %v1065_v12 = vld [vmem:[#allocation2 + $0x78] sm:$0xff]  ;;  %v1083_v13 = vadd.f32 %v1593_v50, %v1063_v8  ;;  %v1084_v15 = vadd.f32 %v1593_v50, %v1064_v10 }
 0x17a   : > { %1090 = vst [vmem:[%s1944_s3 + $0x18] sm:$0xff] %v1074_v59  ;;  %v1066_v14 = vld [vmem:[#allocation2 + $0x28] sm:$0xff]  ;;  %v1085_v16 = vadd.f32 %v1593_v50, %v1065_v12 }
 0x17b   : > { %1091 = vst [vmem:[%s1944_s3 + $0x20] sm:$0xff] %v1075_v61  ;;  %v1086_v17 = vadd.f32 %v1593_v50, %v1066_v14 }
 0x17c   : > { %1092 = vst [vmem:[%s1944_s3 + $0x28] sm:$0xff] %v1076_v63 }
 0x17d   : > { %1093 = vst [vmem:[%s1944_s3 + $0x30] sm:$0xff] %v1077_v1 }
 0x17e   : > { %1094 = vst [vmem:[%s1944_s3 + $0x38] sm:$0xff] %v1078_v3 }
 0x17f   : > { %1095 = vst [vmem:[%s1944_s3 + $0x40] sm:$0xff] %v1079_v5 }
 0x180   : > { %1096 = vst [vmem:[%s1944_s3 + $0x48] sm:$0xff] %v1080_v7 }
 0x181   : > { %1097 = vst [vmem:[%s1944_s3 + $0x50] sm:$0xff] %v1081_v9 }
 0x182   : > { %1098 = vst [vmem:[%s1944_s3 + $0x58] sm:$0xff] %v1082_v11 }
 0x183   : > { %1099 = vst [vmem:[%s1944_s3 + $0x60] sm:$0xff] %v1083_v13 }
 0x184   : > { %1100 = vst [vmem:[%s1944_s3 + $0x68] sm:$0xff] %v1084_v15 }
 0x185   : > { %1101 = vst [vmem:[%s1944_s3 + $0x70] sm:$0xff] %v1085_v16 }
 0x186   : > { %1102 = vst [vmem:[%s1944_s3 + $0x78] sm:$0xff] %v1086_v17 }
 0x187 PF: > { %s13_s16 = sadd.s32 1, %s1632_s16   ;;  %s1945_s12 = smov %s1620_s13 }
 0x188   : > { %p10_p12 = scmp.ge.s32.totalorder %s13_s16, 4   ;;  %s1946_s13 = smov %s1690_s20 }
 0x189   : > { %s1947_s14 = smov %s1628_s15  ;;  %s1948_s15 = smov %s1950_s17 }
 0x18a   :  { %12 = sbr.rel (!%p10_p12) target bundleno = 3 (0x3), region = 104 }

// kernel: run.17
= control target key start
LH: loop header
LB: loop body
LE: loop exit
PB: predicated region body
PF: predicated region fallthrough
CT: control target
= control target key end

     0   :  { %s1655_s12 = smov 0   ;;  %s1657_s13 = smov 0   ;;  %s1941_s0 = inlined_call_operand.vmem [shape: bf16[128,1536], index: 0, kind: input, shape index: {}]   ;;  %s1942_s1 = inlined_call_operand.vmem [shape: bf16[1536,128], index: 1, kind: input, shape index: {}]   ;;  %s1943_s2 = inlined_call_operand.vmem [shape: f32[1,128], index: 2, kind: input, shape index: {}]   ;;  %s1944_s3 = inlined_call_operand.vmem [shape: f32[128,128], index: 3, kind: output, shape index: {}]  }
   0x1   :  { %s1659_s14 = smov 0   ;;  %s1661_s15 = smov 0  }
   0x2   :  { %s1663_s16 = smov 0  }
   0x3 LB: > { %s25_s17 = sadd.s32 1, %s1628_s15  ;;  %p48_p1 = scmp.ne.s32.totalorder %s1620_s13, %s1616_s12  ;;  %s1632_s16 = sphi %s1663_s16, %s13_s16   ;;  %s1628_s15 = sphi %s1661_s15, %s1948_s15   ;;  %s1624_s14 = sphi %s1659_s14, %s1947_s14   ;;  %s1620_s13 = sphi %s1657_s13, %s1946_s13   ;;  %s1616_s12 = sphi %s1655_s12, %s1945_s12  }
   0x4   : > { %p26_p0 = scmp.ge.s32.totalorder %s25_s17, 3  ;;  %p49_p2 = scmp.eq.s32.totalorder %s1632_s16, 0 }
   0x5   : > { %s41_s19 = sadd.s32 1, %s1620_s13  ;;  %p1217_p5 = scmp.ge.s32.totalorder %s1632_s16, 3 }
   0x6   : > { %s1950_s17 = smov (%p26_p0, %s25_s17), 0  ;;  %p50_p3 = por %p49_p2, %p48_p1 }
   0x7   : > { %s37_s18 = ssub.s32 %s1628_s15, %s1950_s17  ;;  %162 = sbr.rel (%p1217_p5) target bundleno = 48 (0x30), region = 20 }
   0x8   : > { %p39_p4 = scmp.eq.s32.totalorder %s37_s18, 0 }
   0xa   : > { %s1690_s20 = scalar_select %p39_p4, %s1620_s13, %s41_s19  }
   0xc   : > { %165 = sbr.rel (!%p50_p3) target bundleno = 48 (0x30), region = 24  ;;  %s167_s21 = sand.u32 (%p50_p3), 1, %s1620_s13  }
   0xd   : > { %s1487_s22 = sshll.u32 (%p50_p3), %s1628_s15, 4  ;;  %s1218_s23 = sshll.u32 (%p50_p3), %s167_s21, 8 }
   0xe   : > { %s1698_s26 = scalar_lea.vmem (%p50_p3), %s1941_s0, %s1487_s22  ;;  %s1703_s27 = scalar_lea.vmem (%p50_p3), [#allocation3], %s1218_s23 }
   0xf   : > { %v188_v0 = vld [vmem:[%s1698_s26] sm:$0xff] (%p50_p3)  ;;  %v190_v1 = vld [vmem:[%s1698_s26 + $0x8] sm:$0xff] (%p50_p3)  ;;  %v192_v2 = vld [vmem:[%s1698_s26 + $0x30] sm:$0xff] (%p50_p3) }
  0x10   : > { %189 = vst [vmem:[%s1703_s27] sm:$0xff] (%p50_p3), %v188_v0  ;;  %v194_v3 = vld [vmem:[%s1698_s26 + $0x38] sm:$0xff] (%p50_p3)  ;;  %v196_v4 = vld [vmem:[%s1698_s26 + $0x60] sm:$0xff] (%p50_p3)  ;;  %v198_v5 = vld [vmem:[%s1698_s26 + $0x68] sm:$0xff] (%p50_p3) }
  0x11   : > { %191 = vst [vmem:[%s1703_s27 + $0x8] sm:$0xff] %v190_v1  ;;  %v200_v6 = vld [vmem:[%s1698_s26 + $0x90] sm:$0xff]  ;;  %v202_v7 = vld [vmem:[%s1698_s26 + $0x98] sm:$0xff]  ;;  %v204_v8 = vld [vmem:[%s1698_s26 + $0xc0] sm:$0xff] }
  0x12   : > { %193 = vst [vmem:[%s1703_s27 + $0x10] sm:$0xff] %v192_v2  ;;  %v206_v9 = vld [vmem:[%s1698_s26 + $0xc8] sm:$0xff]  ;;  %v208_v10 = vld [vmem:[%s1698_s26 + $0xf0] sm:$0xff]  ;;  %v210_v11 = vld [vmem:[%s1698_s26 + $0xf8] sm:$0xff] }
  0x13   : > { %195 = vst [vmem:[%s1703_s27 + $0x18] sm:$0xff] %v194_v3  ;;  %v212_v12 = vld [vmem:[%s1698_s26 + $0x120] sm:$0xff]  ;;  %v214_v13 = vld [vmem:[%s1698_s26 + $0x128] sm:$0xff]  ;;  %v216_v14 = vld [vmem:[%s1698_s26 + $0x150] sm:$0xff] }
  0x14   : > { %197 = vst [vmem:[%s1703_s27 + $0x20] sm:$0xff] %v196_v4  ;;  %v218_v15 = vld [vmem:[%s1698_s26 + $0x158] sm:$0xff]  ;;  %v220_v16 = vld [vmem:[%s1698_s26 + $0x180] sm:$0xff]  ;;  %v222_v17 = vld [vmem:[%s1698_s26 + $0x188] sm:$0xff] }
  0x15   : > { %199 = vst [vmem:[%s1703_s27 + $0x28] sm:$0xff] %v198_v5  ;;  %v224_v18 = vld [vmem:[%s1698_s26 + $0x1b0] sm:$0xff]  ;;  %v226_v19 = vld [vmem:[%s1698_s26 + $0x1b8] sm:$0xff]  ;;  %v228_v20 = vld [vmem:[%s1698_s26 + $0x1e0] sm:$0xff] }
  0x16   : > { %201 = vst [vmem:[%s1703_s27 + $0x30] sm:$0xff] %v200_v6  ;;  %v230_v21 = vld [vmem:[%s1698_s26 + $0x1e8] sm:$0xff]  ;;  %v232_v22 = vld [vmem:[%s1698_s26 + $0x210] sm:$0xff]  ;;  %v234_v23 = vld [vmem:[%s1698_s26 + $0x218] sm:$0xff] }
  0x17   : > { %203 = vst [vmem:[%s1703_s27 + $0x38] sm:$0xff] %v202_v7  ;;  %v236_v24 = vld [vmem:[%s1698_s26 + $0x240] sm:$0xff]  ;;  %v238_v25 = vld [vmem:[%s1698_s26 + $0x248] sm:$0xff]  ;;  %v240_v26 = vld [vmem:[%s1698_s26 + $0x270] sm:$0xff] }
  0x18   : > { %205 = vst [vmem:[%s1703_s27 + $0x40] sm:$0xff] %v204_v8  ;;  %v242_v27 = vld [vmem:[%s1698_s26 + $0x278] sm:$0xff]  ;;  %v244_v28 = vld [vmem:[%s1698_s26 + $0x2a0] sm:$0xff]  ;;  %v246_v29 = vld [vmem:[%s1698_s26 + $0x2a8] sm:$0xff] }
  0x19   : > { %207 = vst [vmem:[%s1703_s27 + $0x48] sm:$0xff] %v206_v9  ;;  %v248_v30 = vld [vmem:[%s1698_s26 + $0x2d0] sm:$0xff]  ;;  %v250_v31 = vld [vmem:[%s1698_s26 + $0x2d8] sm:$0xff] }
  0x1a   : > { %209 = vst [vmem:[%s1703_s27 + $0x50] sm:$0xff] %v208_v10 }
  0x1b   : > { %211 = vst [vmem:[%s1703_s27 + $0x58] sm:$0xff] %v210_v11 }
  0x1c   : > { %213 = vst [vmem:[%s1703_s27 + $0x60] sm:$0xff] %v212_v12 }
  0x1d   : > { %215 = vst [vmem:[%s1703_s27 + $0x68] sm:$0xff] %v214_v13 }
  0x1e   : > { %217 = vst [vmem:[%s1703_s27 + $0x70] sm:$0xff] %v216_v14 }
  0x1f   : > { %219 = vst [vmem:[%s1703_s27 + $0x78] sm:$0xff] %v218_v15 }
  0x20   : > { %221 = vst [vmem:[%s1703_s27 + $0x80] sm:$0xff] %v220_v16 }
  0x21   : > { %223 = vst [vmem:[%s1703_s27 + $0x88] sm:$0xff] %v222_v17 }
  0x22   : > { %225 = vst [vmem:[%s1703_s27 + $0x90] sm:$0xff] %v224_v18 }
  0x23   : > { %227 = vst [vmem:[%s1703_s27 + $0x98] sm:$0xff] %v226_v19 }
  0x24   : > { %229 = vst [vmem:[%s1703_s27 + $0xa0] sm:$0xff] %v228_v20 }
  0x25   : > { %231 = vst [vmem:[%s1703_s27 + $0xa8] sm:$0xff] %v230_v21 }
  0x26   : > { %233 = vst [vmem:[%s1703_s27 + $0xb0] sm:$0xff] %v232_v22 }
  0x27   : > { %235 = vst [vmem:[%s1703_s27 + $0xb8] sm:$0xff] %v234_v23 }
  0x28   : > { %237 = vst [vmem:[%s1703_s27 + $0xc0] sm:$0xff] %v236_v24 }
  0x29   : > { %239 = vst [vmem:[%s1703_s27 + $0xc8] sm:$0xff] %v238_v25 }
  0x2a   : > { %241 = vst [vmem:[%s1703_s27 + $0xd0] sm:$0xff] %v240_v26 }
  0x2b   : > { %243 = vst [vmem:[%s1703_s27 + $0xd8] sm:$0xff] %v242_v27 }
  0x2c   : > { %245 = vst [vmem:[%s1703_s27 + $0xe0] sm:$0xff] %v244_v28 }
  0x2d   : > { %247 = vst [vmem:[%s1703_s27 + $0xe8] sm:$0xff] %v246_v29 }
  0x2e   : > { %249 = vst [vmem:[%s1703_s27 + $0xf0] sm:$0xff] %v248_v30 }
  0x2f   : > { %251 = vst [vmem:[%s1703_s27 + $0xf8] sm:$0xff] %v250_v31 }
  0x30 PF: > { %p1221_p6 = scmp.ge.s32.totalorder %s1632_s16, 1  ;;  %p268_p7 = scmp.lt.s32.totalorder %s1632_s16, 4 }
  0x32   : > { %p269_p8 = pnand %p1221_p6, %p268_p7 }
  0x33   : > { %s275_s28 = sand.u32 (!%p269_p8), 1, %s1616_s12   ;;  %s1223_s29 = sshll.u32 (!%p269_p8), %s1624_s14, 6 }
  0x34   : > { %272 = sbr.rel (%p269_p8) target bundleno = 391 (0x187), region = 51  ;;  %s1222_s30 = sshll.u32 (!%p269_p8), %s275_s28, 8 }
  0x35   : > { %p315_p9 = scmp.lt.s32.totalorder (!%p269_p8), %s1223_s29, 191  ;;  %s1775_s8 = scalar_lea.vmem (!%p269_p8), [#allocation3], %s1222_s30 }
  0x36   : > { %p1225_p10 = scmp.ne.s32.totalorder (!%p269_p8), %s1624_s14, 0 }
  0x39   : > { %s1952_s29 = smov (!%p315_p9, %s1223_s29), 191  ;;  %338 = sbr.rel (%p1225_p10) target bundleno = 79 (0x4f), region = 59 }
  0x3a   : > { %s1224_s4 = sshll.u32 %s1952_s29, 2 }
  0x3b   : > { %s1773_s7 = scalar_lea.vmem %s1942_s1, %s1224_s4 }
  0x3e   : > { %v1634_v32 = vmov 0.0  }
  0x3f   : > { %339 = vst [vmem:[#allocation2 + $0x30] sm:$0xff] %v1634_v32 }
  0x40   : > { %340 = vst [vmem:[#allocation2] sm:$0xff] %v1634_v32 }
  0x41   : > { %341 = vst [vmem:[#allocation2 + $0x58] sm:$0xff] %v1634_v32 }
  0x42   : > { %342 = vst [vmem:[#allocation2 + $0x18] sm:$0xff] %v1634_v32 }
  0x43   : > { %343 = vst [vmem:[#allocation2 + $0x50] sm:$0xff] %v1634_v32 }
  0x44   : > { %344 = vst [vmem:[#allocation2 + $0x68] sm:$0xff] %v1634_v32 }
  0x45   : > { %345 = vst [vmem:[#allocation2 + $0x8] sm:$0xff] %v1634_v32 }
  0x46   : > { %346 = vst [vmem:[#allocation2 + $0x48] sm:$0xff] %v1634_v32 }
  0x47   : > { %347 = vst [vmem:[#allocation2 + $0x40] sm:$0xff] %v1634_v32 }
  0x48   : > { %348 = vst [vmem:[#allocation2 + $0x20] sm:$0xff] %v1634_v32 }
  0x49   : > { %349 = vst [vmem:[#allocation2 + $0x10] sm:$0xff] %v1634_v32 }
  0x4a   : > { %350 = vst [vmem:[#allocation2 + $0x38] sm:$0xff] %v1634_v32 }
  0x4b   : > { %351 = vst [vmem:[#allocation2 + $0x60] sm:$0xff] %v1634_v32 }
  0x4c   : > { %352 = vst [vmem:[#allocation2 + $0x70] sm:$0xff] %v1634_v32 }
  0x4d   : > { %353 = vst [vmem:[#allocation2 + $0x78] sm:$0xff] %v1634_v32 }
  0x4e   : > { %354 = vst [vmem:[#allocation2 + $0x28] sm:$0xff] %v1634_v32 }
  0x4f PF: > { %v1527_v33 = vld [vmem:[%s1773_s7 + $0x38] sm:$0xff]  ;;  %v1526_v37 = vld [vmem:[%s1773_s7 + $0x30] sm:$0xff]  ;;  %v1525_v41 = vld [vmem:[%s1773_s7 + $0x28] sm:$0xff]  ;;  %p1482_p11 = scmp.ne.s32.totalorder %s1624_s14, 2 }
  0x50   : > { %v1535_v34 = vld [vmem:[%s1773_s7 + $0x78] sm:$0xff]  ;;  %819 = vmatpush.bf16.msra.mxu0 %v1527_v33  ;;  %v1534_v38 = vld [vmem:[%s1773_s7 + $0x70] sm:$0xff]  ;;  %v1533_v42 = vld [vmem:[%s1773_s7 + $0x68] sm:$0xff] }
  0x51   : > { %v1543_v35 = vld [vmem:[%s1773_s7 + $0xb8] sm:$0xff]  ;;  %868 = vmatpush.bf16.msra.mxu1 %v1535_v34  ;;  %v1542_v39 = vld [vmem:[%s1773_s7 + $0xb0] sm:$0xff]  ;;  %v1541_v43 = vld [vmem:[%s1773_s7 + $0xa8] sm:$0xff] }
  0x52   : > { %v1551_v36 = vld [vmem:[%s1773_s7 + $0xf8] sm:$0xff]  ;;  %917 = vmatpush.bf16.msra.mxu2 %v1543_v35  ;;  %v1550_v40 = vld [vmem:[%s1773_s7 + $0xf0] sm:$0xff]  ;;  %v1549_v44 = vld [vmem:[%s1773_s7 + $0xe8] sm:$0xff] }
  0x53   : > { %966 = vmatpush.bf16.msra.mxu3 %v1551_v36  ;;  %v1524_v45 = vld [vmem:[%s1773_s7 + $0x20] sm:$0xff]  ;;  %v1523_v49 = vld [vmem:[%s1773_s7 + $0x18] sm:$0xff]  ;;  %v1522_v53 = vld [vmem:[%s1773_s7 + $0x10] sm:$0xff] }
  0x54   : > { %820 = vmatpush.bf16.msra.mxu0 %v1526_v37  ;;  %v1532_v46 = vld [vmem:[%s1773_s7 + $0x60] sm:$0xff]  ;;  %v1531_v50 = vld [vmem:[%s1773_s7 + $0x58] sm:$0xff]  ;;  %v1530_v54 = vld [vmem:[%s1773_s7 + $0x50] sm:$0xff] }
  0x55   : > { %869 = vmatpush.bf16.msra.mxu1 %v1534_v38  ;;  %v1540_v47 = vld [vmem:[%s1773_s7 + $0xa0] sm:$0xff]  ;;  %v1539_v51 = vld [vmem:[%s1773_s7 + $0x98] sm:$0xff]  ;;  %v1538_v55 = vld [vmem:[%s1773_s7 + $0x90] sm:$0xff] }
  0x56   : > { %918 = vmatpush.bf16.msra.mxu2 %v1542_v39  ;;  %v1548_v48 = vld [vmem:[%s1773_s7 + $0xe0] sm:$0xff]  ;;  %v1547_v52 = vld [vmem:[%s1773_s7 + $0xd8] sm:$0xff]  ;;  %v1546_v56 = vld [vmem:[%s1773_s7 + $0xd0] sm:$0xff] }
  0x57   : > { %967 = vmatpush.bf16.msra.mxu3 %v1550_v40  ;;  %v1521_v57 = vld [vmem:[%s1773_s7 + $0x8] sm:$0xff]  ;;  %v1520_v61 = vld [vmem:[%s1773_s7] sm:$0xff]  ;;  %v1490_v2 = vld [vmem:[%s1775_s8 + $0xc] sm:$0xf0] }
  0x58   : > { %821 = vmatpush.bf16.msra.mxu0 %v1525_v41  ;;  %v1529_v58 = vld [vmem:[%s1773_s7 + $0x48] sm:$0xff]  ;;  %v1528_v62 = vld [vmem:[%s1773_s7 + $0x40] sm:$0xff]  ;;  %v1230_v4 = vld [vmem:[%s1775_s8 + $0x10] sm:$0xf0] }
  0x59   : > { %870 = vmatpush.bf16.msra.mxu1 %v1533_v42  ;;  %v1537_v59 = vld [vmem:[%s1773_s7 + $0x88] sm:$0xff]  ;;  %v1536_v63 = vld [vmem:[%s1773_s7 + $0x80] sm:$0xff]  ;;  %v1491_v6 = vld [vmem:[%s1775_s8 + $0x14] sm:$0xf0] }
  0x5a   : > { %919 = vmatpush.bf16.msra.mxu2 %v1541_v43  ;;  %v1545_v60 = vld [vmem:[%s1773_s7 + $0xc8] sm:$0xff]  ;;  %v1544_v0 = vld [vmem:[%s1773_s7 + $0xc0] sm:$0xff]  ;;  %v1238_v8 = vld [vmem:[%s1775_s8 + $0x18] sm:$0xf0] }
  0x5b   : > { %968 = vmatpush.bf16.msra.mxu3 %v1549_v44  ;;  %v1228_v1 = vld [vmem:[%s1775_s8] sm:$0xf]  ;;  %v1488_v3 = vld [vmem:[%s1775_s8 + $0x4] sm:$0xf]  ;;  %v1236_v5 = vld [vmem:[%s1775_s8 + $0x8] sm:$0xf] }
  0x5c   : > { %822 = vmatpush.bf16.msra.mxu0 %v1524_v45  ;;  %v1489_v7 = vld [vmem:[%s1775_s8 + $0xc] sm:$0xf]  ;;  %v1229_v9 = vor.u32 %v1490_v2, %v1228_v1  ;;  %v1233_v10 = vor.u32 %v1488_v3, %v1230_v4  ;;  %v1237_v11 = vor.u32 %v1491_v6, %v1236_v5  ;;  %v1244_v13 = vld [vmem:[%s1775_s8 + $0x20] sm:$0xf]  ;;  %v1494_v14 = vld [vmem:[%s1775_s8 + $0x2c] sm:$0xf0] }
  0x5d   : > { %871 = vmatpush.bf16.msra.mxu1 %v1532_v46  ;;  %v1241_v12 = vor.u32 %v1489_v7, %v1238_v8  ;;  %v1492_v15 = vld [vmem:[%s1775_s8 + $0x24] sm:$0xf]  ;;  %v1246_v16 = vld [vmem:[%s1775_s8 + $0x30] sm:$0xf0]  ;;  %v1252_v17 = vld [vmem:[%s1775_s8 + $0x28] sm:$0xf]  ;;  %v1245_v21 = vor.u32 %v1494_v14, %v1244_v13 }
  0x5e   : > { %920 = vmatpush.bf16.msra.mxu2 %v1540_v47  ;;  %v1495_v18 = vld [vmem:[%s1775_s8 + $0x34] sm:$0xf0]  ;;  %v1493_v19 = vld [vmem:[%s1775_s8 + $0x2c] sm:$0xf]  ;;  %v1254_v20 = vld [vmem:[%s1775_s8 + $0x38] sm:$0xf0]  ;;  %v1249_v22 = vor.u32 %v1492_v15, %v1246_v16 }
  0x5f   : > { %969 = vmatpush.bf16.msra.mxu3 %v1548_v48  ;;  %v1253_v23 = vor.u32 %v1495_v18, %v1252_v17  ;;  %v1257_v24 = vor.u32 %v1493_v19, %v1254_v20  ;;  %v1260_v25 = vld [vmem:[%s1775_s8 + $0x40] sm:$0xf]  ;;  %v1498_v26 = vld [vmem:[%s1775_s8 + $0x4c] sm:$0xf0]  ;;  %v1496_v27 = vld [vmem:[%s1775_s8 + $0x44] sm:$0xf] }
  0x60   : > { %823 = vmatpush.bf16.msra.mxu0 %v1523_v49  ;;  %v1262_v28 = vld [vmem:[%s1775_s8 + $0x50] sm:$0xf0]  ;;  %v1268_v29 = vld [vmem:[%s1775_s8 + $0x48] sm:$0xf]  ;;  %v1499_v30 = vld [vmem:[%s1775_s8 + $0x54] sm:$0xf0]  ;;  %v1261_v33 = vor.u32 %v1498_v26, %v1260_v25 }
  0x61   : > { %872 = vmatpush.bf16.msra.mxu1 %v1531_v50  ;;  %v1497_v31 = vld [vmem:[%s1775_s8 + $0x4c] sm:$0xf]  ;;  %v1270_v32 = vld [vmem:[%s1775_s8 + $0x58] sm:$0xf0]  ;;  %v1265_v34 = vor.u32 %v1496_v27, %v1262_v28  ;;  %v1269_v35 = vor.u32 %v1499_v30, %v1268_v29  ;;  %v1276_v37 = vld [vmem:[%s1775_s8 + $0x60] sm:$0xf] }
  0x62   : > { %921 = vmatpush.bf16.msra.mxu2 %v1539_v51  ;;  %v1273_v36 = vor.u32 %v1497_v31, %v1270_v32  ;;  %v1502_v38 = vld [vmem:[%s1775_s8 + $0x6c] sm:$0xf0]  ;;  %v1500_v39 = vld [vmem:[%s1775_s8 + $0x64] sm:$0xf]  ;;  %v1278_v40 = vld [vmem:[%s1775_s8 + $0x70] sm:$0xf0] }
  0x63   : > { %970 = vmatpush.bf16.msra.mxu3 %v1547_v52  ;;  %v1284_v41 = vld [vmem:[%s1775_s8 + $0x68] sm:$0xf]  ;;  %v1503_v42 = vld [vmem:[%s1775_s8 + $0x74] sm:$0xf0]  ;;  %v1501_v43 = vld [vmem:[%s1775_s8 + $0x6c] sm:$0xf]  ;;  %v1277_v45 = vor.u32 %v1502_v38, %v1276_v37  ;;  %v1281_v46 = vor.u32 %v1500_v39, %v1278_v40 }
  0x64   : > { %824 = vmatpush.bf16.msra.mxu0 %v1522_v53  ;;  %v1286_v44 = vld [vmem:[%s1775_s8 + $0x78] sm:$0xf0]  ;;  %v1285_v47 = vor.u32 %v1503_v42, %v1284_v41  ;;  %v1292_v49 = vld [vmem:[%s1775_s8 + $0x80] sm:$0xf]  ;;  %v1506_v50 = vld [vmem:[%s1775_s8 + $0x8c] sm:$0xf0] }
  0x65   : > { %873 = vmatpush.bf16.msra.mxu1 %v1530_v54  ;;  %v1289_v48 = vor.u32 %v1501_v43, %v1286_v44  ;;  %v1504_v51 = vld [vmem:[%s1775_s8 + $0x84] sm:$0xf]  ;;  %v1294_v52 = vld [vmem:[%s1775_s8 + $0x90] sm:$0xf0]  ;;  %v1300_v53 = vld [vmem:[%s1775_s8 + $0x88] sm:$0xf] }
  0x66   : > { %922 = vmatpush.bf16.msra.mxu2 %v1538_v55  ;;  %v1507_v54 = vld [vmem:[%s1775_s8 + $0x94] sm:$0xf0]  ;;  %v1505_v55 = vld [vmem:[%s1775_s8 + $0x8c] sm:$0xf]  ;;  %v1316_v1 = vld [vmem:[%s1775_s8 + $0xa8] sm:$0xf] }
  0x67   : > { %971 = vmatpush.bf16.msra.mxu3 %v1546_v56  ;;  %v1302_v56 = vld [vmem:[%s1775_s8 + $0x98] sm:$0xf0]  ;;  %v1511_v2 = vld [vmem:[%s1775_s8 + $0xb4] sm:$0xf0]  ;;  %v1509_v3 = vld [vmem:[%s1775_s8 + $0xac] sm:$0xf] }
  0x68   : > { %825 = vmatpush.bf16.msra.mxu0 %v1521_v57  ;;  %v1293_v57 = vor.u32 %v1506_v50, %v1292_v49  ;;  %v1318_v4 = vld [vmem:[%s1775_s8 + $0xb8] sm:$0xf0]  ;;  %v1317_v7 = vor.u32 %v1511_v2, %v1316_v1  ;;  %v1332_v13 = vld [vmem:[%s1775_s8 + $0xc8] sm:$0xf]  ;;  %v1515_v14 = vld [vmem:[%s1775_s8 + $0xd4] sm:$0xf0] }
  0x69   : > { %874 = vmatpush.bf16.msra.mxu1 %v1529_v58  ;;  %v1297_v58 = vor.u32 %v1504_v51, %v1294_v52  ;;  %v1321_v8 = vor.u32 %v1509_v3, %v1318_v4  ;;  %v1513_v15 = vld [vmem:[%s1775_s8 + $0xcc] sm:$0xf]  ;;  %v1334_v16 = vld [vmem:[%s1775_s8 + $0xd8] sm:$0xf0]  ;;  %v1333_v19 = vor.u32 %v1515_v14, %v1332_v13  ;;  %v1348_v25 = vld [vmem:[%s1775_s8 + $0xe8] sm:$0xf] }
  0x6a   : > { %923 = vmatpush.bf16.msra.mxu2 %v1537_v59  ;;  %v1301_v59 = vor.u32 %v1507_v54, %v1300_v53  ;;  %v1337_v20 = vor.u32 %v1513_v15, %v1334_v16  ;;  %v1519_v26 = vld [vmem:[%s1775_s8 + $0xf4] sm:$0xf0]  ;;  %v1517_v27 = vld [vmem:[%s1775_s8 + $0xec] sm:$0xf]  ;;  %v1350_v28 = vld [vmem:[%s1775_s8 + $0xf8] sm:$0xf0] }
  0x6b   : > { %972 = vmatpush.bf16.msra.mxu3 %v1545_v60  ;;  %v1305_v60 = vor.u32 %v1505_v55, %v1302_v56  ;;  %v1349_v31 = vor.u32 %v1519_v26, %v1348_v25  ;;  %v1353_v32 = vor.u32 %v1517_v27, %v1350_v28  ;;  %v355_v41 = vld [vmem:[#allocation2 + $0x30] sm:$0xff]  ;;  %v356_v50 = vld [vmem:[#allocation2] sm:$0xff]  ;;  %v358_v4 = vld [vmem:[#allocation2 + $0x18] sm:$0xff] }
  0x6c   : > { %826 = vmatpush.bf16.msra.mxu0 %v1520_v61  ;;  %v1308_v61 = vld [vmem:[%s1775_s8 + $0xa0] sm:$0xf]  ;;  %v359_v13 = vld [vmem:[#allocation2 + $0x50] sm:$0xff] }
  0x6d   : > { %875 = vmatpush.bf16.msra.mxu1 %v1528_v62  ;;  %v1510_v62 = vld [vmem:[%s1775_s8 + $0xac] sm:$0xf0] }
  0x6e   : > { %924 = vmatpush.bf16.msra.mxu2 %v1536_v63  ;;  %v1508_v63 = vld [vmem:[%s1775_s8 + $0xa4] sm:$0xf]  ;;  %v1309_v5 = vor.u32 %v1510_v62, %v1308_v61 }
  0x6f   : > { %973 = vmatpush.bf16.msra.mxu3 %v1544_v0  ;;  %827 = vmatmul.bf16.vlgmr.msra.gmra.mxu0 %v1229_v9  ;;  %v1310_v0 = vld [vmem:[%s1775_s8 + $0xb0] sm:$0xf0]  ;;  %v1324_v9 = vld [vmem:[%s1775_s8 + $0xc0] sm:$0xf] }
  0x70   : > { %876 = vmatmul.bf16.vlgmr.msra.gmra.mxu1 %v1233_v10  ;;  %v1313_v6 = vor.u32 %v1508_v63, %v1310_v0  ;;  %v1514_v10 = vld [vmem:[%s1775_s8 + $0xcc] sm:$0xf0] }
  0x71   : > { %925 = vmatmul.bf16.vlgmr.msra.gmra.mxu2 %v1237_v11  ;;  %v1512_v11 = vld [vmem:[%s1775_s8 + $0xc4] sm:$0xf]  ;;  %v1325_v17 = vor.u32 %v1514_v10, %v1324_v9 }
  0x72   : > { %974 = vmatmul.bf16.vlgmr.msra.gmra.mxu3 %v1241_v12  ;;  %v1326_v12 = vld [vmem:[%s1775_s8 + $0xd0] sm:$0xf0] }
  0x73   : > { %v1329_v18 = vor.u32 %v1512_v11, %v1326_v12 }
  0x7f   : > { %832 = vmatmul.bf16.gmra.mxu0 %v1245_v21  ;;  %v1340_v21 = vld [vmem:[%s1775_s8 + $0xe0] sm:$0xf] }
  0x80   : > { %881 = vmatmul.bf16.gmra.mxu1 %v1249_v22  ;;  %v1518_v22 = vld [vmem:[%s1775_s8 + $0xec] sm:$0xf0] }
  0x81   : > { %930 = vmatmul.bf16.gmra.mxu2 %v1253_v23  ;;  %v1516_v23 = vld [vmem:[%s1775_s8 + $0xe4] sm:$0xf]  ;;  %v1341_v29 = vor.u32 %v1518_v22, %v1340_v21  ;;  %v360_v22 = vld [vmem:[#allocation2 + $0x68] sm:$0xff] }
  0x82   : > { %979 = vmatmul.bf16.gmra.mxu3 %v1257_v24  ;;  %v1342_v24 = vld [vmem:[%s1775_s8 + $0xf0] sm:$0xf0] }
  0x83   : > { %v1345_v30 = vor.u32 %v1516_v23, %v1342_v24 }
  0x8f   : > { %837 = vmatmul.bf16.gmra.mxu0 %v1261_v33 }
  0x90   : > { %886 = vmatmul.bf16.gmra.mxu1 %v1265_v34 }
  0x91   : > { %935 = vmatmul.bf16.gmra.mxu2 %v1269_v35 }
  0x92   : > { %984 = vmatmul.bf16.gmra.mxu3 %v1273_v36 }
  0x9f   : > { %842 = vmatmul.bf16.gmra.mxu0 %v1277_v45 }
  0xa0   : > { %891 = vmatmul.bf16.gmra.mxu1 %v1281_v46 }
  0xa1   : > { %940 = vmatmul.bf16.gmra.mxu2 %v1285_v47 }
  0xa2   : > { %989 = vmatmul.bf16.gmra.mxu3 %v1289_v48 }
  0xaf   : > { %847 = vmatmul.bf16.gmra.mxu0 %v1293_v57 }
  0xb0   : > { %896 = vmatmul.bf16.gmra.mxu1 %v1297_v58 }
  0xb1   : > { %945 = vmatmul.bf16.gmra.mxu2 %v1301_v59  ;;  %v357_v59 = vld [vmem:[#allocation2 + $0x58] sm:$0xff] }
  0xb2   : > { %994 = vmatmul.bf16.gmra.mxu3 %v1305_v60 }
  0xbf   : > { %852 = vmatmul.bf16.gmra.mxu0 %v1309_v5 }
  0xc0   : > { %901 = vmatmul.bf16.gmra.mxu1 %v1313_v6 }
  0xc1   : > { %950 = vmatmul.bf16.gmra.mxu2 %v1317_v7 }
  0xc2   : > { %999 = vmatmul.bf16.gmra.mxu3 %v1321_v8 }
  0xcf   : > { %857 = vmatmul.bf16.gmra.mxu0 %v1325_v17 }
  0xd0   : > { %906 = vmatmul.bf16.gmra.mxu1 %v1329_v18 }
  0xd1   : > { %955 = vmatmul.bf16.gmra.mxu2 %v1333_v19 }
  0xd2   : > { %1004 = vmatmul.bf16.gmra.mxu3 %v1337_v20 }
  0xdf   : > { %862 = vmatmul.bf16.gmra.mxu0 %v1341_v29 }
  0xe0   : > { %911 = vmatmul.bf16.gmra.mxu1 %v1345_v30 }
  0xe1   : > { %960 = vmatmul.bf16.gmra.mxu2 %v1349_v31  ;;  %v361_v31 = vld [vmem:[#allocation2 + $0x8] sm:$0xff] }
  0xe2   : > { %1009 = vmatmul.bf16.gmra.mxu3 %v1353_v32 }
  0xec   : > { %v828_v33 = vpop.f32.mrf.mxu0 }
  0xed   : > { %v877_v34 = vpop.f32.mrf.mxu1 }
  0xee   : > { %v878_v35 = vadd.f32 %v877_v34, %v828_v33 }
  0xf4   : > { %v926_v36 = vpop.f32.mrf.mxu2  ;;  %v830_v39 = vpop.f32.mrf.mxu0 }
  0xf5   : > { %v975_v37 = vpop.f32.mrf.mxu3  ;;  %v927_v38 = vadd.f32 %v926_v36, %v878_v35  ;;  %v879_v40 = vpop.f32.mrf.mxu1 }
  0xf6   : > { %v880_v44 = vadd.f32 %v879_v40, %v830_v39  ;;  %v362_v40 = vld [vmem:[#allocation2 + $0x48] sm:$0xff] }
  0xf7   : > { %v976_v42 = vadd.f32 %v975_v37, %v927_v38 }
  0xf9   : > { %v1015_v43 = vadd.f32 %v976_v42, %v355_v41 }
  0xfb   : > { %1031 = vst [vmem:[#allocation2 + $0x30] sm:$0xff] %v1015_v43 }
  0xfc   : > { %v928_v45 = vpop.f32.mrf.mxu2  ;;  %v833_v48 = vpop.f32.mrf.mxu0 }
  0xfd   : > { %v977_v46 = vpop.f32.mrf.mxu3  ;;  %v929_v47 = vadd.f32 %v928_v45, %v880_v44  ;;  %v882_v49 = vpop.f32.mrf.mxu1 }
  0xfe   : > { %v883_v53 = vadd.f32 %v882_v49, %v833_v48  ;;  %v363_v49 = vld [vmem:[#allocation2 + $0x40] sm:$0xff] }
  0xff   : > { %v978_v51 = vadd.f32 %v977_v46, %v929_v47 }
 0x101   : > { %v1016_v52 = vadd.f32 %v978_v51, %v356_v50 }
 0x103   : > { %1032 = vst [vmem:[#allocation2] sm:$0xff] %v1016_v52 }
 0x104   : > { %v931_v54 = vpop.f32.mrf.mxu2  ;;  %v835_v57 = vpop.f32.mrf.mxu0 }
 0x105   : > { %v980_v55 = vpop.f32.mrf.mxu3  ;;  %v932_v56 = vadd.f32 %v931_v54, %v883_v53  ;;  %v884_v58 = vpop.f32.mrf.mxu1 }
 0x106   : > { %v885_v62 = vadd.f32 %v884_v58, %v835_v57  ;;  %v364_v58 = vld [vmem:[#allocation2 + $0x20] sm:$0xff] }
 0x107   : > { %v981_v60 = vadd.f32 %v980_v55, %v932_v56 }
 0x109   : > { %v1017_v61 = vadd.f32 %v981_v60, %v357_v59 }
 0x10b   : > { %1033 = vst [vmem:[#allocation2 + $0x58] sm:$0xff] %v1017_v61 }
 0x10c   : > { %v933_v63 = vpop.f32.mrf.mxu2  ;;  %v838_v2 = vpop.f32.mrf.mxu0 }
 0x10d   : > { %v982_v0 = vpop.f32.mrf.mxu3  ;;  %v934_v1 = vadd.f32 %v933_v63, %v885_v62  ;;  %v887_v3 = vpop.f32.mrf.mxu1 }
 0x10e   : > { %v888_v7 = vadd.f32 %v887_v3, %v838_v2  ;;  %v365_v3 = vld [vmem:[#allocation2 + $0x10] sm:$0xff] }
 0x10f   : > { %v983_v5 = vadd.f32 %v982_v0, %v934_v1 }
 0x111   : > { %v1018_v6 = vadd.f32 %v983_v5, %v358_v4 }
 0x113   : > { %1034 = vst [vmem:[#allocation2 + $0x18] sm:$0xff] %v1018_v6 }
 0x114   : > { %v936_v8 = vpop.f32.mrf.mxu2  ;;  %v840_v11 = vpop.f32.mrf.mxu0 }
 0x115   : > { %v985_v9 = vpop.f32.mrf.mxu3  ;;  %v937_v10 = vadd.f32 %v936_v8, %v888_v7  ;;  %v889_v12 = vpop.f32.mrf.mxu1 }
 0x116   : > { %v890_v16 = vadd.f32 %v889_v12, %v840_v11  ;;  %v366_v12 = vld [vmem:[#allocation2 + $0x38] sm:$0xff] }
 0x117   : > { %v986_v14 = vadd.f32 %v985_v9, %v937_v10 }
 0x119   : > { %v1019_v15 = vadd.f32 %v986_v14, %v359_v13 }
 0x11b   : > { %1035 = vst [vmem:[#allocation2 + $0x50] sm:$0xff] %v1019_v15 }
 0x11c   : > { %v938_v17 = vpop.f32.mrf.mxu2  ;;  %v843_v20 = vpop.f32.mrf.mxu0 }
 0x11d   : > { %v987_v18 = vpop.f32.mrf.mxu3  ;;  %v939_v19 = vadd.f32 %v938_v17, %v890_v16  ;;  %v892_v21 = vpop.f32.mrf.mxu1 }
 0x11e   : > { %v893_v25 = vadd.f32 %v892_v21, %v843_v20  ;;  %v367_v21 = vld [vmem:[#allocation2 + $0x60] sm:$0xff] }
 0x11f   : > { %v988_v23 = vadd.f32 %v987_v18, %v939_v19 }
 0x121   : > { %v1020_v24 = vadd.f32 %v988_v23, %v360_v22 }
 0x123   : > { %1036 = vst [vmem:[#allocation2 + $0x68] sm:$0xff] %v1020_v24 }
 0x124   : > { %v941_v26 = vpop.f32.mrf.mxu2  ;;  %v845_v29 = vpop.f32.mrf.mxu0 }
 0x125   : > { %v990_v27 = vpop.f32.mrf.mxu3  ;;  %v942_v28 = vadd.f32 %v941_v26, %v893_v25  ;;  %v894_v30 = vpop.f32.mrf.mxu1 }
 0x126   : > { %v895_v34 = vadd.f32 %v894_v30, %v845_v29 }
 0x127   : > { %v991_v32 = vadd.f32 %v990_v27, %v942_v28  ;;  %v368_v28 = vld [vmem:[#allocation2 + $0x70] sm:$0xff] }
 0x129   : > { %v1021_v33 = vadd.f32 %v991_v32, %v361_v31 }
 0x12b   : > { %1037 = vst [vmem:[#allocation2 + $0x8] sm:$0xff] %v1021_v33 }
 0x12c   : > { %v943_v35 = vpop.f32.mrf.mxu2  ;;  %v848_v38 = vpop.f32.mrf.mxu0 }
 0x12d   : > { %v992_v36 = vpop.f32.mrf.mxu3  ;;  %v944_v37 = vadd.f32 %v943_v35, %v895_v34  ;;  %v897_v39 = vpop.f32.mrf.mxu1 }
 0x12e   : > { %v898_v43 = vadd.f32 %v897_v39, %v848_v38 }
 0x12f   : > { %v993_v41 = vadd.f32 %v992_v36, %v944_v37  ;;  %v369_v37 = vld [vmem:[#allocation2 + $0x78] sm:$0xff] }
 0x131   : > { %v1022_v42 = vadd.f32 %v993_v41, %v362_v40 }
 0x133   : > { %1038 = vst [vmem:[#allocation2 + $0x48] sm:$0xff] %v1022_v42 }
 0x134   : > { %v946_v44 = vpop.f32.mrf.mxu2  ;;  %v850_v47 = vpop.f32.mrf.mxu0 }
 0x135   : > { %v995_v45 = vpop.f32.mrf.mxu3  ;;  %v947_v46 = vadd.f32 %v946_v44, %v898_v43  ;;  %v899_v48 = vpop.f32.mrf.mxu1 }
 0x136   : > { %v900_v52 = vadd.f32 %v899_v48, %v850_v47 }
 0x137   : > { %v996_v50 = vadd.f32 %v995_v45, %v947_v46  ;;  %v370_v45 = vld [vmem:[#allocation2 + $0x28] sm:$0xff] }
 0x139   : > { %v1023_v51 = vadd.f32 %v996_v50, %v363_v49 }
 0x13b   : > { %1039 = vst [vmem:[#allocation2 + $0x40] sm:$0xff] %v1023_v51 }
 0x13c   : > { %v948_v53 = vpop.f32.mrf.mxu2  ;;  %v853_v56 = vpop.f32.mrf.mxu0 }
 0x13d   : > { %v997_v54 = vpop.f32.mrf.mxu3  ;;  %v949_v55 = vadd.f32 %v948_v53, %v900_v52  ;;  %v902_v57 = vpop.f32.mrf.mxu1 }
 0x13e   : > { %v903_v61 = vadd.f32 %v902_v57, %v853_v56 }
 0x13f   : > { %v998_v59 = vadd.f32 %v997_v54, %v949_v55 }
 0x141   : > { %v1024_v60 = vadd.f32 %v998_v59, %v364_v58 }
 0x143   : > { %1040 = vst [vmem:[#allocation2 + $0x20] sm:$0xff] %v1024_v60 }
 0x144   : > { %v951_v62 = vpop.f32.mrf.mxu2  ;;  %v855_v1 = vpop.f32.mrf.mxu0 }
 0x145   : > { %v1000_v63 = vpop.f32.mrf.mxu3  ;;  %v952_v0 = vadd.f32 %v951_v62, %v903_v61  ;;  %v904_v2 = vpop.f32.mrf.mxu1 }
 0x146   : > { %v905_v6 = vadd.f32 %v904_v2, %v855_v1 }
 0x147   : > { %v1001_v4 = vadd.f32 %v1000_v63, %v952_v0 }
 0x149   : > { %v1025_v5 = vadd.f32 %v1001_v4, %v365_v3 }
 0x14b   : > { %1041 = vst [vmem:[#allocation2 + $0x10] sm:$0xff] %v1025_v5 }
 0x14c   : > { %v953_v7 = vpop.f32.mrf.mxu2  ;;  %v858_v10 = vpop.f32.mrf.mxu0 }
 0x14d   : > { %v1002_v8 = vpop.f32.mrf.mxu3  ;;  %v954_v9 = vadd.f32 %v953_v7, %v905_v6  ;;  %v907_v11 = vpop.f32.mrf.mxu1 }
 0x14e   : > { %v908_v15 = vadd.f32 %v907_v11, %v858_v10 }
 0x14f   : > { %v1003_v13 = vadd.f32 %v1002_v8, %v954_v9 }
 0x151   : > { %v1026_v14 = vadd.f32 %v1003_v13, %v366_v12 }
 0x153   : > { %1042 = vst [vmem:[#allocation2 + $0x38] sm:$0xff] %v1026_v14 }
 0x154   : > { %v956_v16 = vpop.f32.mrf.mxu2  ;;  %v860_v19 = vpop.f32.mrf.mxu0 }
 0x155   : > { %v1005_v17 = vpop.f32.mrf.mxu3  ;;  %v957_v18 = vadd.f32 %v956_v16, %v908_v15  ;;  %v909_v20 = vpop.f32.mrf.mxu1 }
 0x156   : > { %v910_v24 = vadd.f32 %v909_v20, %v860_v19 }
 0x157   : > { %v1006_v22 = vadd.f32 %v1005_v17, %v957_v18 }
 0x159   : > { %v1027_v23 = vadd.f32 %v1006_v22, %v367_v21 }
 0x15b   : > { %1043 = vst [vmem:[#allocation2 + $0x60] sm:$0xff] %v1027_v23 }
 0x15c   : > { %v958_v25 = vpop.f32.mrf.mxu2  ;;  %v863_v29 = vpop.f32.mrf.mxu0 }
 0x15d   : > { %v1007_v26 = vpop.f32.mrf.mxu3  ;;  %v959_v27 = vadd.f32 %v958_v25, %v910_v24  ;;  %v912_v30 = vpop.f32.mrf.mxu1 }
 0x15e   : > { %v913_v33 = vadd.f32 %v912_v30, %v863_v29 }
 0x15f   : > { %v1008_v31 = vadd.f32 %v1007_v26, %v959_v27 }
 0x161   : > { %v1028_v32 = vadd.f32 %v1008_v31, %v368_v28 }
 0x163   : > { %1044 = vst [vmem:[#allocation2 + $0x70] sm:$0xff] %v1028_v32 }
 0x164   : > { %v961_v34 = vpop.f32.mrf.mxu2  ;;  %v865_v39 = vpop.f32.mrf.mxu0 }
 0x165   : > { %v1010_v35 = vpop.f32.mrf.mxu3  ;;  %v962_v36 = vadd.f32 %v961_v34, %v913_v33  ;;  %v914_v40 = vpop.f32.mrf.mxu1 }
 0x166   : > { %v915_v42 = vadd.f32 %v914_v40, %v865_v39 }
 0x167   : > { %v1011_v38 = vadd.f32 %v1010_v35, %v962_v36 }
 0x169   : > { %v1029_v41 = vadd.f32 %v1011_v38, %v369_v37 }
 0x16b   : > { %1045 = vst [vmem:[#allocation2 + $0x78] sm:$0xff] %v1029_v41 }
 0x16c   : > { %v963_v43 = vpop.f32.mrf.mxu2 }
 0x16d   : > { %v964_v44 = vadd.f32 %v963_v43, %v915_v42  ;;  %v1012_v46 = vpop.f32.mrf.mxu3 }
 0x16f   : > { %v1013_v47 = vadd.f32 %v1012_v46, %v964_v44  ;;  %1050 = sbr.rel (%p1482_p11) target bundleno = 391 (0x187), region = 63 }
 0x171   : > { %v1030_v48 = vadd.f32 %v1013_v47, %v370_v45 }
 0x173   : > { %1046 = vst [vmem:[#allocation2 + $0x28] sm:$0xff] %v1030_v48 }
 0x174   : > { %v1051_v49 = vld [vmem:[#allocation2 + $0x30] sm:$0xff]  ;;  %v1593_v50 = vld [vmem:[%s1943_s2] ss:$0 sm:$0xff]  ;;  %v1053_v52 = vld [vmem:[#allocation2 + $0x58] sm:$0xff] }
 0x175   : > { %v1052_v51 = vld [vmem:[#allocation2] sm:$0xff]  ;;  %v1054_v53 = vld [vmem:[#allocation2 + $0x18] sm:$0xff]  ;;  %v1071_v54 = vadd.f32 %v1593_v50, %v1051_v49  ;;  %v1073_v56 = vadd.f32 %v1593_v50, %v1053_v52  ;;  %v1055_v57 = vld [vmem:[#allocation2 + $0x50] sm:$0xff] }
 0x176   : > { %v1072_v55 = vadd.f32 %v1593_v50, %v1052_v51  ;;  %v1056_v58 = vld [vmem:[#allocation2 + $0x68] sm:$0xff]  ;;  %v1074_v59 = vadd.f32 %v1593_v50, %v1054_v53  ;;  %v1075_v61 = vadd.f32 %v1593_v50, %v1055_v57  ;;  %v1059_v0 = vld [vmem:[#allocation2 + $0x40] sm:$0xff]  ;;  %v1061_v4 = vld [vmem:[#allocation2 + $0x10] sm:$0xff] }
 0x177   : > { %v1057_v60 = vld [vmem:[#allocation2 + $0x8] sm:$0xff]  ;;  %1087 = vst [vmem:[%s1944_s3] sm:$0xff] %v1071_v54  ;;  %v1076_v63 = vadd.f32 %v1593_v50, %v1056_v58  ;;  %v1060_v2 = vld [vmem:[#allocation2 + $0x20] sm:$0xff]  ;;  %v1079_v5 = vadd.f32 %v1593_v50, %v1059_v0  ;;  %v1062_v6 = vld [vmem:[#allocation2 + $0x38] sm:$0xff]  ;;  %v1081_v9 = vadd.f32 %v1593_v50, %v1061_v4 }
 0x178   : > { %v1058_v62 = vld [vmem:[#allocation2 + $0x48] sm:$0xff]  ;;  %1088 = vst [vmem:[%s1944_s3 + $0x8] sm:$0xff] %v1072_v55  ;;  %v1077_v1 = vadd.f32 %v1593_v50, %v1057_v60  ;;  %v1080_v7 = vadd.f32 %v1593_v50, %v1060_v2  ;;  %v1063_v8 = vld [vmem:[#allocation2 + $0x60] sm:$0xff]  ;;  %v1064_v10 = vld [vmem:[#allocation2 + $0x70] sm:$0xff]  ;;  %v1082_v11 = vadd.f32 %v1593_v50, %v1062_v6 }
 0x179   : > { %1089 = vst [vmem:[%s1944_s3 + $0x10] sm:$0xff] %v1073_v56  ;;  %v1078_v3 = vadd.f32 %v1593_v50, %v1058_v62  ;;  %v1065_v12 = vld [vmem:[#allocation2 + $0x78] sm:$0xff]  ;;  %v1083_v13 = vadd.f32 %v1593_v50, %v1063_v8  ;;  %v1084_v15 = vadd.f32 %v1593_v50, %v1064_v10 }
 0x17a   : > { %1090 = vst [vmem:[%s1944_s3 + $0x18] sm:$0xff] %v1074_v59  ;;  %v1066_v14 = vld [vmem:[#allocation2 + $0x28] sm:$0xff]  ;;  %v1085_v16 = vadd.f32 %v1593_v50, %v1065_v12 }
 0x17b   : > { %1091 = vst [vmem:[%s1944_s3 + $0x20] sm:$0xff] %v1075_v61  ;;  %v1086_v17 = vadd.f32 %v1593_v50, %v1066_v14 }
 0x17c   : > { %1092 = vst [vmem:[%s1944_s3 + $0x28] sm:$0xff] %v1076_v63 }
 0x17d   : > { %1093 = vst [vmem:[%s1944_s3 + $0x30] sm:$0xff] %v1077_v1 }
 0x17e   : > { %1094 = vst [vmem:[%s1944_s3 + $0x38] sm:$0xff] %v1078_v3 }
 0x17f   : > { %1095 = vst [vmem:[%s1944_s3 + $0x40] sm:$0xff] %v1079_v5 }
 0x180   : > { %1096 = vst [vmem:[%s1944_s3 + $0x48] sm:$0xff] %v1080_v7 }
 0x181   : > { %1097 = vst [vmem:[%s1944_s3 + $0x50] sm:$0xff] %v1081_v9 }
 0x182   : > { %1098 = vst [vmem:[%s1944_s3 + $0x58] sm:$0xff] %v1082_v11 }
 0x183   : > { %1099 = vst [vmem:[%s1944_s3 + $0x60] sm:$0xff] %v1083_v13 }
 0x184   : > { %1100 = vst [vmem:[%s1944_s3 + $0x68] sm:$0xff] %v1084_v15 }
 0x185   : > { %1101 = vst [vmem:[%s1944_s3 + $0x70] sm:$0xff] %v1085_v16 }
 0x186   : > { %1102 = vst [vmem:[%s1944_s3 + $0x78] sm:$0xff] %v1086_v17 }
 0x187 PF: > { %s13_s16 = sadd.s32 1, %s1632_s16   ;;  %s1945_s12 = smov %s1620_s13 }
 0x188   : > { %p10_p12 = scmp.ge.s32.totalorder %s13_s16, 5   ;;  %s1946_s13 = smov %s1690_s20 }
 0x189   : > { %s1947_s14 = smov %s1628_s15  ;;  %s1948_s15 = smov %s1950_s17 }
 0x18a   :  { %12 = sbr.rel (!%p10_p12) target bundleno = 3 (0x3), region = 104 }

// kernel: run.18
= control target key start
LH: loop header
LB: loop body
LE: loop exit
PB: predicated region body
PF: predicated region fallthrough
CT: control target
= control target key end

     0   :  { %s821_s1 = inlined_call_operand.vmem [shape: bf16[512,128], index: 1, kind: input, shape index: {}]   ;;  %s822_s0 = inlined_call_operand.vmem [shape: bf16[32,512], index: 0, kind: input, shape index: {}]   ;;  %s823_s2 = inlined_call_operand.vmem [shape: f32[1,128], index: 2, kind: input, shape index: {}]   ;;  %s824_s3 = inlined_call_operand.vmem [shape: f32[32,128], index: 3, kind: output, shape index: {}]  }
   0x1   :  { %v616_v0 = vld [vmem:[%s821_s1 + $0x38] sm:$0xff]  ;;  %v615_v4 = vld [vmem:[%s821_s1 + $0x30] sm:$0xff]  ;;  %v614_v8 = vld [vmem:[%s821_s1 + $0x28] sm:$0xff] }
   0x2   :  { %v624_v1 = vld [vmem:[%s821_s1 + $0x78] sm:$0xff]  ;;  %330 = vmatpush.bf16.msra.mxu0 %v616_v0  ;;  %v623_v5 = vld [vmem:[%s821_s1 + $0x70] sm:$0xff]  ;;  %v622_v9 = vld [vmem:[%s821_s1 + $0x68] sm:$0xff] }
   0x3   :  { %v632_v2 = vld [vmem:[%s821_s1 + $0xb8] sm:$0xff]  ;;  %349 = vmatpush.bf16.msra.mxu1 %v624_v1  ;;  %v631_v6 = vld [vmem:[%s821_s1 + $0xb0] sm:$0xff]  ;;  %v630_v10 = vld [vmem:[%s821_s1 + $0xa8] sm:$0xff] }
   0x4   :  { %v640_v3 = vld [vmem:[%s821_s1 + $0xf8] sm:$0xff]  ;;  %368 = vmatpush.bf16.msra.mxu2 %v632_v2  ;;  %v639_v7 = vld [vmem:[%s821_s1 + $0xf0] sm:$0xff]  ;;  %v638_v11 = vld [vmem:[%s821_s1 + $0xe8] sm:$0xff] }
   0x5   :  { %387 = vmatpush.bf16.msra.mxu3 %v640_v3  ;;  %v613_v12 = vld [vmem:[%s821_s1 + $0x20] sm:$0xff]  ;;  %v612_v16 = vld [vmem:[%s821_s1 + $0x18] sm:$0xff]  ;;  %v611_v20 = vld [vmem:[%s821_s1 + $0x10] sm:$0xff] }
   0x6   :  { %331 = vmatpush.bf16.msra.mxu0 %v615_v4  ;;  %v621_v13 = vld [vmem:[%s821_s1 + $0x60] sm:$0xff]  ;;  %v620_v17 = vld [vmem:[%s821_s1 + $0x58] sm:$0xff]  ;;  %v619_v21 = vld [vmem:[%s821_s1 + $0x50] sm:$0xff] }
   0x7   :  { %350 = vmatpush.bf16.msra.mxu1 %v623_v5  ;;  %v629_v14 = vld [vmem:[%s821_s1 + $0xa0] sm:$0xff]  ;;  %v628_v18 = vld [vmem:[%s821_s1 + $0x98] sm:$0xff]  ;;  %v627_v22 = vld [vmem:[%s821_s1 + $0x90] sm:$0xff] }
   0x8   :  { %369 = vmatpush.bf16.msra.mxu2 %v631_v6  ;;  %v637_v15 = vld [vmem:[%s821_s1 + $0xe0] sm:$0xff]  ;;  %v636_v19 = vld [vmem:[%s821_s1 + $0xd8] sm:$0xff]  ;;  %v635_v23 = vld [vmem:[%s821_s1 + $0xd0] sm:$0xff] }
   0x9   :  { %388 = vmatpush.bf16.msra.mxu3 %v639_v7  ;;  %v610_v24 = vld [vmem:[%s821_s1 + $0x8] sm:$0xff]  ;;  %v609_v28 = vld [vmem:[%s821_s1] sm:$0xff]  ;;  %v603_v33 = vld [vmem:[%s822_s0 + $0xc] sm:$0xf0] }
   0xa   :  { %332 = vmatpush.bf16.msra.mxu0 %v614_v8  ;;  %v618_v25 = vld [vmem:[%s821_s1 + $0x48] sm:$0xff]  ;;  %v617_v29 = vld [vmem:[%s821_s1 + $0x40] sm:$0xff]  ;;  %v445_v35 = vld [vmem:[%s822_s0 + $0x10] sm:$0xf0] }
   0xb   :  { %351 = vmatpush.bf16.msra.mxu1 %v622_v9  ;;  %v626_v26 = vld [vmem:[%s821_s1 + $0x88] sm:$0xff]  ;;  %v625_v30 = vld [vmem:[%s821_s1 + $0x80] sm:$0xff]  ;;  %v604_v37 = vld [vmem:[%s822_s0 + $0x14] sm:$0xf0] }
   0xc   :  { %370 = vmatpush.bf16.msra.mxu2 %v630_v10  ;;  %v634_v27 = vld [vmem:[%s821_s1 + $0xc8] sm:$0xff]  ;;  %v633_v31 = vld [vmem:[%s821_s1 + $0xc0] sm:$0xff]  ;;  %v453_v39 = vld [vmem:[%s822_s0 + $0x18] sm:$0xf0] }
   0xd   :  { %389 = vmatpush.bf16.msra.mxu3 %v638_v11  ;;  %v443_v32 = vld [vmem:[%s822_s0] sm:$0xf]  ;;  %v601_v34 = vld [vmem:[%s822_s0 + $0x4] sm:$0xf]  ;;  %v451_v36 = vld [vmem:[%s822_s0 + $0x8] sm:$0xf] }
   0xe   :  { %333 = vmatpush.bf16.msra.mxu0 %v613_v12  ;;  %v602_v38 = vld [vmem:[%s822_s0 + $0xc] sm:$0xf]  ;;  %v444_v40 = vor.u32 %v603_v33, %v443_v32  ;;  %v448_v41 = vor.u32 %v601_v34, %v445_v35  ;;  %v452_v42 = vor.u32 %v604_v37, %v451_v36  ;;  %v459_v44 = vld [vmem:[%s822_s0 + $0x20] sm:$0xf]  ;;  %v607_v45 = vld [vmem:[%s822_s0 + $0x2c] sm:$0xf0] }
   0xf   :  { %352 = vmatpush.bf16.msra.mxu1 %v621_v13  ;;  %v456_v43 = vor.u32 %v602_v38, %v453_v39  ;;  %v605_v46 = vld [vmem:[%s822_s0 + $0x24] sm:$0xf]  ;;  %v461_v47 = vld [vmem:[%s822_s0 + $0x30] sm:$0xf0]  ;;  %v467_v48 = vld [vmem:[%s822_s0 + $0x28] sm:$0xf]  ;;  %v460_v52 = vor.u32 %v607_v45, %v459_v44 }
  0x10   :  { %371 = vmatpush.bf16.msra.mxu2 %v629_v14  ;;  %v608_v49 = vld [vmem:[%s822_s0 + $0x34] sm:$0xf0]  ;;  %v606_v50 = vld [vmem:[%s822_s0 + $0x2c] sm:$0xf]  ;;  %v469_v51 = vld [vmem:[%s822_s0 + $0x38] sm:$0xf0]  ;;  %v464_v53 = vor.u32 %v605_v46, %v461_v47 }
  0x11   :  { %390 = vmatpush.bf16.msra.mxu3 %v637_v15  ;;  %v468_v54 = vor.u32 %v608_v49, %v467_v48  ;;  %v472_v55 = vor.u32 %v606_v50, %v469_v51  ;;  %v641_v62 = vld [vmem:[%s823_s2] ss:$0 sm:$0xff] }
  0x12   :  { %334 = vmatpush.bf16.msra.mxu0 %v612_v16 }
  0x13   :  { %353 = vmatpush.bf16.msra.mxu1 %v620_v17 }
  0x14   :  { %372 = vmatpush.bf16.msra.mxu2 %v628_v18 }
  0x15   :  { %391 = vmatpush.bf16.msra.mxu3 %v636_v19 }
  0x16   :  { %335 = vmatpush.bf16.msra.mxu0 %v611_v20 }
  0x17   :  { %354 = vmatpush.bf16.msra.mxu1 %v619_v21 }
  0x18   :  { %373 = vmatpush.bf16.msra.mxu2 %v627_v22 }
  0x19   :  { %392 = vmatpush.bf16.msra.mxu3 %v635_v23 }
  0x1a   :  { %336 = vmatpush.bf16.msra.mxu0 %v610_v24 }
  0x1b   :  { %355 = vmatpush.bf16.msra.mxu1 %v618_v25 }
  0x1c   :  { %374 = vmatpush.bf16.msra.mxu2 %v626_v26 }
  0x1d   :  { %393 = vmatpush.bf16.msra.mxu3 %v634_v27 }
  0x1e   :  { %337 = vmatpush.bf16.msra.mxu0 %v609_v28 }
  0x1f   :  { %356 = vmatpush.bf16.msra.mxu1 %v617_v29 }
  0x20   :  { %375 = vmatpush.bf16.msra.mxu2 %v625_v30 }
  0x21   :  { %394 = vmatpush.bf16.msra.mxu3 %v633_v31  ;;  %338 = vmatmul.bf16.vlgmr.msra.gmra.mxu0 %v444_v40 }
  0x22   :  { %357 = vmatmul.bf16.vlgmr.msra.gmra.mxu1 %v448_v41 }
  0x23   :  { %376 = vmatmul.bf16.vlgmr.msra.gmra.mxu2 %v452_v42 }
  0x24   :  { %395 = vmatmul.bf16.vlgmr.msra.gmra.mxu3 %v456_v43 }
  0x31   :  { %343 = vmatmul.bf16.gmra.mxu0 %v460_v52 }
  0x32   :  { %362 = vmatmul.bf16.gmra.mxu1 %v464_v53 }
  0x33   :  { %381 = vmatmul.bf16.gmra.mxu2 %v468_v54 }
  0x34   :  { %400 = vmatmul.bf16.gmra.mxu3 %v472_v55 }
  0x9e   :  { %v339_v56 = vpop.f32.mrf.mxu0 }
  0x9f   :  { %v358_v57 = vpop.f32.mrf.mxu1 }
  0xa0   :  { %v359_v58 = vadd.f32 %v358_v57, %v339_v56 }
  0xa6   :  { %v377_v59 = vpop.f32.mrf.mxu2  ;;  %v341_v63 = vpop.f32.mrf.mxu0 }
  0xa7   :  { %v396_v60 = vpop.f32.mrf.mxu3  ;;  %v378_v61 = vadd.f32 %v377_v59, %v359_v58  ;;  %v360_v0 = vpop.f32.mrf.mxu1 }
  0xa8   :  { %v361_v4 = vadd.f32 %v360_v0, %v341_v63 }
  0xa9   :  { %v397_v1 = vadd.f32 %v396_v60, %v378_v61 }
  0xab   :  { %v425_v2 = vadd.f32 %v641_v62, %v397_v1 }
  0xad   :  { %v429_v3 = vmax.f32 %v425_v2, 0.0 }
  0xae   :  { %v379_v5 = vpop.f32.mrf.mxu2  ;;  %v344_v8 = vpop.f32.mrf.mxu0 }
  0xaf   :  { %v398_v6 = vpop.f32.mrf.mxu3  ;;  %433 = vst [vmem:[%s824_s3] sm:$0xff] %v429_v3  ;;  %v380_v7 = vadd.f32 %v379_v5, %v361_v4  ;;  %v363_v9 = vpop.f32.mrf.mxu1 }
  0xb0   :  { %v364_v12 = vadd.f32 %v363_v9, %v344_v8 }
  0xb1   :  { %v399_v10 = vadd.f32 %v398_v6, %v380_v7 }
  0xb3   :  { %v426_v11 = vadd.f32 %v641_v62, %v399_v10 }
  0xb5   :  { %v430_v13 = vmax.f32 %v426_v11, 0.0 }
  0xb6   :  { %v382_v14 = vpop.f32.mrf.mxu2  ;;  %v346_v18 = vpop.f32.mrf.mxu0 }
  0xb7   :  { %v401_v15 = vpop.f32.mrf.mxu3  ;;  %434 = vst [vmem:[%s824_s3 + $0x8] sm:$0xff] %v430_v13  ;;  %v383_v16 = vadd.f32 %v382_v14, %v364_v12  ;;  %v365_v19 = vpop.f32.mrf.mxu1 }
  0xb8   :  { %v366_v22 = vadd.f32 %v365_v19, %v346_v18 }
  0xb9   :  { %v402_v17 = vadd.f32 %v401_v15, %v383_v16 }
  0xbb   :  { %v427_v20 = vadd.f32 %v641_v62, %v402_v17 }
  0xbd   :  { %v431_v21 = vmax.f32 %v427_v20, 0.0 }
  0xbe   :  { %v384_v23 = vpop.f32.mrf.mxu2 }
  0xbf   :  { %435 = vst [vmem:[%s824_s3 + $0x10] sm:$0xff] %v431_v21  ;;  %v385_v24 = vadd.f32 %v384_v23, %v366_v22  ;;  %v403_v25 = vpop.f32.mrf.mxu3 }
  0xc1   :  { %v404_v26 = vadd.f32 %v403_v25, %v385_v24 }
  0xc3   :  { %v428_v27 = vadd.f32 %v641_v62, %v404_v26 }
  0xc5   :  { %v432_v28 = vmax.f32 %v428_v27, 0.0 }
  0xc7   :  { %436 = vst [vmem:[%s824_s3 + $0x18] sm:$0xff] %v432_v28 }

// kernel: custom-call.3
= control target key start
LH: loop header
LB: loop body
LE: loop exit
PB: predicated region body
PF: predicated region fallthrough
CT: control target
= control target key end

     0   :  { %s6_s0 = inlined_call_operand.vmem [shape: f32[2,32], index: 0, kind: output, shape index: {}]  }

// kernel: custom-call.2
= control target key start
LH: loop header
LB: loop body
LE: loop exit
PB: predicated region body
PF: predicated region fallthrough
CT: control target
= control target key end

     0   :  { %s6_s0 = inlined_call_operand.vmem [shape: bf16[2,32], index: 0, kind: output, shape index: {}]  }

// kernel: run.19
= control target key start
LH: loop header
LB: loop body
LE: loop exit
PB: predicated region body
PF: predicated region fallthrough
CT: control target
= control target key end

     0   :  { %s810_s12 = smov 0   ;;  %s812_s13 = smov 0   ;;  %s918_s0 = inlined_call_operand.vmem [shape: bf16[32,128], index: 0, kind: input, shape index: {}]   ;;  %s919_s1 = inlined_call_operand.vmem [shape: bf16[128,256], index: 1, kind: input, shape index: {}]   ;;  %s920_s2 = inlined_call_operand.vmem [shape: f32[1,256], index: 2, kind: input, shape index: {}]   ;;  %s921_s3 = inlined_call_operand.vmem [shape: f32[32,256], index: 3, kind: output, shape index: {}]  }
   0x1   :  { %s814_s14 = smov 0   ;;  %s816_s15 = smov 0  }
   0x2   :  { %s818_s16 = smov 0  }
   0x3 LB: > { %s28_s17 = sadd.s32 1, %s784_s15  ;;  %s637_s18 = sadd.s32 4294967295, %s788_s16   ;;  %s788_s16 = sphi %s818_s16, %s13_s16   ;;  %s784_s15 = sphi %s816_s15, %s926_s15   ;;  %s780_s14 = sphi %s814_s14, %s925_s14   ;;  %s776_s13 = sphi %s812_s13, %s924_s13   ;;  %s772_s12 = sphi %s810_s12, %s923_s12  }
   0x4   : > { %p30_p0 = scmp.ge.s32.totalorder %s28_s17, 2  ;;  %p76_p1 = scmp.ne.s32.totalorder %s776_s13, %s772_s12 }
   0x5   : > { %p77_p2 = scmp.eq.s32.totalorder %s788_s16, 0  ;;  %p134_p4 = scmp.eq.s32.totalorder %s637_s18, 1 }
   0x6   : > { %s928_s17 = smov (%p30_p0, %s28_s17), 0  ;;  %s69_s20 = sadd.s32 1, %s776_s13 }
   0x7   : > { %p78_p3 = por %p77_p2, %p76_p1  ;;  %s65_s19 = ssub.s32 %s784_s15, %s928_s17 }
   0x8   : > { %p67_p5 = scmp.eq.s32.totalorder %s65_s19, 0  ;;  %p845_p6 = por %p134_p4, %p76_p1 }
   0x9   : > { %p641_p7 = scmp.ge.s32.totalorder %s788_s16, 2 }
   0xa   : > { %s850_s22 = scalar_select %p67_p5, %s776_s13, %s69_s20  }
   0xb   : > { %168 = sbr.rel (%p641_p7) target bundleno = 36 (0x24), region = 20 }
  0x10   : > { %171 = sbr.rel (!%p78_p3) target bundleno = 36 (0x24), region = 24  ;;  %s173_s23 = sand.u32 (%p78_p3), 1, %s776_s13  }
  0x11   : > { %s643_s24 = sshll.u32 (%p78_p3), %s784_s15, 2  ;;  %s642_s25 = sshll.u32 (%p78_p3), %s173_s23, 6 }
  0x12   : > { %s858_s28 = scalar_lea.vmem (%p78_p3), %s919_s1, %s643_s24  ;;  %s175_s29 = scalar_lea.vmem (%p78_p3), [#allocation3], %s642_s25 }
  0x13   : > { %v197_v0 = vld [vmem:[%s858_s28] sm:$0xf] (%p78_p3)  ;;  %v199_v1 = vld [vmem:[%s858_s28 + $0x8] sm:$0xf] (%p78_p3)  ;;  %v201_v2 = vld [vmem:[%s858_s28 + $0x10] sm:$0xf] (%p78_p3) }
  0x14   : > { %198 = vst [vmem:[%s175_s29] sm:$0xf] (%p78_p3), %v197_v0  ;;  %v203_v3 = vld [vmem:[%s858_s28 + $0x18] sm:$0xf] (%p78_p3)  ;;  %v205_v4 = vld [vmem:[%s858_s28 + $0x20] sm:$0xf] (%p78_p3) }
  0x15   : > { %200 = vst [vmem:[%s175_s29 + $0x4] sm:$0xf] %v199_v1  ;;  %v207_v5 = vld [vmem:[%s858_s28 + $0x28] sm:$0xf]  ;;  %v209_v6 = vld [vmem:[%s858_s28 + $0x30] sm:$0xf] }
  0x16   : > { %202 = vst [vmem:[%s175_s29 + $0x8] sm:$0xf] %v201_v2  ;;  %v211_v7 = vld [vmem:[%s858_s28 + $0x38] sm:$0xf]  ;;  %v213_v8 = vld [vmem:[%s858_s28 + $0x40] sm:$0xf] }
  0x17   : > { %204 = vst [vmem:[%s175_s29 + $0xc] sm:$0xf] %v203_v3  ;;  %v215_v9 = vld [vmem:[%s858_s28 + $0x48] sm:$0xf]  ;;  %v217_v10 = vld [vmem:[%s858_s28 + $0x50] sm:$0xf] }
  0x18   : > { %206 = vst [vmem:[%s175_s29 + $0x10] sm:$0xf] %v205_v4  ;;  %v219_v11 = vld [vmem:[%s858_s28 + $0x58] sm:$0xf]  ;;  %v221_v12 = vld [vmem:[%s858_s28 + $0x60] sm:$0xf] }
  0x19   : > { %208 = vst [vmem:[%s175_s29 + $0x14] sm:$0xf] %v207_v5  ;;  %v223_v13 = vld [vmem:[%s858_s28 + $0x68] sm:$0xf]  ;;  %v225_v14 = vld [vmem:[%s858_s28 + $0x70] sm:$0xf] }
  0x1a   : > { %210 = vst [vmem:[%s175_s29 + $0x18] sm:$0xf] %v209_v6  ;;  %v227_v15 = vld [vmem:[%s858_s28 + $0x78] sm:$0xf] }
  0x1b   : > { %212 = vst [vmem:[%s175_s29 + $0x1c] sm:$0xf] %v211_v7 }
  0x1c   : > { %214 = vst [vmem:[%s175_s29 + $0x20] sm:$0xf] %v213_v8 }
  0x1d   : > { %216 = vst [vmem:[%s175_s29 + $0x24] sm:$0xf] %v215_v9 }
  0x1e   : > { %218 = vst [vmem:[%s175_s29 + $0x28] sm:$0xf] %v217_v10 }
  0x1f   : > { %220 = vst [vmem:[%s175_s29 + $0x2c] sm:$0xf] %v219_v11 }
  0x20   : > { %222 = vst [vmem:[%s175_s29 + $0x30] sm:$0xf] %v221_v12 }
  0x21   : > { %224 = vst [vmem:[%s175_s29 + $0x34] sm:$0xf] %v223_v13 }
  0x22   : > { %226 = vst [vmem:[%s175_s29 + $0x38] sm:$0xf] %v225_v14 }
  0x23   : > { %228 = vst [vmem:[%s175_s29 + $0x3c] sm:$0xf] %v227_v15 }
  0x24 PF: > { %p644_p8 = scmp.ge.s32.totalorder %s788_s16, 1  ;;  %p289_p9 = scmp.lt.s32.totalorder %s788_s16, 3 }
  0x26   : > { %p290_p10 = pnand %p644_p8, %p289_p9 }
  0x27   : > { %s296_s30 = sand.u32 (!%p290_p10), 1, %s772_s12   ;;  %p339_p11 = scmp.lt.s32.totalorder (!%p290_p10), %s780_s14, 1 }
  0x28   : > { %293 = sbr.rel (%p290_p10) target bundleno = 223 (0xdf), region = 69  ;;  %s645_s4 = sshll.u32 (!%p290_p10), %s296_s30, 6 }
  0x29   : > { %s298_s5 = scalar_lea.vmem (!%p290_p10), [#allocation3], %s645_s4  ;;  %s646_s20 = sshll.u32 (!%p290_p10), %s296_s30, 5 }
  0x2a   : > { %s328_s23 = scalar_lea.vmem (!%p290_p10), [#allocation4], %s646_s20 }
  0x2d   : > { %v700_v16 = vld [vmem:[%s298_s5 + $0x38] sm:$0xff]  ;;  %s883_s6 = scalar_select %p339_p11, %s780_s14, 1  ;;  %v699_v17 = vld [vmem:[%s298_s5 + $0x30] sm:$0xff]  ;;  %v698_v18 = vld [vmem:[%s298_s5 + $0x28] sm:$0xff] }
  0x2e   : > { %435 = vmatpush.bf16.msra.mxu0 %v700_v16  ;;  %701 = vmatpush.bf16.msra.mxu1 %v700_v16  ;;  %v697_v19 = vld [vmem:[%s298_s5 + $0x20] sm:$0xff]  ;;  %v696_v20 = vld [vmem:[%s298_s5 + $0x18] sm:$0xff]  ;;  %v695_v21 = vld [vmem:[%s298_s5 + $0x10] sm:$0xff]  ;;  %s688_s12 = sshll.u32 (%p845_p6), %s780_s14, 3 }
  0x2f   : > { %s341_s9 = scalar_lea.vmem %s920_s2, %s883_s6  ;;  %v694_v22 = vld [vmem:[%s298_s5 + $0x8] sm:$0xff]  ;;  %v693_v23 = vld [vmem:[%s298_s5] sm:$0xff]  ;;  %s492_s26 = scalar_lea.vmem (%p845_p6), %s921_s3, %s688_s12 }
  0x30   : > { %v691_v24 = vld [vmem:[%s918_s0] sm:$0xff]  ;;  %v692_v25 = vld [vmem:[%s918_s0 + $0x8] sm:$0xff] }
  0x31   : > { %v749_v26 = vld [vmem:[%s341_s9] ss:$0 sm:$0xff] }
  0x32   : > { %436 = vmatpush.bf16.msra.mxu0 %v699_v17  ;;  %702 = vmatpush.bf16.msra.mxu1 %v699_v17 }
  0x36   : > { %437 = vmatpush.bf16.msra.mxu0 %v698_v18  ;;  %703 = vmatpush.bf16.msra.mxu1 %v698_v18 }
  0x3a   : > { %438 = vmatpush.bf16.msra.mxu0 %v697_v19  ;;  %704 = vmatpush.bf16.msra.mxu1 %v697_v19 }
  0x3e   : > { %439 = vmatpush.bf16.msra.mxu0 %v696_v20  ;;  %705 = vmatpush.bf16.msra.mxu1 %v696_v20 }
  0x42   : > { %440 = vmatpush.bf16.msra.mxu0 %v695_v21  ;;  %706 = vmatpush.bf16.msra.mxu1 %v695_v21 }
  0x46   : > { %441 = vmatpush.bf16.msra.mxu0 %v694_v22  ;;  %707 = vmatpush.bf16.msra.mxu1 %v694_v22 }
  0x4a   : > { %442 = vmatpush.bf16.msra.mxu0 %v693_v23  ;;  %708 = vmatpush.bf16.msra.mxu1 %v693_v23 }
  0x4d   : > { %443 = vmatmul.bf16.vlgmr.msra.gmra.mxu0 %v691_v24  ;;  %448 = vmatmul.bf16.vlgmr.msra.gmra.mxu1 %v692_v25 }
  0xca   : > { %v444_v27 = vpop.f32.mrf.mxu0  ;;  %v449_v28 = vpop.f32.mrf.mxu1 }
  0xcb   : > { %v473_v29 = vadd.f32 %v749_v26, %v444_v27  ;;  %v475_v30 = vadd.f32 %v749_v26, %v449_v28 }
  0xcd   : > { %477 = vst [vmem:[%s328_s23] sm:$0xff] %v473_v29 }
  0xce   : > { %479 = vst [vmem:[%s328_s23 + $0x10] sm:$0xff] %v475_v30 }
  0xd2   : > { %v446_v31 = vpop.f32.mrf.mxu0  ;;  %v451_v32 = vpop.f32.mrf.mxu1  ;;  %487 = sbr.rel (!%p845_p6) target bundleno = 223 (0xdf), region = 85 }
  0xd3   : > { %v474_v33 = vadd.f32 %v749_v26, %v446_v31  ;;  %v476_v34 = vadd.f32 %v749_v26, %v451_v32 }
  0xd4   : > { %v527_v35 = vld [vmem:[%s328_s23] sm:$0xff] (%p845_p6) }
  0xd5   : > { %478 = vst [vmem:[%s328_s23 + $0x8] sm:$0xff] %v474_v33  ;;  %v531_v37 = vld [vmem:[%s328_s23 + $0x10] sm:$0xff] (%p845_p6) }
  0xd6   : > { %480 = vst [vmem:[%s328_s23 + $0x18] sm:$0xff] %v476_v34 }
  0xd7   : > { %528 = vst [vmem:[%s492_s26] sm:$0xff] %v527_v35 }
  0xd8   : > { %532 = vst [vmem:[%s492_s26 + $0x20] sm:$0xff] %v531_v37 }
  0xdc   : > { %v529_v36 = vld [vmem:[%s328_s23 + $0x8] sm:$0xff] }
  0xdd   : > { %v533_v38 = vld [vmem:[%s328_s23 + $0x18] sm:$0xff]  ;;  %530 = vst [vmem:[%s492_s26 + $0x10] sm:$0xff] %v529_v36 }
  0xde   : > { %534 = vst [vmem:[%s492_s26 + $0x30] sm:$0xff] %v533_v38 }
  0xdf PF: > { %s13_s16 = sadd.s32 1, %s788_s16   ;;  %s923_s12 = smov %s776_s13 }
  0xe0   : > { %p10_p12 = scmp.ge.s32.totalorder %s13_s16, 4   ;;  %s924_s13 = smov %s850_s22 }
  0xe1   : > { %s925_s14 = smov %s784_s15  ;;  %s926_s15 = smov %s928_s17 }
  0xe2   :  { %12 = sbr.rel (!%p10_p12) target bundleno = 3 (0x3), region = 160 }

// kernel: run.20
= control target key start
LH: loop header
LB: loop body
LE: loop exit
PB: predicated region body
PF: predicated region fallthrough
CT: control target
= control target key end

     0   :  { %s280_s1 = inlined_call_operand.vmem [shape: bf16[128,128], index: 1, kind: input, shape index: {}]   ;;  %s281_s2 = inlined_call_operand.vmem [shape: f32[1,128], index: 2, kind: input, shape index: {}]   ;;  %s282_s0 = inlined_call_operand.vmem [shape: bf16[32,128], index: 0, kind: input, shape index: {}]   ;;  %s283_s3 = inlined_call_operand.vmem [shape: f32[32,128], index: 3, kind: output, shape index: {}]  }
   0x1   :  { %v205_v0 = vld [vmem:[%s280_s1 + $0x38] sm:$0xff]  ;;  %v204_v1 = vld [vmem:[%s280_s1 + $0x30] sm:$0xff]  ;;  %v203_v2 = vld [vmem:[%s280_s1 + $0x28] sm:$0xff] }
   0x2   :  { %106 = vmatpush.bf16.msra.mxu0 %v205_v0  ;;  %206 = vmatpush.bf16.msra.mxu1 %v205_v0  ;;  %v202_v3 = vld [vmem:[%s280_s1 + $0x20] sm:$0xff]  ;;  %v201_v4 = vld [vmem:[%s280_s1 + $0x18] sm:$0xff]  ;;  %v200_v5 = vld [vmem:[%s280_s1 + $0x10] sm:$0xff] }
   0x3   :  { %v199_v6 = vld [vmem:[%s280_s1 + $0x8] sm:$0xff]  ;;  %v198_v7 = vld [vmem:[%s280_s1] sm:$0xff] }
   0x4   :  { %v196_v8 = vld [vmem:[%s282_s0] sm:$0xff]  ;;  %v197_v9 = vld [vmem:[%s282_s0 + $0x8] sm:$0xff] }
   0x5   :  { %v214_v10 = vld [vmem:[%s281_s2] ss:$0 sm:$0xff] }
   0x6   :  { %107 = vmatpush.bf16.msra.mxu0 %v204_v1  ;;  %207 = vmatpush.bf16.msra.mxu1 %v204_v1 }
   0xa   :  { %108 = vmatpush.bf16.msra.mxu0 %v203_v2  ;;  %208 = vmatpush.bf16.msra.mxu1 %v203_v2 }
   0xe   :  { %109 = vmatpush.bf16.msra.mxu0 %v202_v3  ;;  %209 = vmatpush.bf16.msra.mxu1 %v202_v3 }
  0x12   :  { %110 = vmatpush.bf16.msra.mxu0 %v201_v4  ;;  %210 = vmatpush.bf16.msra.mxu1 %v201_v4 }
  0x16   :  { %111 = vmatpush.bf16.msra.mxu0 %v200_v5  ;;  %211 = vmatpush.bf16.msra.mxu1 %v200_v5 }
  0x1a   :  { %112 = vmatpush.bf16.msra.mxu0 %v199_v6  ;;  %212 = vmatpush.bf16.msra.mxu1 %v199_v6 }
  0x1e   :  { %113 = vmatpush.bf16.msra.mxu0 %v198_v7  ;;  %213 = vmatpush.bf16.msra.mxu1 %v198_v7 }
  0x21   :  { %114 = vmatmul.bf16.vlgmr.msra.gmra.mxu0 %v196_v8  ;;  %119 = vmatmul.bf16.vlgmr.msra.gmra.mxu1 %v197_v9 }
  0x9e   :  { %v115_v11 = vpop.f32.mrf.mxu0  ;;  %v120_v12 = vpop.f32.mrf.mxu1 }
  0x9f   :  { %v144_v13 = vadd.f32 %v214_v10, %v115_v11  ;;  %v146_v14 = vadd.f32 %v214_v10, %v120_v12 }
  0xa1   :  { %148 = vst [vmem:[%s283_s3] sm:$0xff] %v144_v13 }
  0xa2   :  { %150 = vst [vmem:[%s283_s3 + $0x10] sm:$0xff] %v146_v14 }
  0xa6   :  { %v117_v15 = vpop.f32.mrf.mxu0  ;;  %v122_v16 = vpop.f32.mrf.mxu1 }
  0xa7   :  { %v145_v17 = vadd.f32 %v214_v10, %v117_v15  ;;  %v147_v18 = vadd.f32 %v214_v10, %v122_v16 }
  0xa9   :  { %149 = vst [vmem:[%s283_s3 + $0x8] sm:$0xff] %v145_v17 }
  0xaa   :  { %151 = vst [vmem:[%s283_s3 + $0x18] sm:$0xff] %v147_v18 }

</bundles_post_ra>
